<compile_context>
chip_gen: v7x
topology: tpu7x:2x2x1
jax: 0.10.0
libtpu: 0.0.40
codegen_flags: <defaults>
</compile_context>

<pallas_src>
from functools import partial

import jax
import jax.numpy as jnp
from jax import lax
from jax.experimental import pallas as pl
from jax.experimental.pallas import tpu as pltpu

LEAKY_SLOPE = 0.01                       # PyTorch nn.LeakyReLU() default
BN_EPS = 1e-5                            # PyTorch BatchNorm3d default
VMEM_LIMIT_BYTES = 32 * 1024 * 1024      # explicit scoped-VMEM budget
MAX_TK = 2048                            # K tile once the folded K gets large


# ----------------------------------------------------------------------------
# Pallas kernels: bf16 matmul (f32 accumulation over the K grid axis) +
# folded bias/BN shift + LeakyReLU (+ residual), stored as bf16/f32.
# ----------------------------------------------------------------------------
def _stage_kernel(x_ref, w_ref, shift_ref, o_ref, acc_ref):
    k = pl.program_id(1)

    @pl.when(k == 0)
    def _init():
        acc_ref[...] = jnp.zeros_like(acc_ref)

    acc_ref[...] += jnp.dot(x_ref[...], w_ref[...],
                            preferred_element_type=jnp.float32)

    @pl.when(k == pl.num_programs(1) - 1)
    def _finish():
        y = acc_ref[...] + shift_ref[...]
        y = jnp.maximum(y, LEAKY_SLOPE * y)          # LeakyReLU (2 VPU ops)
        o_ref[...] = y.astype(o_ref.dtype)


def _stage_res_kernel(x_ref, w_ref, shift_ref, res_ref, o_ref, acc_ref):
    k = pl.program_id(1)

    @pl.when(k == 0)
    def _init():
        acc_ref[...] = jnp.zeros_like(acc_ref)

    acc_ref[...] += jnp.dot(x_ref[...], w_ref[...],
                            preferred_element_type=jnp.float32)

    @pl.when(k == pl.num_programs(1) - 1)
    def _finish():
        y = acc_ref[...] + shift_ref[...]
        y = jnp.maximum(y, LEAKY_SLOPE * y)          # activation BEFORE skip add
        y = y + res_ref[...].astype(jnp.float32)
        o_ref[...] = y.astype(o_ref.dtype)


# ----------------------------------------------------------------------------
# Fused stage wrapper: row-folding for lane density, tiling, pallas_call
# ----------------------------------------------------------------------------
def _pick_tm(mf, target=256):
    """Folded-rows-per-tile: multiple of 16, prefers an exact divisor of mf
    (no padding / output slice) and keeps >= 2 M grid steps (v7x megacore)."""
    if mf <= 16:
        return mf
    tm = min(target, max(16, (((mf + 1) // 2) // 16) * 16))
    for cand in range(tm, 15, -16):
        if mf % cand == 0:
            return cand
    return tm


def fused_matmul_bn_lrelu(patches, w_mat, shift, residual=None,
                          out_dtype=jnp.bfloat16):
    """out = LeakyReLU(patches @ w_mat + shift) (+ residual).

    patches: (M, K) bf16, w_mat: (K, C) f32 (BN scale pre-folded),
    shift: (C,) f32, residual: (M, C) or None.  Output: (M, C) out_dtype.
    """
    M, K = patches.shape
    C = w_mat.shape[1]

    # ---- fold rows into lanes so loads AND stores are lane-dense -----------
    fold = max(1, 128 // C)
    while fold > 1 and M % fold:
        fold //= 2
    Mf, Kf, Cf = M // fold, K * fold, C * fold

    x = patches.reshape(Mf, Kf)                       # row-major: free reshape
    if fold > 1:
        eye = jnp.eye(fold, dtype=w_mat.dtype)
        w = jnp.einsum("fg,kc->fkgc", eye, w_mat).reshape(Kf, Cf)
        shift_f = jnp.tile(shift, fold)
    else:
        w, shift_f = w_mat, shift
    res = None if residual is None else residual.reshape(Mf, Cf)

    # ---- tiling -------------------------------------------------------------
    tm = _pick_tm(Mf)
    Mp = pl.cdiv(Mf, tm) * tm
    if Mp != Mf:                       # fallback only (not hit for __main__)
        x = jnp.pad(x, ((0, Mp - Mf), (0, 0)))
        if res is not None:
            res = jnp.pad(res, ((0, Mp - Mf), (0, 0)))

    tk = Kf if Kf <= 2 * MAX_TK else MAX_TK
    Kp = pl.cdiv(Kf, tk) * tk
    if Kp != Kf:                       # zero-pad K when tiling kicks in
        x = jnp.pad(x, ((0, 0), (0, Kp - Kf)))
        w = jnp.pad(w, ((0, Kp - Kf), (0, 0)))

    x = x.astype(jnp.bfloat16)
    w = w.astype(jnp.bfloat16)
    shift_f = shift_f.reshape(1, Cf).astype(jnp.float32)

    grid = (Mp // tm, Kp // tk)
    in_specs = [pl.BlockSpec((tm, tk), lambda i, k: (i, k)),
                pl.BlockSpec((tk, Cf), lambda i, k: (k, 0)),
                pl.BlockSpec((1, Cf), lambda i, k: (0, 0))]
    args = [x, w, shift_f]
    kernel = _stage_kernel
    if res is not None:
        in_specs.append(pl.BlockSpec((tm, Cf), lambda i, k: (i, 0)))
        args.append(res.astype(jnp.bfloat16))
        kernel = _stage_res_kernel

    out = pl.pallas_call(
        kernel,
        out_shape=jax.ShapeDtypeStruct((Mp, Cf), out_dtype),
        grid_spec=pltpu.PrefetchScalarGridSpec(
            num_scalar_prefetch=0,
            grid=grid,
            in_specs=in_specs,
            out_specs=pl.BlockSpec((tm, Cf), lambda i, k: (i, 0)),
            scratch_shapes=[pltpu.VMEM((tm, Cf), jnp.float32)]),
        compiler_params=pltpu.CompilerParams(
            dimension_semantics=("parallel", "arbitrary"),
            vmem_limit_bytes=VMEM_LIMIT_BYTES),
    )(*args)

    if Mp != Mf:
        out = out[:Mf]
    return out.reshape(M, C)                          # un-fold: free reshape


# ----------------------------------------------------------------------------
# JAX glue: im2col (bf16), BN folding, sub-pixel ConvTranspose, pixel shuffle
# ----------------------------------------------------------------------------
def _im2col_3d(x, k):
    """x: (N, Dp, Hp, Wp, C), already padded -> (M, k^3*C) tap-major patches."""
    N, Dp, Hp, Wp, C = x.shape
    Do, Ho, Wo = Dp - k + 1, Hp - k + 1, Wp - k + 1
    if k == 1:
        return x.reshape(N * Do * Ho * Wo, C), (N, Do, Ho, Wo)
    cols = []
    for kd in range(k):
        for kh in range(k):
            for kw in range(k):
                cols.append(x[:, kd:kd + Do, kh:kh + Ho, kw:kw + Wo, :])
    patches = jnp.stack(cols, axis=4)                 # (N,Do,Ho,Wo,k^3,C)
    return patches.reshape(N * Do * Ho * Wo, k * k * k * C), (N, Do, Ho, Wo)


def _fold_bn(bias, bn):
    scale = bn["gamma"] / jnp.sqrt(bn["var"] + BN_EPS)
    shift = (bias - bn["mean"]) * scale + bn["beta"]
    return scale, shift


def _conv3d_stage(x, w_khwc, scale, shift, padding, residual_flat=None,
                  out_dtype=jnp.bfloat16):
    """Stride-1 conv. x: (N,D,H,W,Cin); w_khwc: (k,k,k,Cin,Cout) tap-major."""
    k = w_khwc.shape[0]
    cin, cout = w_khwc.shape[3], w_khwc.shape[4]
    x = x.astype(jnp.bfloat16)            # bf16 BEFORE pad / im2col
    if padding > 0:
        x = jnp.pad(x, ((0, 0), (padding,) * 2, (padding,) * 2,
                        (padding,) * 2, (0, 0)))
    patches, (N, Do, Ho, Wo) = _im2col_3d(x, k)
    w_mat = w_khwc.reshape(k * k * k * cin, cout) * scale[None, :]  # fold BN
    out = fused_matmul_bn_lrelu(patches, w_mat, shift, residual_flat, out_dtype)
    return out.reshape(N, Do, Ho, Wo, cout)


def _conv3d_torch_stage(x, w_torch, bias, bn, padding, residual_flat=None,
                        out_dtype=jnp.bfloat16):
    """w_torch: PyTorch Conv3d layout (Cout, Cin, k, k, k)."""
    w_khwc = jnp.transpose(w_torch, (2, 3, 4, 1, 0))
    scale, shift = _fold_bn(bias, bn)
    return _conv3d_stage(x, w_khwc, scale, shift, padding, residual_flat,
                         out_dtype)


def _subpixel_weight_from_convtranspose(w_t):
    """ConvTranspose3d(k=4,s=2,p=1) weight (Cin,Cout,4,4,4) -> equivalent
    stride-1 3x3x3 conv weight (3,3,3,Cin,8*Cout), output channels ordered
    (phase_d, phase_h, phase_w, Cout) for pixel-shuffle.

    Per axis, output 2j+p (phase p) vs padded-input tap t covering x[j-1+t]:
        p=0: taps (0,1) use kernel indices (3,1); tap 2 unused
        p=1: taps (1,2) use kernel indices (2,0); tap 0 unused
    """
    Cin, Cout = w_t.shape[0], w_t.shape[1]
    kidx = jnp.array([[3, 1, 0], [0, 2, 0]], jnp.int32)      # (phase, tap)
    kmask = jnp.array([[1.0, 1.0, 0.0], [0.0, 1.0, 1.0]], jnp.float32)
    flat = kidx.reshape(-1)
    w = jnp.take(w_t, flat, axis=2).reshape(Cin, Cout, 2, 3, 4, 4)
    w = jnp.take(w, flat, axis=4).reshape(Cin, Cout, 2, 3, 2, 3, 4)
    w = jnp.take(w, flat, axis=6).reshape(Cin, Cout, 2, 3, 2, 3, 2, 3)
    # axes: (ci, co, pd, td, ph, th, pw, tw)
    m = (kmask[:, :, None, None, None, None] *
         kmask[None, None, :, :, None, None] *
         kmask[None, None, None, None, :, :])                # (2,3,2,3,2,3)
    w = w * m[None, None]
    w = jnp.transpose(w, (3, 5, 7, 0, 2, 4, 6, 1))           # (td,th,tw,ci,pd,ph,pw,co)
    return w.reshape(3, 3, 3, Cin, 8 * Cout)


def _zero_insert(x, s):
    """Generic transposed-conv fallback: insert s-1 zeros between elements."""
    N, D, H, W, C = x.shape
    out = jnp.zeros((N, (D - 1) * s + 1, (H - 1) * s + 1, (W - 1) * s + 1, C),
                    x.dtype)
    return out.at[:, ::s, ::s, ::s, :].set(x)


def _conv_transpose3d_stage(x, w_t, bias, bn, stride, padding):
    """w_t: PyTorch ConvTranspose3d layout (Cin, Cout, k, k, k)."""
    Cout, k = w_t.shape[1], w_t.shape[2]
    scale, shift = _fold_bn(bias, bn)
    if k == 4 and stride == 2 and padding == 1:
        # Sub-pixel decomposition: stride-1 3x3x3 conv with 8*Cout phase
        # channels on the un-dilated input, then pixel-shuffle (XLA, bf16).
        w_eff = _subpixel_weight_from_convtranspose(w_t)
        y = _conv3d_stage(x, w_eff, jnp.tile(scale, 8), jnp.tile(shift, 8),
                          padding=1)
        N, n = y.shape[0], y.shape[1]
        y = y.reshape(N, n, n, n, 2, 2, 2, Cout)
        y = jnp.transpose(y, (0, 1, 4, 2, 5, 3, 6, 7))
        return y.reshape(N, 2 * n, 2 * n, 2 * n, Cout)
    # TODO(synk): generic config — exact but slow zero-insertion equivalence.
    w_conv = jnp.flip(jnp.transpose(w_t, (1, 0, 2, 3, 4)), axis=(2, 3, 4))
    w_khwc = jnp.transpose(w_conv, (2, 3, 4, 1, 0))
    x_dil = _zero_insert(x.astype(jnp.bfloat16), stride)
    return _conv3d_stage(x_dil, w_khwc, scale, shift, padding=k - 1 - padding)


def _skip_stage(x, w_torch, bias, bn, scale_factor):
    # Conv1x1 + BN + LeakyReLU fused; nearest-upsample commutes with the
    # per-channel pointwise BN/LeakyReLU (eval mode), so it is applied after,
    # on the small pre-upsample bf16 tensor.
    out = _conv3d_torch_stage(x, w_torch, bias, bn, padding=0)
    for ax in (1, 2, 3):
        out = jnp.repeat(out, scale_factor, axis=ax)
    return out                                         # bf16 residual stream


# ----------------------------------------------------------------------------
# Full module forward (jitted)
# ----------------------------------------------------------------------------
@partial(jax.jit, static_argnames=("stride", "padding"))
def conv_residual_decoder_block_3d(x_ncdhw, p, stride=2, padding=1):
    x = jnp.transpose(x_ncdhw, (0, 2, 3, 4, 1)).astype(jnp.bfloat16)  # NDHWC
    cout = p["skip_w"].shape[0]

    # skip branch -> bf16 residual, flattened to match the final stage's rows
    identity = _skip_stage(x, p["skip_w"], p["skip_b"], p["skip_bn"],
                           scale_factor=stride ** 2)
    id_flat = identity.reshape(-1, cout)

    # upsample1
    h = _conv_transpose3d_stage(x, p["ct1_w"], p["ct1_b"], p["bn1a"],
                                stride, padding)
    h = _conv3d_torch_stage(h, p["c1_w"], p["c1_b"], p["bn1b"], padding)

    # upsample2 (+ residual fused into the final Pallas stage, f32 output)
    h = _conv_transpose3d_stage(h, p["ct2_w"], p["ct2_b"], p["bn2a"],
                                stride, padding)
    h = _conv3d_torch_stage(h, p["c2_w"], p["c2_b"], p["bn2b"], padding,
                            residual_flat=id_flat, out_dtype=jnp.float32)

    return jnp.transpose(h, (0, 4, 1, 2, 3))  # back to NCDHW


# ----------------------------------------------------------------------------
# Pure-f32 XLA reference (for correctness check against the bf16 kernels)
# ----------------------------------------------------------------------------
def _reference_forward(x_ncdhw, p, stride=2, padding=1):
    dn = ("NDHWC", "DHWIO", "NDHWC")

    def bn_lrelu(y, bn):
        y = (y - bn["mean"]) / jnp.sqrt(bn["var"] + BN_EPS) * bn["gamma"] \
            + bn["beta"]
        return jnp.where(y >= 0, y, LEAKY_SLOPE * y)

    def conv(y, w_torch, b, pad):
        w = jnp.transpose(w_torch, (2, 3, 4, 1, 0))            # DHWIO
        out = lax.conv_general_dilated(y, w, (1, 1, 1), [(pad, pad)] * 3,
                                       dimension_numbers=dn)
        return out + b

    def convT(y, w_t, b, s, pad):
        k = w_t.shape[2]
        w = jnp.transpose(jnp.flip(w_t, (2, 3, 4)), (2, 3, 4, 0, 1))
        out = lax.conv_general_dilated(y, w, (1, 1, 1),
                                       [(k - 1 - pad, k - 1 - pad)] * 3,
                                       lhs_dilation=(s, s, s),
                                       dimension_numbers=dn)
        return out + b

    x = jnp.transpose(x_ncdhw, (0, 2, 3, 4, 1)).astype(jnp.float32)

    idn = conv(x, p["skip_w"], p["skip_b"], 0)
    for ax in (1, 2, 3):
        idn = jnp.repeat(idn, stride ** 2, axis=ax)
    idn = bn_lrelu(idn, p["skip_bn"])

    h = bn_lrelu(convT(x, p["ct1_w"], p["ct1_b"], stride, padding), p["bn1a"])
    h = bn_lrelu(conv(h, p["c1_w"], p["c1_b"], padding), p["bn1b"])
    h = bn_lrelu(convT(h, p["ct2_w"], p["ct2_b"], stride, padding), p["bn2a"])
    h = bn_lrelu(conv(h, p["c2_w"], p["c2_b"], padding), p["bn2b"])
    h = h + idn
    return jnp.transpose(h, (0, 4, 1, 2, 3))


# ----------------------------------------------------------------------------
# Deterministic parameter construction + run
# ----------------------------------------------------------------------------
def _make_params(key, cin, cout, k):
    keys = iter(jax.random.split(key, 40))

    def nrm(shape, s=0.1):
        return s * jax.random.normal(next(keys), shape, jnp.float32)

    def bn(c):
        return dict(
            gamma=1.0 + 0.1 * jax.random.normal(next(keys), (c,), jnp.float32),
            beta=0.1 * jax.random.normal(next(keys), (c,), jnp.float32),
            mean=0.1 * jax.random.normal(next(keys), (c,), jnp.float32),
            var=0.5 + jax.random.uniform(next(keys), (c,), jnp.float32),
        )

    return dict(
        ct1_w=nrm((cin, cout, k, k, k)), ct1_b=nrm((cout,)), bn1a=bn(cout),
        c1_w=nrm((cout, cout, 3, 3, 3)), c1_b=nrm((cout,)), bn1b=bn(cout),
        ct2_w=nrm((cout, cout, k, k, k)), ct2_b=nrm((cout,)), bn2a=bn(cout),
        c2_w=nrm((cout, cout, 3, 3, 3)), c2_b=nrm((cout,)), bn2b=bn(cout),
        skip_w=nrm((cout, cin, 1, 1, 1)), skip_b=nrm((cout,)), skip_bn=bn(cout),
    )


if __name__ == "__main__":
    N, C_IN, C_OUT = 2, 4, 8
    D = H = W = 4
    KSIZE, STRIDE, PAD = 4, 2, 1

    key = jax.random.PRNGKey(0)
    k_params, k_x = jax.random.split(key)
    params = _make_params(k_params, C_IN, C_OUT, KSIZE)
    x = jax.random.normal(k_x, (N, C_IN, D, H, W), jnp.float32)  # NCDHW

    out = conv_residual_decoder_block_3d(x, params, stride=STRIDE, padding=PAD)
    out = jax.block_until_ready(out)

    expected = (N, C_OUT, D * STRIDE ** 2, H * STRIDE ** 2, W * STRIDE ** 2)
    assert out.shape == expected, (out.shape, expected)
    assert bool(jnp.all(jnp.isfinite(out)))

    # Correctness vs. a pure-f32 XLA reference (loose tolerance: activations,
    # weights and intermediate stage outputs are streamed in bf16).
    ref = jax.jit(_reference_forward, static_argnames=("stride", "padding"))(
        x, params, stride=STRIDE, padding=PAD)
    ref = jax.block_until_ready(ref)
    diff = jnp.abs(out - ref)
    max_err = float(jnp.max(diff))
    max_ref = float(jnp.max(jnp.abs(ref)))
    rel_l2 = float(jnp.linalg.norm(out - ref) / (jnp.linalg.norm(ref) + 1e-6))
    assert max_err <= 0.25 * max(1.0, max_ref), (max_err, max_ref)
    assert rel_l2 <= 0.1, rel_l2

    print("KERNEL_OK")
</pallas_src>

<mosaic_0001>
module attributes {stable_mosaic.version = 11 : i64} {
  func.func @_stage_kernel(%arg0: i32, %arg1: i32, %arg2: memref<8x64xbf16, #tpu.memory_space<vmem>>, %arg3: memref<64x128xbf16, #tpu.memory_space<vmem>>, %arg4: memref<1x128xf32, #tpu.memory_space<vmem>>, %arg5: memref<8x128xbf16, #tpu.memory_space<vmem>>, %arg6: memref<8x128xf32, #tpu.memory_space<vmem>>) attributes {dimension_semantics = [#tpu.dimension_semantics<parallel>, #tpu.dimension_semantics<arbitrary>], iteration_bounds = array<i64: 1, 1>, scalar_prefetch = 0 : i64, scratch_operands = 1 : i64, tpu.core_type = #tpu.core_type<tc>, window_params = [{transform_indices = @transform_0, window_bounds = array<i64: 8, 64>}, {transform_indices = @transform_1, window_bounds = array<i64: 64, 128>}, {pipeline_mode = #tpu.pipeline_mode<synchronous>, transform_indices = @transform_2, window_bounds = array<i64: 1, 128>}, {transform_indices = @transform_3, window_bounds = array<i64: 8, 128>}]} {
    %c0_i32 = arith.constant 0 : i32
    %0 = arith.cmpi eq, %arg1, %c0_i32 : i32
    %1 = arith.extui %0 : i1 to i32
    %c0_i32_0 = arith.constant 0 : i32
    %2 = arith.cmpi ne, %1, %c0_i32_0 : i32
    scf.if %2 {
      %cst_10 = arith.constant 0.000000e+00 : f32
      %12 = vector.broadcast %cst_10 : f32 to vector<8x128xf32>
      %c0_11 = arith.constant 0 : index
      %c0_12 = arith.constant 0 : index
      %13 = vector.load %arg6[%c0_11, %c0_12] : memref<8x128xf32, #tpu.memory_space<vmem>>, vector<8x128xf32>
      tpu.vector_store %arg6[%c0_11, %c0_12], %12 {strides = array<i32>} : memref<8x128xf32, #tpu.memory_space<vmem>>, vector<8x128xf32>,
    } else {
    }
    %c0 = arith.constant 0 : index
    %c0_1 = arith.constant 0 : index
    %3 = vector.load %arg6[%c0, %c0_1] : memref<8x128xf32, #tpu.memory_space<vmem>>, vector<8x128xf32>
    %c0_2 = arith.constant 0 : index
    %c0_3 = arith.constant 0 : index
    %4 = vector.load %arg2[%c0_2, %c0_3] : memref<8x64xbf16, #tpu.memory_space<vmem>>, vector<8x64xbf16>
    %c0_4 = arith.constant 0 : index
    %c0_5 = arith.constant 0 : index
    %5 = vector.load %arg3[%c0_4, %c0_5] : memref<64x128xbf16, #tpu.memory_space<vmem>>, vector<64x128xbf16>
    %cst = arith.constant dense<0.000000e+00> : vector<8x128xf32>
    %6 = tpu.matmul %4, %5, %cst {dimension_numbers = #tpu.dot_dimension_numbers<[1], [0], [0], [1], [0, 0, 1, 1], [], []>} : vector<8x64xbf16>, vector<64x128xbf16>, vector<8x128xf32> -> vector<8x128xf32>
    %7 = arith.addf %3, %6 : vector<8x128xf32>
    %c0_6 = arith.constant 0 : index
    %c0_7 = arith.constant 0 : index
    %8 = vector.load %arg6[%c0_6, %c0_7] : memref<8x128xf32, #tpu.memory_space<vmem>>, vector<8x128xf32>
    tpu.vector_store %arg6[%c0_6, %c0_7], %7 {strides = array<i32>} : memref<8x128xf32, #tpu.memory_space<vmem>>, vector<8x128xf32>,
    %c0_i32_8 = arith.constant 0 : i32
    %9 = arith.cmpi eq, %arg1, %c0_i32_8 : i32
    %10 = arith.extui %9 : i1 to i32
    %c0_i32_9 = arith.constant 0 : i32
    %11 = arith.cmpi ne, %10, %c0_i32_9 : i32
    scf.if %11 {
      %c0_10 = arith.constant 0 : index
      %c0_11 = arith.constant 0 : index
      %12 = vector.load %arg6[%c0_10, %c0_11] : memref<8x128xf32, #tpu.memory_space<vmem>>, vector<8x128xf32>
      %c0_12 = arith.constant 0 : index
      %c0_13 = arith.constant 0 : index
      %13 = vector.load %arg4[%c0_12, %c0_13] : memref<1x128xf32, #tpu.memory_space<vmem>>, vector<1x128xf32>
      %14 = vector.broadcast %13 : vector<1x128xf32> to vector<8x128xf32>
      %15 = arith.addf %12, %14 : vector<8x128xf32>
      %cst_14 = arith.constant 0.00999999977 : f32
      %16 = vector.broadcast %cst_14 : f32 to vector<8x128xf32>
      %17 = arith.mulf %16, %15 : vector<8x128xf32>
      %18 = arith.maximumf %15, %17 : vector<8x128xf32>
      %19 = arith.truncf %18 : vector<8x128xf32> to vector<8x128xbf16>
      %c0_15 = arith.constant 0 : index
      %c0_16 = arith.constant 0 : index
      %20 = vector.load %arg5[%c0_15, %c0_16] : memref<8x128xbf16, #tpu.memory_space<vmem>>, vector<8x128xbf16>
      tpu.vector_store %arg5[%c0_15, %c0_16], %19 {strides = array<i32>} : memref<8x128xbf16, #tpu.memory_space<vmem>>, vector<8x128xbf16>,
    } else {
    }
    return
  }
  func.func @transform_0(%arg0: i32, %arg1: i32) -> (i32, i32) {
    %c0_i32 = arith.constant 0 : i32
    return %arg0, %arg1 : i32, i32
  }
  func.func @transform_1(%arg0: i32, %arg1: i32) -> (i32, i32) {
    %c0_i32 = arith.constant 0 : i32
    %c0_i32_0 = arith.constant 0 : i32
    return %arg1, %c0_i32 : i32, i32
  }
  func.func @transform_2(%arg0: i32, %arg1: i32) -> (i32, i32) {
    %c0_i32 = arith.constant 0 : i32
    %c0_i32_0 = arith.constant 0 : i32
    %c0_i32_1 = arith.constant 0 : i32
    return %c0_i32, %c0_i32_0 : i32, i32
  }
  func.func @transform_3(%arg0: i32, %arg1: i32) -> (i32, i32) {
    %c0_i32 = arith.constant 0 : i32
    %c0_i32_0 = arith.constant 0 : i32
    return %arg0, %c0_i32 : i32, i32
  }
}

module attributes {stable_mosaic.version = 11 : i64} {
  func.func @_stage_kernel(%arg0: i32, %arg1: i32, %arg2: memref<32x216xbf16, #tpu.memory_space<vmem>>, %arg3: memref<216x128xbf16, #tpu.memory_space<vmem>>, %arg4: memref<1x128xf32, #tpu.memory_space<vmem>>, %arg5: memref<32x128xbf16, #tpu.memory_space<vmem>>, %arg6: memref<32x128xf32, #tpu.memory_space<vmem>>) attributes {dimension_semantics = [#tpu.dimension_semantics<parallel>, #tpu.dimension_semantics<arbitrary>], iteration_bounds = array<i64: 2, 1>, scalar_prefetch = 0 : i64, scratch_operands = 1 : i64, tpu.core_type = #tpu.core_type<tc>, window_params = [{transform_indices = @transform_0, window_bounds = array<i64: 32, 216>}, {transform_indices = @transform_1, window_bounds = array<i64: 216, 128>}, {pipeline_mode = #tpu.pipeline_mode<synchronous>, transform_indices = @transform_2, window_bounds = array<i64: 1, 128>}, {transform_indices = @transform_3, window_bounds = array<i64: 32, 128>}]} {
    %c0_i32 = arith.constant 0 : i32
    %0 = arith.cmpi eq, %arg1, %c0_i32 : i32
    %1 = arith.extui %0 : i1 to i32
    %c0_i32_0 = arith.constant 0 : i32
    %2 = arith.cmpi ne, %1, %c0_i32_0 : i32
    scf.if %2 {
      %cst_10 = arith.constant 0.000000e+00 : f32
      %12 = vector.broadcast %cst_10 : f32 to vector<32x128xf32>
      %c0_11 = arith.constant 0 : index
      %c0_12 = arith.constant 0 : index
      %13 = vector.load %arg6[%c0_11, %c0_12] : memref<32x128xf32, #tpu.memory_space<vmem>>, vector<32x128xf32>
      tpu.vector_store %arg6[%c0_11, %c0_12], %12 {strides = array<i32>} : memref<32x128xf32, #tpu.memory_space<vmem>>, vector<32x128xf32>,
    } else {
    }
    %c0 = arith.constant 0 : index
    %c0_1 = arith.constant 0 : index
    %3 = vector.load %arg6[%c0, %c0_1] : memref<32x128xf32, #tpu.memory_space<vmem>>, vector<32x128xf32>
    %c0_2 = arith.constant 0 : index
    %c0_3 = arith.constant 0 : index
    %4 = vector.load %arg2[%c0_2, %c0_3] : memref<32x216xbf16, #tpu.memory_space<vmem>>, vector<32x216xbf16>
    %c0_4 = arith.constant 0 : index
    %c0_5 = arith.constant 0 : index
    %5 = vector.load %arg3[%c0_4, %c0_5] : memref<216x128xbf16, #tpu.memory_space<vmem>>, vector<216x128xbf16>
    %cst = arith.constant dense<0.000000e+00> : vector<32x128xf32>
    %6 = tpu.matmul %4, %5, %cst {dimension_numbers = #tpu.dot_dimension_numbers<[1], [0], [0], [1], [0, 0, 1, 1], [], []>} : vector<32x216xbf16>, vector<216x128xbf16>, vector<32x128xf32> -> vector<32x128xf32>
    %7 = arith.addf %3, %6 : vector<32x128xf32>
    %c0_6 = arith.constant 0 : index
    %c0_7 = arith.constant 0 : index
    %8 = vector.load %arg6[%c0_6, %c0_7] : memref<32x128xf32, #tpu.memory_space<vmem>>, vector<32x128xf32>
    tpu.vector_store %arg6[%c0_6, %c0_7], %7 {strides = array<i32>} : memref<32x128xf32, #tpu.memory_space<vmem>>, vector<32x128xf32>,
    %c0_i32_8 = arith.constant 0 : i32
    %9 = arith.cmpi eq, %arg1, %c0_i32_8 : i32
    %10 = arith.extui %9 : i1 to i32
    %c0_i32_9 = arith.constant 0 : i32
    %11 = arith.cmpi ne, %10, %c0_i32_9 : i32
    scf.if %11 {
      %c0_10 = arith.constant 0 : index
      %c0_11 = arith.constant 0 : index
      %12 = vector.load %arg6[%c0_10, %c0_11] : memref<32x128xf32, #tpu.memory_space<vmem>>, vector<32x128xf32>
      %c0_12 = arith.constant 0 : index
      %c0_13 = arith.constant 0 : index
      %13 = vector.load %arg4[%c0_12, %c0_13] : memref<1x128xf32, #tpu.memory_space<vmem>>, vector<1x128xf32>
      %14 = vector.broadcast %13 : vector<1x128xf32> to vector<32x128xf32>
      %15 = arith.addf %12, %14 : vector<32x128xf32>
      %cst_14 = arith.constant 0.00999999977 : f32
      %16 = vector.broadcast %cst_14 : f32 to vector<32x128xf32>
      %17 = arith.mulf %16, %15 : vector<32x128xf32>
      %18 = arith.maximumf %15, %17 : vector<32x128xf32>
      %19 = arith.truncf %18 : vector<32x128xf32> to vector<32x128xbf16>
      %c0_15 = arith.constant 0 : index
      %c0_16 = arith.constant 0 : index
      %20 = vector.load %arg5[%c0_15, %c0_16] : memref<32x128xbf16, #tpu.memory_space<vmem>>, vector<32x128xbf16>
      tpu.vector_store %arg5[%c0_15, %c0_16], %19 {strides = array<i32>} : memref<32x128xbf16, #tpu.memory_space<vmem>>, vector<32x128xbf16>,
    } else {
    }
    return
  }
  func.func @transform_0(%arg0: i32, %arg1: i32) -> (i32, i32) {
    %c0_i32 = arith.constant 0 : i32
    return %arg0, %arg1 : i32, i32
  }
  func.func @transform_1(%arg0: i32, %arg1: i32) -> (i32, i32) {
    %c0_i32 = arith.constant 0 : i32
    %c0_i32_0 = arith.constant 0 : i32
    return %arg1, %c0_i32 : i32, i32
  }
  func.func @transform_2(%arg0: i32, %arg1: i32) -> (i32, i32) {
    %c0_i32 = arith.constant 0 : i32
    %c0_i32_0 = arith.constant 0 : i32
    %c0_i32_1 = arith.constant 0 : i32
    return %c0_i32, %c0_i32_0 : i32, i32
  }
  func.func @transform_3(%arg0: i32, %arg1: i32) -> (i32, i32) {
    %c0_i32 = arith.constant 0 : i32
    %c0_i32_0 = arith.constant 0 : i32
    return %arg0, %c0_i32 : i32, i32
  }
}

module attributes {stable_mosaic.version = 11 : i64} {
  func.func @_stage_kernel(%arg0: i32, %arg1: i32, %arg2: memref<32x3456xbf16, #tpu.memory_space<vmem>>, %arg3: memref<3456x128xbf16, #tpu.memory_space<vmem>>, %arg4: memref<1x128xf32, #tpu.memory_space<vmem>>, %arg5: memref<32x128xbf16, #tpu.memory_space<vmem>>, %arg6: memref<32x128xf32, #tpu.memory_space<vmem>>) attributes {dimension_semantics = [#tpu.dimension_semantics<parallel>, #tpu.dimension_semantics<arbitrary>], iteration_bounds = array<i64: 2, 1>, scalar_prefetch = 0 : i64, scratch_operands = 1 : i64, tpu.core_type = #tpu.core_type<tc>, window_params = [{transform_indices = @transform_0, window_bounds = array<i64: 32, 3456>}, {transform_indices = @transform_1, window_bounds = array<i64: 3456, 128>}, {pipeline_mode = #tpu.pipeline_mode<synchronous>, transform_indices = @transform_2, window_bounds = array<i64: 1, 128>}, {transform_indices = @transform_3, window_bounds = array<i64: 32, 128>}]} {
    %c0_i32 = arith.constant 0 : i32
    %0 = arith.cmpi eq, %arg1, %c0_i32 : i32
    %1 = arith.extui %0 : i1 to i32
    %c0_i32_0 = arith.constant 0 : i32
    %2 = arith.cmpi ne, %1, %c0_i32_0 : i32
    scf.if %2 {
      %cst_10 = arith.constant 0.000000e+00 : f32
      %12 = vector.broadcast %cst_10 : f32 to vector<32x128xf32>
      %c0_11 = arith.constant 0 : index
      %c0_12 = arith.constant 0 : index
      %13 = vector.load %arg6[%c0_11, %c0_12] : memref<32x128xf32, #tpu.memory_space<vmem>>, vector<32x128xf32>
      tpu.vector_store %arg6[%c0_11, %c0_12], %12 {strides = array<i32>} : memref<32x128xf32, #tpu.memory_space<vmem>>, vector<32x128xf32>,
    } else {
    }
    %c0 = arith.constant 0 : index
    %c0_1 = arith.constant 0 : index
    %3 = vector.load %arg6[%c0, %c0_1] : memref<32x128xf32, #tpu.memory_space<vmem>>, vector<32x128xf32>
    %c0_2 = arith.constant 0 : index
    %c0_3 = arith.constant 0 : index
    %4 = vector.load %arg2[%c0_2, %c0_3] : memref<32x3456xbf16, #tpu.memory_space<vmem>>, vector<32x3456xbf16>
    %c0_4 = arith.constant 0 : index
    %c0_5 = arith.constant 0 : index
    %5 = vector.load %arg3[%c0_4, %c0_5] : memref<3456x128xbf16, #tpu.memory_space<vmem>>, vector<3456x128xbf16>
    %cst = arith.constant dense<0.000000e+00> : vector<32x128xf32>
    %6 = tpu.matmul %4, %5, %cst {dimension_numbers = #tpu.dot_dimension_numbers<[1], [0], [0], [1], [0, 0, 1, 1], [], []>} : vector<32x3456xbf16>, vector<3456x128xbf16>, vector<32x128xf32> -> vector<32x128xf32>
    %7 = arith.addf %3, %6 : vector<32x128xf32>
    %c0_6 = arith.constant 0 : index
    %c0_7 = arith.constant 0 : index
    %8 = vector.load %arg6[%c0_6, %c0_7] : memref<32x128xf32, #tpu.memory_space<vmem>>, vector<32x128xf32>
    tpu.vector_store %arg6[%c0_6, %c0_7], %7 {strides = array<i32>} : memref<32x128xf32, #tpu.memory_space<vmem>>, vector<32x128xf32>,
    %c0_i32_8 = arith.constant 0 : i32
    %9 = arith.cmpi eq, %arg1, %c0_i32_8 : i32
    %10 = arith.extui %9 : i1 to i32
    %c0_i32_9 = arith.constant 0 : i32
    %11 = arith.cmpi ne, %10, %c0_i32_9 : i32
    scf.if %11 {
      %c0_10 = arith.constant 0 : index
      %c0_11 = arith.constant 0 : index
      %12 = vector.load %arg6[%c0_10, %c0_11] : memref<32x128xf32, #tpu.memory_space<vmem>>, vector<32x128xf32>
      %c0_12 = arith.constant 0 : index
      %c0_13 = arith.constant 0 : index
      %13 = vector.load %arg4[%c0_12, %c0_13] : memref<1x128xf32, #tpu.memory_space<vmem>>, vector<1x128xf32>
      %14 = vector.broadcast %13 : vector<1x128xf32> to vector<32x128xf32>
      %15 = arith.addf %12, %14 : vector<32x128xf32>
      %cst_14 = arith.constant 0.00999999977 : f32
      %16 = vector.broadcast %cst_14 : f32 to vector<32x128xf32>
      %17 = arith.mulf %16, %15 : vector<32x128xf32>
      %18 = arith.maximumf %15, %17 : vector<32x128xf32>
      %19 = arith.truncf %18 : vector<32x128xf32> to vector<32x128xbf16>
      %c0_15 = arith.constant 0 : index
      %c0_16 = arith.constant 0 : index
      %20 = vector.load %arg5[%c0_15, %c0_16] : memref<32x128xbf16, #tpu.memory_space<vmem>>, vector<32x128xbf16>
      tpu.vector_store %arg5[%c0_15, %c0_16], %19 {strides = array<i32>} : memref<32x128xbf16, #tpu.memory_space<vmem>>, vector<32x128xbf16>,
    } else {
    }
    return
  }
  func.func @transform_0(%arg0: i32, %arg1: i32) -> (i32, i32) {
    %c0_i32 = arith.constant 0 : i32
    return %arg0, %arg1 : i32, i32
  }
  func.func @transform_1(%arg0: i32, %arg1: i32) -> (i32, i32) {
    %c0_i32 = arith.constant 0 : i32
    %c0_i32_0 = arith.constant 0 : i32
    return %arg1, %c0_i32 : i32, i32
  }
  func.func @transform_2(%arg0: i32, %arg1: i32) -> (i32, i32) {
    %c0_i32 = arith.constant 0 : i32
    %c0_i32_0 = arith.constant 0 : i32
    %c0_i32_1 = arith.constant 0 : i32
    return %c0_i32, %c0_i32_0 : i32, i32
  }
  func.func @transform_3(%arg0: i32, %arg1: i32) -> (i32, i32) {
    %c0_i32 = arith.constant 0 : i32
    %c0_i32_0 = arith.constant 0 : i32
    return %arg0, %c0_i32 : i32, i32
  }
}

module attributes {stable_mosaic.version = 11 : i64} {
  func.func @_stage_kernel(%arg0: i32, %arg1: i32, %arg2: memref<256x432xbf16, #tpu.memory_space<vmem>>, %arg3: memref<432x128xbf16, #tpu.memory_space<vmem>>, %arg4: memref<1x128xf32, #tpu.memory_space<vmem>>, %arg5: memref<256x128xbf16, #tpu.memory_space<vmem>>, %arg6: memref<256x128xf32, #tpu.memory_space<vmem>>) attributes {dimension_semantics = [#tpu.dimension_semantics<parallel>, #tpu.dimension_semantics<arbitrary>], iteration_bounds = array<i64: 2, 1>, scalar_prefetch = 0 : i64, scratch_operands = 1 : i64, tpu.core_type = #tpu.core_type<tc>, window_params = [{transform_indices = @transform_0, window_bounds = array<i64: 256, 432>}, {transform_indices = @transform_1, window_bounds = array<i64: 432, 128>}, {pipeline_mode = #tpu.pipeline_mode<synchronous>, transform_indices = @transform_2, window_bounds = array<i64: 1, 128>}, {transform_indices = @transform_3, window_bounds = array<i64: 256, 128>}]} {
    %c0_i32 = arith.constant 0 : i32
    %0 = arith.cmpi eq, %arg1, %c0_i32 : i32
    %1 = arith.extui %0 : i1 to i32
    %c0_i32_0 = arith.constant 0 : i32
    %2 = arith.cmpi ne, %1, %c0_i32_0 : i32
    scf.if %2 {
      %cst_10 = arith.constant 0.000000e+00 : f32
      %12 = vector.broadcast %cst_10 : f32 to vector<256x128xf32>
      %c0_11 = arith.constant 0 : index
      %c0_12 = arith.constant 0 : index
      %13 = vector.load %arg6[%c0_11, %c0_12] : memref<256x128xf32, #tpu.memory_space<vmem>>, vector<256x128xf32>
      tpu.vector_store %arg6[%c0_11, %c0_12], %12 {strides = array<i32>} : memref<256x128xf32, #tpu.memory_space<vmem>>, vector<256x128xf32>,
    } else {
    }
    %c0 = arith.constant 0 : index
    %c0_1 = arith.constant 0 : index
    %3 = vector.load %arg6[%c0, %c0_1] : memref<256x128xf32, #tpu.memory_space<vmem>>, vector<256x128xf32>
    %c0_2 = arith.constant 0 : index
    %c0_3 = arith.constant 0 : index
    %4 = vector.load %arg2[%c0_2, %c0_3] : memref<256x432xbf16, #tpu.memory_space<vmem>>, vector<256x432xbf16>
    %c0_4 = arith.constant 0 : index
    %c0_5 = arith.constant 0 : index
    %5 = vector.load %arg3[%c0_4, %c0_5] : memref<432x128xbf16, #tpu.memory_space<vmem>>, vector<432x128xbf16>
    %cst = arith.constant dense<0.000000e+00> : vector<256x128xf32>
    %6 = tpu.matmul %4, %5, %cst {dimension_numbers = #tpu.dot_dimension_numbers<[1], [0], [0], [1], [0, 0, 1, 1], [], []>} : vector<256x432xbf16>, vector<432x128xbf16>, vector<256x128xf32> -> vector<256x128xf32>
    %7 = arith.addf %3, %6 : vector<256x128xf32>
    %c0_6 = arith.constant 0 : index
    %c0_7 = arith.constant 0 : index
    %8 = vector.load %arg6[%c0_6, %c0_7] : memref<256x128xf32, #tpu.memory_space<vmem>>, vector<256x128xf32>
    tpu.vector_store %arg6[%c0_6, %c0_7], %7 {strides = array<i32>} : memref<256x128xf32, #tpu.memory_space<vmem>>, vector<256x128xf32>,
    %c0_i32_8 = arith.constant 0 : i32
    %9 = arith.cmpi eq, %arg1, %c0_i32_8 : i32
    %10 = arith.extui %9 : i1 to i32
    %c0_i32_9 = arith.constant 0 : i32
    %11 = arith.cmpi ne, %10, %c0_i32_9 : i32
    scf.if %11 {
      %c0_10 = arith.constant 0 : index
      %c0_11 = arith.constant 0 : index
      %12 = vector.load %arg6[%c0_10, %c0_11] : memref<256x128xf32, #tpu.memory_space<vmem>>, vector<256x128xf32>
      %c0_12 = arith.constant 0 : index
      %c0_13 = arith.constant 0 : index
      %13 = vector.load %arg4[%c0_12, %c0_13] : memref<1x128xf32, #tpu.memory_space<vmem>>, vector<1x128xf32>
      %14 = vector.broadcast %13 : vector<1x128xf32> to vector<256x128xf32>
      %15 = arith.addf %12, %14 : vector<256x128xf32>
      %cst_14 = arith.constant 0.00999999977 : f32
      %16 = vector.broadcast %cst_14 : f32 to vector<256x128xf32>
      %17 = arith.mulf %16, %15 : vector<256x128xf32>
      %18 = arith.maximumf %15, %17 : vector<256x128xf32>
      %19 = arith.truncf %18 : vector<256x128xf32> to vector<256x128xbf16>
      %c0_15 = arith.constant 0 : index
      %c0_16 = arith.constant 0 : index
      %20 = vector.load %arg5[%c0_15, %c0_16] : memref<256x128xbf16, #tpu.memory_space<vmem>>, vector<256x128xbf16>
      tpu.vector_store %arg5[%c0_15, %c0_16], %19 {strides = array<i32>} : memref<256x128xbf16, #tpu.memory_space<vmem>>, vector<256x128xbf16>,
    } else {
    }
    return
  }
  func.func @transform_0(%arg0: i32, %arg1: i32) -> (i32, i32) {
    %c0_i32 = arith.constant 0 : i32
    return %arg0, %arg1 : i32, i32
  }
  func.func @transform_1(%arg0: i32, %arg1: i32) -> (i32, i32) {
    %c0_i32 = arith.constant 0 : i32
    %c0_i32_0 = arith.constant 0 : i32
    return %arg1, %c0_i32 : i32, i32
  }
  func.func @transform_2(%arg0: i32, %arg1: i32) -> (i32, i32) {
    %c0_i32 = arith.constant 0 : i32
    %c0_i32_0 = arith.constant 0 : i32
    %c0_i32_1 = arith.constant 0 : i32
    return %c0_i32, %c0_i32_0 : i32, i32
  }
  func.func @transform_3(%arg0: i32, %arg1: i32) -> (i32, i32) {
    %c0_i32 = arith.constant 0 : i32
    %c0_i32_0 = arith.constant 0 : i32
    return %arg0, %c0_i32 : i32, i32
  }
}

module attributes {stable_mosaic.version = 11 : i64} {
  func.func @_stage_res_kernel(%arg0: i32, %arg1: i32, %arg2: memref<256x3456xbf16, #tpu.memory_space<vmem>>, %arg3: memref<3456x128xbf16, #tpu.memory_space<vmem>>, %arg4: memref<1x128xf32, #tpu.memory_space<vmem>>, %arg5: memref<256x128xbf16, #tpu.memory_space<vmem>>, %arg6: memref<256x128xf32, #tpu.memory_space<vmem>>, %arg7: memref<256x128xf32, #tpu.memory_space<vmem>>) attributes {dimension_semantics = [#tpu.dimension_semantics<parallel>, #tpu.dimension_semantics<arbitrary>], iteration_bounds = array<i64: 2, 1>, scalar_prefetch = 0 : i64, scratch_operands = 1 : i64, tpu.core_type = #tpu.core_type<tc>, window_params = [{transform_indices = @transform_0, window_bounds = array<i64: 256, 3456>}, {transform_indices = @transform_1, window_bounds = array<i64: 3456, 128>}, {pipeline_mode = #tpu.pipeline_mode<synchronous>, transform_indices = @transform_2, window_bounds = array<i64: 1, 128>}, {transform_indices = @transform_3, window_bounds = array<i64: 256, 128>}, {transform_indices = @transform_4, window_bounds = array<i64: 256, 128>}]} {
    %c0_i32 = arith.constant 0 : i32
    %0 = arith.cmpi eq, %arg1, %c0_i32 : i32
    %1 = arith.extui %0 : i1 to i32
    %c0_i32_0 = arith.constant 0 : i32
    %2 = arith.cmpi ne, %1, %c0_i32_0 : i32
    scf.if %2 {
      %cst_10 = arith.constant 0.000000e+00 : f32
      %12 = vector.broadcast %cst_10 : f32 to vector<256x128xf32>
      %c0_11 = arith.constant 0 : index
      %c0_12 = arith.constant 0 : index
      %13 = vector.load %arg7[%c0_11, %c0_12] : memref<256x128xf32, #tpu.memory_space<vmem>>, vector<256x128xf32>
      tpu.vector_store %arg7[%c0_11, %c0_12], %12 {strides = array<i32>} : memref<256x128xf32, #tpu.memory_space<vmem>>, vector<256x128xf32>,
    } else {
    }
    %c0 = arith.constant 0 : index
    %c0_1 = arith.constant 0 : index
    %3 = vector.load %arg7[%c0, %c0_1] : memref<256x128xf32, #tpu.memory_space<vmem>>, vector<256x128xf32>
    %c0_2 = arith.constant 0 : index
    %c0_3 = arith.constant 0 : index
    %4 = vector.load %arg2[%c0_2, %c0_3] : memref<256x3456xbf16, #tpu.memory_space<vmem>>, vector<256x3456xbf16>
    %c0_4 = arith.constant 0 : index
    %c0_5 = arith.constant 0 : index
    %5 = vector.load %arg3[%c0_4, %c0_5] : memref<3456x128xbf16, #tpu.memory_space<vmem>>, vector<3456x128xbf16>
    %cst = arith.constant dense<0.000000e+00> : vector<256x128xf32>
    %6 = tpu.matmul %4, %5, %cst {dimension_numbers = #tpu.dot_dimension_numbers<[1], [0], [0], [1], [0, 0, 1, 1], [], []>} : vector<256x3456xbf16>, vector<3456x128xbf16>, vector<256x128xf32> -> vector<256x128xf32>
    %7 = arith.addf %3, %6 : vector<256x128xf32>
    %c0_6 = arith.constant 0 : index
    %c0_7 = arith.constant 0 : index
    %8 = vector.load %arg7[%c0_6, %c0_7] : memref<256x128xf32, #tpu.memory_space<vmem>>, vector<256x128xf32>
    tpu.vector_store %arg7[%c0_6, %c0_7], %7 {strides = array<i32>} : memref<256x128xf32, #tpu.memory_space<vmem>>, vector<256x128xf32>,
    %c0_i32_8 = arith.constant 0 : i32
    %9 = arith.cmpi eq, %arg1, %c0_i32_8 : i32
    %10 = arith.extui %9 : i1 to i32
    %c0_i32_9 = arith.constant 0 : i32
    %11 = arith.cmpi ne, %10, %c0_i32_9 : i32
    scf.if %11 {
      %c0_10 = arith.constant 0 : index
      %c0_11 = arith.constant 0 : index
      %12 = vector.load %arg7[%c0_10, %c0_11] : memref<256x128xf32, #tpu.memory_space<vmem>>, vector<256x128xf32>
      %c0_12 = arith.constant 0 : index
      %c0_13 = arith.constant 0 : index
      %13 = vector.load %arg4[%c0_12, %c0_13] : memref<1x128xf32, #tpu.memory_space<vmem>>, vector<1x128xf32>
      %14 = vector.broadcast %13 : vector<1x128xf32> to vector<256x128xf32>
      %15 = arith.addf %12, %14 : vector<256x128xf32>
      %cst_14 = arith.constant 0.00999999977 : f32
      %16 = vector.broadcast %cst_14 : f32 to vector<256x128xf32>
      %17 = arith.mulf %16, %15 : vector<256x128xf32>
      %18 = arith.maximumf %15, %17 : vector<256x128xf32>
      %c0_15 = arith.constant 0 : index
      %c0_16 = arith.constant 0 : index
      %19 = vector.load %arg5[%c0_15, %c0_16] : memref<256x128xbf16, #tpu.memory_space<vmem>>, vector<256x128xbf16>
      %20 = arith.extf %19 : vector<256x128xbf16> to vector<256x128xf32>
      %21 = arith.addf %18, %20 : vector<256x128xf32>
      %c0_17 = arith.constant 0 : index
      %c0_18 = arith.constant 0 : index
      %22 = vector.load %arg6[%c0_17, %c0_18] : memref<256x128xf32, #tpu.memory_space<vmem>>, vector<256x128xf32>
      tpu.vector_store %arg6[%c0_17, %c0_18], %21 {strides = array<i32>} : memref<256x128xf32, #tpu.memory_space<vmem>>, vector<256x128xf32>,
    } else {
    }
    return
  }
  func.func @transform_0(%arg0: i32, %arg1: i32) -> (i32, i32) {
    %c0_i32 = arith.constant 0 : i32
    return %arg0, %arg1 : i32, i32
  }
  func.func @transform_1(%arg0: i32, %arg1: i32) -> (i32, i32) {
    %c0_i32 = arith.constant 0 : i32
    %c0_i32_0 = arith.constant 0 : i32
    return %arg1, %c0_i32 : i32, i32
  }
  func.func @transform_2(%arg0: i32, %arg1: i32) -> (i32, i32) {
    %c0_i32 = arith.constant 0 : i32
    %c0_i32_0 = arith.constant 0 : i32
    %c0_i32_1 = arith.constant 0 : i32
    return %c0_i32, %c0_i32_0 : i32, i32
  }
  func.func @transform_3(%arg0: i32, %arg1: i32) -> (i32, i32) {
    %c0_i32 = arith.constant 0 : i32
    %c0_i32_0 = arith.constant 0 : i32
    return %arg0, %c0_i32 : i32, i32
  }
  func.func @transform_4(%arg0: i32, %arg1: i32) -> (i32, i32) {
    %c0_i32 = arith.constant 0 : i32
    %c0_i32_0 = arith.constant 0 : i32
    return %arg0, %c0_i32 : i32, i32
  }
}

</mosaic_0001>

<bundles_post_ra>
// kernel: tile.74
= control target key start
LH: loop header
LB: loop body
LE: loop exit
PB: predicated region body
PF: predicated region fallthrough
CT: control target
= control target key end

     0   :  { %s22_s0 = inlined_call_operand.vmem [shape: f32[8], index: 0, kind: input, shape index: {}]   ;;  %s23_s1 = inlined_call_operand.vmem [shape: f32[8,8], index: 1, kind: output, shape index: {}]  }
   0x1   :  { %v4_v0 = vld [vmem:[%s22_s0] ss:$0 sm:$0xff] }
   0x2   :  { %5 = vst [vmem:[%s23_s1] sm:$0xff] %v4_v0 }

// kernel: tile.79
= control target key start
LH: loop header
LB: loop body
LE: loop exit
PB: predicated region body
PF: predicated region fallthrough
CT: control target
= control target key end

     0   :  { %s22_s0 = inlined_call_operand.vmem [shape: f32[64], index: 0, kind: input, shape index: {}]   ;;  %s23_s1 = inlined_call_operand.vmem [shape: f32[2,64], index: 1, kind: output, shape index: {}]  }
   0x1   :  { %v4_v0 = vld [vmem:[%s22_s0] ss:$0 sm:$0xff] }
   0x2   :  { %5 = vst [vmem:[%s23_s1] sm:$0x3] %v4_v0 }

// kernel: tile.78
= control target key start
LH: loop header
LB: loop body
LE: loop exit
PB: predicated region body
PF: predicated region fallthrough
CT: control target
= control target key end

     0   :  { %s67_s10 = smov 56   ;;  %s68_s11 = smov 40   ;;  %vm3_vm0 = vcmask 64512   ;;  %vm9_vm1 = vcmask 523712   ;;  %vm15_vm2 = vcmask 458112   ;;  %vm21_vm3 = vcmask 392512   ;;  %s111_s0 = inlined_call_operand.vmem [shape: f32[8,8], index: 0, kind: input, shape index: {}]   ;;  %s112_s1 = inlined_call_operand.vmem [shape: f32[64], index: 1, kind: output, shape index: {}]  }
   0x1   :  { %v53_v0 = vld [vmem:[%s111_s0 + $0x7] sm:$0x1]   ;;  %v55_v1 = vld [vmem:[%s111_s0 + $0x5] sm:$0x1]   ;;  %v54_v2 = vld [vmem:[%s111_s0 + $0x6] sm:$0x1]  }
   0x2   :  { %7 = vrot.lane.b32.xlu0 %v53_v0, %s67_s10  ;;  %19 = vrot.lane.b32.xlu1 %v55_v1, %s68_s11  ;;  %v56_v3 = vld [vmem:[%s111_s0 + $0x4] sm:$0x1]   ;;  %v2_v4 = vld [vmem:[%s111_s0] sm:$0x1]   ;;  %s69_s18 = smov 48   ;;  %s70_s19 = smov 32  }
   0x3   :  { %4 = vst.msk [vmem:[#allocation0] sm:$0x1] %vm3_vm0, %v2_v4   ;;  %v57_v5 = vld [vmem:[%s111_s0 + $0x3] sm:$0x1]   ;;  %v58_v6 = vld [vmem:[%s111_s0 + $0x2] sm:$0x1]  }
   0x4   :  { %s71_s24 = smov 24   ;;  %s72_s25 = smov 16   ;;  %v59_v7 = vld [vmem:[%s111_s0 + $0x1] sm:$0x1]   ;;  %vm27_vm4 = vcmask 326912   ;;  %vm33_vm5 = vcmask 261312  }
   0x5   :  { %s73_s0 = smov 8   ;;  %vm39_vm6 = vcmask 195712   ;;  %vm45_vm7 = vcmask 130112  }
   0x6   :  { %13 = vrot.lane.b32.xlu0 %v54_v2, %s69_s18  ;;  %25 = vrot.lane.b32.xlu1 %v56_v3, %s70_s19 }
   0xa   :  { %31 = vrot.lane.b32.xlu0 %v57_v5, %s71_s24  ;;  %37 = vrot.lane.b32.xlu1 %v58_v6, %s72_s25 }
   0xe   :  { %43 = vrot.lane.b32.xlu0 %v59_v7, %s73_s0 }
  0x74   :  { %v8_v8 = vpop.permute.xlu0 %7   ;;  %v20_v9 = vpop.permute.xlu1 %19  }
  0x75   :  { %10 = vst.msk [vmem:[#allocation0] sm:$0x1] %vm9_vm1, %v8_v8  }
  0x78   :  { %v14_v10 = vpop.permute.xlu0 %13   ;;  %v26_v11 = vpop.permute.xlu1 %25  }
  0x79   :  { %16 = vst.msk [vmem:[#allocation0] sm:$0x1] %vm15_vm2, %v14_v10  }
  0x7a   :  { %22 = vst.msk [vmem:[#allocation0] sm:$0x1] %vm21_vm3, %v20_v9  }
  0x7b   :  { %28 = vst.msk [vmem:[#allocation0] sm:$0x1] %vm27_vm4, %v26_v11  }
  0x7c   :  { %v32_v12 = vpop.permute.xlu0 %31   ;;  %v38_v13 = vpop.permute.xlu1 %37  }
  0x7d   :  { %34 = vst.msk [vmem:[#allocation0] sm:$0x1] %vm33_vm5, %v32_v12  }
  0x7e   :  { %40 = vst.msk [vmem:[#allocation0] sm:$0x1] %vm39_vm6, %v38_v13  }
  0x80   :  { %v44_v14 = vpop.permute.xlu0 %43  }
  0x81   :  { %46 = vst.msk [vmem:[#allocation0] sm:$0x1] %vm45_vm7, %v44_v14  }
  0x88   :  { %v50_v15 = vld [vmem:[#allocation0] sm:$0x1] }
  0x89   :  { %52 = vst [vmem:[%s112_s1] sm:$0x1] %v50_v15 }

// kernel: tile.80
= control target key start
LH: loop header
LB: loop body
LE: loop exit
PB: predicated region body
PF: predicated region fallthrough
CT: control target
= control target key end

     0   :  { %vm7_vm0 = vcmask 523264   ;;  %vm13_vm1 = vcmask 1048064   ;;  %s39_s0 = inlined_call_operand.vmem [shape: f32[2,64], index: 0, kind: input, shape index: {}]   ;;  %s40_s1 = inlined_call_operand.vmem [shape: f32[1,128], index: 1, kind: output, shape index: {}]  }
   0x1   :  { %v4_v0 = vld [vmem:[%s39_s0] sm:$0x3]  ;;  %s22_s0 = smov 64  }
   0x2   :  { %5 = vst [vmem:[#allocation1] sm:$0x3] %v4_v0 }
   0x9   :  { %v10_v1 = vld [vmem:[#allocation1 + $0x1] sm:$0x1]   ;;  %v6_v2 = vld [vmem:[#allocation1] sm:$0x1]  }
   0xa   :  { %11 = vrot.lane.b32.xlu0 %v10_v1, %s22_s0  ;;  %8 = vst.msk [vmem:[#allocation0] sm:$0x1] %vm7_vm0, %v6_v2  }
  0x7c   :  { %v12_v3 = vpop.permute.xlu0 %11  }
  0x7d   :  { %14 = vst.msk [vmem:[#allocation0] sm:$0x1] %vm13_vm1, %v12_v3  }
  0x84   :  { %v18_v4 = vld [vmem:[#allocation0] sm:$0x1] }
  0x85   :  { %20 = vst [vmem:[%s40_s1] sm:$0x1] %v18_v4 }

// kernel: tile.46
= control target key start
LH: loop header
LB: loop body
LE: loop exit
PB: predicated region body
PF: predicated region fallthrough
CT: control target
= control target key end

     0   :  { %s28_s0 = inlined_call_operand.vmem [shape: f32[8], index: 0, kind: input, shape index: {}]   ;;  %s29_s1 = inlined_call_operand.vmem [shape: f32[16,8], index: 1, kind: output, shape index: {}]  }
   0x1   :  { %v4_v0 = vld [vmem:[%s28_s0] ss:$0 sm:$0xff] }
   0x2   :  { %5 = vst [vmem:[%s29_s1] sm:$0xff] %v4_v0  ;;  %8 = vst [vmem:[%s29_s1 + $0x8] sm:$0xff] %v4_v0 }

// kernel: tile.47
= control target key start
LH: loop header
LB: loop body
LE: loop exit
PB: predicated region body
PF: predicated region fallthrough
CT: control target
= control target key end

     0   :  { %s131_s10 = smov 120   ;;  %s132_s11 = smov 104   ;;  %vm3_vm0 = vcmask 64512   ;;  %vm9_vm1 = vcmask 1048512   ;;  %vm15_vm2 = vcmask 982912   ;;  %vm21_vm3 = vcmask 917312   ;;  %s207_s0 = inlined_call_operand.vmem [shape: f32[16,8], index: 0, kind: input, shape index: {}]   ;;  %s208_s1 = inlined_call_operand.vmem [shape: f32[1,128], index: 1, kind: output, shape index: {}]  }
   0x1   :  { %v101_v0 = vld [vmem:[%s207_s0 + $0xf] sm:$0x1]   ;;  %v103_v1 = vld [vmem:[%s207_s0 + $0xd] sm:$0x1]   ;;  %v102_v2 = vld [vmem:[%s207_s0 + $0xe] sm:$0x1]  }
   0x2   :  { %7 = vrot.lane.b32.xlu0 %v101_v0, %s131_s10  ;;  %19 = vrot.lane.b32.xlu1 %v103_v1, %s132_s11  ;;  %v104_v3 = vld [vmem:[%s207_s0 + $0xc] sm:$0x1]   ;;  %s133_s16 = smov 112   ;;  %s134_s17 = smov 96   ;;  %v105_v4 = vld [vmem:[%s207_s0 + $0xb] sm:$0x1]  }
   0x3   :  { %v106_v5 = vld [vmem:[%s207_s0 + $0xa] sm:$0x1]   ;;  %v2_v6 = vld [vmem:[%s207_s0] sm:$0x1]   ;;  %s135_s24 = smov 88   ;;  %s136_s25 = smov 80  }
   0x4   :  { %4 = vst.msk [vmem:[#allocation0] sm:$0x1] %vm3_vm0, %v2_v6   ;;  %v107_v7 = vld [vmem:[%s207_s0 + $0x9] sm:$0x1]   ;;  %v108_v8 = vld [vmem:[%s207_s0 + $0x8] sm:$0x1]  }
   0x5   :  { %s137_s30 = smov 72   ;;  %s138_s2 = smov 64   ;;  %v109_v9 = vld [vmem:[%s207_s0 + $0x7] sm:$0x1]   ;;  %v110_v10 = vld [vmem:[%s207_s0 + $0x6] sm:$0x1]  }
   0x6   :  { %13 = vrot.lane.b32.xlu0 %v102_v2, %s133_s16  ;;  %25 = vrot.lane.b32.xlu1 %v104_v3, %s134_s17  ;;  %s139_s7 = smov 56   ;;  %s140_s8 = smov 48   ;;  %v111_v11 = vld [vmem:[%s207_s0 + $0x5] sm:$0x1]   ;;  %v112_v12 = vld [vmem:[%s207_s0 + $0x4] sm:$0x1]  }
   0x7   :  { %s141_s13 = smov 40   ;;  %s142_s14 = smov 32   ;;  %v113_v13 = vld [vmem:[%s207_s0 + $0x3] sm:$0x1]   ;;  %v114_v14 = vld [vmem:[%s207_s0 + $0x2] sm:$0x1]  }
   0x8   :  { %s143_s19 = smov 24   ;;  %s144_s20 = smov 16   ;;  %v115_v15 = vld [vmem:[%s207_s0 + $0x1] sm:$0x1]   ;;  %vm27_vm4 = vcmask 851712   ;;  %vm33_vm5 = vcmask 786112  }
   0x9   :  { %s145_s0 = smov 8   ;;  %vm39_vm6 = vcmask 720512   ;;  %vm45_vm7 = vcmask 654912   ;;  %vm51_vm8 = vcmask 589312   ;;  %vm57_vm9 = vcmask 523712  }
   0xa   :  { %31 = vrot.lane.b32.xlu0 %v105_v4, %s135_s24  ;;  %37 = vrot.lane.b32.xlu1 %v106_v5, %s136_s25  ;;  %vm63_vm10 = vcmask 458112   ;;  %vm69_vm11 = vcmask 392512   ;;  %vm75_vm12 = vcmask 326912   ;;  %vm81_vm13 = vcmask 261312  }
   0xb   :  { %vm87_vm14 = vcmask 195712   ;;  %vm93_vm15 = vcmask 130112  }
   0xe   :  { %43 = vrot.lane.b32.xlu0 %v107_v7, %s137_s30  ;;  %49 = vrot.lane.b32.xlu1 %v108_v8, %s138_s2 }
  0x12   :  { %55 = vrot.lane.b32.xlu0 %v109_v9, %s139_s7  ;;  %61 = vrot.lane.b32.xlu1 %v110_v10, %s140_s8 }
  0x16   :  { %67 = vrot.lane.b32.xlu0 %v111_v11, %s141_s13  ;;  %73 = vrot.lane.b32.xlu1 %v112_v12, %s142_s14 }
  0x1a   :  { %79 = vrot.lane.b32.xlu0 %v113_v13, %s143_s19  ;;  %85 = vrot.lane.b32.xlu1 %v114_v14, %s144_s20 }
  0x1e   :  { %91 = vrot.lane.b32.xlu0 %v115_v15, %s145_s0 }
  0x74   :  { %v8_v16 = vpop.permute.xlu0 %7   ;;  %v20_v17 = vpop.permute.xlu1 %19  }
  0x75   :  { %10 = vst.msk [vmem:[#allocation0] sm:$0x1] %vm9_vm1, %v8_v16  }
  0x78   :  { %v14_v18 = vpop.permute.xlu0 %13   ;;  %v26_v19 = vpop.permute.xlu1 %25  }
  0x79   :  { %16 = vst.msk [vmem:[#allocation0] sm:$0x1] %vm15_vm2, %v14_v18  }
  0x7a   :  { %22 = vst.msk [vmem:[#allocation0] sm:$0x1] %vm21_vm3, %v20_v17  }
  0x7b   :  { %28 = vst.msk [vmem:[#allocation0] sm:$0x1] %vm27_vm4, %v26_v19  }
  0x7c   :  { %v32_v20 = vpop.permute.xlu0 %31   ;;  %v38_v21 = vpop.permute.xlu1 %37  }
  0x7d   :  { %34 = vst.msk [vmem:[#allocation0] sm:$0x1] %vm33_vm5, %v32_v20  }
  0x7e   :  { %40 = vst.msk [vmem:[#allocation0] sm:$0x1] %vm39_vm6, %v38_v21  }
  0x80   :  { %v44_v22 = vpop.permute.xlu0 %43   ;;  %v50_v23 = vpop.permute.xlu1 %49  }
  0x81   :  { %46 = vst.msk [vmem:[#allocation0] sm:$0x1] %vm45_vm7, %v44_v22  }
  0x82   :  { %52 = vst.msk [vmem:[#allocation0] sm:$0x1] %vm51_vm8, %v50_v23  }
  0x84   :  { %v56_v24 = vpop.permute.xlu0 %55   ;;  %v62_v25 = vpop.permute.xlu1 %61  }
  0x85   :  { %58 = vst.msk [vmem:[#allocation0] sm:$0x1] %vm57_vm9, %v56_v24  }
  0x86   :  { %64 = vst.msk [vmem:[#allocation0] sm:$0x1] %vm63_vm10, %v62_v25  }
  0x88   :  { %v68_v26 = vpop.permute.xlu0 %67   ;;  %v74_v27 = vpop.permute.xlu1 %73  }
  0x89   :  { %70 = vst.msk [vmem:[#allocation0] sm:$0x1] %vm69_vm11, %v68_v26  }
  0x8a   :  { %76 = vst.msk [vmem:[#allocation0] sm:$0x1] %vm75_vm12, %v74_v27  }
  0x8c   :  { %v80_v28 = vpop.permute.xlu0 %79   ;;  %v86_v29 = vpop.permute.xlu1 %85  }
  0x8d   :  { %82 = vst.msk [vmem:[#allocation0] sm:$0x1] %vm81_vm13, %v80_v28  }
  0x8e   :  { %88 = vst.msk [vmem:[#allocation0] sm:$0x1] %vm87_vm14, %v86_v29  }
  0x90   :  { %v92_v30 = vpop.permute.xlu0 %91  }
  0x91   :  { %94 = vst.msk [vmem:[#allocation0] sm:$0x1] %vm93_vm15, %v92_v30  }
  0x98   :  { %v98_v31 = vld [vmem:[#allocation0] sm:$0x1] }
  0x99   :  { %100 = vst [vmem:[%s208_s1] sm:$0x1] %v98_v31 }

// kernel: tile.85
= control target key start
LH: loop header
LB: loop body
LE: loop exit
PB: predicated region body
PF: predicated region fallthrough
CT: control target
= control target key end

     0   :  { %s167_s10 = smov 120   ;;  %s168_s11 = smov 104   ;;  %vm4_vm0 = vcmask 64512   ;;  %s253_s0 = inlined_call_operand.vmem [shape: f32[16,8], index: 0, kind: input, shape index: {}]   ;;  %s254_s1 = inlined_call_operand.hbm [shape: f32[1,128], index: 1, kind: output, shape index: {}]  }
   0x1   :  { %v112_v0 = vld [vmem:[%s253_s0 + $0xf] sm:$0x1]   ;;  %v114_v1 = vld [vmem:[%s253_s0 + $0xd] sm:$0x1]   ;;  %v113_v2 = vld [vmem:[%s253_s0 + $0xe] sm:$0x1]  }
   0x2   :  { %8 = vrot.lane.b32.xlu0 %v112_v0, %s167_s10  ;;  %20 = vrot.lane.b32.xlu1 %v114_v1, %s168_s11  ;;  %v115_v3 = vld [vmem:[%s253_s0 + $0xc] sm:$0x1]   ;;  %s169_s16 = smov 112   ;;  %s170_s17 = smov 96   ;;  %v116_v4 = vld [vmem:[%s253_s0 + $0xb] sm:$0x1]  }
   0x3   :  { %v117_v5 = vld [vmem:[%s253_s0 + $0xa] sm:$0x1]   ;;  %v3_v6 = vld [vmem:[%s253_s0] sm:$0x1]  }
   0x6   :  { %14 = vrot.lane.b32.xlu0 %v113_v2, %s169_s16  ;;  %26 = vrot.lane.b32.xlu1 %v115_v3, %s170_s17 }
   0x7   :  { %2 = vsyncpa [#allocation1], 0  ;;  %s171_s24 = smov 88   ;;  %s172_s25 = smov 80   ;;  %5 = vst.msk [vmem:[#allocation2] sm:$0x1] %vm4_vm0, %v3_v6  }
   0x8   :  { %v118_v7 = vld [vmem:[%s253_s0 + $0x9] sm:$0x1]   ;;  %v119_v8 = vld [vmem:[%s253_s0 + $0x8] sm:$0x1]   ;;  %s173_s30 = smov 72   ;;  %s174_s2 = smov 64  }
   0x9   :  { %v120_v9 = vld [vmem:[%s253_s0 + $0x7] sm:$0x1]   ;;  %v121_v10 = vld [vmem:[%s253_s0 + $0x6] sm:$0x1]   ;;  %s175_s7 = smov 56   ;;  %s176_s8 = smov 48  }
   0xa   :  { %32 = vrot.lane.b32.xlu0 %v116_v4, %s171_s24  ;;  %38 = vrot.lane.b32.xlu1 %v117_v5, %s172_s25  ;;  %v122_v11 = vld [vmem:[%s253_s0 + $0x5] sm:$0x1]   ;;  %v123_v12 = vld [vmem:[%s253_s0 + $0x4] sm:$0x1]   ;;  %s177_s13 = smov 40   ;;  %s178_s14 = smov 32  }
   0xb   :  { %v124_v13 = vld [vmem:[%s253_s0 + $0x3] sm:$0x1]   ;;  %v125_v14 = vld [vmem:[%s253_s0 + $0x2] sm:$0x1]   ;;  %s179_s19 = smov 24   ;;  %s180_s20 = smov 16  }
   0xc   :  { %v126_v15 = vld [vmem:[%s253_s0 + $0x1] sm:$0x1]   ;;  %s181_s0 = smov 8   ;;  %vm10_vm1 = vcmask 1048512   ;;  %vm16_vm2 = vcmask 982912   ;;  %vm22_vm3 = vcmask 917312  }
   0xd   :  { %vm28_vm4 = vcmask 851712   ;;  %vm34_vm5 = vcmask 786112   ;;  %vm40_vm6 = vcmask 720512   ;;  %vm46_vm7 = vcmask 654912   ;;  %s182_s23 = smov [#allocation0]  }
   0xe   :  { %44 = vrot.lane.b32.xlu0 %v118_v7, %s173_s30  ;;  %50 = vrot.lane.b32.xlu1 %v119_v8, %s174_s2  ;;  %vm52_vm8 = vcmask 589312   ;;  %vm58_vm9 = vcmask 523712   ;;  %vm64_vm10 = vcmask 458112   ;;  %vm70_vm11 = vcmask 392512   ;;  %s106_s24 = sshll.u32 %s182_s23, 4  ;;  %s107_s24 = int_to_ptr.vmem [resolvable:$true] %s106_s24 }
   0xf   :  { %vm76_vm12 = vcmask 326912   ;;  %vm82_vm13 = vcmask 261312   ;;  %vm88_vm14 = vcmask 195712   ;;  %vm94_vm15 = vcmask 130112   ;;  %s143_s25 = scalar_lea.vmem %s107_s24, 16  ;;  %s147_s26 = scalar_lea.vmem %s107_s24, 32 }
  0x10   :  { %p144_p0 = scmp.ne.s32.totalorder %s107_s24, %s143_s25  ;;  %p148_p1 = scmp.lt.s32.totalorder %s107_s24, %s107_s24 }
  0x11   :  { %p149_p2 = scmp.lt.s32.totalorder %s147_s26, %s143_s25 }
  0x12   :  { %56 = vrot.lane.b32.xlu0 %v120_v9, %s175_s7  ;;  %62 = vrot.lane.b32.xlu1 %v121_v10, %s176_s8 }
  0x13   :  { %p150_p3 = por %p149_p2, %p148_p1 }
  0x15   :  { %p151_p4 = pnand %p150_p3, %p144_p0 }
  0x16   :  { %68 = vrot.lane.b32.xlu0 %v122_v11, %s177_s13  ;;  %74 = vrot.lane.b32.xlu1 %v123_v12, %s178_s14 }
  0x1a   :  { %80 = vrot.lane.b32.xlu0 %v124_v13, %s179_s19  ;;  %86 = vrot.lane.b32.xlu1 %v125_v14, %s180_s20 }
  0x1e   :  { %92 = vrot.lane.b32.xlu0 %v126_v15, %s181_s0 }
  0x74   :  { %v9_v16 = vpop.permute.xlu0 %8   ;;  %v21_v17 = vpop.permute.xlu1 %20  }
  0x75   :  { %11 = vst.msk [vmem:[#allocation2] sm:$0x1] %vm10_vm1, %v9_v16  }
  0x78   :  { %v15_v18 = vpop.permute.xlu0 %14   ;;  %v27_v19 = vpop.permute.xlu1 %26  }
  0x79   :  { %17 = vst.msk [vmem:[#allocation2] sm:$0x1] %vm16_vm2, %v15_v18  }
  0x7a   :  { %23 = vst.msk [vmem:[#allocation2] sm:$0x1] %vm22_vm3, %v21_v17  }
  0x7b   :  { %29 = vst.msk [vmem:[#allocation2] sm:$0x1] %vm28_vm4, %v27_v19  }
  0x7c   :  { %v33_v20 = vpop.permute.xlu0 %32   ;;  %v39_v21 = vpop.permute.xlu1 %38  }
  0x7d   :  { %35 = vst.msk [vmem:[#allocation2] sm:$0x1] %vm34_vm5, %v33_v20  }
  0x7e   :  { %41 = vst.msk [vmem:[#allocation2] sm:$0x1] %vm40_vm6, %v39_v21  }
  0x80   :  { %v45_v22 = vpop.permute.xlu0 %44   ;;  %v51_v23 = vpop.permute.xlu1 %50  }
  0x81   :  { %47 = vst.msk [vmem:[#allocation2] sm:$0x1] %vm46_vm7, %v45_v22  }
  0x82   :  { %53 = vst.msk [vmem:[#allocation2] sm:$0x1] %vm52_vm8, %v51_v23  }
  0x84   :  { %v57_v24 = vpop.permute.xlu0 %56   ;;  %v63_v25 = vpop.permute.xlu1 %62  }
  0x85   :  { %59 = vst.msk [vmem:[#allocation2] sm:$0x1] %vm58_vm9, %v57_v24  }
  0x86   :  { %65 = vst.msk [vmem:[#allocation2] sm:$0x1] %vm64_vm10, %v63_v25  }
  0x88   :  { %v69_v26 = vpop.permute.xlu0 %68   ;;  %v75_v27 = vpop.permute.xlu1 %74  }
  0x89   :  { %71 = vst.msk [vmem:[#allocation2] sm:$0x1] %vm70_vm11, %v69_v26  }
  0x8a   :  { %77 = vst.msk [vmem:[#allocation2] sm:$0x1] %vm76_vm12, %v75_v27  }
  0x8c   :  { %v81_v28 = vpop.permute.xlu0 %80   ;;  %v87_v29 = vpop.permute.xlu1 %86  }
  0x8d   :  { %83 = vst.msk [vmem:[#allocation2] sm:$0x1] %vm82_vm13, %v81_v28  }
  0x8e   :  { %89 = vst.msk [vmem:[#allocation2] sm:$0x1] %vm88_vm14, %v87_v29  }
  0x90   :  { %v93_v30 = vpop.permute.xlu0 %92  }
  0x91   :  { %95 = vst.msk [vmem:[#allocation2] sm:$0x1] %vm94_vm15, %v93_v30  }
  0x98   :  { %v99_v31 = vld [vmem:[#allocation2] sm:$0x1] }
  0x99   :  { %101 = vst [vmem:[#allocation0] sm:$0x1] %v99_v31 }
  0x9a   :  { %154 = shalt.err (!%p151_p4)
}
  0x9b   :  { %s155_s29 = scalar_lea.hbm %s254_s1, 16 }
  0x9c   :  { %p156_p5 = scmp.ne.s32.totalorder %s254_s1, %s155_s29  ;;  %p159_p6 = scmp.lt.u32.totalorder %s155_s29, %s254_s1 }
  0x9e   :  { %p161_p7 = pnand %p159_p6, %p156_p5 }
  0xa0   :  { %164 = shalt.err (!%p161_p7)
}
  0xa1   :  { %109 = dma.vmem_to_hbm [thread:$0]  %s107_s24, 16, %s254_s1, [#allocation1]  }
  0xa2   :  { %165 = dma.done.wait [#allocation1], 16  }
  0xa3   :  { %166 = vsyncadd [#allocation1], 4294967280 }
  0xa4   :  { %111 = vsyncpa [#allocation1], 1 }

// kernel: conv_residual_decoder_block_3d.5
= control target key start
LH: loop header
LB: loop body
LE: loop exit
PB: predicated region body
PF: predicated region fallthrough
CT: control target
= control target key end

     0   :  { %v149_v0 = vmov 0.0   ;;  %vm150_vm0 = vmmov 0   ;;  %vm54_vm1 = vcmask 523264   ;;  %s192_s1 = inlined_call_operand.vmem [shape: bf16[64,128], index: 1, kind: input, shape index: {}]   ;;  %s193_s0 = inlined_call_operand.vmem [shape: bf16[8,64], index: 0, kind: input, shape index: {}]   ;;  %s194_s2 = inlined_call_operand.vmem [shape: f32[1,128], index: 2, kind: input, shape index: {}]   ;;  %s195_s3 = inlined_call_operand.vmem [shape: bf16[8,128], index: 3, kind: output, shape index: {}]  }
   0x1   :  { %131 = vmatprep.subr.bf16.mxu0 %v149_v0  ;;  %v145_v1 = vld [vmem:[%s192_s1] sm:$0xff]   ;;  %139 = vmatprep.mubr.msk.bf16.mxu0 %vm150_vm0, %v149_v0  ;;  %v146_v2 = vld [vmem:[%s192_s1 + $0x8] sm:$0xff]   ;;  %v147_v3 = vld [vmem:[%s192_s1 + $0x10] sm:$0xff]  }
   0x2   :  { %132 = vmatpush3.bf16.msra.mxu0 %v145_v1  ;;  %v148_v4 = vld [vmem:[%s192_s1 + $0x18] sm:$0xff]   ;;  %v21_v5 = vld [vmem:[%s193_s0] sm:$0xf] }
   0x3   :  { %133 = vmatprep.subr.bf16.mxu0 %v149_v0  ;;  %v125_v6 = vld [vmem:[%s194_s2] ss:$0 sm:$0xff] }
   0x6   :  { %134 = vmatpush3.bf16.msra.mxu0 %v146_v2 }
   0x7   :  { %135 = vmatprep.subr.bf16.mxu0 %v149_v0 }
   0xa   :  { %136 = vmatpush3.bf16.msra.mxu0 %v147_v3 }
   0xb   :  { %137 = vmatprep.subr.bf16.mxu0 %v149_v0 }
   0xe   :  { %138 = vmatpush3.bf16.msra.mxu0 %v148_v4 }
  0x11   :  { %140 = vmatmul.mubr.msk.bf16.vlgmr.msra.gmra.mrb[0].mxu0 %vm54_vm1, %v21_v5 }
  0xe4   :  { %v92_v7 = vpop.f32.mrb[0].mxu0 }
  0xe5   :  { %v111_v8 = vadd.f32 %v125_v6, %v92_v7  ;;  %v141_v9 = vpop.f32.mrb[1].mxu0 }
  0xe6   :  { %v95_v10 = vpop.f32.mrb[2].mxu0 }
  0xe7   :  { %v112_v11 = vmul.f32 0.01, %v111_v8  ;;  %v142_v12 = vpop.f32.mrb[3].mxu0 }
  0xe9   :  { %v113_v13 = vmax.f32 %v111_v8, %v112_v11 }
  0xeb   :  { %v114_v14 = vpack.c.bf16 %v113_v13, %v113_v13 }
  0xed   :  { %115 = vst [vmem:[%s195_s3] sm:$0xf] %v114_v14 }

// kernel: conv_residual_decoder_block_3d.6
= control target key start
LH: loop header
LB: loop body
LE: loop exit
PB: predicated region body
PF: predicated region fallthrough
CT: control target
= control target key end

     0   :  { %s742_s12 = smov 0   ;;  %s744_s13 = smov 0   ;;  %s858_s0 = inlined_call_operand.vmem [shape: bf16[64,216], index: 0, kind: input, shape index: {}]   ;;  %s859_s1 = inlined_call_operand.vmem [shape: bf16[216,128], index: 1, kind: input, shape index: {}]   ;;  %s860_s2 = inlined_call_operand.vmem [shape: f32[1,128], index: 2, kind: input, shape index: {}]   ;;  %s861_s3 = inlined_call_operand.vmem [shape: bf16[64,128], index: 3, kind: output, shape index: {}]  }
   0x1   :  { %s746_s14 = smov 0  }
   0x2 LB: > { %s25_s15 = sadd.s32 1, %s715_s13  ;;  %p575_p0 = scmp.ge.s32.totalorder %s719_s14, 1  ;;  %s719_s14 = sphi %s746_s14, %s13_s14   ;;  %s715_s13 = sphi %s744_s13, %s863_s13   ;;  %s711_s12 = sphi %s742_s12, %s862_s12  }
   0x3   : > { %p27_p1 = scmp.ge.s32.totalorder %s25_s15, 2  ;;  %p169_p2 = scmp.lt.s32.totalorder %s719_s14, 3 }
   0x5   : > { %s865_s15 = smov (%p27_p1, %s25_s15), 0  ;;  %p170_p3 = pnand %p575_p0, %p169_p2 }
   0x6   : > { %v677_v0 = vld [vmem:[%s859_s1] sm:$0xff] (!%p170_p3)   ;;  %v721_v1 = vmov (!%p170_p3), 0   ;;  %v678_v2 = vld [vmem:[%s859_s1 + $0x8] sm:$0xff] (!%p170_p3)   ;;  %s576_s20 = sshll.u32 (!%p170_p3), %s711_s12, 2  ;;  %v679_v3 = vld [vmem:[%s859_s1 + $0x10] sm:$0xff] (!%p170_p3)   ;;  %vm370_vm0 = vcmask (!%p170_p3), 719872  }
   0x7   : > { %173 = sbr.rel (%p170_p3) target bundleno = 286 (0x11e), region = 32  ;;  %381 = vmatprep.subr.bf16.mxu0 (!%p170_p3), %v721_v1  ;;  %624 = vmatprep.subr.bf16.mxu1 (!%p170_p3), %v721_v1  ;;  %p205_p4 = scmp.lt.s32.totalorder (!%p170_p3), %s576_s20, 7  ;;  %v680_v4 = vld [vmem:[%s859_s1 + $0x18] sm:$0xff] (!%p170_p3)   ;;  %v681_v5 = vld [vmem:[%s859_s1 + $0x20] sm:$0xff] (!%p170_p3)   ;;  %v682_v8 = vld [vmem:[%s859_s1 + $0x28] sm:$0xff] (!%p170_p3)   ;;  %vm377_vm1 = vcmask (!%p170_p3), 1043456  }
   0x8   : > { %382 = vmatpush1.bf16.msra.mxu0 (!%p170_p3), %v677_v0  ;;  %638 = vmatpush1.bf16.msra.mxu1 (!%p170_p3), %v677_v0  ;;  %v683_v9 = vld [vmem:[%s859_s1 + $0x30] sm:$0xff] (!%p170_p3)   ;;  %v684_v10 = vld [vmem:[%s859_s1 + $0x38] sm:$0xff] (!%p170_p3)   ;;  %v685_v11 = vld [vmem:[%s859_s1 + $0x40] sm:$0xff] (!%p170_p3)  }
   0x9   : > { %383 = vmatprep.subr.bf16.mxu0 (!%p170_p3), %v721_v1  ;;  %625 = vmatprep.subr.bf16.mxu1 (!%p170_p3), %v721_v1  ;;  %v686_v12 = vld [vmem:[%s859_s1 + $0x48] sm:$0xff] (!%p170_p3)   ;;  %v687_v13 = vld [vmem:[%s859_s1 + $0x50] sm:$0xff] (!%p170_p3)   ;;  %v688_v14 = vld [vmem:[%s859_s1 + $0x58] sm:$0xff] (!%p170_p3)  }
   0xa   : > { %v689_v15 = vld [vmem:[%s859_s1 + $0x60] sm:$0xff] (!%p170_p3)   ;;  %v690_v16 = vld [vmem:[%s859_s1 + $0x68] ss:$0 sps:$4 sm:$0xff] (!%p170_p3)  }
   0xb   : > { %v379_v17 = vsel (!%p170_p3), %vm377_vm1, %v690_v16, 0  ;;  %v601_v20 = vld [vmem:[%s860_s2] ss:$0 sm:$0xff] (!%p170_p3) }
   0xc   : > { %384 = vmatpush1.bf16.msra.mxu0 (!%p170_p3), %v678_v2  ;;  %639 = vmatpush1.bf16.msra.mxu1 (!%p170_p3), %v678_v2 }
   0xd   : > { %385 = vmatprep.subr.bf16.mxu0 (!%p170_p3), %v721_v1  ;;  %626 = vmatprep.subr.bf16.mxu1 (!%p170_p3), %v721_v1 }
   0xe   : > { %s867_s20 = smov (!%p205_p4, %s576_s20), 7 }
   0xf   : > { %s608_s23 = sshll.u32 %s867_s20, 3 }
  0x10   : > { %386 = vmatpush1.bf16.msra.mxu0 %v679_v3  ;;  %640 = vmatpush1.bf16.msra.mxu1 %v679_v3  ;;  %s786_s28 = scalar_lea.vmem %s858_s0, %s608_s23 }
  0x11   : > { %387 = vmatprep.subr.bf16.mxu0 %v721_v1  ;;  %627 = vmatprep.subr.bf16.mxu1 %v721_v1  ;;  %v693_v6 = vld [vmem:[%s786_s28 + $0x4] ss:$8 sps:$4 sm:$0xff]   ;;  %v696_v7 = vld [vmem:[%s786_s28 + $0x14] ss:$8 sps:$4 sm:$0xff]   ;;  %v691_v18 = vld [vmem:[%s786_s28] ss:$8 sps:$4 sm:$0xff]  }
  0x12   : > { %599 = vmatprep.mubr.msk.bf16.mxu0 %vm370_vm0, %v693_v6  ;;  %600 = vmatprep.mubr.msk.bf16.mxu1 %vm370_vm0, %v696_v7  ;;  %v694_v19 = vld [vmem:[%s786_s28 + $0x10] ss:$8 sps:$4 sm:$0xff]   ;;  %s580_s28 = sshll.u32 %s867_s20, 2 }
  0x13   : > { %s225_s4 = scalar_lea.vmem %s861_s3, %s580_s28 }
  0x14   : > { %388 = vmatpush1.bf16.msra.mxu0 %v680_v4  ;;  %641 = vmatpush1.bf16.msra.mxu1 %v680_v4 }
  0x15   : > { %389 = vmatprep.subr.bf16.mxu0 %v721_v1  ;;  %628 = vmatprep.subr.bf16.mxu1 %v721_v1 }
  0x18   : > { %390 = vmatpush1.bf16.msra.mxu0 %v681_v5  ;;  %642 = vmatpush1.bf16.msra.mxu1 %v681_v5 }
  0x19   : > { %391 = vmatprep.subr.bf16.mxu0 %v721_v1  ;;  %629 = vmatprep.subr.bf16.mxu1 %v721_v1 }
  0x1c   : > { %392 = vmatpush1.bf16.msra.mxu0 %v682_v8  ;;  %643 = vmatpush1.bf16.msra.mxu1 %v682_v8 }
  0x1d   : > { %393 = vmatprep.subr.bf16.mxu0 %v721_v1  ;;  %630 = vmatprep.subr.bf16.mxu1 %v721_v1 }
  0x20   : > { %394 = vmatpush1.bf16.msra.mxu0 %v683_v9  ;;  %644 = vmatpush1.bf16.msra.mxu1 %v683_v9 }
  0x21   : > { %395 = vmatprep.subr.bf16.mxu0 %v721_v1  ;;  %631 = vmatprep.subr.bf16.mxu1 %v721_v1 }
  0x24   : > { %396 = vmatpush1.bf16.msra.mxu0 %v684_v10  ;;  %645 = vmatpush1.bf16.msra.mxu1 %v684_v10 }
  0x25   : > { %397 = vmatprep.subr.bf16.mxu0 %v721_v1  ;;  %632 = vmatprep.subr.bf16.mxu1 %v721_v1 }
  0x28   : > { %398 = vmatpush1.bf16.msra.mxu0 %v685_v11  ;;  %646 = vmatpush1.bf16.msra.mxu1 %v685_v11 }
  0x29   : > { %399 = vmatprep.subr.bf16.mxu0 %v721_v1  ;;  %633 = vmatprep.subr.bf16.mxu1 %v721_v1 }
  0x2c   : > { %400 = vmatpush1.bf16.msra.mxu0 %v686_v12  ;;  %647 = vmatpush1.bf16.msra.mxu1 %v686_v12 }
  0x2d   : > { %401 = vmatprep.subr.bf16.mxu0 %v721_v1  ;;  %634 = vmatprep.subr.bf16.mxu1 %v721_v1 }
  0x30   : > { %402 = vmatpush1.bf16.msra.mxu0 %v687_v13  ;;  %648 = vmatpush1.bf16.msra.mxu1 %v687_v13 }
  0x31   : > { %403 = vmatprep.subr.bf16.mxu0 %v721_v1  ;;  %635 = vmatprep.subr.bf16.mxu1 %v721_v1 }
  0x34   : > { %404 = vmatpush1.bf16.msra.mxu0 %v688_v14  ;;  %649 = vmatpush1.bf16.msra.mxu1 %v688_v14 }
  0x35   : > { %405 = vmatprep.subr.bf16.mxu0 %v721_v1  ;;  %636 = vmatprep.subr.bf16.mxu1 %v721_v1 }
  0x38   : > { %406 = vmatpush1.bf16.msra.mxu0 %v689_v15  ;;  %650 = vmatpush1.bf16.msra.mxu1 %v689_v15 }
  0x39   : > { %407 = vmatprep.subr.bf16.mxu0 %v721_v1  ;;  %637 = vmatprep.subr.bf16.mxu1 %v721_v1 }
  0x3c   : > { %408 = vmatpush1.bf16.msra.mxu0 %v379_v17  ;;  %651 = vmatpush1.bf16.msra.mxu1 %v379_v17 }
  0x3f   : > { %414 = vmatmul.mubr.bf16.vlgmr.msra.gmra.mrb[0].mxu0 %v691_v18  ;;  %422 = vmatmul.mubr.bf16.vlgmr.msra.gmra.mrb[0].mxu1 %v694_v19 }
 0x112   : > { %v415_v21 = vpop.f32.mrb[0].mxu0  ;;  %v423_v22 = vpop.f32.mrb[0].mxu1 }
 0x113   : > { %v452_v23 = vadd.f32 %v601_v20, %v415_v21  ;;  %v454_v24 = vadd.f32 %v601_v20, %v423_v22  ;;  %v417_v25 = vpop.f32.mrb[1].mxu0  ;;  %v425_v26 = vpop.f32.mrb[1].mxu1 }
 0x114   : > { %v418_v27 = vpop.f32.mrb[2].mxu0  ;;  %v426_v28 = vpop.f32.mrb[2].mxu1 }
 0x115   : > { %v456_v29 = vmul.f32 0.01, %v452_v23  ;;  %v458_v30 = vmul.f32 0.01, %v454_v24  ;;  %v453_v31 = vadd.f32 %v601_v20, %v418_v27  ;;  %v455_v32 = vadd.f32 %v601_v20, %v426_v28  ;;  %v420_v33 = vpop.f32.mrb[3].mxu0  ;;  %v428_v34 = vpop.f32.mrb[3].mxu1 }
 0x117   : > { %v457_v35 = vmul.f32 0.01, %v453_v31  ;;  %v459_v36 = vmul.f32 0.01, %v455_v32  ;;  %v460_v37 = vmax.f32 %v452_v23, %v456_v29  ;;  %v462_v38 = vmax.f32 %v454_v24, %v458_v30 }
 0x119   : > { %v461_v39 = vmax.f32 %v453_v31, %v457_v35  ;;  %v463_v40 = vmax.f32 %v455_v32, %v459_v36 }
 0x11b   : > { %v616_v41 = vpack.c.bf16 %v461_v39, %v460_v37  ;;  %v621_v42 = vpack.c.bf16 %v463_v40, %v462_v38 }
 0x11d   : > { %617 = vst [vmem:[%s225_s4] sm:$0xff] %v616_v41   ;;  %623 = vst [vmem:[%s225_s4 + $0x8] sm:$0xff] %v621_v42  }
 0x11e PF: > { %s13_s14 = sadd.s32 1, %s719_s14   ;;  %s862_s12 = smov %s715_s13 }
 0x11f   : > { %p10_p5 = scmp.ge.s32.totalorder %s13_s14, 4   ;;  %s863_s13 = smov %s865_s15 }
 0x121   :  { %12 = sbr.rel (!%p10_p5) target bundleno = 2 (0x2), region = 73 }

// kernel: conv_residual_decoder_block_3d.7
= control target key start
LH: loop header
LB: loop body
LE: loop exit
PB: predicated region body
PF: predicated region fallthrough
CT: control target
= control target key end

     0   :  { %s4183_s12 = smov 0   ;;  %s4185_s13 = smov 0   ;;  %s4930_s0 = inlined_call_operand.vmem [shape: bf16[64,3456], index: 0, kind: input, shape index: {}]   ;;  %s4931_s1 = inlined_call_operand.vmem [shape: bf16[3456,128], index: 1, kind: input, shape index: {}]   ;;  %s4932_s2 = inlined_call_operand.vmem [shape: f32[1,128], index: 2, kind: input, shape index: {}]   ;;  %s4933_s3 = inlined_call_operand.vmem [shape: bf16[64,128], index: 3, kind: output, shape index: {}]  }
   0x1   :  { %s4187_s14 = smov 0  }
   0x2 LB: > { %s25_s15 = sadd.s32 1, %s4157_s13  ;;  %p3127_p0 = scmp.ge.s32.totalorder %s4161_s14, 1  ;;  %s4161_s14 = sphi %s4187_s14, %s13_s14   ;;  %s4157_s13 = sphi %s4185_s13, %s4935_s13   ;;  %s4153_s12 = sphi %s4183_s12, %s4934_s12  }
   0x3   : > { %p27_p1 = scmp.ge.s32.totalorder %s25_s15, 2  ;;  %p169_p2 = scmp.lt.s32.totalorder %s4161_s14, 3 }
   0x5   : > { %s4937_s15 = smov (%p27_p1, %s25_s15), 0  ;;  %p170_p3 = pnand %p3127_p0, %p169_p2 }
   0x6   : > { %v3843_v0 = vld [vmem:[%s4931_s1 + $0x40] sm:$0xff] (!%p170_p3)   ;;  %v3847_v4 = vld [vmem:[%s4931_s1 + $0x48] sm:$0xff] (!%p170_p3)   ;;  %v3851_v8 = vld [vmem:[%s4931_s1 + $0x50] sm:$0xff] (!%p170_p3)   ;;  %s3128_s23 = sshll.u32 (!%p170_p3), %s4153_s12, 2 }
   0x7   : > { %173 = sbr.rel (%p170_p3) target bundleno = 470 (0x1d6), region = 32  ;;  %v3844_v1 = vld [vmem:[%s4931_s1 + $0xc0] sm:$0xff] (!%p170_p3)   ;;  %3424 = vmatprep.subr.bf16.mxu0 (!%p170_p3), %v3843_v0  ;;  %v3848_v5 = vld [vmem:[%s4931_s1 + $0xc8] sm:$0xff] (!%p170_p3)   ;;  %v3852_v9 = vld [vmem:[%s4931_s1 + $0xd0] sm:$0xff] (!%p170_p3)   ;;  %p205_p4 = scmp.lt.s32.totalorder (!%p170_p3), %s3128_s23, 7 }
   0x8   : > { %v3845_v2 = vld [vmem:[%s4931_s1] sm:$0xff] (!%p170_p3)   ;;  %3452 = vmatprep.subr.bf16.mxu1 (!%p170_p3), %v3844_v1  ;;  %v3849_v6 = vld [vmem:[%s4931_s1 + $0x8] sm:$0xff] (!%p170_p3)   ;;  %v3853_v10 = vld [vmem:[%s4931_s1 + $0x10] sm:$0xff] (!%p170_p3)  }
   0x9   : > { %v3846_v3 = vld [vmem:[%s4931_s1 + $0x80] sm:$0xff] (!%p170_p3)   ;;  %3425 = vmatpush3.bf16.msra.mxu0 (!%p170_p3), %v3845_v2  ;;  %v3850_v7 = vld [vmem:[%s4931_s1 + $0x88] sm:$0xff] (!%p170_p3)   ;;  %v3854_v11 = vld [vmem:[%s4931_s1 + $0x90] sm:$0xff] (!%p170_p3)  }
   0xa   : > { %3453 = vmatpush3.bf16.msra.mxu1 (!%p170_p3), %v3846_v3  ;;  %3426 = vmatprep.subr.bf16.mxu0 (!%p170_p3), %v3847_v4  ;;  %v3855_v12 = vld [vmem:[%s4931_s1 + $0x58] sm:$0xff] (!%p170_p3)   ;;  %v3859_v16 = vld [vmem:[%s4931_s1 + $0x60] sm:$0xff] (!%p170_p3)   ;;  %v3863_v20 = vld [vmem:[%s4931_s1 + $0x68] sm:$0xff] (!%p170_p3)  }
   0xb   : > { %3454 = vmatprep.subr.bf16.mxu1 (!%p170_p3), %v3848_v5  ;;  %v3856_v13 = vld [vmem:[%s4931_s1 + $0xd8] sm:$0xff] (!%p170_p3)   ;;  %v3860_v17 = vld [vmem:[%s4931_s1 + $0xe0] sm:$0xff] (!%p170_p3)   ;;  %v3864_v21 = vld [vmem:[%s4931_s1 + $0xe8] sm:$0xff] (!%p170_p3)  }
   0xc   : > { %v3857_v14 = vld [vmem:[%s4931_s1 + $0x18] sm:$0xff] (!%p170_p3)   ;;  %v3861_v18 = vld [vmem:[%s4931_s1 + $0x20] sm:$0xff] (!%p170_p3)   ;;  %v3865_v22 = vld [vmem:[%s4931_s1 + $0x28] sm:$0xff] (!%p170_p3)  }
   0xd   : > { %3427 = vmatpush3.bf16.msra.mxu0 (!%p170_p3), %v3849_v6  ;;  %v3858_v15 = vld [vmem:[%s4931_s1 + $0x98] sm:$0xff] (!%p170_p3)   ;;  %v3862_v19 = vld [vmem:[%s4931_s1 + $0xa0] sm:$0xff] (!%p170_p3)   ;;  %v3866_v23 = vld [vmem:[%s4931_s1 + $0xa8] sm:$0xff] (!%p170_p3)  }
   0xe   : > { %3455 = vmatpush3.bf16.msra.mxu1 %v3850_v7  ;;  %3428 = vmatprep.subr.bf16.mxu0 %v3851_v8  ;;  %s4939_s23 = smov (!%p205_p4, %s3128_s23), 7  ;;  %v3867_v24 = vld [vmem:[%s4931_s1 + $0x70] sm:$0xff]   ;;  %v3871_v28 = vld [vmem:[%s4931_s1 + $0x78] sm:$0xff]   ;;  %v3881_v36 = vld [vmem:[%s4931_s1 + $0x140] sm:$0xff]  }
   0xf   : > { %3456 = vmatprep.subr.bf16.mxu1 %v3852_v9  ;;  %v3868_v25 = vld [vmem:[%s4931_s1 + $0xf0] sm:$0xff]   ;;  %s3818_s22 = smul.u32 108, %s4939_s23  ;;  %v3872_v29 = vld [vmem:[%s4931_s1 + $0xf8] sm:$0xff]   ;;  %v3882_v37 = vld [vmem:[%s4931_s1 + $0x100] sm:$0xff]   ;;  %s3131_s5 = sshll.u32 %s4939_s23, 2 }
  0x10   : > { %v3869_v26 = vld [vmem:[%s4931_s1 + $0x30] sm:$0xff]   ;;  %v3873_v30 = vld [vmem:[%s4931_s1 + $0x38] sm:$0xff]   ;;  %v3883_v38 = vld [vmem:[%s4931_s1 + $0x1c0] sm:$0xff]   ;;  %s225_s9 = scalar_lea.vmem %s4933_s3, %s3131_s5 }
  0x11   : > { %3429 = vmatpush3.bf16.msra.mxu0 %v3853_v10  ;;  %v3870_v27 = vld [vmem:[%s4931_s1 + $0xb0] sm:$0xff]   ;;  %s4300_s6 = scalar_lea.vmem %s4930_s0, %s3818_s22  ;;  %v3874_v31 = vld [vmem:[%s4931_s1 + $0xb8] sm:$0xff]   ;;  %v3884_v39 = vld [vmem:[%s4931_s1 + $0x180] sm:$0xff]  }
  0x12   : > { %3457 = vmatpush3.bf16.msra.mxu1 %v3854_v11  ;;  %3430 = vmatprep.subr.bf16.mxu0 %v3855_v12  ;;  %v3875_v32 = vld [vmem:[%s4300_s6] ss:$108 sps:$4 sm:$0xff]   ;;  %v3877_v33 = vld [vmem:[%s4300_s6 + $0x4] ss:$108 sps:$4 sm:$0xff]   ;;  %v3878_v34 = vld [vmem:[%s4300_s6 + $0x8] ss:$108 sps:$4 sm:$0xff]  }
  0x13   : > { %3458 = vmatprep.subr.bf16.mxu1 %v3856_v13  ;;  %v3880_v35 = vld [vmem:[%s4300_s6 + $0xc] ss:$108 sps:$4 sm:$0xff]   ;;  %2328 = vmatprep.mubr.bf16.mxu0 %v3877_v33  ;;  %v3889_v44 = vld [vmem:[%s4931_s1 + $0x150] sm:$0xff]   ;;  %v3897_v52 = vld [vmem:[%s4931_s1 + $0x160] sm:$0xff]  }
  0x14   : > { %2377 = vmatprep.mubr.bf16.mxu1 %v3880_v35  ;;  %v3885_v40 = vld [vmem:[%s4931_s1 + $0x148] sm:$0xff]   ;;  %v3890_v45 = vld [vmem:[%s4931_s1 + $0x110] sm:$0xff]   ;;  %v3893_v48 = vld [vmem:[%s4931_s1 + $0x158] sm:$0xff]  }
  0x15   : > { %3431 = vmatpush3.bf16.msra.mxu0 %v3857_v14  ;;  %v3886_v41 = vld [vmem:[%s4931_s1 + $0x108] sm:$0xff]   ;;  %v3891_v46 = vld [vmem:[%s4931_s1 + $0x1d0] sm:$0xff]   ;;  %v3894_v49 = vld [vmem:[%s4931_s1 + $0x118] sm:$0xff]  }
  0x16   : > { %3459 = vmatpush3.bf16.msra.mxu1 %v3858_v15  ;;  %3432 = vmatprep.subr.bf16.mxu0 %v3859_v16  ;;  %v3887_v42 = vld [vmem:[%s4931_s1 + $0x1c8] sm:$0xff]   ;;  %v3892_v47 = vld [vmem:[%s4931_s1 + $0x190] sm:$0xff]   ;;  %v3895_v50 = vld [vmem:[%s4931_s1 + $0x1d8] sm:$0xff]  }
  0x17   : > { %3460 = vmatprep.subr.bf16.mxu1 %v3860_v17  ;;  %v3888_v43 = vld [vmem:[%s4931_s1 + $0x188] sm:$0xff]   ;;  %v3896_v51 = vld [vmem:[%s4931_s1 + $0x198] sm:$0xff]   ;;  %v3898_v53 = vld [vmem:[%s4931_s1 + $0x120] sm:$0xff]  }
  0x18   : > { %v3899_v54 = vld [vmem:[%s4931_s1 + $0x1e0] sm:$0xff]   ;;  %v3901_v56 = vld [vmem:[%s4931_s1 + $0x168] sm:$0xff]   ;;  %v3911_v0 = vld [vmem:[%s4931_s1 + $0x170] sm:$0xff]  }
  0x19   : > { %3433 = vmatpush3.bf16.msra.mxu0 %v3861_v18  ;;  %v3900_v55 = vld [vmem:[%s4931_s1 + $0x1a0] sm:$0xff]   ;;  %v3902_v57 = vld [vmem:[%s4300_s6 + $0xdc] ss:$108 sps:$4 sm:$0xff]   ;;  %v3912_v1 = vld [vmem:[%s4931_s1 + $0x130] sm:$0xff]  }
  0x1a   : > { %3461 = vmatpush3.bf16.msra.mxu1 %v3862_v19  ;;  %3434 = vmatprep.subr.bf16.mxu0 %v3863_v20  ;;  %v3904_v58 = vld [vmem:[%s4300_s6 + $0xe4] ss:$108 sps:$4 sm:$0xff]   ;;  %v3906_v59 = vld [vmem:[%s4931_s1 + $0x128] sm:$0xff]   ;;  %v3915_v4 = vld [vmem:[%s4931_s1 + $0x178] sm:$0xff]  }
  0x1b   : > { %3462 = vmatprep.subr.bf16.mxu1 %v3864_v21  ;;  %v3907_v60 = vld [vmem:[%s4300_s6 + $0xd8] ss:$108 sps:$4 sm:$0xff]   ;;  %v3908_v61 = vld [vmem:[%s4300_s6 + $0xe0] ss:$108 sps:$4 sm:$0xff]   ;;  %v3913_v2 = vld [vmem:[%s4931_s1 + $0x1f0] sm:$0xff]  }
  0x1c   : > { %v3909_v62 = vld [vmem:[%s4931_s1 + $0x1e8] sm:$0xff]   ;;  %v3914_v3 = vld [vmem:[%s4931_s1 + $0x1b0] sm:$0xff]   ;;  %v3916_v5 = vld [vmem:[%s4931_s1 + $0x138] sm:$0xff]  }
  0x1d   : > { %3435 = vmatpush3.bf16.msra.mxu0 %v3865_v22  ;;  %v3910_v63 = vld [vmem:[%s4931_s1 + $0x1a8] sm:$0xff]   ;;  %v3917_v6 = vld [vmem:[%s4931_s1 + $0x1f8] sm:$0xff]   ;;  %v3920_v8 = vld [vmem:[%s4300_s6 + $0x14] ss:$108 sps:$4 sm:$0xff]  }
  0x1e   : > { %3463 = vmatpush3.bf16.msra.mxu1 %v3866_v23  ;;  %3436 = vmatprep.subr.bf16.mxu0 %v3867_v24  ;;  %v3918_v7 = vld [vmem:[%s4300_s6 + $0x10] ss:$108 sps:$4 sm:$0xff]   ;;  %v3922_v10 = vld [vmem:[%s4931_s1 + $0x240] sm:$0xff]   ;;  %v3929_v16 = vld [vmem:[%s4931_s1 + $0x248] sm:$0xff]  }
  0x1f   : > { %3464 = vmatprep.subr.bf16.mxu1 %v3868_v25  ;;  %v3921_v9 = vld [vmem:[%s4931_s1 + $0x1b8] sm:$0xff]   ;;  %v3926_v13 = vld [vmem:[%s4931_s1 + $0x200] sm:$0xff]   ;;  %v3930_v17 = vld [vmem:[%s4931_s1 + $0x208] sm:$0xff]  }
  0x20   : > { %v3923_v11 = vld [vmem:[%s4300_s6 + $0x18] ss:$108 sps:$4 sm:$0xff]   ;;  %v3925_v12 = vld [vmem:[%s4300_s6 + $0x1c] ss:$108 sps:$4 sm:$0xff]   ;;  %v3936_v22 = vld [vmem:[%s4931_s1 + $0x250] sm:$0xff]  }
  0x21   : > { %3437 = vmatpush3.bf16.msra.mxu0 %v3869_v26  ;;  %v3927_v14 = vld [vmem:[%s4931_s1 + $0x2c0] sm:$0xff]   ;;  %v3931_v18 = vld [vmem:[%s4931_s1 + $0x2c8] sm:$0xff]   ;;  %v3939_v24 = vld [vmem:[%s4931_s1 + $0x210] sm:$0xff]  }
  0x22   : > { %3465 = vmatpush3.bf16.msra.mxu1 %v3870_v27  ;;  %3438 = vmatprep.subr.bf16.mxu0 %v3871_v28  ;;  %v3928_v15 = vld [vmem:[%s4931_s1 + $0x280] sm:$0xff]   ;;  %v3932_v19 = vld [vmem:[%s4300_s6 + $0xec] ss:$108 sps:$4 sm:$0xff]   ;;  %v3935_v21 = vld [vmem:[%s4300_s6 + $0xe8] ss:$108 sps:$4 sm:$0xff]  }
  0x23   : > { %3466 = vmatprep.subr.bf16.mxu1 %v3872_v29  ;;  %v3934_v20 = vld [vmem:[%s4931_s1 + $0x288] sm:$0xff]   ;;  %v3937_v23 = vld [vmem:[%s4300_s6 + $0xf4] ss:$108 sps:$4 sm:$0xff]   ;;  %v3940_v25 = vld [vmem:[%s4300_s6 + $0xf0] ss:$108 sps:$4 sm:$0xff]  }
  0x24   : > { %v3941_v26 = vld [vmem:[%s4931_s1 + $0x2d0] sm:$0xff]   ;;  %v3943_v28 = vld [vmem:[%s4931_s1 + $0x258] sm:$0xff]   ;;  %v3948_v33 = vld [vmem:[%s4931_s1 + $0x220] sm:$0xff]  }
  0x25   : > { %3439 = vmatpush3.bf16.msra.mxu0 %v3873_v30  ;;  %v3942_v27 = vld [vmem:[%s4931_s1 + $0x290] sm:$0xff]   ;;  %v3944_v29 = vld [vmem:[%s4931_s1 + $0x218] sm:$0xff]   ;;  %v3950_v35 = vld [vmem:[%s4931_s1 + $0x2a0] sm:$0xff]  }
  0x26   : > { %3467 = vmatpush3.bf16.msra.mxu1 %v3874_v31  ;;  %3480 = vmatprep.subr.bf16.mxu0 %v3881_v36  ;;  %v3945_v30 = vld [vmem:[%s4931_s1 + $0x2d8] sm:$0xff]   ;;  %v3951_v36 = vld [vmem:[%s4931_s1 + $0x268] sm:$0xff]  }
  0x27   : > { %3508 = vmatprep.subr.bf16.mxu1 %v3883_v38  ;;  %v3946_v31 = vld [vmem:[%s4931_s1 + $0x298] sm:$0xff]   ;;  %v3953_v38 = vld [vmem:[%s4931_s1 + $0x2e8] sm:$0xff]  }
  0x28   : > { %2329 = vmatmul.mubr.bf16.vlgmr.msra.gmra.mrb[0].mxu0 %v3875_v32  ;;  %v3947_v32 = vld [vmem:[%s4931_s1 + $0x260] sm:$0xff]  }
  0x29   : > { %2378 = vmatmul.mubr.bf16.vlgmr.msra.gmra.mrb[0].mxu1 %v3878_v34  ;;  %3481 = vmatpush3.bf16.msra.mxu0 %v3882_v37  ;;  %v3949_v34 = vld [vmem:[%s4931_s1 + $0x2e0] sm:$0xff]   ;;  %v3952_v37 = vld [vmem:[%s4931_s1 + $0x228] sm:$0xff]  }
  0x2a   : > { %3509 = vmatpush3.bf16.msra.mxu1 %v3884_v39  ;;  %3482 = vmatprep.subr.bf16.mxu0 %v3885_v40  ;;  %v3954_v39 = vld [vmem:[%s4931_s1 + $0x2a8] sm:$0xff]   ;;  %v3955_v40 = vld [vmem:[%s4931_s1 + $0x270] sm:$0xff]  }
  0x2b   : > { %3510 = vmatprep.subr.bf16.mxu1 %v3887_v42  ;;  %2336 = vmatprep.mubr.bf16.mxu0 %v3902_v57  ;;  %v3957_v42 = vld [vmem:[%s4931_s1 + $0x2f0] sm:$0xff]   ;;  %v3974_v57 = vld [vmem:[%s4931_s1 + $0x308] sm:$0xff]  }
  0x2c   : > { %2385 = vmatprep.mubr.bf16.mxu1 %v3904_v58  ;;  %v3975_v58 = vld [vmem:[%s4931_s1 + $0x3c8] sm:$0xff]  }
  0x2d   : > { %3483 = vmatpush3.bf16.msra.mxu0 %v3886_v41  ;;  %v3956_v41 = vld [vmem:[%s4931_s1 + $0x230] sm:$0xff]  }
  0x2e   : > { %3511 = vmatpush3.bf16.msra.mxu1 %v3888_v43  ;;  %3484 = vmatprep.subr.bf16.mxu0 %v3889_v44  ;;  %v3958_v43 = vld [vmem:[%s4931_s1 + $0x2b0] sm:$0xff]   ;;  %v3959_v44 = vld [vmem:[%s4931_s1 + $0x278] sm:$0xff]  }
  0x2f   : > { %3512 = vmatprep.subr.bf16.mxu1 %v3891_v46  ;;  %v3961_v46 = vld [vmem:[%s4931_s1 + $0x2f8] sm:$0xff]  }
  0x30   : > { %2337 = vmatmul.mubr.bf16.gmra.mrb[4].mxu0 %v3907_v60  ;;  %v3978_v60 = vld [vmem:[%s4931_s1 + $0x388] sm:$0xff]  }
  0x31   : > { %3485 = vmatpush3.bf16.msra.mxu0 %v3890_v45  ;;  %2386 = vmatmul.mubr.bf16.gmra.mrb[4].mxu1 %v3908_v61  ;;  %v3960_v45 = vld [vmem:[%s4931_s1 + $0x238] sm:$0xff]  }
  0x32   : > { %3513 = vmatpush3.bf16.msra.mxu1 %v3892_v47  ;;  %3486 = vmatprep.subr.bf16.mxu0 %v3893_v48  ;;  %v3962_v47 = vld [vmem:[%s4300_s6 + $0x20] ss:$108 sps:$4 sm:$0xff]   ;;  %v3964_v48 = vld [vmem:[%s4300_s6 + $0x24] ss:$108 sps:$4 sm:$0xff]  }
  0x33   : > { %3514 = vmatprep.subr.bf16.mxu1 %v3895_v50  ;;  %2426 = vmatprep.mubr.bf16.mxu0 %v3920_v8  ;;  %v3966_v50 = vld [vmem:[%s4931_s1 + $0x340] sm:$0xff]  }
  0x34   : > { %2475 = vmatprep.mubr.bf16.mxu1 %v3925_v12  ;;  %v3979_v61 = vld [vmem:[%s4300_s6 + $0xf8] ss:$108 sps:$4 sm:$0xff]   ;;  %v3995_v12 = vld [vmem:[%s4931_s1 + $0x368] sm:$0xff]  }
  0x35   : > { %3487 = vmatpush3.bf16.msra.mxu0 %v3894_v49  ;;  %v3965_v49 = vld [vmem:[%s4931_s1 + $0x2b8] sm:$0xff]   ;;  %v3991_v8 = vld [vmem:[%s4931_s1 + $0x360] sm:$0xff]  }
  0x36   : > { %3515 = vmatpush3.bf16.msra.mxu1 %v3896_v51  ;;  %3488 = vmatprep.subr.bf16.mxu0 %v3897_v52  ;;  %v3967_v51 = vld [vmem:[%s4300_s6 + $0x28] ss:$108 sps:$4 sm:$0xff]   ;;  %v3969_v52 = vld [vmem:[%s4300_s6 + $0x2c] ss:$108 sps:$4 sm:$0xff]  }
  0x37   : > { %3516 = vmatprep.subr.bf16.mxu1 %v3899_v54  ;;  %v3971_v54 = vld [vmem:[%s4931_s1 + $0x3c0] sm:$0xff]  }
  0x39   : > { %3489 = vmatpush3.bf16.msra.mxu0 %v3898_v53  ;;  %v3970_v53 = vld [vmem:[%s4931_s1 + $0x300] sm:$0xff]  }
  0x3a   : > { %3517 = vmatpush3.bf16.msra.mxu1 %v3900_v55  ;;  %3490 = vmatprep.subr.bf16.mxu0 %v3901_v56  ;;  %v3972_v55 = vld [vmem:[%s4931_s1 + $0x380] sm:$0xff]   ;;  %v3973_v56 = vld [vmem:[%s4931_s1 + $0x348] sm:$0xff]  }
  0x3b   : > { %3518 = vmatprep.subr.bf16.mxu1 %v3909_v62  ;;  %v3980_v62 = vld [vmem:[%s4931_s1 + $0x350] sm:$0xff]  }
  0x3d   : > { %3491 = vmatpush3.bf16.msra.mxu0 %v3906_v59  ;;  %v3976_v59 = vld [vmem:[%s4300_s6 + $0xfc] ss:$108 sps:$4 sm:$0xff]  }
  0x3e   : > { %3519 = vmatpush3.bf16.msra.mxu1 %v3910_v63  ;;  %3492 = vmatprep.subr.bf16.mxu0 %v3911_v0  ;;  %v3981_v63 = vld [vmem:[%s4300_s6 + $0x104] ss:$108 sps:$4 sm:$0xff]  }
  0x3f   : > { %3520 = vmatprep.subr.bf16.mxu1 %v3913_v2  ;;  %v3983_v0 = vld [vmem:[%s4931_s1 + $0x310] sm:$0xff]  }
  0x40   : > { %v3985_v2 = vld [vmem:[%s4931_s1 + $0x3d0] sm:$0xff]  }
  0x41   : > { %3493 = vmatpush3.bf16.msra.mxu0 %v3912_v1  ;;  %v3984_v1 = vld [vmem:[%s4300_s6 + $0x100] ss:$108 sps:$4 sm:$0xff]  }
  0x42   : > { %3521 = vmatpush3.bf16.msra.mxu1 %v3914_v3  ;;  %3494 = vmatprep.subr.bf16.mxu0 %v3915_v4  ;;  %v3986_v3 = vld [vmem:[%s4931_s1 + $0x390] sm:$0xff]   ;;  %v3987_v4 = vld [vmem:[%s4931_s1 + $0x358] sm:$0xff]  }
  0x43   : > { %3522 = vmatprep.subr.bf16.mxu1 %v3917_v6  ;;  %v3989_v6 = vld [vmem:[%s4931_s1 + $0x3d8] sm:$0xff]  }
  0x45   : > { %3495 = vmatpush3.bf16.msra.mxu0 %v3916_v5  ;;  %v3988_v5 = vld [vmem:[%s4931_s1 + $0x318] sm:$0xff]  }
  0x46   : > { %3523 = vmatpush3.bf16.msra.mxu1 %v3921_v9  ;;  %3536 = vmatprep.subr.bf16.mxu0 %v3922_v10  ;;  %v3992_v9 = vld [vmem:[%s4931_s1 + $0x320] sm:$0xff]  }
  0x47   : > { %3564 = vmatprep.subr.bf16.mxu1 %v3927_v14  ;;  %v3993_v10 = vld [vmem:[%s4931_s1 + $0x3e0] sm:$0xff]   ;;  %v3997_v14 = vld [vmem:[%s4931_s1 + $0x3e8] sm:$0xff]  }
  0x48   : > { %2427 = vmatmul.mubr.bf16.vlgmr.msra.gmra.mrb[8].mxu0 %v3918_v7  ;;  %v3990_v7 = vld [vmem:[%s4931_s1 + $0x398] sm:$0xff]  }
  0x49   : > { %3537 = vmatpush3.bf16.msra.mxu0 %v3926_v13  ;;  %2476 = vmatmul.mubr.bf16.vlgmr.msra.gmra.mrb[8].mxu1 %v3923_v11  ;;  %v3994_v11 = vld [vmem:[%s4931_s1 + $0x3a0] sm:$0xff]   ;;  %v3996_v13 = vld [vmem:[%s4931_s1 + $0x328] sm:$0xff]  }
  0x4a   : > { %3565 = vmatpush3.bf16.msra.mxu1 %v3928_v15  ;;  %3538 = vmatprep.subr.bf16.mxu0 %v3929_v16  ;;  %v3998_v15 = vld [vmem:[%s4931_s1 + $0x3a8] sm:$0xff]   ;;  %v3999_v16 = vld [vmem:[%s4931_s1 + $0x370] sm:$0xff]  }
  0x4b   : > { %3566 = vmatprep.subr.bf16.mxu1 %v3931_v18  ;;  %2434 = vmatprep.mubr.bf16.mxu0 %v3932_v19  ;;  %v4001_v18 = vld [vmem:[%s4931_s1 + $0x3f0] sm:$0xff]  }
  0x4c   : > { %2483 = vmatprep.mubr.bf16.mxu1 %v3937_v23  ;;  %v4002_v19 = vld [vmem:[%s4931_s1 + $0x3b0] sm:$0xff]  }
  0x4d   : > { %3539 = vmatpush3.bf16.msra.mxu0 %v3930_v17  ;;  %v4000_v17 = vld [vmem:[%s4931_s1 + $0x330] sm:$0xff]  }
  0x4e   : > { %3567 = vmatpush3.bf16.msra.mxu1 %v3934_v20  ;;  %3540 = vmatprep.subr.bf16.mxu0 %v3936_v22  ;;  %v4003_v20 = vld [vmem:[%s4931_s1 + $0x378] sm:$0xff]  }
  0x4f   : > { %3568 = vmatprep.subr.bf16.mxu1 %v3941_v26  ;;  %v4005_v22 = vld [vmem:[%s4931_s1 + $0x3f8] sm:$0xff]   ;;  %v4010_v26 = vld [vmem:[%s4931_s1 + $0x440] sm:$0xff]  }
  0x50   : > { %2435 = vmatmul.mubr.bf16.gmra.mrb[12].mxu0 %v3935_v21  ;;  %v4004_v21 = vld [vmem:[%s4931_s1 + $0x338] sm:$0xff]  }
  0x51   : > { %3541 = vmatpush3.bf16.msra.mxu0 %v3939_v24  ;;  %2484 = vmatmul.mubr.bf16.gmra.mrb[12].mxu1 %v3940_v25  ;;  %v4006_v23 = vld [vmem:[%s4300_s6 + $0x30] ss:$108 sps:$4 sm:$0xff]   ;;  %v4008_v24 = vld [vmem:[%s4300_s6 + $0x34] ss:$108 sps:$4 sm:$0xff]  }
  0x52   : > { %3569 = vmatpush3.bf16.msra.mxu1 %v3942_v27  ;;  %3542 = vmatprep.subr.bf16.mxu0 %v3943_v28  ;;  %v4009_v25 = vld [vmem:[%s4931_s1 + $0x3b8] sm:$0xff]  }
  0x53   : > { %3570 = vmatprep.subr.bf16.mxu1 %v3945_v30  ;;  %2524 = vmatprep.mubr.bf16.mxu0 %v3964_v48  ;;  %v4011_v27 = vld [vmem:[%s4300_s6 + $0x38] ss:$108 sps:$4 sm:$0xff]   ;;  %v4013_v28 = vld [vmem:[%s4300_s6 + $0x3c] ss:$108 sps:$4 sm:$0xff]  }
  0x54   : > { %2573 = vmatprep.mubr.bf16.mxu1 %v3969_v52  ;;  %v4015_v30 = vld [vmem:[%s4931_s1 + $0x4c0] sm:$0xff]   ;;  %v4039_v52 = vld [vmem:[%s4931_s1 + $0x468] sm:$0xff]  }
  0x55   : > { %3543 = vmatpush3.bf16.msra.mxu0 %v3944_v29  ;;  %v4014_v29 = vld [vmem:[%s4931_s1 + $0x400] sm:$0xff]  }
  0x56   : > { %3571 = vmatpush3.bf16.msra.mxu1 %v3946_v31  ;;  %3544 = vmatprep.subr.bf16.mxu0 %v3947_v32  ;;  %v4016_v31 = vld [vmem:[%s4931_s1 + $0x480] sm:$0xff]   ;;  %v4017_v32 = vld [vmem:[%s4931_s1 + $0x448] sm:$0xff]  }
  0x57   : > { %3572 = vmatprep.subr.bf16.mxu1 %v3949_v34  ;;  %v4019_v34 = vld [vmem:[%s4931_s1 + $0x4c8] sm:$0xff]   ;;  %v4035_v48 = vld [vmem:[%s4931_s1 + $0x460] sm:$0xff]  }
  0x59   : > { %3545 = vmatpush3.bf16.msra.mxu0 %v3948_v33  ;;  %v4018_v33 = vld [vmem:[%s4931_s1 + $0x408] sm:$0xff]  }
  0x5a   : > { %3573 = vmatpush3.bf16.msra.mxu1 %v3950_v35  ;;  %3546 = vmatprep.subr.bf16.mxu0 %v3951_v36  ;;  %v4020_v35 = vld [vmem:[%s4300_s6 + $0x10c] ss:$108 sps:$4 sm:$0xff]  }
  0x5b   : > { %3574 = vmatprep.subr.bf16.mxu1 %v3953_v38  ;;  %v4022_v36 = vld [vmem:[%s4931_s1 + $0x488] sm:$0xff]   ;;  %v4024_v38 = vld [vmem:[%s4931_s1 + $0x450] sm:$0xff]  }
  0x5d   : > { %3547 = vmatpush3.bf16.msra.mxu0 %v3952_v37  ;;  %v4023_v37 = vld [vmem:[%s4300_s6 + $0x108] ss:$108 sps:$4 sm:$0xff]  }
  0x5e   : > { %3575 = vmatpush3.bf16.msra.mxu1 %v3954_v39  ;;  %3548 = vmatprep.subr.bf16.mxu0 %v3955_v40  ;;  %v4025_v39 = vld [vmem:[%s4300_s6 + $0x114] ss:$108 sps:$4 sm:$0xff]  }
  0x5f   : > { %3576 = vmatprep.subr.bf16.mxu1 %v3957_v42  ;;  %v4027_v40 = vld [vmem:[%s4931_s1 + $0x410] sm:$0xff]  }
  0x60   : > { %v4029_v42 = vld [vmem:[%s4931_s1 + $0x4d0] sm:$0xff]  }
  0x61   : > { %3549 = vmatpush3.bf16.msra.mxu0 %v3956_v41  ;;  %v4028_v41 = vld [vmem:[%s4300_s6 + $0x110] ss:$108 sps:$4 sm:$0xff]  }
  0x62   : > { %3577 = vmatpush3.bf16.msra.mxu1 %v3958_v43  ;;  %3550 = vmatprep.subr.bf16.mxu0 %v3959_v44  ;;  %v4030_v43 = vld [vmem:[%s4931_s1 + $0x490] sm:$0xff]   ;;  %v4031_v44 = vld [vmem:[%s4931_s1 + $0x458] sm:$0xff]  }
  0x63   : > { %3578 = vmatprep.subr.bf16.mxu1 %v3961_v46  ;;  %v4033_v46 = vld [vmem:[%s4931_s1 + $0x4d8] sm:$0xff]  }
  0x65   : > { %3551 = vmatpush3.bf16.msra.mxu0 %v3960_v45  ;;  %v4032_v45 = vld [vmem:[%s4931_s1 + $0x418] sm:$0xff]  }
  0x66   : > { %3579 = vmatpush3.bf16.msra.mxu1 %v3965_v49  ;;  %3592 = vmatprep.subr.bf16.mxu0 %v3966_v50  ;;  %v4036_v49 = vld [vmem:[%s4931_s1 + $0x420] sm:$0xff]  }
  0x67   : > { %3620 = vmatprep.subr.bf16.mxu1 %v3971_v54  ;;  %v4037_v50 = vld [vmem:[%s4931_s1 + $0x4e0] sm:$0xff]   ;;  %v4041_v54 = vld [vmem:[%s4931_s1 + $0x4e8] sm:$0xff]  }
  0x68   : > { %2525 = vmatmul.mubr.bf16.vlgmr.msra.gmra.mrb[16].mxu0 %v3962_v47  ;;  %v4034_v47 = vld [vmem:[%s4931_s1 + $0x498] sm:$0xff]  }
  0x69   : > { %3593 = vmatpush3.bf16.msra.mxu0 %v3970_v53  ;;  %2574 = vmatmul.mubr.bf16.vlgmr.msra.gmra.mrb[16].mxu1 %v3967_v51  ;;  %v4038_v51 = vld [vmem:[%s4931_s1 + $0x4a0] sm:$0xff]   ;;  %v4040_v53 = vld [vmem:[%s4931_s1 + $0x428] sm:$0xff]  }
  0x6a   : > { %3621 = vmatpush3.bf16.msra.mxu1 %v3972_v55  ;;  %3594 = vmatprep.subr.bf16.mxu0 %v3973_v56  ;;  %v4042_v55 = vld [vmem:[%s4931_s1 + $0x4a8] sm:$0xff]   ;;  %v4043_v56 = vld [vmem:[%s4931_s1 + $0x470] sm:$0xff]  }
  0x6b   : > { %3622 = vmatprep.subr.bf16.mxu1 %v3975_v58  ;;  %2532 = vmatprep.mubr.bf16.mxu0 %v3976_v59  ;;  %v4045_v58 = vld [vmem:[%s4931_s1 + $0x4f0] sm:$0xff]  }
  0x6c   : > { %2581 = vmatprep.mubr.bf16.mxu1 %v3981_v63  ;;  %v4046_v59 = vld [vmem:[%s4931_s1 + $0x4b0] sm:$0xff]   ;;  %v4050_v63 = vld [vmem:[%s4300_s6 + $0x40] ss:$108 sps:$4 sm:$0xff]  }
  0x6d   : > { %3595 = vmatpush3.bf16.msra.mxu0 %v3974_v57  ;;  %v4044_v57 = vld [vmem:[%s4931_s1 + $0x430] sm:$0xff]  }
  0x6e   : > { %3623 = vmatpush3.bf16.msra.mxu1 %v3978_v60  ;;  %3596 = vmatprep.subr.bf16.mxu0 %v3980_v62  ;;  %v4047_v60 = vld [vmem:[%s4931_s1 + $0x478] sm:$0xff]  }
  0x6f   : > { %3624 = vmatprep.subr.bf16.mxu1 %v3985_v2  ;;  %v4049_v62 = vld [vmem:[%s4931_s1 + $0x4f8] sm:$0xff]   ;;  %v4054_v2 = vld [vmem:[%s4931_s1 + $0x540] sm:$0xff]  }
  0x70   : > { %2533 = vmatmul.mubr.bf16.gmra.mrb[20].mxu0 %v3979_v61  ;;  %v4048_v61 = vld [vmem:[%s4931_s1 + $0x438] sm:$0xff]  }
  0x71   : > { %3597 = vmatpush3.bf16.msra.mxu0 %v3983_v0  ;;  %2582 = vmatmul.mubr.bf16.gmra.mrb[20].mxu1 %v3984_v1  ;;  %v4052_v0 = vld [vmem:[%s4300_s6 + $0x44] ss:$108 sps:$4 sm:$0xff]   ;;  %v4053_v1 = vld [vmem:[%s4931_s1 + $0x4b8] sm:$0xff]  }
  0x72   : > { %3625 = vmatpush3.bf16.msra.mxu1 %v3986_v3  ;;  %3598 = vmatprep.subr.bf16.mxu0 %v3987_v4  ;;  %v4055_v3 = vld [vmem:[%s4300_s6 + $0x48] ss:$108 sps:$4 sm:$0xff]   ;;  %v4057_v4 = vld [vmem:[%s4300_s6 + $0x4c] ss:$108 sps:$4 sm:$0xff]  }
  0x73   : > { %3626 = vmatprep.subr.bf16.mxu1 %v3989_v6  ;;  %2622 = vmatprep.mubr.bf16.mxu0 %v4008_v24  ;;  %v4059_v6 = vld [vmem:[%s4931_s1 + $0x5c0] sm:$0xff]  }
  0x74   : > { %2671 = vmatprep.mubr.bf16.mxu1 %v4013_v28  ;;  %v4079_v24 = vld [vmem:[%s4931_s1 + $0x560] sm:$0xff]   ;;  %v4083_v28 = vld [vmem:[%s4931_s1 + $0x568] sm:$0xff]  }
  0x75   : > { %3599 = vmatpush3.bf16.msra.mxu0 %v3988_v5  ;;  %v4058_v5 = vld [vmem:[%s4931_s1 + $0x500] sm:$0xff]  }
  0x76   : > { %3627 = vmatpush3.bf16.msra.mxu1 %v3990_v7  ;;  %3600 = vmatprep.subr.bf16.mxu0 %v3991_v8  ;;  %v4060_v7 = vld [vmem:[%s4931_s1 + $0x580] sm:$0xff]   ;;  %v4061_v8 = vld [vmem:[%s4931_s1 + $0x548] sm:$0xff]  }
  0x77   : > { %3628 = vmatprep.subr.bf16.mxu1 %v3993_v10  ;;  %v4063_v10 = vld [vmem:[%s4931_s1 + $0x5c8] sm:$0xff]  }
  0x79   : > { %3601 = vmatpush3.bf16.msra.mxu0 %v3992_v9  ;;  %v4062_v9 = vld [vmem:[%s4931_s1 + $0x508] sm:$0xff]  }
  0x7a   : > { %3629 = vmatpush3.bf16.msra.mxu1 %v3994_v11  ;;  %3602 = vmatprep.subr.bf16.mxu0 %v3995_v12  ;;  %v4064_v11 = vld [vmem:[%s4300_s6 + $0x11c] ss:$108 sps:$4 sm:$0xff]  }
  0x7b   : > { %3630 = vmatprep.subr.bf16.mxu1 %v3997_v14  ;;  %v4066_v12 = vld [vmem:[%s4931_s1 + $0x588] sm:$0xff]   ;;  %v4068_v14 = vld [vmem:[%s4931_s1 + $0x550] sm:$0xff]  }
  0x7d   : > { %3603 = vmatpush3.bf16.msra.mxu0 %v3996_v13  ;;  %v4067_v13 = vld [vmem:[%s4300_s6 + $0x118] ss:$108 sps:$4 sm:$0xff]  }
  0x7e   : > { %3631 = vmatpush3.bf16.msra.mxu1 %v3998_v15  ;;  %3604 = vmatprep.subr.bf16.mxu0 %v3999_v16  ;;  %v4069_v15 = vld [vmem:[%s4300_s6 + $0x124] ss:$108 sps:$4 sm:$0xff]  }
  0x7f   : > { %3632 = vmatprep.subr.bf16.mxu1 %v4001_v18  ;;  %v4071_v16 = vld [vmem:[%s4931_s1 + $0x510] sm:$0xff]  }
  0x80   : > { %v4073_v18 = vld [vmem:[%s4931_s1 + $0x5d0] sm:$0xff]  }
  0x81   : > { %3605 = vmatpush3.bf16.msra.mxu0 %v4000_v17  ;;  %v4072_v17 = vld [vmem:[%s4300_s6 + $0x120] ss:$108 sps:$4 sm:$0xff]  }
  0x82   : > { %3633 = vmatpush3.bf16.msra.mxu1 %v4002_v19  ;;  %3606 = vmatprep.subr.bf16.mxu0 %v4003_v20  ;;  %v4074_v19 = vld [vmem:[%s4931_s1 + $0x590] sm:$0xff]   ;;  %v4075_v20 = vld [vmem:[%s4931_s1 + $0x558] sm:$0xff]  }
  0x83   : > { %3634 = vmatprep.subr.bf16.mxu1 %v4005_v22  ;;  %v4077_v22 = vld [vmem:[%s4931_s1 + $0x5d8] sm:$0xff]  }
  0x85   : > { %3607 = vmatpush3.bf16.msra.mxu0 %v4004_v21  ;;  %v4076_v21 = vld [vmem:[%s4931_s1 + $0x518] sm:$0xff]  }
  0x86   : > { %3635 = vmatpush3.bf16.msra.mxu1 %v4009_v25  ;;  %3648 = vmatprep.subr.bf16.mxu0 %v4010_v26  ;;  %v4080_v25 = vld [vmem:[%s4931_s1 + $0x520] sm:$0xff]  }
  0x87   : > { %3676 = vmatprep.subr.bf16.mxu1 %v4015_v30  ;;  %v4081_v26 = vld [vmem:[%s4931_s1 + $0x5e0] sm:$0xff]   ;;  %v4085_v30 = vld [vmem:[%s4931_s1 + $0x5e8] sm:$0xff]  }
  0x88   : > { %2623 = vmatmul.mubr.bf16.vlgmr.msra.gmra.mrb[24].mxu0 %v4006_v23  ;;  %v4078_v23 = vld [vmem:[%s4931_s1 + $0x598] sm:$0xff]  }
  0x89   : > { %3649 = vmatpush3.bf16.msra.mxu0 %v4014_v29  ;;  %2672 = vmatmul.mubr.bf16.vlgmr.msra.gmra.mrb[24].mxu1 %v4011_v27  ;;  %v4082_v27 = vld [vmem:[%s4931_s1 + $0x5a0] sm:$0xff]   ;;  %v4084_v29 = vld [vmem:[%s4931_s1 + $0x528] sm:$0xff]  }
  0x8a   : > { %3677 = vmatpush3.bf16.msra.mxu1 %v4016_v31  ;;  %3650 = vmatprep.subr.bf16.mxu0 %v4017_v32  ;;  %v4086_v31 = vld [vmem:[%s4931_s1 + $0x5a8] sm:$0xff]   ;;  %v4087_v32 = vld [vmem:[%s4931_s1 + $0x570] sm:$0xff]  }
  0x8b   : > { %3678 = vmatprep.subr.bf16.mxu1 %v4019_v34  ;;  %2630 = vmatprep.mubr.bf16.mxu0 %v4020_v35  ;;  %v4089_v34 = vld [vmem:[%s4931_s1 + $0x5f0] sm:$0xff]  }
  0x8c   : > { %2679 = vmatprep.mubr.bf16.mxu1 %v4025_v39  ;;  %v4090_v35 = vld [vmem:[%s4931_s1 + $0x5b0] sm:$0xff]  }
  0x8d   : > { %3651 = vmatpush3.bf16.msra.mxu0 %v4018_v33  ;;  %v4088_v33 = vld [vmem:[%s4931_s1 + $0x530] sm:$0xff]  }
  0x8e   : > { %3679 = vmatpush3.bf16.msra.mxu1 %v4022_v36  ;;  %3652 = vmatprep.subr.bf16.mxu0 %v4024_v38  ;;  %v4091_v36 = vld [vmem:[%s4931_s1 + $0x578] sm:$0xff]  }
  0x8f   : > { %3680 = vmatprep.subr.bf16.mxu1 %v4029_v42  ;;  %v4093_v38 = vld [vmem:[%s4931_s1 + $0x5f8] sm:$0xff]   ;;  %v4098_v42 = vld [vmem:[%s4931_s1 + $0x640] sm:$0xff]  }
  0x90   : > { %2631 = vmatmul.mubr.bf16.gmra.mrb[28].mxu0 %v4023_v37  ;;  %v4092_v37 = vld [vmem:[%s4931_s1 + $0x538] sm:$0xff]  }
  0x91   : > { %3653 = vmatpush3.bf16.msra.mxu0 %v4027_v40  ;;  %2680 = vmatmul.mubr.bf16.gmra.mrb[28].mxu1 %v4028_v41  ;;  %v4094_v39 = vld [vmem:[%s4300_s6 + $0x50] ss:$108 sps:$4 sm:$0xff]   ;;  %v4096_v40 = vld [vmem:[%s4300_s6 + $0x54] ss:$108 sps:$4 sm:$0xff]  }
  0x92   : > { %3681 = vmatpush3.bf16.msra.mxu1 %v4030_v43  ;;  %3654 = vmatprep.subr.bf16.mxu0 %v4031_v44  ;;  %v4097_v41 = vld [vmem:[%s4931_s1 + $0x5b8] sm:$0xff]  }
  0x93   : > { %3682 = vmatprep.subr.bf16.mxu1 %v4033_v46  ;;  %2720 = vmatprep.mubr.bf16.mxu0 %v4052_v0  ;;  %v4099_v43 = vld [vmem:[%s4300_s6 + $0x58] ss:$108 sps:$4 sm:$0xff]   ;;  %v4101_v44 = vld [vmem:[%s4300_s6 + $0x5c] ss:$108 sps:$4 sm:$0xff]  }
  0x94   : > { %2769 = vmatprep.mubr.bf16.mxu1 %v4057_v4  ;;  %v4103_v46 = vld [vmem:[%s4931_s1 + $0x648] sm:$0xff]   ;;  %v4128_v4 = vld [vmem:[%s4931_s1 + $0x6b0] sm:$0xff]  }
  0x95   : > { %3655 = vmatpush3.bf16.msra.mxu0 %v4032_v45  ;;  %v4102_v45 = vld [vmem:[%s4931_s1 + $0x600] sm:$0xff]   ;;  %v4123_v0 = vld [vmem:[%s4931_s1 + $0x628] sm:$0xff]  }
  0x96   : > { %3683 = vmatpush3.bf16.msra.mxu1 %v4034_v47  ;;  %3656 = vmatprep.subr.bf16.mxu0 %v4035_v48  ;;  %v4104_v47 = vld [vmem:[%s4931_s1 + $0x680] sm:$0xff]   ;;  %v4105_v48 = vld [vmem:[%s4931_s1 + $0x608] sm:$0xff]  }
  0x97   : > { %3684 = vmatprep.subr.bf16.mxu1 %v4037_v50  ;;  %v4108_v50 = vld [vmem:[%s4300_s6 + $0x128] ss:$108 sps:$4 sm:$0xff]  }
  0x99   : > { %3657 = vmatpush3.bf16.msra.mxu0 %v4036_v49  ;;  %v4106_v49 = vld [vmem:[%s4300_s6 + $0x12c] ss:$108 sps:$4 sm:$0xff]  }
  0x9a   : > { %3685 = vmatpush3.bf16.msra.mxu1 %v4038_v51  ;;  %3658 = vmatprep.subr.bf16.mxu0 %v4039_v52  ;;  %v4109_v51 = vld [vmem:[%s4931_s1 + $0x650] sm:$0xff]   ;;  %v4110_v52 = vld [vmem:[%s4931_s1 + $0x688] sm:$0xff]  }
  0x9b   : > { %3686 = vmatprep.subr.bf16.mxu1 %v4041_v54  ;;  %v4113_v54 = vld [vmem:[%s4931_s1 + $0x610] sm:$0xff]  }
  0x9d   : > { %3659 = vmatpush3.bf16.msra.mxu0 %v4040_v53  ;;  %v4111_v53 = vld [vmem:[%s4300_s6 + $0x134] ss:$108 sps:$4 sm:$0xff]  }
  0x9e   : > { %3687 = vmatpush3.bf16.msra.mxu1 %v4042_v55  ;;  %3660 = vmatprep.subr.bf16.mxu0 %v4043_v56  ;;  %v4114_v55 = vld [vmem:[%s4300_s6 + $0x130] ss:$108 sps:$4 sm:$0xff]  }
  0x9f   : > { %3688 = vmatprep.subr.bf16.mxu1 %v4045_v58  ;;  %v4115_v56 = vld [vmem:[%s4931_s1 + $0x658] sm:$0xff]  }
  0xa0   : > { %v4117_v58 = vld [vmem:[%s4931_s1 + $0x618] sm:$0xff]  }
  0xa1   : > { %3661 = vmatpush3.bf16.msra.mxu0 %v4044_v57  ;;  %v4116_v57 = vld [vmem:[%s4931_s1 + $0x690] sm:$0xff]  }
  0xa2   : > { %3689 = vmatpush3.bf16.msra.mxu1 %v4046_v59  ;;  %3662 = vmatprep.subr.bf16.mxu0 %v4047_v60  ;;  %v4118_v59 = vld [vmem:[%s4931_s1 + $0x660] sm:$0xff]   ;;  %v4119_v60 = vld [vmem:[%s4931_s1 + $0x698] sm:$0xff]  }
  0xa3   : > { %3690 = vmatprep.subr.bf16.mxu1 %v4049_v62  ;;  %v4121_v62 = vld [vmem:[%s4931_s1 + $0x668] sm:$0xff]  }
  0xa5   : > { %3663 = vmatpush3.bf16.msra.mxu0 %v4048_v61  ;;  %v4120_v61 = vld [vmem:[%s4931_s1 + $0x620] sm:$0xff]  }
  0xa6   : > { %3691 = vmatpush3.bf16.msra.mxu1 %v4053_v1  ;;  %3704 = vmatprep.subr.bf16.mxu0 %v4054_v2  ;;  %v4124_v1 = vld [vmem:[%s4931_s1 + $0x670] sm:$0xff]   ;;  %v4125_v2 = vld [vmem:[%s4931_s1 + $0x6a8] sm:$0xff]  }
  0xa7   : > { %3732 = vmatprep.subr.bf16.mxu1 %v4059_v6  ;;  %v4129_v6 = vld [vmem:[%s4931_s1 + $0x638] sm:$0xff]  }
  0xa8   : > { %2721 = vmatmul.mubr.bf16.vlgmr.msra.gmra.mrb[32].mxu0 %v4050_v63  ;;  %v4122_v63 = vld [vmem:[%s4931_s1 + $0x6a0] sm:$0xff]  }
  0xa9   : > { %3705 = vmatpush3.bf16.msra.mxu0 %v4058_v5  ;;  %2770 = vmatmul.mubr.bf16.vlgmr.msra.gmra.mrb[32].mxu1 %v4055_v3  ;;  %v4126_v3 = vld [vmem:[%s4931_s1 + $0x630] sm:$0xff]   ;;  %v4127_v5 = vld [vmem:[%s4931_s1 + $0x678] sm:$0xff]  }
  0xaa   : > { %3733 = vmatpush3.bf16.msra.mxu1 %v4060_v7  ;;  %3706 = vmatprep.subr.bf16.mxu0 %v4061_v8  ;;  %v4132_v8 = vld [vmem:[%s4300_s6 + $0x64] ss:$108 sps:$4 sm:$0xff]  }
  0xab   : > { %3734 = vmatprep.subr.bf16.mxu1 %v4063_v10  ;;  %2728 = vmatprep.mubr.bf16.mxu0 %v4064_v11  ;;  %v4134_v11 = vld [vmem:[%s4300_s6 + $0x68] ss:$108 sps:$4 sm:$0xff]  }
  0xac   : > { %2777 = vmatprep.mubr.bf16.mxu1 %v4069_v15 }
  0xad   : > { %3707 = vmatpush3.bf16.msra.mxu0 %v4062_v9  ;;  %v4133_v9 = vld [vmem:[%s4931_s1 + $0x6b8] sm:$0xff]  }
  0xae   : > { %3735 = vmatpush3.bf16.msra.mxu1 %v4066_v12  ;;  %3708 = vmatprep.subr.bf16.mxu0 %v4068_v14  ;;  %v4130_v14 = vld [vmem:[%s4300_s6 + $0x60] ss:$108 sps:$4 sm:$0xff]  }
  0xaf   : > { %3736 = vmatprep.subr.bf16.mxu1 %v4073_v18 }
  0xb0   : > { %2729 = vmatmul.mubr.bf16.gmra.mrb[36].mxu0 %v4067_v13 }
  0xb1   : > { %3709 = vmatpush3.bf16.msra.mxu0 %v4071_v16  ;;  %2778 = vmatmul.mubr.bf16.gmra.mrb[36].mxu1 %v4072_v17 }
  0xb2   : > { %3737 = vmatpush3.bf16.msra.mxu1 %v4074_v19  ;;  %3710 = vmatprep.subr.bf16.mxu0 %v4075_v20  ;;  %v4136_v19 = vld [vmem:[%s4300_s6 + $0x13c] ss:$108 sps:$4 sm:$0xff]  }
  0xb3   : > { %3738 = vmatprep.subr.bf16.mxu1 %v4077_v22  ;;  %2818 = vmatprep.mubr.bf16.mxu0 %v4096_v40 }
  0xb4   : > { %2867 = vmatprep.mubr.bf16.mxu1 %v4101_v44 }
  0xb5   : > { %3711 = vmatpush3.bf16.msra.mxu0 %v4076_v21 }
  0xb6   : > { %3739 = vmatpush3.bf16.msra.mxu1 %v4078_v23  ;;  %3712 = vmatprep.subr.bf16.mxu0 %v4079_v24 }
  0xb7   : > { %3740 = vmatprep.subr.bf16.mxu1 %v4081_v26 }
  0xb9   : > { %3713 = vmatpush3.bf16.msra.mxu0 %v4080_v25  ;;  %v4135_v25 = vld [vmem:[%s4300_s6 + $0x140] ss:$108 sps:$4 sm:$0xff]  }
  0xba   : > { %3741 = vmatpush3.bf16.msra.mxu1 %v4082_v27  ;;  %3714 = vmatprep.subr.bf16.mxu0 %v4083_v28  ;;  %v4138_v27 = vld [vmem:[%s4300_s6 + $0x138] ss:$108 sps:$4 sm:$0xff]  }
  0xbb   : > { %3742 = vmatprep.subr.bf16.mxu1 %v4085_v30 }
  0xbd   : > { %3715 = vmatpush3.bf16.msra.mxu0 %v4084_v29 }
  0xbe   : > { %3743 = vmatpush3.bf16.msra.mxu1 %v4086_v31  ;;  %3716 = vmatprep.subr.bf16.mxu0 %v4087_v32 }
  0xbf   : > { %3744 = vmatprep.subr.bf16.mxu1 %v4089_v34 }
  0xc1   : > { %3717 = vmatpush3.bf16.msra.mxu0 %v4088_v33 }
  0xc2   : > { %3745 = vmatpush3.bf16.msra.mxu1 %v4090_v35  ;;  %3718 = vmatprep.subr.bf16.mxu0 %v4091_v36 }
  0xc3   : > { %3746 = vmatprep.subr.bf16.mxu1 %v4093_v38 }
  0xc5   : > { %3719 = vmatpush3.bf16.msra.mxu0 %v4092_v37 }
  0xc6   : > { %3747 = vmatpush3.bf16.msra.mxu1 %v4097_v41  ;;  %3760 = vmatprep.subr.bf16.mxu0 %v4098_v42 }
  0xc7   : > { %3798 = vmatprep.subr.bf16.mxu1 %v4104_v47 }
  0xc8   : > { %2819 = vmatmul.mubr.bf16.vlgmr.msra.gmra.mrb[40].mxu0 %v4094_v39 }
  0xc9   : > { %3761 = vmatpush3.bf16.msra.mxu0 %v4102_v45  ;;  %2868 = vmatmul.mubr.bf16.vlgmr.msra.gmra.mrb[40].mxu1 %v4099_v43 }
  0xca   : > { %3762 = vmatprep.subr.bf16.mxu0 %v4103_v46  ;;  %3799 = vmatpush3.bf16.msra.mxu1 %v4104_v47 }
  0xcb   : > { %2826 = vmatprep.mubr.bf16.mxu0 %v4106_v49  ;;  %3800 = vmatprep.subr.bf16.mxu1 %v4110_v52 }
  0xcc   : > { %2875 = vmatprep.mubr.bf16.mxu1 %v4111_v53 }
  0xcd   : > { %3763 = vmatpush3.bf16.msra.mxu0 %v4105_v48 }
  0xce   : > { %3764 = vmatprep.subr.bf16.mxu0 %v4109_v51  ;;  %3801 = vmatpush3.bf16.msra.mxu1 %v4110_v52 }
  0xcf   : > { %3802 = vmatprep.subr.bf16.mxu1 %v4116_v57 }
  0xd0   : > { %2827 = vmatmul.mubr.bf16.gmra.mrb[44].mxu0 %v4108_v50 }
  0xd1   : > { %3765 = vmatpush3.bf16.msra.mxu0 %v4113_v54  ;;  %2876 = vmatmul.mubr.bf16.gmra.mrb[44].mxu1 %v4114_v55 }
  0xd2   : > { %3766 = vmatprep.subr.bf16.mxu0 %v4115_v56  ;;  %3803 = vmatpush3.bf16.msra.mxu1 %v4116_v57 }
  0xd3   : > { %3804 = vmatprep.subr.bf16.mxu1 %v4119_v60  ;;  %2916 = vmatprep.mubr.bf16.mxu0 %v4132_v8 }
  0xd4   : > { %3814 = vmatprep.mubr.bf16.mxu1 %v4134_v11 }
  0xd5   : > { %3767 = vmatpush3.bf16.msra.mxu0 %v4117_v58 }
  0xd6   : > { %3768 = vmatprep.subr.bf16.mxu0 %v4118_v59  ;;  %3805 = vmatpush3.bf16.msra.mxu1 %v4119_v60 }
  0xd7   : > { %3806 = vmatprep.subr.bf16.mxu1 %v4122_v63 }
  0xd9   : > { %3769 = vmatpush3.bf16.msra.mxu0 %v4120_v61 }
  0xda   : > { %3770 = vmatprep.subr.bf16.mxu0 %v4121_v62  ;;  %3807 = vmatpush3.bf16.msra.mxu1 %v4122_v63 }
  0xdb   : > { %3808 = vmatprep.subr.bf16.mxu1 %v4125_v2 }
  0xdd   : > { %3771 = vmatpush3.bf16.msra.mxu0 %v4123_v0 }
  0xde   : > { %3772 = vmatprep.subr.bf16.mxu0 %v4124_v1  ;;  %3809 = vmatpush3.bf16.msra.mxu1 %v4125_v2 }
  0xdf   : > { %3810 = vmatprep.subr.bf16.mxu1 %v4128_v4 }
  0xe1   : > { %3773 = vmatpush3.bf16.msra.mxu0 %v4126_v3 }
  0xe2   : > { %3774 = vmatprep.subr.bf16.mxu0 %v4127_v5  ;;  %3811 = vmatpush3.bf16.msra.mxu1 %v4128_v4 }
  0xe3   : > { %3812 = vmatprep.subr.bf16.mxu1 %v4133_v9 }
  0xe5   : > { %3775 = vmatpush3.bf16.msra.mxu0 %v4129_v6 }
  0xe6   : > { %3813 = vmatpush3.bf16.msra.mxu1 %v4133_v9 }
  0xe8   : > { %2917 = vmatmul.mubr.bf16.vlgmr.msra.gmra.mrb[48].mxu0 %v4130_v14 }
  0xe9   : > { %2924 = vmatprep.mubr.bf16.mxu0 %v4136_v19  ;;  %3815 = vmatmul.mubr.bf16.vlgmr.msra.gmra.mrb[48].mxu1 %v4135_v25 }
  0xf0   : > { %2925 = vmatmul.mubr.bf16.gmra.mrb[52].mxu0 %v4138_v27 }
  0xfb   : > { %v3440_v7 = vpop.f32.mrb[0].mxu0 }
  0xfc   : > { %v3468_v10 = vpop.f32.mrb[0].mxu1  ;;  %v3441_v12 = vpop.f32.mrb[1].mxu0 }
  0xfd   : > { %v3469_v13 = vpop.f32.mrb[1].mxu1  ;;  %v3442_v15 = vadd.f32 %v3441_v12, %v3440_v7  ;;  %v3443_v17 = vpop.f32.mrb[2].mxu0 }
  0xfe   : > { %v3470_v16 = vadd.f32 %v3469_v13, %v3468_v10  ;;  %v3471_v18 = vpop.f32.mrb[2].mxu1  ;;  %v3444_v20 = vpop.f32.mrb[3].mxu0 }
  0xff   : > { %v3472_v21 = vpop.f32.mrb[3].mxu1  ;;  %v3445_v23 = vadd.f32 %v3444_v20, %v3443_v17 }
 0x100   : > { %v2380_v22 = vadd.f32 %v3470_v16, %v3442_v15  ;;  %v3473_v24 = vadd.f32 %v3472_v21, %v3471_v18 }
 0x102   : > { %v2383_v26 = vadd.f32 %v3473_v24, %v3445_v23 }
 0x103   : > { %v3446_v28 = vpop.f32.mrb[4].mxu0 }
 0x104   : > { %v3474_v29 = vpop.f32.mrb[4].mxu1  ;;  %v3447_v30 = vpop.f32.mrb[5].mxu0 }
 0x105   : > { %v3475_v31 = vpop.f32.mrb[5].mxu1  ;;  %v3448_v32 = vadd.f32 %v3447_v30, %v3446_v28  ;;  %v3449_v34 = vpop.f32.mrb[6].mxu0 }
 0x106   : > { %v3476_v33 = vadd.f32 %v3475_v31, %v3474_v29  ;;  %v3477_v35 = vpop.f32.mrb[6].mxu1  ;;  %v3450_v36 = vpop.f32.mrb[7].mxu0 }
 0x107   : > { %v3478_v37 = vpop.f32.mrb[7].mxu1  ;;  %v3451_v39 = vadd.f32 %v3450_v36, %v3449_v34 }
 0x108   : > { %v2388_v38 = vadd.f32 %v3476_v33, %v3448_v32  ;;  %v3479_v40 = vadd.f32 %v3478_v37, %v3477_v35 }
 0x10a   : > { %v2391_v41 = vadd.f32 %v3479_v40, %v3451_v39 }
 0x11b   : > { %v3496_v42 = vpop.f32.mrb[8].mxu0 }
 0x11c   : > { %v3497_v43 = vpop.f32.mrb[9].mxu0  ;;  %v3524_v46 = vpop.f32.mrb[8].mxu1 }
 0x11d   : > { %v3498_v44 = vadd.f32 %v3497_v43, %v3496_v42  ;;  %v3499_v45 = vpop.f32.mrb[10].mxu0  ;;  %v3525_v50 = vpop.f32.mrb[9].mxu1 }
 0x11e   : > { %v3500_v47 = vpop.f32.mrb[11].mxu0  ;;  %v3526_v51 = vadd.f32 %v3525_v50, %v3524_v46  ;;  %v3527_v52 = vpop.f32.mrb[10].mxu1 }
 0x11f   : > { %v2429_v48 = vadd.f32 %v3498_v44, %v2380_v22  ;;  %v3501_v49 = vadd.f32 %v3500_v47, %v3499_v45  ;;  %v3528_v54 = vpop.f32.mrb[11].mxu1 }
 0x120   : > { %v3529_v56 = vadd.f32 %v3528_v54, %v3527_v52 }
 0x121   : > { %v2432_v53 = vadd.f32 %v3501_v49, %v2383_v26  ;;  %v2478_v55 = vadd.f32 %v3526_v51, %v2429_v48 }
 0x123   : > { %v2481_v57 = vadd.f32 %v3529_v56, %v2432_v53  ;;  %v3502_v58 = vpop.f32.mrb[12].mxu0 }
 0x124   : > { %v3503_v59 = vpop.f32.mrb[13].mxu0  ;;  %v3530_v62 = vpop.f32.mrb[12].mxu1 }
 0x125   : > { %v3504_v60 = vadd.f32 %v3503_v59, %v3502_v58  ;;  %v3505_v61 = vpop.f32.mrb[14].mxu0  ;;  %v3531_v2 = vpop.f32.mrb[13].mxu1 }
 0x126   : > { %v3506_v63 = vpop.f32.mrb[15].mxu0  ;;  %v3532_v3 = vadd.f32 %v3531_v2, %v3530_v62  ;;  %v3533_v4 = vpop.f32.mrb[14].mxu1 }
 0x127   : > { %v2437_v0 = vadd.f32 %v3504_v60, %v2388_v38  ;;  %v3507_v1 = vadd.f32 %v3506_v63, %v3505_v61  ;;  %v3534_v6 = vpop.f32.mrb[15].mxu1 }
 0x128   : > { %v3535_v8 = vadd.f32 %v3534_v6, %v3533_v4 }
 0x129   : > { %v2440_v5 = vadd.f32 %v3507_v1, %v2391_v41  ;;  %v2486_v7 = vadd.f32 %v3532_v3, %v2437_v0 }
 0x12b   : > { %v2489_v9 = vadd.f32 %v3535_v8, %v2440_v5 }
 0x13b   : > { %v3552_v10 = vpop.f32.mrb[16].mxu0 }
 0x13c   : > { %v3553_v11 = vpop.f32.mrb[17].mxu0  ;;  %v3580_v16 = vpop.f32.mrb[16].mxu1 }
 0x13d   : > { %v3554_v12 = vadd.f32 %v3553_v11, %v3552_v10  ;;  %v3555_v13 = vpop.f32.mrb[18].mxu0  ;;  %v3581_v18 = vpop.f32.mrb[17].mxu1 }
 0x13e   : > { %v3556_v14 = vpop.f32.mrb[19].mxu0  ;;  %v3582_v20 = vadd.f32 %v3581_v18, %v3580_v16  ;;  %v3583_v21 = vpop.f32.mrb[18].mxu1 }
 0x13f   : > { %v2527_v15 = vadd.f32 %v3554_v12, %v2478_v55  ;;  %v3557_v17 = vadd.f32 %v3556_v14, %v3555_v13  ;;  %v3584_v22 = vpop.f32.mrb[19].mxu1 }
 0x140   : > { %v3585_v24 = vadd.f32 %v3584_v22, %v3583_v21 }
 0x141   : > { %v2530_v19 = vadd.f32 %v3557_v17, %v2481_v57  ;;  %v2576_v23 = vadd.f32 %v3582_v20, %v2527_v15 }
 0x143   : > { %v2579_v25 = vadd.f32 %v3585_v24, %v2530_v19  ;;  %v3558_v26 = vpop.f32.mrb[20].mxu0 }
 0x144   : > { %v3559_v27 = vpop.f32.mrb[21].mxu0  ;;  %v3586_v30 = vpop.f32.mrb[20].mxu1 }
 0x145   : > { %v3560_v28 = vadd.f32 %v3559_v27, %v3558_v26  ;;  %v3561_v29 = vpop.f32.mrb[22].mxu0  ;;  %v3587_v34 = vpop.f32.mrb[21].mxu1 }
 0x146   : > { %v3562_v31 = vpop.f32.mrb[23].mxu0  ;;  %v3588_v35 = vadd.f32 %v3587_v34, %v3586_v30  ;;  %v3589_v36 = vpop.f32.mrb[22].mxu1 }
 0x147   : > { %v2535_v32 = vadd.f32 %v3560_v28, %v2486_v7  ;;  %v3563_v33 = vadd.f32 %v3562_v31, %v3561_v29  ;;  %v3590_v38 = vpop.f32.mrb[23].mxu1 }
 0x148   : > { %v3591_v40 = vadd.f32 %v3590_v38, %v3589_v36 }
 0x149   : > { %v2538_v37 = vadd.f32 %v3563_v33, %v2489_v9  ;;  %v2584_v39 = vadd.f32 %v3588_v35, %v2535_v32 }
 0x14b   : > { %v2587_v41 = vadd.f32 %v3591_v40, %v2538_v37 }
 0x15b   : > { %v3608_v42 = vpop.f32.mrb[24].mxu0 }
 0x15c   : > { %v3609_v43 = vpop.f32.mrb[25].mxu0  ;;  %v3636_v46 = vpop.f32.mrb[24].mxu1 }
 0x15d   : > { %v3610_v44 = vadd.f32 %v3609_v43, %v3608_v42  ;;  %v3611_v45 = vpop.f32.mrb[26].mxu0  ;;  %v3637_v50 = vpop.f32.mrb[25].mxu1 }
 0x15e   : > { %v3612_v47 = vpop.f32.mrb[27].mxu0  ;;  %v3638_v51 = vadd.f32 %v3637_v50, %v3636_v46  ;;  %v3639_v52 = vpop.f32.mrb[26].mxu1 }
 0x15f   : > { %v2625_v48 = vadd.f32 %v3610_v44, %v2576_v23  ;;  %v3613_v49 = vadd.f32 %v3612_v47, %v3611_v45  ;;  %v3640_v54 = vpop.f32.mrb[27].mxu1 }
 0x160   : > { %v3641_v56 = vadd.f32 %v3640_v54, %v3639_v52 }
 0x161   : > { %v2628_v53 = vadd.f32 %v3613_v49, %v2579_v25  ;;  %v2674_v55 = vadd.f32 %v3638_v51, %v2625_v48 }
 0x163   : > { %v2677_v57 = vadd.f32 %v3641_v56, %v2628_v53  ;;  %v3614_v58 = vpop.f32.mrb[28].mxu0 }
 0x164   : > { %v3615_v59 = vpop.f32.mrb[29].mxu0  ;;  %v3642_v0 = vpop.f32.mrb[28].mxu1 }
 0x165   : > { %v3616_v60 = vadd.f32 %v3615_v59, %v3614_v58  ;;  %v3617_v61 = vpop.f32.mrb[30].mxu0  ;;  %v3643_v2 = vpop.f32.mrb[29].mxu1 }
 0x166   : > { %v3618_v62 = vpop.f32.mrb[31].mxu0  ;;  %v3644_v4 = vadd.f32 %v3643_v2, %v3642_v0  ;;  %v3645_v5 = vpop.f32.mrb[30].mxu1 }
 0x167   : > { %v2633_v63 = vadd.f32 %v3616_v60, %v2584_v39  ;;  %v3619_v1 = vadd.f32 %v3618_v62, %v3617_v61  ;;  %v3646_v6 = vpop.f32.mrb[31].mxu1 }
 0x168   : > { %v3647_v8 = vadd.f32 %v3646_v6, %v3645_v5 }
 0x169   : > { %v2636_v3 = vadd.f32 %v3619_v1, %v2587_v41  ;;  %v2682_v7 = vadd.f32 %v3644_v4, %v2633_v63 }
 0x16b   : > { %v2685_v9 = vadd.f32 %v3647_v8, %v2636_v3 }
 0x17b   : > { %v3664_v10 = vpop.f32.mrb[32].mxu0 }
 0x17c   : > { %v3665_v11 = vpop.f32.mrb[33].mxu0  ;;  %v3692_v14 = vpop.f32.mrb[32].mxu1 }
 0x17d   : > { %v3666_v12 = vadd.f32 %v3665_v11, %v3664_v10  ;;  %v3667_v13 = vpop.f32.mrb[34].mxu0  ;;  %v3693_v18 = vpop.f32.mrb[33].mxu1 }
 0x17e   : > { %v3668_v15 = vpop.f32.mrb[35].mxu0  ;;  %v3694_v19 = vadd.f32 %v3693_v18, %v3692_v14  ;;  %v3695_v20 = vpop.f32.mrb[34].mxu1 }
 0x17f   : > { %v2723_v16 = vadd.f32 %v3666_v12, %v2674_v55  ;;  %v3669_v17 = vadd.f32 %v3668_v15, %v3667_v13  ;;  %v3696_v22 = vpop.f32.mrb[35].mxu1 }
 0x180   : > { %v3697_v24 = vadd.f32 %v3696_v22, %v3695_v20 }
 0x181   : > { %v2726_v21 = vadd.f32 %v3669_v17, %v2677_v57  ;;  %v2772_v23 = vadd.f32 %v3694_v19, %v2723_v16  ;;  %v3402_v19 = vld [vmem:[%s4932_s2] ss:$0 sm:$0xff] }
 0x183   : > { %v2775_v25 = vadd.f32 %v3697_v24, %v2726_v21  ;;  %v3670_v26 = vpop.f32.mrb[36].mxu0 }
 0x184   : > { %v3671_v27 = vpop.f32.mrb[37].mxu0  ;;  %v3698_v30 = vpop.f32.mrb[36].mxu1 }
 0x185   : > { %v3672_v28 = vadd.f32 %v3671_v27, %v3670_v26  ;;  %v3673_v29 = vpop.f32.mrb[38].mxu0  ;;  %v3699_v34 = vpop.f32.mrb[37].mxu1 }
 0x186   : > { %v3674_v31 = vpop.f32.mrb[39].mxu0  ;;  %v3700_v35 = vadd.f32 %v3699_v34, %v3698_v30  ;;  %v3701_v36 = vpop.f32.mrb[38].mxu1 }
 0x187   : > { %v2731_v32 = vadd.f32 %v3672_v28, %v2682_v7  ;;  %v3675_v33 = vadd.f32 %v3674_v31, %v3673_v29  ;;  %v3702_v38 = vpop.f32.mrb[39].mxu1 }
 0x188   : > { %v3703_v40 = vadd.f32 %v3702_v38, %v3701_v36 }
 0x189   : > { %v2734_v37 = vadd.f32 %v3675_v33, %v2685_v9  ;;  %v2780_v39 = vadd.f32 %v3700_v35, %v2731_v32 }
 0x18b   : > { %v2783_v41 = vadd.f32 %v3703_v40, %v2734_v37 }
 0x19b   : > { %v3720_v42 = vpop.f32.mrb[40].mxu0 }
 0x19c   : > { %v3721_v43 = vpop.f32.mrb[41].mxu0  ;;  %v3748_v48 = vpop.f32.mrb[40].mxu1 }
 0x19d   : > { %v3722_v44 = vadd.f32 %v3721_v43, %v3720_v42  ;;  %v3723_v45 = vpop.f32.mrb[42].mxu0  ;;  %v3749_v50 = vpop.f32.mrb[41].mxu1 }
 0x19e   : > { %v3724_v46 = vpop.f32.mrb[43].mxu0  ;;  %v3750_v52 = vadd.f32 %v3749_v50, %v3748_v48  ;;  %v3751_v53 = vpop.f32.mrb[42].mxu1 }
 0x19f   : > { %v2821_v47 = vadd.f32 %v3722_v44, %v2772_v23  ;;  %v3725_v49 = vadd.f32 %v3724_v46, %v3723_v45  ;;  %v3752_v54 = vpop.f32.mrb[43].mxu1 }
 0x1a0   : > { %v3753_v56 = vadd.f32 %v3752_v54, %v3751_v53 }
 0x1a1   : > { %v2824_v51 = vadd.f32 %v3725_v49, %v2775_v25  ;;  %v2870_v55 = vadd.f32 %v3750_v52, %v2821_v47 }
 0x1a3   : > { %v3726_v57 = vpop.f32.mrb[44].mxu0  ;;  %v2873_v58 = vadd.f32 %v3753_v56, %v2824_v51 }
 0x1a4   : > { %v3727_v59 = vpop.f32.mrb[45].mxu0  ;;  %v3754_v62 = vpop.f32.mrb[44].mxu1 }
 0x1a5   : > { %v3728_v60 = vadd.f32 %v3727_v59, %v3726_v57  ;;  %v3729_v61 = vpop.f32.mrb[46].mxu0  ;;  %v3755_v2 = vpop.f32.mrb[45].mxu1 }
 0x1a6   : > { %v3730_v63 = vpop.f32.mrb[47].mxu0  ;;  %v3756_v3 = vadd.f32 %v3755_v2, %v3754_v62  ;;  %v3757_v4 = vpop.f32.mrb[46].mxu1 }
 0x1a7   : > { %v2829_v0 = vadd.f32 %v3728_v60, %v2780_v39  ;;  %v3731_v1 = vadd.f32 %v3730_v63, %v3729_v61  ;;  %v3758_v6 = vpop.f32.mrb[47].mxu1 }
 0x1a8   : > { %v3759_v8 = vadd.f32 %v3758_v6, %v3757_v4 }
 0x1a9   : > { %v2832_v5 = vadd.f32 %v3731_v1, %v2783_v41  ;;  %v2878_v7 = vadd.f32 %v3756_v3, %v2829_v0 }
 0x1ab   : > { %v2881_v9 = vadd.f32 %v3759_v8, %v2832_v5 }
 0x1bb   : > { %v3776_v10 = vpop.f32.mrb[48].mxu0 }
 0x1bc   : > { %v3777_v11 = vpop.f32.mrb[49].mxu0  ;;  %v3816_v15 = vpop.f32.mrb[48].mxu1 }
 0x1bd   : > { %v3778_v12 = vadd.f32 %v3777_v11, %v3776_v10  ;;  %v3779_v13 = vpop.f32.mrb[50].mxu0  ;;  %v2967_v18 = vpop.f32.mrb[49].mxu1 }
 0x1be   : > { %v3780_v14 = vpop.f32.mrb[51].mxu0  ;;  %v3817_v20 = vpop.f32.mrb[50].mxu1 }
 0x1bf   : > { %v3781_v16 = vadd.f32 %v3780_v14, %v3779_v13  ;;  %v2919_v17 = vadd.f32 %v3778_v12, %v2870_v55  ;;  %v2970_v23 = vpop.f32.mrb[51].mxu1 }
 0x1c1   : > { %v2968_v21 = vadd.f32 %v2967_v18, %v2919_v17  ;;  %v2922_v22 = vadd.f32 %v3781_v16, %v2873_v58 }
 0x1c3   : > { %v3004_v24 = vadd.f32 %v3402_v19, %v2968_v21  ;;  %v2971_v25 = vadd.f32 %v2970_v23, %v2922_v22  ;;  %v3782_v26 = vpop.f32.mrb[52].mxu0 }
 0x1c4   : > { %v3783_v27 = vpop.f32.mrb[53].mxu0 }
 0x1c5   : > { %v3008_v28 = vmul.f32 0.01, %v3004_v24  ;;  %v3005_v29 = vadd.f32 %v3402_v19, %v2971_v25  ;;  %v3784_v30 = vadd.f32 %v3783_v27, %v3782_v26  ;;  %v3785_v31 = vpop.f32.mrb[54].mxu0 }
 0x1c6   : > { %v3786_v32 = vpop.f32.mrb[55].mxu0 }
 0x1c7   : > { %v3009_v33 = vmul.f32 0.01, %v3005_v29  ;;  %v2927_v34 = vadd.f32 %v3784_v30, %v2878_v7  ;;  %v3787_v35 = vadd.f32 %v3786_v32, %v3785_v31  ;;  %v3012_v36 = vmax.f32 %v3004_v24, %v3008_v28 }
 0x1c9   : > { %v3013_v37 = vmax.f32 %v3005_v29, %v3009_v33  ;;  %v2976_v38 = vadd.f32 %v3816_v15, %v2927_v34  ;;  %v2930_v39 = vadd.f32 %v3787_v35, %v2881_v9 }
 0x1cb   : > { %v3416_v40 = vpack.c.bf16 %v3013_v37, %v3012_v36  ;;  %v3006_v41 = vadd.f32 %v3402_v19, %v2976_v38  ;;  %v2979_v42 = vadd.f32 %v3817_v20, %v2930_v39 }
 0x1cd   : > { %3417 = vst [vmem:[%s225_s9] sm:$0xff] %v3416_v40   ;;  %v3010_v43 = vmul.f32 0.01, %v3006_v41  ;;  %v3007_v44 = vadd.f32 %v3402_v19, %v2979_v42 }
 0x1cf   : > { %v3011_v45 = vmul.f32 0.01, %v3007_v44  ;;  %v3014_v46 = vmax.f32 %v3006_v41, %v3010_v43 }
 0x1d1   : > { %v3015_v47 = vmax.f32 %v3007_v44, %v3011_v45 }
 0x1d3   : > { %v3421_v48 = vpack.c.bf16 %v3015_v47, %v3014_v46 }
 0x1d5   : > { %3423 = vst [vmem:[%s225_s9 + $0x8] sm:$0xff] %v3421_v48  }
 0x1d6 PF: > { %s13_s14 = sadd.s32 1, %s4161_s14   ;;  %s4934_s12 = smov %s4157_s13 }
 0x1d7   : > { %p10_p5 = scmp.ge.s32.totalorder %s13_s14, 4   ;;  %s4935_s13 = smov %s4937_s15 }
 0x1d9   :  { %12 = sbr.rel (!%p10_p5) target bundleno = 2 (0x2), region = 73 }

// kernel: conv_residual_decoder_block_3d.8
= control target key start
LH: loop header
LB: loop body
LE: loop exit
PB: predicated region body
PF: predicated region fallthrough
CT: control target
= control target key end

     0   :  { %s2285_s12 = smov 0   ;;  %s2287_s13 = smov 0   ;;  %s2554_s0 = inlined_call_operand.vmem [shape: bf16[512,432], index: 0, kind: input, shape index: {}]   ;;  %s2555_s1 = inlined_call_operand.vmem [shape: bf16[432,128], index: 1, kind: input, shape index: {}]   ;;  %s2556_s2 = inlined_call_operand.vmem [shape: f32[1,128], index: 2, kind: input, shape index: {}]   ;;  %s2557_s3 = inlined_call_operand.vmem [shape: bf16[512,128], index: 3, kind: output, shape index: {}]  }
   0x1   :  { %s2289_s14 = smov 0  }
   0x2 LB: > { %s25_s15 = sadd.s32 1, %s2258_s13  ;;  %p1704_p0 = scmp.ge.s32.totalorder %s2262_s14, 1  ;;  %s2262_s14 = sphi %s2289_s14, %s13_s14   ;;  %s2258_s13 = sphi %s2287_s13, %s2559_s13   ;;  %s2254_s12 = sphi %s2285_s12, %s2558_s12  }
   0x3   : > { %p27_p1 = scmp.ge.s32.totalorder %s25_s15, 2  ;;  %p169_p2 = scmp.lt.s32.totalorder %s2262_s14, 3 }
   0x5   : > { %s2561_s15 = smov (%p27_p1, %s25_s15), 0  ;;  %p170_p3 = pnand %p1704_p0, %p169_p2 }
   0x6   : > { %v2117_v0 = vld [vmem:[%s2555_s1 + $0x80] sm:$0xff] (!%p170_p3)   ;;  %v2264_v1 = vmov (!%p170_p3), 0   ;;  %v2118_v2 = vld [vmem:[%s2555_s1 + $0x88] sm:$0xff] (!%p170_p3)   ;;  %v2121_v5 = vld [vmem:[%s2555_s1 + $0x90] sm:$0xff] (!%p170_p3)   ;;  %s1705_s7 = sshll.u32 (!%p170_p3), %s2254_s12, 5  ;;  %vm880_vm0 = vcmask (!%p170_p3), 392192  }
   0x7   : > { %173 = sbr.rel (%p170_p3) target bundleno = 396 (0x18c), region = 32  ;;  %1090 = vmatprep.subr.bf16.mxu1 (!%p170_p3), %v2264_v1  ;;  %v2119_v3 = vld [vmem:[%s2555_s1 + $0x40] sm:$0xff] (!%p170_p3)   ;;  %v2122_v6 = vld [vmem:[%s2555_s1 + $0x48] sm:$0xff] (!%p170_p3)   ;;  %v2125_v8 = vld [vmem:[%s2555_s1 + $0x50] sm:$0xff] (!%p170_p3)   ;;  %p205_p4 = scmp.lt.s32.totalorder (!%p170_p3), %s1705_s7, 63 }
   0x8   : > { %1091 = vmatpush1.bf16.msra.mxu1 (!%p170_p3), %v2117_v0  ;;  %v2120_v4 = vld [vmem:[%s2555_s1] sm:$0xff] (!%p170_p3)   ;;  %1980 = vmatprep.subr.bf16.mxu0 (!%p170_p3), %v2119_v3  ;;  %v2123_v7 = vld [vmem:[%s2555_s1 + $0x8] sm:$0xff] (!%p170_p3)   ;;  %v2126_v9 = vld [vmem:[%s2555_s1 + $0x10] sm:$0xff] (!%p170_p3)  }
   0x9   : > { %1092 = vmatprep.subr.bf16.mxu1 (!%p170_p3), %v2264_v1  ;;  %1981 = vmatpush3.bf16.msra.mxu0 (!%p170_p3), %v2120_v4  ;;  %v2124_v10 = vld [vmem:[%s2555_s1 + $0x98] sm:$0xff] (!%p170_p3)   ;;  %v2127_v12 = vld [vmem:[%s2555_s1 + $0xa0] sm:$0xff] (!%p170_p3)   ;;  %v2130_v15 = vld [vmem:[%s2555_s1 + $0xa8] sm:$0xff] (!%p170_p3)  }
   0xa   : > { %1982 = vmatprep.subr.bf16.mxu0 (!%p170_p3), %v2122_v6  ;;  %v2128_v11 = vld [vmem:[%s2555_s1 + $0x58] sm:$0xff] (!%p170_p3)   ;;  %v2131_v14 = vld [vmem:[%s2555_s1 + $0x60] sm:$0xff] (!%p170_p3)   ;;  %v2134_v17 = vld [vmem:[%s2555_s1 + $0x68] sm:$0xff] (!%p170_p3)  }
   0xb   : > { %v2129_v13 = vld [vmem:[%s2555_s1 + $0x18] sm:$0xff] (!%p170_p3)   ;;  %v2132_v16 = vld [vmem:[%s2555_s1 + $0x20] sm:$0xff] (!%p170_p3)   ;;  %v2133_v18 = vld [vmem:[%s2555_s1 + $0xb0] sm:$0xff] (!%p170_p3)  }
   0xc   : > { %1093 = vmatpush1.bf16.msra.mxu1 (!%p170_p3), %v2118_v2  ;;  %v2135_v19 = vld [vmem:[%s2555_s1 + $0x28] sm:$0xff] (!%p170_p3)   ;;  %v2137_v20 = vld [vmem:[%s2555_s1 + $0x70] sm:$0xff] (!%p170_p3)   ;;  %v2136_v21 = vld [vmem:[%s2555_s1 + $0xb8] sm:$0xff] (!%p170_p3)  }
   0xd   : > { %1094 = vmatprep.subr.bf16.mxu1 (!%p170_p3), %v2264_v1  ;;  %1983 = vmatpush3.bf16.msra.mxu0 (!%p170_p3), %v2123_v7  ;;  %v2138_v22 = vld [vmem:[%s2555_s1 + $0x30] sm:$0xff] (!%p170_p3)   ;;  %v2140_v23 = vld [vmem:[%s2555_s1 + $0x78] sm:$0xff] (!%p170_p3)   ;;  %v2139_v27 = vld [vmem:[%s2555_s1 + $0xc0] sm:$0xff] (!%p170_p3)  }
   0xe   : > { %1984 = vmatprep.subr.bf16.mxu0 %v2125_v8  ;;  %s2563_s7 = smov (!%p205_p4, %s1705_s7), 63  ;;  %v2141_v25 = vld [vmem:[%s2555_s1 + $0x38] sm:$0xff]   ;;  %v2145_v30 = vld [vmem:[%s2555_s1 + $0xc8] sm:$0xff]   ;;  %v2146_v31 = vld [vmem:[%s2555_s1 + $0xd0] sm:$0xff]  }
   0xf   : > { %s1852_s29 = sshll.u32 %s2563_s7, 4  ;;  %s1709_s30 = sshll.u32 %s2563_s7, 2 }
  0x10   : > { %1095 = vmatpush1.bf16.msra.mxu1 %v2121_v5  ;;  %s2379_s10 = scalar_lea.vmem %s2554_s0, %s1852_s29  ;;  %s2497_s6 = scalar_lea.vmem %s2557_s3, %s1709_s30 }
  0x11   : > { %1096 = vmatprep.subr.bf16.mxu1 %v2264_v1  ;;  %1985 = vmatpush3.bf16.msra.mxu0 %v2126_v9  ;;  %v2144_v24 = vld [vmem:[%s2379_s10 + $0x4] ss:$16 sps:$4 sm:$0xff]   ;;  %v2149_v26 = vld [vmem:[%s2379_s10 + $0xc] ss:$16 sps:$4 sm:$0xff]   ;;  %v2142_v28 = vld [vmem:[%s2379_s10] ss:$16 sps:$4 sm:$0xff]  }
  0x12   : > { %1986 = vmatprep.subr.bf16.mxu0 %v2128_v11  ;;  %961 = vmatprep.mubr.bf16.mxu0 %v2144_v24  ;;  %v2150_v29 = vld [vmem:[%s2379_s10 + $0x24] ss:$16 sps:$4 sm:$0xff]   ;;  %v2152_v32 = vld [vmem:[%s2379_s10 + $0x20] ss:$16 sps:$4 sm:$0xff]   ;;  %v2147_v33 = vld [vmem:[%s2379_s10 + $0x8] ss:$16 sps:$4 sm:$0xff]  }
  0x13   : > { %1801 = vmatprep.mubr.msk.bf16.mxu1 %vm880_vm0, %v2149_v26  ;;  %v2156_v34 = vld [vmem:[%s2379_s10 + $0x44] ss:$16 sps:$4 sm:$0xff]   ;;  %v2153_v35 = vld [vmem:[%s2379_s10 + $0x2c] ss:$16 sps:$4 sm:$0xff]   ;;  %v2158_v36 = vld [vmem:[%s2379_s10 + $0x40] ss:$16 sps:$4 sm:$0xff]  }
  0x14   : > { %1097 = vmatpush1.bf16.msra.mxu1 %v2124_v10  ;;  %v2155_v37 = vld [vmem:[%s2379_s10 + $0x28] ss:$16 sps:$4 sm:$0xff]   ;;  %v2162_v38 = vld [vmem:[%s2379_s10 + $0x64] ss:$16 sps:$4 sm:$0xff]   ;;  %v2159_v39 = vld [vmem:[%s2379_s10 + $0x4c] ss:$16 sps:$4 sm:$0xff]  }
  0x15   : > { %1098 = vmatprep.subr.bf16.mxu1 %v2264_v1  ;;  %1987 = vmatpush3.bf16.msra.mxu0 %v2129_v13  ;;  %v2164_v40 = vld [vmem:[%s2379_s10 + $0x60] ss:$16 sps:$4 sm:$0xff]   ;;  %v2161_v41 = vld [vmem:[%s2379_s10 + $0x48] ss:$16 sps:$4 sm:$0xff]   ;;  %v2168_v42 = vld [vmem:[%s2379_s10 + $0x84] ss:$16 sps:$4 sm:$0xff]  }
  0x16   : > { %1988 = vmatprep.subr.bf16.mxu0 %v2131_v14  ;;  %v2165_v43 = vld [vmem:[%s2379_s10 + $0x6c] ss:$16 sps:$4 sm:$0xff]   ;;  %v2170_v44 = vld [vmem:[%s2379_s10 + $0x80] ss:$16 sps:$4 sm:$0xff]   ;;  %v2167_v45 = vld [vmem:[%s2379_s10 + $0x68] ss:$16 sps:$4 sm:$0xff]  }
  0x17   : > { %v2174_v46 = vld [vmem:[%s2379_s10 + $0xa4] ss:$16 sps:$4 sm:$0xff]   ;;  %v2171_v47 = vld [vmem:[%s2379_s10 + $0x8c] ss:$16 sps:$4 sm:$0xff]   ;;  %v2176_v48 = vld [vmem:[%s2379_s10 + $0xa0] ss:$16 sps:$4 sm:$0xff]  }
  0x18   : > { %1099 = vmatpush1.bf16.msra.mxu1 %v2127_v12  ;;  %v2173_v49 = vld [vmem:[%s2379_s10 + $0x88] ss:$16 sps:$4 sm:$0xff]   ;;  %v2180_v50 = vld [vmem:[%s2379_s10 + $0xc4] ss:$16 sps:$4 sm:$0xff]   ;;  %v2177_v51 = vld [vmem:[%s2379_s10 + $0xac] ss:$16 sps:$4 sm:$0xff]  }
  0x19   : > { %1100 = vmatprep.subr.bf16.mxu1 %v2264_v1  ;;  %1989 = vmatpush3.bf16.msra.mxu0 %v2132_v16  ;;  %v2182_v52 = vld [vmem:[%s2379_s10 + $0xc0] ss:$16 sps:$4 sm:$0xff]   ;;  %v2179_v53 = vld [vmem:[%s2379_s10 + $0xa8] ss:$16 sps:$4 sm:$0xff]   ;;  %v2186_v54 = vld [vmem:[%s2379_s10 + $0xe4] ss:$16 sps:$4 sm:$0xff]  }
  0x1a   : > { %1990 = vmatprep.subr.bf16.mxu0 %v2134_v17  ;;  %v2183_v55 = vld [vmem:[%s2379_s10 + $0xcc] ss:$16 sps:$4 sm:$0xff]   ;;  %v2188_v56 = vld [vmem:[%s2379_s10 + $0xe0] ss:$16 sps:$4 sm:$0xff]   ;;  %v2185_v57 = vld [vmem:[%s2379_s10 + $0xc8] ss:$16 sps:$4 sm:$0xff]  }
  0x1b   : > { %v2192_v58 = vld [vmem:[%s2379_s10 + $0x104] ss:$16 sps:$4 sm:$0xff]   ;;  %v2189_v59 = vld [vmem:[%s2379_s10 + $0xec] ss:$16 sps:$4 sm:$0xff]   ;;  %v2194_v60 = vld [vmem:[%s2379_s10 + $0x100] ss:$16 sps:$4 sm:$0xff]  }
  0x1c   : > { %1101 = vmatpush1.bf16.msra.mxu1 %v2130_v15  ;;  %v2191_v61 = vld [vmem:[%s2379_s10 + $0xe8] ss:$16 sps:$4 sm:$0xff]   ;;  %v2198_v62 = vld [vmem:[%s2379_s10 + $0x124] ss:$16 sps:$4 sm:$0xff]   ;;  %v2195_v63 = vld [vmem:[%s2379_s10 + $0x10c] ss:$16 sps:$4 sm:$0xff]  }
  0x1d   : > { %1102 = vmatprep.subr.bf16.mxu1 %v2264_v1  ;;  %1991 = vmatpush3.bf16.msra.mxu0 %v2135_v19  ;;  %v2200_v0 = vld [vmem:[%s2379_s10 + $0x120] ss:$16 sps:$4 sm:$0xff]   ;;  %v2204_v2 = vld [vmem:[%s2379_s10 + $0x144] ss:$16 sps:$4 sm:$0xff]   ;;  %v2201_v3 = vld [vmem:[%s2379_s10 + $0x12c] ss:$16 sps:$4 sm:$0xff]  }
  0x1e   : > { %1992 = vmatprep.subr.bf16.mxu0 %v2137_v20  ;;  %v2206_v4 = vld [vmem:[%s2379_s10 + $0x140] ss:$16 sps:$4 sm:$0xff]   ;;  %v2203_v5 = vld [vmem:[%s2379_s10 + $0x128] ss:$16 sps:$4 sm:$0xff]   ;;  %v2210_v6 = vld [vmem:[%s2379_s10 + $0x164] ss:$16 sps:$4 sm:$0xff]  }
  0x1f   : > { %v2207_v7 = vld [vmem:[%s2379_s10 + $0x14c] ss:$16 sps:$4 sm:$0xff]   ;;  %v2212_v8 = vld [vmem:[%s2379_s10 + $0x160] ss:$16 sps:$4 sm:$0xff]   ;;  %v2209_v9 = vld [vmem:[%s2379_s10 + $0x148] ss:$16 sps:$4 sm:$0xff]  }
  0x20   : > { %1103 = vmatpush1.bf16.msra.mxu1 %v2133_v18  ;;  %v2216_v10 = vld [vmem:[%s2379_s10 + $0x184] ss:$16 sps:$4 sm:$0xff]   ;;  %v2213_v11 = vld [vmem:[%s2379_s10 + $0x16c] ss:$16 sps:$4 sm:$0xff]   ;;  %v2218_v12 = vld [vmem:[%s2379_s10 + $0x180] ss:$16 sps:$4 sm:$0xff]  }
  0x21   : > { %1104 = vmatprep.subr.bf16.mxu1 %v2264_v1  ;;  %1993 = vmatpush3.bf16.msra.mxu0 %v2138_v22  ;;  %v2215_v13 = vld [vmem:[%s2379_s10 + $0x168] ss:$16 sps:$4 sm:$0xff]   ;;  %v2222_v14 = vld [vmem:[%s2379_s10 + $0x1a4] ss:$16 sps:$4 sm:$0xff]   ;;  %v2219_v15 = vld [vmem:[%s2379_s10 + $0x18c] ss:$16 sps:$4 sm:$0xff]  }
  0x22   : > { %1994 = vmatprep.subr.bf16.mxu0 %v2140_v23  ;;  %v2224_v16 = vld [vmem:[%s2379_s10 + $0x1a0] ss:$16 sps:$4 sm:$0xff]   ;;  %v2221_v17 = vld [vmem:[%s2379_s10 + $0x188] ss:$16 sps:$4 sm:$0xff]   ;;  %v2228_v18 = vld [vmem:[%s2379_s10 + $0x1c4] ss:$16 sps:$4 sm:$0xff]  }
  0x23   : > { %v2225_v19 = vld [vmem:[%s2379_s10 + $0x1ac] ss:$16 sps:$4 sm:$0xff]   ;;  %v2230_v20 = vld [vmem:[%s2379_s10 + $0x1c0] ss:$16 sps:$4 sm:$0xff]   ;;  %v2234_v22 = vld [vmem:[%s2379_s10 + $0x1e4] ss:$16 sps:$4 sm:$0xff]  }
  0x24   : > { %1105 = vmatpush1.bf16.msra.mxu1 %v2136_v21  ;;  %v2227_v21 = vld [vmem:[%s2379_s10 + $0x1a8] ss:$16 sps:$4 sm:$0xff]   ;;  %v2231_v23 = vld [vmem:[%s2379_s10 + $0x1cc] ss:$16 sps:$4 sm:$0xff]   ;;  %v2236_v24 = vld [vmem:[%s2379_s10 + $0x1e0] ss:$16 sps:$4 sm:$0xff]  }
  0x25   : > { %1106 = vmatprep.subr.bf16.mxu1 %v2264_v1  ;;  %1995 = vmatpush3.bf16.msra.mxu0 %v2141_v25  ;;  %v2233_v25 = vld [vmem:[%s2379_s10 + $0x1c8] ss:$16 sps:$4 sm:$0xff]   ;;  %v2237_v26 = vld [vmem:[%s2379_s10 + $0x1ec] ss:$16 sps:$4 sm:$0xff]  }
  0x28   : > { %1107 = vmatpush1.bf16.msra.mxu1 %v2139_v27  ;;  %962 = vmatmul.mubr.bf16.vlgmr.msra.gmra.mrb[0].mxu0 %v2142_v28  ;;  %v2239_v27 = vld [vmem:[%s2379_s10 + $0x1e8] ss:$16 sps:$4 sm:$0xff]  }
  0x29   : > { %1108 = vmatprep.subr.bf16.mxu1 %v2264_v1  ;;  %969 = vmatprep.mubr.bf16.mxu0 %v2150_v29 }
  0x2c   : > { %1109 = vmatpush1.bf16.msra.mxu1 %v2145_v30 }
  0x2d   : > { %1110 = vmatprep.subr.bf16.mxu1 %v2264_v1  ;;  %v2197_v1 = vld [vmem:[%s2379_s10 + $0x108] ss:$16 sps:$4 sm:$0xff]  }
  0x30   : > { %1111 = vmatpush1.bf16.msra.mxu1 %v2146_v31  ;;  %970 = vmatmul.mubr.bf16.gmra.mrb[4].mxu0 %v2152_v32 }
  0x31   : > { %977 = vmatprep.mubr.bf16.mxu0 %v2156_v34 }
  0x33   : > { %1123 = vmatmul.mubr.bf16.vlgmr.msra.gmra.mrb[0].mxu1 %v2147_v33 }
  0x34   : > { %1802 = vmatprep.mubr.msk.bf16.mxu1 %vm880_vm0, %v2153_v35 }
  0x38   : > { %978 = vmatmul.mubr.bf16.gmra.mrb[8].mxu0 %v2158_v36  ;;  %v2489_v36 = vld [vmem:[%s2556_s2] ss:$0 sm:$0xff] }
  0x39   : > { %985 = vmatprep.mubr.bf16.mxu0 %v2162_v38 }
  0x3b   : > { %1131 = vmatmul.mubr.bf16.gmra.mrb[4].mxu1 %v2155_v37 }
  0x3c   : > { %1803 = vmatprep.mubr.msk.bf16.mxu1 %vm880_vm0, %v2159_v39 }
  0x40   : > { %986 = vmatmul.mubr.bf16.gmra.mrb[12].mxu0 %v2164_v40 }
  0x41   : > { %993 = vmatprep.mubr.bf16.mxu0 %v2168_v42 }
  0x43   : > { %1139 = vmatmul.mubr.bf16.gmra.mrb[8].mxu1 %v2161_v41 }
  0x44   : > { %1804 = vmatprep.mubr.msk.bf16.mxu1 %vm880_vm0, %v2165_v43 }
  0x48   : > { %994 = vmatmul.mubr.bf16.gmra.mrb[16].mxu0 %v2170_v44 }
  0x49   : > { %1001 = vmatprep.mubr.bf16.mxu0 %v2174_v46 }
  0x4b   : > { %1147 = vmatmul.mubr.bf16.gmra.mrb[12].mxu1 %v2167_v45 }
  0x4c   : > { %1805 = vmatprep.mubr.msk.bf16.mxu1 %vm880_vm0, %v2171_v47 }
  0x50   : > { %1002 = vmatmul.mubr.bf16.gmra.mrb[20].mxu0 %v2176_v48 }
  0x51   : > { %1009 = vmatprep.mubr.bf16.mxu0 %v2180_v50 }
  0x53   : > { %1155 = vmatmul.mubr.bf16.gmra.mrb[16].mxu1 %v2173_v49 }
  0x54   : > { %1806 = vmatprep.mubr.msk.bf16.mxu1 %vm880_vm0, %v2177_v51 }
  0x58   : > { %1010 = vmatmul.mubr.bf16.gmra.mrb[24].mxu0 %v2182_v52 }
  0x59   : > { %1017 = vmatprep.mubr.bf16.mxu0 %v2186_v54 }
  0x5b   : > { %1163 = vmatmul.mubr.bf16.gmra.mrb[20].mxu1 %v2179_v53 }
  0x5c   : > { %1807 = vmatprep.mubr.msk.bf16.mxu1 %vm880_vm0, %v2183_v55 }
  0x60   : > { %1018 = vmatmul.mubr.bf16.gmra.mrb[28].mxu0 %v2188_v56 }
  0x61   : > { %1025 = vmatprep.mubr.bf16.mxu0 %v2192_v58 }
  0x63   : > { %1171 = vmatmul.mubr.bf16.gmra.mrb[24].mxu1 %v2185_v57 }
  0x64   : > { %1808 = vmatprep.mubr.msk.bf16.mxu1 %vm880_vm0, %v2189_v59 }
  0x68   : > { %1026 = vmatmul.mubr.bf16.gmra.mrb[32].mxu0 %v2194_v60 }
  0x69   : > { %1033 = vmatprep.mubr.bf16.mxu0 %v2198_v62 }
  0x6b   : > { %1179 = vmatmul.mubr.bf16.gmra.mrb[28].mxu1 %v2191_v61 }
  0x6c   : > { %1809 = vmatprep.mubr.msk.bf16.mxu1 %vm880_vm0, %v2195_v63 }
  0x70   : > { %1034 = vmatmul.mubr.bf16.gmra.mrb[36].mxu0 %v2200_v0 }
  0x71   : > { %1041 = vmatprep.mubr.bf16.mxu0 %v2204_v2 }
  0x73   : > { %1187 = vmatmul.mubr.bf16.gmra.mrb[32].mxu1 %v2197_v1 }
  0x74   : > { %1810 = vmatprep.mubr.msk.bf16.mxu1 %vm880_vm0, %v2201_v3 }
  0x78   : > { %1042 = vmatmul.mubr.bf16.gmra.mrb[40].mxu0 %v2206_v4 }
  0x79   : > { %1049 = vmatprep.mubr.bf16.mxu0 %v2210_v6 }
  0x7b   : > { %1195 = vmatmul.mubr.bf16.gmra.mrb[36].mxu1 %v2203_v5 }
  0x7c   : > { %1811 = vmatprep.mubr.msk.bf16.mxu1 %vm880_vm0, %v2207_v7 }
  0x80   : > { %1050 = vmatmul.mubr.bf16.gmra.mrb[44].mxu0 %v2212_v8 }
  0x81   : > { %1057 = vmatprep.mubr.bf16.mxu0 %v2216_v10 }
  0x83   : > { %1203 = vmatmul.mubr.bf16.gmra.mrb[40].mxu1 %v2209_v9 }
  0x84   : > { %1812 = vmatprep.mubr.msk.bf16.mxu1 %vm880_vm0, %v2213_v11 }
  0x88   : > { %1058 = vmatmul.mubr.bf16.gmra.mrb[48].mxu0 %v2218_v12 }
  0x89   : > { %1065 = vmatprep.mubr.bf16.mxu0 %v2222_v14 }
  0x8b   : > { %1211 = vmatmul.mubr.bf16.gmra.mrb[44].mxu1 %v2215_v13 }
  0x8c   : > { %1813 = vmatprep.mubr.msk.bf16.mxu1 %vm880_vm0, %v2219_v15 }
  0x90   : > { %1066 = vmatmul.mubr.bf16.gmra.mrb[52].mxu0 %v2224_v16 }
  0x91   : > { %1073 = vmatprep.mubr.bf16.mxu0 %v2228_v18 }
  0x93   : > { %1219 = vmatmul.mubr.bf16.gmra.mrb[48].mxu1 %v2221_v17 }
  0x94   : > { %1814 = vmatprep.mubr.msk.bf16.mxu1 %vm880_vm0, %v2225_v19 }
  0x98   : > { %1074 = vmatmul.mubr.bf16.gmra.mrb[56].mxu0 %v2230_v20 }
  0x99   : > { %1081 = vmatprep.mubr.bf16.mxu0 %v2234_v22 }
  0x9b   : > { %1227 = vmatmul.mubr.bf16.gmra.mrb[52].mxu1 %v2227_v21 }
  0x9c   : > { %1815 = vmatprep.mubr.msk.bf16.mxu1 %vm880_vm0, %v2231_v23 }
  0xa0   : > { %1082 = vmatmul.mubr.bf16.gmra.mrb[60].mxu0 %v2236_v24 }
  0xa3   : > { %1235 = vmatmul.mubr.bf16.gmra.mrb[56].mxu1 %v2233_v25 }
  0xa4   : > { %1816 = vmatprep.mubr.msk.bf16.mxu1 %vm880_vm0, %v2237_v26 }
  0xab   : > { %1243 = vmatmul.mubr.bf16.gmra.mrb[60].mxu1 %v2239_v27 }
  0xfb   : > { %v1996_v28 = vpop.f32.mrb[0].mxu0 }
  0xfc   : > { %v1997_v29 = vpop.f32.mrb[1].mxu0 }
  0xfd   : > { %v1998_v30 = vadd.f32 %v1997_v29, %v1996_v28  ;;  %v1999_v31 = vpop.f32.mrb[2].mxu0 }
  0xfe   : > { %v2000_v32 = vpop.f32.mrb[3].mxu0 }
  0xff   : > { %v2001_v33 = vadd.f32 %v2000_v32, %v1999_v31 }
 0x103   : > { %v2002_v34 = vpop.f32.mrb[4].mxu0 }
 0x104   : > { %v2003_v37 = vpop.f32.mrb[5].mxu0 }
 0x105   : > { %v2004_v40 = vadd.f32 %v2003_v37, %v2002_v34  ;;  %v2005_v41 = vpop.f32.mrb[6].mxu0 }
 0x106   : > { %v1124_v35 = vpop.f32.mrb[0].mxu1  ;;  %v2006_v43 = vpop.f32.mrb[7].mxu0 }
 0x107   : > { %v1125_v38 = vadd.f32 %v1998_v30, %v1124_v35  ;;  %v1126_v39 = vpop.f32.mrb[1].mxu1  ;;  %v2007_v47 = vadd.f32 %v2006_v43, %v2005_v41 }
 0x108   : > { %v1127_v42 = vpop.f32.mrb[2].mxu1 }
 0x109   : > { %v1357_v44 = vadd.f32 %v2489_v36, %v1125_v38  ;;  %v1128_v45 = vadd.f32 %v2001_v33, %v1127_v42  ;;  %v1129_v46 = vpop.f32.mrb[3].mxu1 }
 0x10b   : > { %v1389_v48 = vmul.f32 0.01, %v1357_v44  ;;  %v1358_v49 = vadd.f32 %v2489_v36, %v1128_v45  ;;  %v2008_v51 = vpop.f32.mrb[8].mxu0 }
 0x10c   : > { %v2009_v53 = vpop.f32.mrb[9].mxu0 }
 0x10d   : > { %v1390_v50 = vmul.f32 0.01, %v1358_v49  ;;  %v1421_v54 = vmax.f32 %v1357_v44, %v1389_v48  ;;  %v2010_v58 = vadd.f32 %v2009_v53, %v2008_v51  ;;  %v2011_v59 = vpop.f32.mrb[10].mxu0 }
 0x10e   : > { %v1132_v52 = vpop.f32.mrb[4].mxu1  ;;  %v2012_v61 = vpop.f32.mrb[11].mxu0 }
 0x10f   : > { %v1422_v55 = vmax.f32 %v1358_v49, %v1390_v50  ;;  %v1133_v56 = vadd.f32 %v2004_v40, %v1132_v52  ;;  %v1134_v57 = vpop.f32.mrb[5].mxu1  ;;  %v2013_v2 = vadd.f32 %v2012_v61, %v2011_v59 }
 0x110   : > { %v1135_v60 = vpop.f32.mrb[6].mxu1 }
 0x111   : > { %v1888_v62 = vpack.c.bf16 %v1422_v55, %v1421_v54  ;;  %v1359_v63 = vadd.f32 %v2489_v36, %v1133_v56  ;;  %v1136_v0 = vadd.f32 %v2007_v47, %v1135_v60  ;;  %v1137_v1 = vpop.f32.mrb[7].mxu1 }
 0x113   : > { %1889 = vst [vmem:[%s2497_s6] sm:$0xff] %v1888_v62   ;;  %v1391_v3 = vmul.f32 0.01, %v1359_v63  ;;  %v1360_v4 = vadd.f32 %v2489_v36, %v1136_v0  ;;  %v2014_v6 = vpop.f32.mrb[12].mxu0 }
 0x114   : > { %v2015_v8 = vpop.f32.mrb[13].mxu0 }
 0x115   : > { %v1392_v5 = vmul.f32 0.01, %v1360_v4  ;;  %v1423_v9 = vmax.f32 %v1359_v63, %v1391_v3  ;;  %v2016_v13 = vadd.f32 %v2015_v8, %v2014_v6  ;;  %v2017_v14 = vpop.f32.mrb[14].mxu0 }
 0x116   : > { %v1140_v7 = vpop.f32.mrb[8].mxu1  ;;  %v2018_v16 = vpop.f32.mrb[15].mxu0 }
 0x117   : > { %v1424_v10 = vmax.f32 %v1360_v4, %v1392_v5  ;;  %v1141_v11 = vadd.f32 %v2010_v58, %v1140_v7  ;;  %v1142_v12 = vpop.f32.mrb[9].mxu1  ;;  %v2019_v21 = vadd.f32 %v2018_v16, %v2017_v14 }
 0x118   : > { %v1143_v15 = vpop.f32.mrb[10].mxu1 }
 0x119   : > { %v1893_v17 = vpack.c.bf16 %v1424_v10, %v1423_v9  ;;  %v1361_v18 = vadd.f32 %v2489_v36, %v1141_v11  ;;  %v1144_v19 = vadd.f32 %v2013_v2, %v1143_v15  ;;  %v1145_v20 = vpop.f32.mrb[11].mxu1 }
 0x11b   : > { %1965 = vst [vmem:[%s2497_s6 + $0x8] sm:$0xff] %v1893_v17   ;;  %v1393_v22 = vmul.f32 0.01, %v1361_v18  ;;  %v1362_v23 = vadd.f32 %v2489_v36, %v1144_v19  ;;  %v2020_v25 = vpop.f32.mrb[16].mxu0 }
 0x11c   : > { %v2021_v27 = vpop.f32.mrb[17].mxu0 }
 0x11d   : > { %v1394_v24 = vmul.f32 0.01, %v1362_v23  ;;  %v1425_v28 = vmax.f32 %v1361_v18, %v1393_v22  ;;  %v2022_v32 = vadd.f32 %v2021_v27, %v2020_v25  ;;  %v2023_v33 = vpop.f32.mrb[18].mxu0 }
 0x11e   : > { %v1148_v26 = vpop.f32.mrb[12].mxu1  ;;  %v2024_v35 = vpop.f32.mrb[19].mxu0 }
 0x11f   : > { %v1426_v29 = vmax.f32 %v1362_v23, %v1394_v24  ;;  %v1149_v30 = vadd.f32 %v2016_v13, %v1148_v26  ;;  %v1150_v31 = vpop.f32.mrb[13].mxu1  ;;  %v2025_v41 = vadd.f32 %v2024_v35, %v2023_v33 }
 0x120   : > { %v1151_v34 = vpop.f32.mrb[14].mxu1 }
 0x121   : > { %v1898_v37 = vpack.c.bf16 %v1426_v29, %v1425_v28  ;;  %v1363_v38 = vadd.f32 %v2489_v36, %v1149_v30  ;;  %v1152_v39 = vadd.f32 %v2019_v21, %v1151_v34  ;;  %v1153_v40 = vpop.f32.mrb[15].mxu1 }
 0x123   : > { %1966 = vst [vmem:[%s2497_s6 + $0x10] sm:$0xff] %v1898_v37   ;;  %v1395_v42 = vmul.f32 0.01, %v1363_v38  ;;  %v1364_v43 = vadd.f32 %v2489_v36, %v1152_v39  ;;  %v2026_v45 = vpop.f32.mrb[20].mxu0 }
 0x124   : > { %v2027_v47 = vpop.f32.mrb[21].mxu0 }
 0x125   : > { %v1396_v44 = vmul.f32 0.01, %v1364_v43  ;;  %v1427_v48 = vmax.f32 %v1363_v38, %v1395_v42  ;;  %v2028_v52 = vadd.f32 %v2027_v47, %v2026_v45  ;;  %v2029_v53 = vpop.f32.mrb[22].mxu0 }
 0x126   : > { %v1156_v46 = vpop.f32.mrb[16].mxu1  ;;  %v2030_v55 = vpop.f32.mrb[23].mxu0 }
 0x127   : > { %v1428_v49 = vmax.f32 %v1364_v43, %v1396_v44  ;;  %v1157_v50 = vadd.f32 %v2022_v32, %v1156_v46  ;;  %v1158_v51 = vpop.f32.mrb[17].mxu1  ;;  %v2031_v60 = vadd.f32 %v2030_v55, %v2029_v53 }
 0x128   : > { %v1159_v54 = vpop.f32.mrb[18].mxu1 }
 0x129   : > { %v1903_v56 = vpack.c.bf16 %v1428_v49, %v1427_v48  ;;  %v1365_v57 = vadd.f32 %v2489_v36, %v1157_v50  ;;  %v1160_v58 = vadd.f32 %v2025_v41, %v1159_v54  ;;  %v1161_v59 = vpop.f32.mrb[19].mxu1 }
 0x12b   : > { %1967 = vst [vmem:[%s2497_s6 + $0x18] sm:$0xff] %v1903_v56   ;;  %v1397_v61 = vmul.f32 0.01, %v1365_v57  ;;  %v1366_v62 = vadd.f32 %v2489_v36, %v1160_v58  ;;  %v2032_v0 = vpop.f32.mrb[24].mxu0 }
 0x12c   : > { %v2033_v2 = vpop.f32.mrb[25].mxu0 }
 0x12d   : > { %v1398_v63 = vmul.f32 0.01, %v1366_v62  ;;  %v1429_v3 = vmax.f32 %v1365_v57, %v1397_v61  ;;  %v2034_v7 = vadd.f32 %v2033_v2, %v2032_v0  ;;  %v2035_v8 = vpop.f32.mrb[26].mxu0 }
 0x12e   : > { %v1164_v1 = vpop.f32.mrb[20].mxu1  ;;  %v2036_v10 = vpop.f32.mrb[27].mxu0 }
 0x12f   : > { %v1430_v4 = vmax.f32 %v1366_v62, %v1398_v63  ;;  %v1165_v5 = vadd.f32 %v2028_v52, %v1164_v1  ;;  %v1166_v6 = vpop.f32.mrb[21].mxu1  ;;  %v2037_v15 = vadd.f32 %v2036_v10, %v2035_v8 }
 0x130   : > { %v1167_v9 = vpop.f32.mrb[22].mxu1 }
 0x131   : > { %v1908_v11 = vpack.c.bf16 %v1430_v4, %v1429_v3  ;;  %v1367_v12 = vadd.f32 %v2489_v36, %v1165_v5  ;;  %v1168_v13 = vadd.f32 %v2031_v60, %v1167_v9  ;;  %v1169_v14 = vpop.f32.mrb[23].mxu1 }
 0x133   : > { %1968 = vst [vmem:[%s2497_s6 + $0x20] sm:$0xff] %v1908_v11   ;;  %v1399_v16 = vmul.f32 0.01, %v1367_v12  ;;  %v1368_v17 = vadd.f32 %v2489_v36, %v1168_v13  ;;  %v2038_v19 = vpop.f32.mrb[28].mxu0 }
 0x134   : > { %v2039_v21 = vpop.f32.mrb[29].mxu0 }
 0x135   : > { %v1400_v18 = vmul.f32 0.01, %v1368_v17  ;;  %v1431_v22 = vmax.f32 %v1367_v12, %v1399_v16  ;;  %v2040_v26 = vadd.f32 %v2039_v21, %v2038_v19  ;;  %v2041_v27 = vpop.f32.mrb[30].mxu0 }
 0x136   : > { %v1172_v20 = vpop.f32.mrb[24].mxu1  ;;  %v2042_v29 = vpop.f32.mrb[31].mxu0 }
 0x137   : > { %v1432_v23 = vmax.f32 %v1368_v17, %v1400_v18  ;;  %v1173_v24 = vadd.f32 %v2034_v7, %v1172_v20  ;;  %v1174_v25 = vpop.f32.mrb[25].mxu1  ;;  %v2043_v34 = vadd.f32 %v2042_v29, %v2041_v27 }
 0x138   : > { %v1175_v28 = vpop.f32.mrb[26].mxu1 }
 0x139   : > { %v1913_v30 = vpack.c.bf16 %v1432_v23, %v1431_v22  ;;  %v1369_v31 = vadd.f32 %v2489_v36, %v1173_v24  ;;  %v1176_v32 = vadd.f32 %v2037_v15, %v1175_v28  ;;  %v1177_v33 = vpop.f32.mrb[27].mxu1 }
 0x13b   : > { %1969 = vst [vmem:[%s2497_s6 + $0x28] sm:$0xff] %v1913_v30   ;;  %v1401_v35 = vmul.f32 0.01, %v1369_v31  ;;  %v1370_v37 = vadd.f32 %v2489_v36, %v1176_v32  ;;  %v2044_v39 = vpop.f32.mrb[32].mxu0 }
 0x13c   : > { %v2045_v41 = vpop.f32.mrb[33].mxu0 }
 0x13d   : > { %v1402_v38 = vmul.f32 0.01, %v1370_v37  ;;  %v1433_v42 = vmax.f32 %v1369_v31, %v1401_v35  ;;  %v2046_v46 = vadd.f32 %v2045_v41, %v2044_v39  ;;  %v2047_v47 = vpop.f32.mrb[34].mxu0 }
 0x13e   : > { %v1180_v40 = vpop.f32.mrb[28].mxu1  ;;  %v2048_v49 = vpop.f32.mrb[35].mxu0 }
 0x13f   : > { %v1434_v43 = vmax.f32 %v1370_v37, %v1402_v38  ;;  %v1181_v44 = vadd.f32 %v2040_v26, %v1180_v40  ;;  %v1182_v45 = vpop.f32.mrb[29].mxu1  ;;  %v2049_v54 = vadd.f32 %v2048_v49, %v2047_v47 }
 0x140   : > { %v1183_v48 = vpop.f32.mrb[30].mxu1 }
 0x141   : > { %v1918_v50 = vpack.c.bf16 %v1434_v43, %v1433_v42  ;;  %v1371_v51 = vadd.f32 %v2489_v36, %v1181_v44  ;;  %v1184_v52 = vadd.f32 %v2043_v34, %v1183_v48  ;;  %v1185_v53 = vpop.f32.mrb[31].mxu1 }
 0x143   : > { %1970 = vst [vmem:[%s2497_s6 + $0x30] sm:$0xff] %v1918_v50   ;;  %v1403_v55 = vmul.f32 0.01, %v1371_v51  ;;  %v1372_v56 = vadd.f32 %v2489_v36, %v1184_v52  ;;  %v2050_v58 = vpop.f32.mrb[36].mxu0 }
 0x144   : > { %v2051_v60 = vpop.f32.mrb[37].mxu0 }
 0x145   : > { %v1404_v57 = vmul.f32 0.01, %v1372_v56  ;;  %v1435_v61 = vmax.f32 %v1371_v51, %v1403_v55  ;;  %v2052_v1 = vadd.f32 %v2051_v60, %v2050_v58  ;;  %v2053_v2 = vpop.f32.mrb[38].mxu0 }
 0x146   : > { %v1188_v59 = vpop.f32.mrb[32].mxu1  ;;  %v2054_v4 = vpop.f32.mrb[39].mxu0 }
 0x147   : > { %v1436_v62 = vmax.f32 %v1372_v56, %v1404_v57  ;;  %v1189_v63 = vadd.f32 %v2046_v46, %v1188_v59  ;;  %v1190_v0 = vpop.f32.mrb[33].mxu1  ;;  %v2055_v9 = vadd.f32 %v2054_v4, %v2053_v2 }
 0x148   : > { %v1191_v3 = vpop.f32.mrb[34].mxu1 }
 0x149   : > { %v1923_v5 = vpack.c.bf16 %v1436_v62, %v1435_v61  ;;  %v1373_v6 = vadd.f32 %v2489_v36, %v1189_v63  ;;  %v1192_v7 = vadd.f32 %v2049_v54, %v1191_v3  ;;  %v1193_v8 = vpop.f32.mrb[35].mxu1 }
 0x14b   : > { %1971 = vst [vmem:[%s2497_s6 + $0x38] sm:$0xff] %v1923_v5   ;;  %v1405_v10 = vmul.f32 0.01, %v1373_v6  ;;  %v1374_v11 = vadd.f32 %v2489_v36, %v1192_v7  ;;  %v2056_v13 = vpop.f32.mrb[40].mxu0 }
 0x14c   : > { %v2057_v15 = vpop.f32.mrb[41].mxu0 }
 0x14d   : > { %v1406_v12 = vmul.f32 0.01, %v1374_v11  ;;  %v1437_v16 = vmax.f32 %v1373_v6, %v1405_v10  ;;  %v2058_v20 = vadd.f32 %v2057_v15, %v2056_v13  ;;  %v2059_v21 = vpop.f32.mrb[42].mxu0 }
 0x14e   : > { %v1196_v14 = vpop.f32.mrb[36].mxu1  ;;  %v2060_v23 = vpop.f32.mrb[43].mxu0 }
 0x14f   : > { %v1438_v17 = vmax.f32 %v1374_v11, %v1406_v12  ;;  %v1197_v18 = vadd.f32 %v2052_v1, %v1196_v14  ;;  %v1198_v19 = vpop.f32.mrb[37].mxu1  ;;  %v2061_v28 = vadd.f32 %v2060_v23, %v2059_v21 }
 0x150   : > { %v1199_v22 = vpop.f32.mrb[38].mxu1 }
 0x151   : > { %v1928_v24 = vpack.c.bf16 %v1438_v17, %v1437_v16  ;;  %v1375_v25 = vadd.f32 %v2489_v36, %v1197_v18  ;;  %v1200_v26 = vadd.f32 %v2055_v9, %v1199_v22  ;;  %v1201_v27 = vpop.f32.mrb[39].mxu1 }
 0x153   : > { %1972 = vst [vmem:[%s2497_s6 + $0x40] sm:$0xff] %v1928_v24   ;;  %v1407_v29 = vmul.f32 0.01, %v1375_v25  ;;  %v1376_v30 = vadd.f32 %v2489_v36, %v1200_v26  ;;  %v2062_v32 = vpop.f32.mrb[44].mxu0 }
 0x154   : > { %v2063_v34 = vpop.f32.mrb[45].mxu0 }
 0x155   : > { %v1408_v31 = vmul.f32 0.01, %v1376_v30  ;;  %v1439_v35 = vmax.f32 %v1375_v25, %v1407_v29  ;;  %v2064_v40 = vadd.f32 %v2063_v34, %v2062_v32  ;;  %v2065_v41 = vpop.f32.mrb[46].mxu0 }
 0x156   : > { %v1204_v33 = vpop.f32.mrb[40].mxu1  ;;  %v2066_v43 = vpop.f32.mrb[47].mxu0 }
 0x157   : > { %v1440_v37 = vmax.f32 %v1376_v30, %v1408_v31  ;;  %v1205_v38 = vadd.f32 %v2058_v20, %v1204_v33  ;;  %v1206_v39 = vpop.f32.mrb[41].mxu1  ;;  %v2067_v48 = vadd.f32 %v2066_v43, %v2065_v41 }
 0x158   : > { %v1207_v42 = vpop.f32.mrb[42].mxu1 }
 0x159   : > { %v1933_v44 = vpack.c.bf16 %v1440_v37, %v1439_v35  ;;  %v1377_v45 = vadd.f32 %v2489_v36, %v1205_v38  ;;  %v1208_v46 = vadd.f32 %v2061_v28, %v1207_v42  ;;  %v1209_v47 = vpop.f32.mrb[43].mxu1 }
 0x15b   : > { %1973 = vst [vmem:[%s2497_s6 + $0x48] sm:$0xff] %v1933_v44   ;;  %v1409_v49 = vmul.f32 0.01, %v1377_v45  ;;  %v1378_v50 = vadd.f32 %v2489_v36, %v1208_v46  ;;  %v2068_v52 = vpop.f32.mrb[48].mxu0 }
 0x15c   : > { %v2069_v54 = vpop.f32.mrb[49].mxu0 }
 0x15d   : > { %v1410_v51 = vmul.f32 0.01, %v1378_v50  ;;  %v1441_v55 = vmax.f32 %v1377_v45, %v1409_v49  ;;  %v2070_v59 = vadd.f32 %v2069_v54, %v2068_v52  ;;  %v2071_v60 = vpop.f32.mrb[50].mxu0 }
 0x15e   : > { %v1212_v53 = vpop.f32.mrb[44].mxu1  ;;  %v2072_v62 = vpop.f32.mrb[51].mxu0 }
 0x15f   : > { %v1442_v56 = vmax.f32 %v1378_v50, %v1410_v51  ;;  %v1213_v57 = vadd.f32 %v2064_v40, %v1212_v53  ;;  %v1214_v58 = vpop.f32.mrb[45].mxu1  ;;  %v2073_v3 = vadd.f32 %v2072_v62, %v2071_v60 }
 0x160   : > { %v1215_v61 = vpop.f32.mrb[46].mxu1 }
 0x161   : > { %v1938_v63 = vpack.c.bf16 %v1442_v56, %v1441_v55  ;;  %v1379_v0 = vadd.f32 %v2489_v36, %v1213_v57  ;;  %v1216_v1 = vadd.f32 %v2067_v48, %v1215_v61  ;;  %v1217_v2 = vpop.f32.mrb[47].mxu1 }
 0x163   : > { %1974 = vst [vmem:[%s2497_s6 + $0x50] sm:$0xff] %v1938_v63   ;;  %v1411_v4 = vmul.f32 0.01, %v1379_v0  ;;  %v1380_v5 = vadd.f32 %v2489_v36, %v1216_v1  ;;  %v2074_v7 = vpop.f32.mrb[52].mxu0 }
 0x164   : > { %v2075_v9 = vpop.f32.mrb[53].mxu0 }
 0x165   : > { %v1412_v6 = vmul.f32 0.01, %v1380_v5  ;;  %v1443_v10 = vmax.f32 %v1379_v0, %v1411_v4  ;;  %v2076_v14 = vadd.f32 %v2075_v9, %v2074_v7  ;;  %v2077_v15 = vpop.f32.mrb[54].mxu0 }
 0x166   : > { %v1220_v8 = vpop.f32.mrb[48].mxu1  ;;  %v2078_v17 = vpop.f32.mrb[55].mxu0 }
 0x167   : > { %v1444_v11 = vmax.f32 %v1380_v5, %v1412_v6  ;;  %v1221_v12 = vadd.f32 %v2070_v59, %v1220_v8  ;;  %v1222_v13 = vpop.f32.mrb[49].mxu1  ;;  %v2079_v22 = vadd.f32 %v2078_v17, %v2077_v15 }
 0x168   : > { %v1223_v16 = vpop.f32.mrb[50].mxu1 }
 0x169   : > { %v1943_v18 = vpack.c.bf16 %v1444_v11, %v1443_v10  ;;  %v1381_v19 = vadd.f32 %v2489_v36, %v1221_v12  ;;  %v1224_v20 = vadd.f32 %v2073_v3, %v1223_v16  ;;  %v1225_v21 = vpop.f32.mrb[51].mxu1 }
 0x16b   : > { %1975 = vst [vmem:[%s2497_s6 + $0x58] sm:$0xff] %v1943_v18   ;;  %v1413_v23 = vmul.f32 0.01, %v1381_v19  ;;  %v1382_v24 = vadd.f32 %v2489_v36, %v1224_v20  ;;  %v2080_v26 = vpop.f32.mrb[56].mxu0 }
 0x16c   : > { %v2081_v28 = vpop.f32.mrb[57].mxu0 }
 0x16d   : > { %v1414_v25 = vmul.f32 0.01, %v1382_v24  ;;  %v1445_v29 = vmax.f32 %v1381_v19, %v1413_v23  ;;  %v2082_v33 = vadd.f32 %v2081_v28, %v2080_v26  ;;  %v2083_v34 = vpop.f32.mrb[58].mxu0 }
 0x16e   : > { %v1228_v27 = vpop.f32.mrb[52].mxu1  ;;  %v2084_v37 = vpop.f32.mrb[59].mxu0 }
 0x16f   : > { %v1446_v30 = vmax.f32 %v1382_v24, %v1414_v25  ;;  %v1229_v31 = vadd.f32 %v2076_v14, %v1228_v27  ;;  %v1230_v32 = vpop.f32.mrb[53].mxu1  ;;  %v2085_v42 = vadd.f32 %v2084_v37, %v2083_v34 }
 0x170   : > { %v1231_v35 = vpop.f32.mrb[54].mxu1 }
 0x171   : > { %v1948_v38 = vpack.c.bf16 %v1446_v30, %v1445_v29  ;;  %v1383_v39 = vadd.f32 %v2489_v36, %v1229_v31  ;;  %v1232_v40 = vadd.f32 %v2079_v22, %v1231_v35  ;;  %v1233_v41 = vpop.f32.mrb[55].mxu1 }
 0x173   : > { %1976 = vst [vmem:[%s2497_s6 + $0x60] sm:$0xff] %v1948_v38   ;;  %v1415_v43 = vmul.f32 0.01, %v1383_v39  ;;  %v1384_v44 = vadd.f32 %v2489_v36, %v1232_v40  ;;  %v2086_v46 = vpop.f32.mrb[60].mxu0 }
 0x174   : > { %v2087_v48 = vpop.f32.mrb[61].mxu0 }
 0x175   : > { %v1416_v45 = vmul.f32 0.01, %v1384_v44  ;;  %v1447_v49 = vmax.f32 %v1383_v39, %v1415_v43  ;;  %v2088_v53 = vadd.f32 %v2087_v48, %v2086_v46  ;;  %v2089_v54 = vpop.f32.mrb[62].mxu0 }
 0x176   : > { %v1236_v47 = vpop.f32.mrb[56].mxu1  ;;  %v2090_v56 = vpop.f32.mrb[63].mxu0 }
 0x177   : > { %v1448_v50 = vmax.f32 %v1384_v44, %v1416_v45  ;;  %v1237_v51 = vadd.f32 %v2082_v33, %v1236_v47  ;;  %v1238_v52 = vpop.f32.mrb[57].mxu1  ;;  %v2091_v61 = vadd.f32 %v2090_v56, %v2089_v54 }
 0x178   : > { %v1239_v55 = vpop.f32.mrb[58].mxu1 }
 0x179   : > { %v1953_v57 = vpack.c.bf16 %v1448_v50, %v1447_v49  ;;  %v1385_v58 = vadd.f32 %v2489_v36, %v1237_v51  ;;  %v1240_v59 = vadd.f32 %v2085_v42, %v1239_v55  ;;  %v1241_v60 = vpop.f32.mrb[59].mxu1 }
 0x17b   : > { %1977 = vst [vmem:[%s2497_s6 + $0x68] sm:$0xff] %v1953_v57   ;;  %v1417_v62 = vmul.f32 0.01, %v1385_v58  ;;  %v1386_v63 = vadd.f32 %v2489_v36, %v1240_v59 }
 0x17d   : > { %v1418_v0 = vmul.f32 0.01, %v1386_v63  ;;  %v1449_v2 = vmax.f32 %v1385_v58, %v1417_v62 }
 0x17e   : > { %v1244_v1 = vpop.f32.mrb[60].mxu1 }
 0x17f   : > { %v1450_v3 = vmax.f32 %v1386_v63, %v1418_v0  ;;  %v1245_v4 = vadd.f32 %v2088_v53, %v1244_v1  ;;  %v1246_v5 = vpop.f32.mrb[61].mxu1 }
 0x180   : > { %v1247_v6 = vpop.f32.mrb[62].mxu1 }
 0x181   : > { %v1958_v7 = vpack.c.bf16 %v1450_v3, %v1449_v2  ;;  %v1387_v8 = vadd.f32 %v2489_v36, %v1245_v4  ;;  %v1248_v9 = vadd.f32 %v2091_v61, %v1247_v6  ;;  %v1249_v10 = vpop.f32.mrb[63].mxu1 }
 0x183   : > { %1978 = vst [vmem:[%s2497_s6 + $0x70] sm:$0xff] %v1958_v7   ;;  %v1419_v11 = vmul.f32 0.01, %v1387_v8  ;;  %v1388_v12 = vadd.f32 %v2489_v36, %v1248_v9 }
 0x185   : > { %v1420_v13 = vmul.f32 0.01, %v1388_v12  ;;  %v1451_v14 = vmax.f32 %v1387_v8, %v1419_v11 }
 0x187   : > { %v1452_v15 = vmax.f32 %v1388_v12, %v1420_v13 }
 0x189   : > { %v1963_v16 = vpack.c.bf16 %v1452_v15, %v1451_v14 }
 0x18b   : > { %1979 = vst [vmem:[%s2497_s6 + $0x78] sm:$0xff] %v1963_v16  }
 0x18c PF: > { %s13_s14 = sadd.s32 1, %s2262_s14   ;;  %s2558_s12 = smov %s2258_s13 }
 0x18d   : > { %p10_p5 = scmp.ge.s32.totalorder %s13_s14, 4   ;;  %s2559_s13 = smov %s2561_s15 }
 0x18f   :  { %12 = sbr.rel (!%p10_p5) target bundleno = 2 (0x2), region = 73 }

// kernel: conv_residual_decoder_block_3d.9
= control target key start
LH: loop header
LB: loop body
LE: loop exit
PB: predicated region body
PF: predicated region fallthrough
CT: control target
= control target key end

     0   :  { %s10595_s15 = smov 0   ;;  %s10597_s16 = smov 0   ;;  %s13038_s0 = inlined_call_operand.vmem [shape: bf16[512,3456], index: 0, kind: input, shape index: {}]   ;;  %s13039_s1 = inlined_call_operand.vmem [shape: bf16[3456,128], index: 1, kind: input, shape index: {}]   ;;  %s13040_s2 = inlined_call_operand.vmem [shape: f32[1,128], index: 2, kind: input, shape index: {}]   ;;  %s13041_s3 = inlined_call_operand.vmem [shape: bf16[512,128], index: 3, kind: input, shape index: {}]   ;;  %s13042_s4 = inlined_call_operand.vmem [shape: f32[512,128], index: 4, kind: output, shape index: {}]  }
   0x1   :  { %s10599_s17 = smov 0  }
   0x2 LB: > { %s26_s18 = sadd.s32 1, %s10564_s16  ;;  %p7384_p0 = scmp.ge.s32.totalorder %s10568_s17, 1  ;;  %s10568_s17 = sphi %s10599_s17, %s14_s17   ;;  %s10564_s16 = sphi %s10597_s16, %s13044_s16   ;;  %s10560_s15 = sphi %s10595_s15, %s13043_s15  }
   0x3   : > { %p28_p1 = scmp.ge.s32.totalorder %s26_s18, 2  ;;  %p205_p2 = scmp.lt.s32.totalorder %s10568_s17, 3 }
   0x5   : > { %s13046_s18 = smov (%p28_p1, %s26_s18), 0  ;;  %p206_p3 = pnand %p7384_p0, %p205_p2 }
   0x6   : > { %v9690_v0 = vld [vmem:[%s13039_s1 + $0x40] sm:$0xff] (!%p206_p3)   ;;  %s7385_s21 = sshll.u32 (!%p206_p3), %s10560_s15, 5  ;;  %v9692_v2 = vld [vmem:[%s13039_s1 + $0x48] sm:$0xff] (!%p206_p3)   ;;  %v9694_v4 = vld [vmem:[%s13039_s1 + $0x50] sm:$0xff] (!%p206_p3)  }
   0x7   : > { %209 = sbr.rel (%p206_p3) target bundleno = 1125 (0x465), region = 36  ;;  %v9691_v1 = vld [vmem:[%s13039_s1] sm:$0xff] (!%p206_p3)   ;;  %8121 = vmatprep.subr.bf16.mxu0 (!%p206_p3), %v9690_v0  ;;  %9649 = vmatprep.subr.bf16.mxu1 (!%p206_p3), %v9690_v0  ;;  %p248_p4 = scmp.lt.s32.totalorder (!%p206_p3), %s7385_s21, 63  ;;  %v9693_v3 = vld [vmem:[%s13039_s1 + $0x8] sm:$0xff] (!%p206_p3)   ;;  %v9695_v5 = vld [vmem:[%s13039_s1 + $0x10] sm:$0xff] (!%p206_p3)  }
   0x8   : > { %8122 = vmatpush3.bf16.msra.mxu0 (!%p206_p3), %v9691_v1  ;;  %9657 = vmatpush3.bf16.msra.mxu1 (!%p206_p3), %v9691_v1  ;;  %v9696_v6 = vld [vmem:[%s13039_s1 + $0x58] sm:$0xff] (!%p206_p3)   ;;  %v9698_v8 = vld [vmem:[%s13039_s1 + $0x60] sm:$0xff] (!%p206_p3)   ;;  %v9700_v10 = vld [vmem:[%s13039_s1 + $0x68] sm:$0xff] (!%p206_p3)  }
   0x9   : > { %8123 = vmatprep.subr.bf16.mxu0 (!%p206_p3), %v9692_v2  ;;  %9650 = vmatprep.subr.bf16.mxu1 (!%p206_p3), %v9692_v2  ;;  %v9697_v7 = vld [vmem:[%s13039_s1 + $0x18] sm:$0xff] (!%p206_p3)   ;;  %v9699_v9 = vld [vmem:[%s13039_s1 + $0x20] sm:$0xff] (!%p206_p3)   ;;  %v9701_v13 = vld [vmem:[%s13039_s1 + $0x28] sm:$0xff] (!%p206_p3)  }
   0xa   : > { %v9702_v14 = vld [vmem:[%s13039_s1 + $0x70] sm:$0xff] (!%p206_p3)   ;;  %v9704_v16 = vld [vmem:[%s13039_s1 + $0x78] sm:$0xff] (!%p206_p3)   ;;  %v9712_v18 = vld [vmem:[%s13039_s1 + $0xc0] sm:$0xff] (!%p206_p3)  }
   0xb   : > { %v9703_v15 = vld [vmem:[%s13039_s1 + $0x30] sm:$0xff] (!%p206_p3)   ;;  %v9705_v17 = vld [vmem:[%s13039_s1 + $0x38] sm:$0xff] (!%p206_p3)   ;;  %v9713_v21 = vld [vmem:[%s13039_s1 + $0x140] sm:$0xff] (!%p206_p3)  }
   0xc   : > { %8124 = vmatpush3.bf16.msra.mxu0 (!%p206_p3), %v9693_v3  ;;  %9658 = vmatpush3.bf16.msra.mxu1 (!%p206_p3), %v9693_v3  ;;  %v9714_v22 = vld [vmem:[%s13039_s1 + $0x80] sm:$0xff] (!%p206_p3)   ;;  %v9716_v24 = vld [vmem:[%s13039_s1 + $0xc8] sm:$0xff] (!%p206_p3)   ;;  %v9724_v32 = vld [vmem:[%s13039_s1 + $0xd0] sm:$0xff] (!%p206_p3)  }
   0xd   : > { %8125 = vmatprep.subr.bf16.mxu0 (!%p206_p3), %v9694_v4  ;;  %9651 = vmatprep.subr.bf16.mxu1 (!%p206_p3), %v9694_v4  ;;  %v9715_v23 = vld [vmem:[%s13039_s1 + $0x100] sm:$0xff] (!%p206_p3)   ;;  %v9727_v27 = vld [vmem:[%s13039_s1 + $0x148] sm:$0xff] (!%p206_p3)   ;;  %v9725_v33 = vld [vmem:[%s13039_s1 + $0x90] sm:$0xff] (!%p206_p3)  }
   0xe   : > { %s13048_s21 = smov (!%p248_p4, %s7385_s21), 63  ;;  %v9717_v28 = vld [vmem:[%s13039_s1 + $0x88] sm:$0xff]   ;;  %v9726_v34 = vld [vmem:[%s13039_s1 + $0xd8] sm:$0xff]   ;;  %v9736_v38 = vld [vmem:[%s13039_s1 + $0xe0] sm:$0xff]  }
   0xf   : > { %s9665_s8 = smul.u32 108, %s13048_s21  ;;  %v9729_v29 = vld [vmem:[%s13039_s1 + $0x108] sm:$0xff]   ;;  %v9728_v37 = vld [vmem:[%s13039_s1 + $0x98] sm:$0xff]   ;;  %v9747_v41 = vld [vmem:[%s13039_s1 + $0x150] sm:$0xff]   ;;  %s7390_s14 = sshll.u32 %s13048_s21, 3 }
  0x10   : > { %8126 = vmatpush3.bf16.msra.mxu0 %v9695_v5  ;;  %9659 = vmatpush3.bf16.msra.mxu1 %v9695_v5  ;;  %v9737_v42 = vld [vmem:[%s13039_s1 + $0xa0] sm:$0xff]   ;;  %v9738_v43 = vld [vmem:[%s13039_s1 + $0xe8] sm:$0xff]   ;;  %v9749_v44 = vld [vmem:[%s13039_s1 + $0x110] sm:$0xff]   ;;  %s12904_s22 = scalar_lea.vmem %s13042_s4, %s7390_s14 }
  0x11   : > { %8127 = vmatprep.subr.bf16.mxu0 %v9696_v6  ;;  %9652 = vmatprep.subr.bf16.mxu1 %v9696_v6  ;;  %s10646_s15 = scalar_lea.vmem %s13038_s0, %s9665_s8  ;;  %v9739_v47 = vld [vmem:[%s13039_s1 + $0xa8] sm:$0xff]   ;;  %v9746_v48 = vld [vmem:[%s13039_s1 + $0xf0] sm:$0xff]   ;;  %v9758_v51 = vld [vmem:[%s13039_s1 + $0x158] sm:$0xff]  }
  0x12   : > { %v9708_v11 = vld [vmem:[%s10646_s15 + $0x4] ss:$108 sps:$4 sm:$0xff]   ;;  %v9706_v19 = vld [vmem:[%s10646_s15] ss:$108 sps:$4 sm:$0xff]   ;;  %v9718_v25 = vld [vmem:[%s10646_s15 + $0xdc] ss:$108 sps:$4 sm:$0xff]  }
  0x13   : > { %v9711_v12 = vld [vmem:[%s10646_s15 + $0xa24] ss:$108 sps:$4 sm:$0xff]   ;;  %4729 = vmatprep.mubr.bf16.mxu0 %v9708_v11  ;;  %v9709_v20 = vld [vmem:[%s10646_s15 + $0xa20] ss:$108 sps:$4 sm:$0xff]   ;;  %v9720_v26 = vld [vmem:[%s10646_s15 + $0xafc] ss:$108 sps:$4 sm:$0xff]  }
  0x14   : > { %8128 = vmatpush3.bf16.msra.mxu0 %v9697_v7  ;;  %9660 = vmatpush3.bf16.msra.mxu1 %v9697_v7  ;;  %v9722_v30 = vld [vmem:[%s10646_s15 + $0xd8] ss:$108 sps:$4 sm:$0xff]   ;;  %v9730_v35 = vld [vmem:[%s10646_s15 + $0x1b4] ss:$108 sps:$4 sm:$0xff]   ;;  %v9734_v39 = vld [vmem:[%s10646_s15 + $0x1b0] ss:$108 sps:$4 sm:$0xff]  }
  0x15   : > { %8129 = vmatprep.subr.bf16.mxu0 %v9698_v8  ;;  %9653 = vmatprep.subr.bf16.mxu1 %v9698_v8  ;;  %v9723_v31 = vld [vmem:[%s10646_s15 + $0xaf8] ss:$108 sps:$4 sm:$0xff]   ;;  %v9732_v36 = vld [vmem:[%s10646_s15 + $0xbd4] ss:$108 sps:$4 sm:$0xff]   ;;  %v9735_v40 = vld [vmem:[%s10646_s15 + $0xbd0] ss:$108 sps:$4 sm:$0xff]  }
  0x16   : > { %4825 = vmatprep.mubr.bf16.mxu1 %v9711_v12  ;;  %v9740_v45 = vld [vmem:[%s10646_s15 + $0x28c] ss:$108 sps:$4 sm:$0xff]   ;;  %v9744_v49 = vld [vmem:[%s10646_s15 + $0x288] ss:$108 sps:$4 sm:$0xff]   ;;  %v9752_v55 = vld [vmem:[%s10646_s15 + $0x364] ss:$108 sps:$4 sm:$0xff]  }
  0x17   : > { %v9742_v46 = vld [vmem:[%s10646_s15 + $0xcac] ss:$108 sps:$4 sm:$0xff]   ;;  %v9745_v50 = vld [vmem:[%s10646_s15 + $0xca8] ss:$108 sps:$4 sm:$0xff]   ;;  %v9759_v60 = vld [vmem:[%s13039_s1 + $0x1c0] sm:$0xff]  }
  0x18   : > { %8130 = vmatpush3.bf16.msra.mxu0 %v9699_v9  ;;  %9661 = vmatpush3.bf16.msra.mxu1 %v9699_v9  ;;  %v9748_v52 = vld [vmem:[%s13039_s1 + $0xb0] sm:$0xff]   ;;  %v9750_v53 = vld [vmem:[%s13039_s1 + $0xf8] sm:$0xff]   ;;  %v9757_v59 = vld [vmem:[%s10646_s15 + $0x360] ss:$108 sps:$4 sm:$0xff]  }
  0x19   : > { %8131 = vmatprep.subr.bf16.mxu0 %v9700_v10  ;;  %9654 = vmatprep.subr.bf16.mxu1 %v9700_v10  ;;  %v9760_v54 = vld [vmem:[%s13039_s1 + $0x118] sm:$0xff]   ;;  %v9754_v58 = vld [vmem:[%s10646_s15 + $0x8] ss:$108 sps:$4 sm:$0xff]   ;;  %v9761_v61 = vld [vmem:[%s13039_s1 + $0x180] sm:$0xff]  }
  0x1a   : > { %v9756_v56 = vld [vmem:[%s10646_s15 + $0xc] ss:$108 sps:$4 sm:$0xff]   ;;  %v9762_v62 = vld [vmem:[%s10646_s15 + $0x43c] ss:$108 sps:$4 sm:$0xff]   ;;  %v9774_v63 = vld [vmem:[%s13039_s1 + $0x160] sm:$0xff]  }
  0x1b   : > { %v9751_v57 = vld [vmem:[%s13039_s1 + $0xb8] sm:$0xff]   ;;  %v9775_v0 = vld [vmem:[%s13039_s1 + $0x120] sm:$0xff]   ;;  %v9776_v2 = vld [vmem:[%s13039_s1 + $0x1c8] sm:$0xff]  }
  0x1c   : > { %8132 = vmatpush3.bf16.msra.mxu0 %v9701_v13  ;;  %9662 = vmatpush3.bf16.msra.mxu1 %v9701_v13  ;;  %v9764_v1 = vld [vmem:[%s10646_s15 + $0xe4] ss:$108 sps:$4 sm:$0xff]   ;;  %v9777_v3 = vld [vmem:[%s13039_s1 + $0x188] sm:$0xff]   ;;  %v9768_v8 = vld [vmem:[%s10646_s15 + $0x514] ss:$108 sps:$4 sm:$0xff]  }
  0x1d   : > { %8133 = vmatprep.subr.bf16.mxu0 %v9702_v14  ;;  %9655 = vmatprep.subr.bf16.mxu1 %v9702_v14  ;;  %v9766_v4 = vld [vmem:[%s10646_s15 + $0x438] ss:$108 sps:$4 sm:$0xff]   ;;  %v9784_v5 = vld [vmem:[%s13039_s1 + $0x168] sm:$0xff]   ;;  %v9792_v10 = vld [vmem:[%s13039_s1 + $0x1d0] sm:$0xff]  }
  0x1e   : > { %v9785_v6 = vld [vmem:[%s13039_s1 + $0x128] sm:$0xff]   ;;  %v9793_v11 = vld [vmem:[%s13039_s1 + $0x190] sm:$0xff]   ;;  %v9773_v13 = vld [vmem:[%s10646_s15 + $0x1b8] ss:$108 sps:$4 sm:$0xff]  }
  0x1f   : > { %v9767_v7 = vld [vmem:[%s10646_s15 + $0xe0] ss:$108 sps:$4 sm:$0xff]   ;;  %v9770_v9 = vld [vmem:[%s10646_s15 + $0x1bc] ss:$108 sps:$4 sm:$0xff]  }
  0x20   : > { %8134 = vmatpush3.bf16.msra.mxu0 %v9703_v15  ;;  %9663 = vmatpush3.bf16.msra.mxu1 %v9703_v15  ;;  %v9772_v12 = vld [vmem:[%s10646_s15 + $0x510] ss:$108 sps:$4 sm:$0xff]   ;;  %v9778_v14 = vld [vmem:[%s10646_s15 + $0x5ec] ss:$108 sps:$4 sm:$0xff]  }
  0x21   : > { %8135 = vmatprep.subr.bf16.mxu0 %v9704_v16  ;;  %9656 = vmatprep.subr.bf16.mxu1 %v9704_v16  ;;  %v9800_v15 = vld [vmem:[%s13039_s1 + $0x170] sm:$0xff]  }
  0x22   : > { %v9801_v16 = vld [vmem:[%s13039_s1 + $0x130] sm:$0xff]  }
  0x24   : > { %8136 = vmatpush3.bf16.msra.mxu0 %v9705_v17  ;;  %9664 = vmatpush3.bf16.msra.mxu1 %v9705_v17  ;;  %v9780_v17 = vld [vmem:[%s10646_s15 + $0x294] ss:$108 sps:$4 sm:$0xff]  }
  0x25   : > { %8233 = vmatprep.subr.bf16.mxu1 %v9712_v18  ;;  %8345 = vmatprep.subr.bf16.mxu0 %v9713_v21  ;;  %v9808_v18 = vld [vmem:[%s13039_s1 + $0x178] sm:$0xff]  }
  0x26   : > { %v9810_v21 = vld [vmem:[%s13039_s1 + $0x138] sm:$0xff]  }
  0x27   : > { %4730 = vmatmul.mubr.bf16.vlgmr.msra.gmra.mrb[0].mxu0 %v9706_v19  ;;  %4826 = vmatmul.mubr.bf16.vlgmr.msra.gmra.mrb[0].mxu1 %v9709_v20  ;;  %v9809_v19 = vld [vmem:[%s13039_s1 + $0x1d8] sm:$0xff]   ;;  %v9782_v20 = vld [vmem:[%s10646_s15 + $0x5e8] ss:$108 sps:$4 sm:$0xff]  }
  0x28   : > { %8234 = vmatpush3.bf16.msra.mxu1 %v9714_v22  ;;  %8346 = vmatpush3.bf16.msra.mxu0 %v9715_v23  ;;  %v9811_v22 = vld [vmem:[%s13039_s1 + $0x198] sm:$0xff]  }
  0x29   : > { %8235 = vmatprep.subr.bf16.mxu1 %v9716_v24  ;;  %4737 = vmatprep.mubr.bf16.mxu0 %v9718_v25  ;;  %v9783_v23 = vld [vmem:[%s10646_s15 + $0x290] ss:$108 sps:$4 sm:$0xff]   ;;  %v9788_v25 = vld [vmem:[%s10646_s15 + $0x36c] ss:$108 sps:$4 sm:$0xff]  }
  0x2a   : > { %4833 = vmatprep.mubr.bf16.mxu1 %v9720_v26  ;;  %8347 = vmatprep.subr.bf16.mxu0 %v9727_v27  ;;  %v9786_v24 = vld [vmem:[%s10646_s15 + $0x6c4] ss:$108 sps:$4 sm:$0xff]   ;;  %v9790_v27 = vld [vmem:[%s10646_s15 + $0x6c0] ss:$108 sps:$4 sm:$0xff]  }
  0x2b   : > { %v9824_v26 = vld [vmem:[%s13039_s1 + $0x240] sm:$0xff]  }
  0x2c   : > { %8236 = vmatpush3.bf16.msra.mxu1 %v9717_v28  ;;  %8348 = vmatpush3.bf16.msra.mxu0 %v9729_v29  ;;  %v9791_v28 = vld [vmem:[%s10646_s15 + $0x368] ss:$108 sps:$4 sm:$0xff]  }
  0x2d   : > { %8237 = vmatprep.subr.bf16.mxu1 %v9724_v32  ;;  %8349 = vmatprep.subr.bf16.mxu0 %v9747_v41  ;;  %v9794_v29 = vld [vmem:[%s10646_s15 + $0x79c] ss:$108 sps:$4 sm:$0xff]   ;;  %v9796_v32 = vld [vmem:[%s10646_s15 + $0x444] ss:$108 sps:$4 sm:$0xff]   ;;  %v9812_v41 = vld [vmem:[%s10646_s15 + $0x94c] ss:$108 sps:$4 sm:$0xff]  }
  0x2f   : > { %4738 = vmatmul.mubr.bf16.gmra.mrb[4].mxu0 %v9722_v30  ;;  %4834 = vmatmul.mubr.bf16.gmra.mrb[4].mxu1 %v9723_v31  ;;  %v9826_v30 = vld [vmem:[%s13039_s1 + $0x1e0] sm:$0xff]  }
  0x30   : > { %8238 = vmatpush3.bf16.msra.mxu1 %v9725_v33  ;;  %4745 = vmatprep.mubr.bf16.mxu0 %v9730_v35  ;;  %v9827_v31 = vld [vmem:[%s13039_s1 + $0x1a0] sm:$0xff]  }
  0x31   : > { %8239 = vmatprep.subr.bf16.mxu1 %v9726_v34  ;;  %4841 = vmatprep.mubr.bf16.mxu1 %v9732_v36  ;;  %v9798_v33 = vld [vmem:[%s10646_s15 + $0x798] ss:$108 sps:$4 sm:$0xff]   ;;  %v9799_v34 = vld [vmem:[%s10646_s15 + $0x440] ss:$108 sps:$4 sm:$0xff]   ;;  %v9804_v36 = vld [vmem:[%s10646_s15 + $0x51c] ss:$108 sps:$4 sm:$0xff]  }
  0x32   : > { %8350 = vmatpush3.bf16.msra.mxu0 %v9749_v44  ;;  %v9802_v35 = vld [vmem:[%s10646_s15 + $0x874] ss:$108 sps:$4 sm:$0xff]  }
  0x33   : > { %8351 = vmatprep.subr.bf16.mxu0 %v9758_v51  ;;  %v9859_v44 = vld [vmem:[%s13039_s1 + $0x1b0] sm:$0xff]  }
  0x34   : > { %8240 = vmatpush3.bf16.msra.mxu1 %v9728_v37  ;;  %v9842_v37 = vld [vmem:[%s13039_s1 + $0x1e8] sm:$0xff]   ;;  %v9820_v51 = vld [vmem:[%s10646_s15 + $0x10] ss:$108 sps:$4 sm:$0xff]  }
  0x35   : > { %8241 = vmatprep.subr.bf16.mxu1 %v9736_v38  ;;  %v9843_v38 = vld [vmem:[%s13039_s1 + $0x1a8] sm:$0xff]  }
  0x36   : > { %8352 = vmatpush3.bf16.msra.mxu0 %v9760_v54  ;;  %v9828_v54 = vld [vmem:[%s10646_s15 + $0x7a4] ss:$108 sps:$4 sm:$0xff]  }
  0x37   : > { %4746 = vmatmul.mubr.bf16.gmra.mrb[8].mxu0 %v9734_v39  ;;  %4842 = vmatmul.mubr.bf16.gmra.mrb[8].mxu1 %v9735_v40  ;;  %v9806_v39 = vld [vmem:[%s10646_s15 + $0x870] ss:$108 sps:$4 sm:$0xff]   ;;  %v9807_v40 = vld [vmem:[%s10646_s15 + $0x518] ss:$108 sps:$4 sm:$0xff]  }
  0x38   : > { %8242 = vmatpush3.bf16.msra.mxu1 %v9737_v42  ;;  %4753 = vmatprep.mubr.bf16.mxu0 %v9740_v45  ;;  %v9814_v42 = vld [vmem:[%s10646_s15 + $0x5f4] ss:$108 sps:$4 sm:$0xff]  }
  0x39   : > { %8243 = vmatprep.subr.bf16.mxu1 %v9738_v43  ;;  %4849 = vmatprep.mubr.bf16.mxu1 %v9742_v46  ;;  %v9858_v43 = vld [vmem:[%s13039_s1 + $0x1f0] sm:$0xff]  }
  0x3a   : > { %8353 = vmatprep.subr.bf16.mxu0 %v9774_v63  ;;  %v9816_v45 = vld [vmem:[%s10646_s15 + $0x948] ss:$108 sps:$4 sm:$0xff]   ;;  %v9817_v46 = vld [vmem:[%s10646_s15 + $0x5f0] ss:$108 sps:$4 sm:$0xff]  }
  0x3b   : > { %8354 = vmatpush3.bf16.msra.mxu0 %v9775_v0  ;;  %v9836_v63 = vld [vmem:[%s10646_s15 + $0x1c4] ss:$108 sps:$4 sm:$0xff]  }
  0x3c   : > { %8244 = vmatpush3.bf16.msra.mxu1 %v9739_v47  ;;  %8355 = vmatprep.subr.bf16.mxu0 %v9784_v5  ;;  %v9818_v47 = vld [vmem:[%s10646_s15 + $0x6cc] ss:$108 sps:$4 sm:$0xff]   ;;  %v9857_v0 = vld [vmem:[%s13039_s1 + $0x210] sm:$0xff]  }
  0x3d   : > { %8245 = vmatprep.subr.bf16.mxu1 %v9746_v48  ;;  %v9822_v48 = vld [vmem:[%s10646_s15 + $0x14] ss:$108 sps:$4 sm:$0xff]  }
  0x3e   : > { %v9839_v5 = vld [vmem:[%s10646_s15 + $0x1c0] ss:$108 sps:$4 sm:$0xff]  }
  0x3f   : > { %4754 = vmatmul.mubr.bf16.gmra.mrb[12].mxu0 %v9744_v49  ;;  %4850 = vmatmul.mubr.bf16.gmra.mrb[12].mxu1 %v9745_v50  ;;  %v9874_v49 = vld [vmem:[%s13039_s1 + $0x1f8] sm:$0xff]  }
  0x40   : > { %8246 = vmatpush3.bf16.msra.mxu1 %v9748_v52  ;;  %4761 = vmatprep.mubr.bf16.mxu0 %v9752_v55  ;;  %v9875_v50 = vld [vmem:[%s13039_s1 + $0x1b8] sm:$0xff]   ;;  %v9823_v52 = vld [vmem:[%s10646_s15 + $0x6c8] ss:$108 sps:$4 sm:$0xff]  }
  0x41   : > { %8247 = vmatprep.subr.bf16.mxu1 %v9750_v53  ;;  %4890 = vmatprep.mubr.bf16.mxu1 %v9756_v56  ;;  %v9825_v53 = vld [vmem:[%s13039_s1 + $0x200] sm:$0xff]   ;;  %v9830_v55 = vld [vmem:[%s10646_s15 + $0xec] ss:$108 sps:$4 sm:$0xff]  }
  0x42   : > { %8356 = vmatpush3.bf16.msra.mxu0 %v9785_v6  ;;  %v9840_v56 = vld [vmem:[%s13039_s1 + $0x248] sm:$0xff]   ;;  %v9844_v6 = vld [vmem:[%s10646_s15 + $0x954] ss:$108 sps:$4 sm:$0xff]  }
  0x43   : > { %8357 = vmatprep.subr.bf16.mxu0 %v9800_v15  ;;  %v9852_v15 = vld [vmem:[%s10646_s15 + $0x374] ss:$108 sps:$4 sm:$0xff]  }
  0x44   : > { %8248 = vmatpush3.bf16.msra.mxu1 %v9751_v57  ;;  %v9890_v57 = vld [vmem:[%s13039_s1 + $0x2c0] sm:$0xff]  }
  0x45   : > { %8457 = vmatprep.subr.bf16.mxu1 %v9759_v60  ;;  %v9832_v60 = vld [vmem:[%s10646_s15 + $0x7a0] ss:$108 sps:$4 sm:$0xff]  }
  0x46   : > { %8358 = vmatpush3.bf16.msra.mxu0 %v9801_v16  ;;  %v9921_v16 = vld [vmem:[%s13039_s1 + $0x230] sm:$0xff]  }
  0x47   : > { %4762 = vmatmul.mubr.bf16.gmra.mrb[16].mxu0 %v9757_v59  ;;  %4891 = vmatmul.mubr.bf16.vlgmr.msra.gmra.mrb[16].mxu1 %v9754_v58  ;;  %v9841_v58 = vld [vmem:[%s13039_s1 + $0x208] sm:$0xff]   ;;  %v9856_v59 = vld [vmem:[%s13039_s1 + $0x250] sm:$0xff]  }
  0x48   : > { %8458 = vmatpush3.bf16.msra.mxu1 %v9761_v61  ;;  %4769 = vmatprep.mubr.bf16.mxu0 %v9762_v62  ;;  %v9833_v61 = vld [vmem:[%s10646_s15 + $0xe8] ss:$108 sps:$4 sm:$0xff]  }
  0x49   : > { %4898 = vmatprep.mubr.bf16.mxu1 %v9764_v1  ;;  %8459 = vmatprep.subr.bf16.mxu1 %v9776_v2  ;;  %v9834_v62 = vld [vmem:[%s10646_s15 + $0x87c] ss:$108 sps:$4 sm:$0xff]   ;;  %v9838_v2 = vld [vmem:[%s10646_s15 + $0x878] ss:$108 sps:$4 sm:$0xff]  }
  0x4a   : > { %8359 = vmatprep.subr.bf16.mxu0 %v9808_v18  ;;  %v9872_v1 = vld [vmem:[%s13039_s1 + $0x258] sm:$0xff]  }
  0x4b   : > { %8360 = vmatpush3.bf16.msra.mxu0 %v9810_v21  ;;  %v9855_v18 = vld [vmem:[%s10646_s15 + $0x370] ss:$108 sps:$4 sm:$0xff]  }
  0x4c   : > { %8460 = vmatpush3.bf16.msra.mxu1 %v9777_v3  ;;  %8569 = vmatprep.subr.bf16.mxu0 %v9824_v26  ;;  %v9873_v3 = vld [vmem:[%s13039_s1 + $0x218] sm:$0xff]   ;;  %v9860_v21 = vld [vmem:[%s10646_s15 + $0xb04] ss:$108 sps:$4 sm:$0xff]  }
  0x4d   : > { %8461 = vmatprep.subr.bf16.mxu1 %v9792_v10  ;;  %v9848_v10 = vld [vmem:[%s10646_s15 + $0x950] ss:$108 sps:$4 sm:$0xff]   ;;  %v9952_v26 = vld [vmem:[%s13039_s1 + $0x340] sm:$0xff]  }
  0x4f   : > { %4770 = vmatmul.mubr.bf16.gmra.mrb[20].mxu0 %v9766_v4  ;;  %4899 = vmatmul.mubr.bf16.gmra.mrb[20].mxu1 %v9767_v7  ;;  %v9888_v4 = vld [vmem:[%s13039_s1 + $0x260] sm:$0xff]   ;;  %v9846_v7 = vld [vmem:[%s10646_s15 + $0x29c] ss:$108 sps:$4 sm:$0xff]  }
  0x50   : > { %4777 = vmatprep.mubr.bf16.mxu0 %v9768_v8  ;;  %4906 = vmatprep.mubr.bf16.mxu1 %v9770_v9  ;;  %v9889_v8 = vld [vmem:[%s13039_s1 + $0x220] sm:$0xff]   ;;  %v9904_v9 = vld [vmem:[%s13039_s1 + $0x268] sm:$0xff]  }
  0x51   : > { %8462 = vmatpush3.bf16.msra.mxu1 %v9793_v11  ;;  %v9849_v11 = vld [vmem:[%s10646_s15 + $0x298] ss:$108 sps:$4 sm:$0xff]  }
  0x52   : > { %8463 = vmatprep.subr.bf16.mxu1 %v9809_v19  ;;  %v9936_v19 = vld [vmem:[%s13039_s1 + $0x278] sm:$0xff]  }
  0x55   : > { %8464 = vmatpush3.bf16.msra.mxu1 %v9811_v22  ;;  %v9862_v22 = vld [vmem:[%s10646_s15 + $0x44c] ss:$108 sps:$4 sm:$0xff]  }
  0x56   : > { %8465 = vmatprep.subr.bf16.mxu1 %v9826_v30  ;;  %v9876_v30 = vld [vmem:[%s10646_s15 + $0xcb4] ss:$108 sps:$4 sm:$0xff]  }
  0x57   : > { %4778 = vmatmul.mubr.bf16.gmra.mrb[24].mxu0 %v9772_v12  ;;  %4907 = vmatmul.mubr.bf16.gmra.mrb[24].mxu1 %v9773_v13  ;;  %v9905_v12 = vld [vmem:[%s13039_s1 + $0x228] sm:$0xff]   ;;  %v9920_v13 = vld [vmem:[%s13039_s1 + $0x270] sm:$0xff]  }
  0x58   : > { %4785 = vmatprep.mubr.bf16.mxu0 %v9778_v14  ;;  %4914 = vmatprep.mubr.bf16.mxu1 %v9780_v17  ;;  %v9850_v14 = vld [vmem:[%s10646_s15 + $0xa2c] ss:$108 sps:$4 sm:$0xff]   ;;  %v9854_v17 = vld [vmem:[%s10646_s15 + $0xa28] ss:$108 sps:$4 sm:$0xff]  }
  0x59   : > { %8466 = vmatpush3.bf16.msra.mxu1 %v9827_v31  ;;  %v9878_v31 = vld [vmem:[%s10646_s15 + $0x5fc] ss:$108 sps:$4 sm:$0xff]  }
  0x5a   : > { %8467 = vmatprep.subr.bf16.mxu1 %v9842_v37  ;;  %v9887_v37 = vld [vmem:[%s10646_s15 + $0x6d0] ss:$108 sps:$4 sm:$0xff]  }
  0x5d   : > { %8468 = vmatpush3.bf16.msra.mxu1 %v9843_v38  ;;  %v9891_v38 = vld [vmem:[%s13039_s1 + $0x280] sm:$0xff]  }
  0x5e   : > { %8469 = vmatprep.subr.bf16.mxu1 %v9858_v43  ;;  %v9922_v43 = vld [vmem:[%s13039_s1 + $0x2d0] sm:$0xff]  }
  0x5f   : > { %4786 = vmatmul.mubr.bf16.gmra.mrb[28].mxu0 %v9782_v20  ;;  %4915 = vmatmul.mubr.bf16.gmra.mrb[28].mxu1 %v9783_v23  ;;  %v9937_v20 = vld [vmem:[%s13039_s1 + $0x238] sm:$0xff]   ;;  %v9864_v23 = vld [vmem:[%s10646_s15 + $0xb00] ss:$108 sps:$4 sm:$0xff]  }
  0x60   : > { %4793 = vmatprep.mubr.bf16.mxu0 %v9786_v24  ;;  %4922 = vmatprep.mubr.bf16.mxu1 %v9788_v25  ;;  %v9865_v24 = vld [vmem:[%s10646_s15 + $0x448] ss:$108 sps:$4 sm:$0xff]  }
  0x61   : > { %8470 = vmatpush3.bf16.msra.mxu1 %v9859_v44  ;;  %v9866_v25 = vld [vmem:[%s10646_s15 + $0xbdc] ss:$108 sps:$4 sm:$0xff]  }
  0x62   : > { %8471 = vmatprep.subr.bf16.mxu1 %v9874_v49  ;;  %v9896_v44 = vld [vmem:[%s10646_s15 + $0x7a8] ss:$108 sps:$4 sm:$0xff]   ;;  %v9938_v49 = vld [vmem:[%s13039_s1 + $0x2d8] sm:$0xff]  }
  0x65   : > { %8472 = vmatpush3.bf16.msra.mxu1 %v9875_v50  ;;  %v9902_v50 = vld [vmem:[%s10646_s15 + $0x880] ss:$108 sps:$4 sm:$0xff]  }
  0x66   : > { %8681 = vmatprep.subr.bf16.mxu1 %v9890_v57  ;;  %v9970_v57 = vld [vmem:[%s13039_s1 + $0x2e8] sm:$0xff]  }
  0x67   : > { %4794 = vmatmul.mubr.bf16.gmra.mrb[32].mxu0 %v9790_v27  ;;  %4923 = vmatmul.mubr.bf16.gmra.mrb[32].mxu1 %v9791_v28  ;;  %v9868_v27 = vld [vmem:[%s10646_s15 + $0x524] ss:$108 sps:$4 sm:$0xff]  }
  0x68   : > { %4801 = vmatprep.mubr.bf16.mxu0 %v9794_v29  ;;  %4930 = vmatprep.mubr.bf16.mxu1 %v9796_v32  ;;  %v9870_v28 = vld [vmem:[%s10646_s15 + $0xbd8] ss:$108 sps:$4 sm:$0xff]   ;;  %v9871_v29 = vld [vmem:[%s10646_s15 + $0x520] ss:$108 sps:$4 sm:$0xff]   ;;  %v9880_v32 = vld [vmem:[%s10646_s15 + $0xcb0] ss:$108 sps:$4 sm:$0xff]  }
  0x6f   : > { %4802 = vmatmul.mubr.bf16.gmra.mrb[36].mxu0 %v9798_v33  ;;  %4931 = vmatmul.mubr.bf16.gmra.mrb[36].mxu1 %v9799_v34  ;;  %v9881_v33 = vld [vmem:[%s10646_s15 + $0x5f8] ss:$108 sps:$4 sm:$0xff]   ;;  %v9882_v34 = vld [vmem:[%s10646_s15 + $0x6d4] ss:$108 sps:$4 sm:$0xff]  }
  0x70   : > { %4809 = vmatprep.mubr.bf16.mxu0 %v9802_v35  ;;  %4938 = vmatprep.mubr.bf16.mxu1 %v9804_v36  ;;  %v9886_v35 = vld [vmem:[%s10646_s15 + $0x1c] ss:$108 sps:$4 sm:$0xff]   ;;  %v9884_v36 = vld [vmem:[%s10646_s15 + $0x18] ss:$108 sps:$4 sm:$0xff]  }
  0x77   : > { %4810 = vmatmul.mubr.bf16.gmra.mrb[40].mxu0 %v9806_v39  ;;  %4939 = vmatmul.mubr.bf16.gmra.mrb[40].mxu1 %v9807_v40  ;;  %v9892_v39 = vld [vmem:[%s10646_s15 + $0x7ac] ss:$108 sps:$4 sm:$0xff]   ;;  %v9894_v40 = vld [vmem:[%s10646_s15 + $0xf4] ss:$108 sps:$4 sm:$0xff]  }
  0x78   : > { %4817 = vmatprep.mubr.bf16.mxu0 %v9812_v41  ;;  %4946 = vmatprep.mubr.bf16.mxu1 %v9814_v42  ;;  %v9906_v41 = vld [vmem:[%s13039_s1 + $0x2c8] sm:$0xff]  }
  0x79   : > { %v9907_v42 = vld [vmem:[%s13039_s1 + $0x288] sm:$0xff]  }
  0x7f   : > { %4818 = vmatmul.mubr.bf16.gmra.mrb[44].mxu0 %v9816_v45  ;;  %4947 = vmatmul.mubr.bf16.gmra.mrb[44].mxu1 %v9817_v46  ;;  %v9897_v45 = vld [vmem:[%s10646_s15 + $0xf0] ss:$108 sps:$4 sm:$0xff]  }
  0x80   : > { %4954 = vmatprep.mubr.bf16.mxu1 %v9818_v47  ;;  %5051 = vmatprep.mubr.bf16.mxu0 %v9822_v48  ;;  %v9898_v46 = vld [vmem:[%s10646_s15 + $0x884] ss:$108 sps:$4 sm:$0xff]   ;;  %v9900_v47 = vld [vmem:[%s10646_s15 + $0x1cc] ss:$108 sps:$4 sm:$0xff]  }
  0x81   : > { %v9923_v48 = vld [vmem:[%s13039_s1 + $0x290] sm:$0xff]  }
  0x87   : > { %4955 = vmatmul.mubr.bf16.gmra.mrb[48].mxu1 %v9823_v52  ;;  %5052 = vmatmul.mubr.bf16.vlgmr.msra.gmra.mrb[48].mxu0 %v9820_v51  ;;  %v9903_v51 = vld [vmem:[%s10646_s15 + $0x1c8] ss:$108 sps:$4 sm:$0xff]   ;;  %v9939_v52 = vld [vmem:[%s13039_s1 + $0x298] sm:$0xff]  }
  0x88   : > { %8570 = vmatpush3.bf16.msra.mxu0 %v9825_v53  ;;  %4962 = vmatprep.mubr.bf16.mxu1 %v9828_v54  ;;  %v9954_v53 = vld [vmem:[%s13039_s1 + $0x2e0] sm:$0xff]   ;;  %v9908_v54 = vld [vmem:[%s10646_s15 + $0x95c] ss:$108 sps:$4 sm:$0xff]  }
  0x89   : > { %5059 = vmatprep.mubr.bf16.mxu0 %v9830_v55  ;;  %8571 = vmatprep.subr.bf16.mxu0 %v9840_v56  ;;  %v9910_v55 = vld [vmem:[%s10646_s15 + $0x2a4] ss:$108 sps:$4 sm:$0xff]  }
  0x8a   : > { %v9955_v56 = vld [vmem:[%s13039_s1 + $0x2a0] sm:$0xff]  }
  0x8c   : > { %8572 = vmatpush3.bf16.msra.mxu0 %v9841_v58  ;;  %v9912_v58 = vld [vmem:[%s10646_s15 + $0x958] ss:$108 sps:$4 sm:$0xff]  }
  0x8d   : > { %8573 = vmatprep.subr.bf16.mxu0 %v9856_v59  ;;  %v9913_v59 = vld [vmem:[%s10646_s15 + $0x2a0] ss:$108 sps:$4 sm:$0xff]  }
  0x8f   : > { %4963 = vmatmul.mubr.bf16.gmra.mrb[52].mxu1 %v9832_v60  ;;  %5060 = vmatmul.mubr.bf16.gmra.mrb[52].mxu0 %v9833_v61  ;;  %v9971_v60 = vld [vmem:[%s13039_s1 + $0x2a8] sm:$0xff]   ;;  %v9914_v61 = vld [vmem:[%s10646_s15 + $0xa34] ss:$108 sps:$4 sm:$0xff]  }
  0x90   : > { %4970 = vmatprep.mubr.bf16.mxu1 %v9834_v62  ;;  %5067 = vmatprep.mubr.bf16.mxu0 %v9836_v63  ;;  %v9916_v62 = vld [vmem:[%s10646_s15 + $0x37c] ss:$108 sps:$4 sm:$0xff]   ;;  %v9986_v63 = vld [vmem:[%s13039_s1 + $0x2f0] sm:$0xff]  }
  0x91   : > { %8574 = vmatpush3.bf16.msra.mxu0 %v9857_v0  ;;  %v9987_v0 = vld [vmem:[%s13039_s1 + $0x2b0] sm:$0xff]  }
  0x92   : > { %8575 = vmatprep.subr.bf16.mxu0 %v9872_v1  ;;  %v10002_v1 = vld [vmem:[%s13039_s1 + $0x2f8] sm:$0xff]  }
  0x95   : > { %8576 = vmatpush3.bf16.msra.mxu0 %v9873_v3  ;;  %v10018_v3 = vld [vmem:[%s13039_s1 + $0x3c0] sm:$0xff]  }
  0x96   : > { %8577 = vmatprep.subr.bf16.mxu0 %v9888_v4  ;;  %v9918_v4 = vld [vmem:[%s10646_s15 + $0xa30] ss:$108 sps:$4 sm:$0xff]  }
  0x97   : > { %4971 = vmatmul.mubr.bf16.gmra.mrb[56].mxu1 %v9838_v2  ;;  %5068 = vmatmul.mubr.bf16.gmra.mrb[56].mxu0 %v9839_v5  ;;  %v10003_v2 = vld [vmem:[%s13039_s1 + $0x2b8] sm:$0xff]  }
  0x98   : > { %4978 = vmatprep.mubr.bf16.mxu1 %v9844_v6  ;;  %5075 = vmatprep.mubr.bf16.mxu0 %v9846_v7  ;;  %v9919_v5 = vld [vmem:[%s10646_s15 + $0x378] ss:$108 sps:$4 sm:$0xff]   ;;  %v9926_v7 = vld [vmem:[%s10646_s15 + $0x454] ss:$108 sps:$4 sm:$0xff]  }
  0x99   : > { %8578 = vmatpush3.bf16.msra.mxu0 %v9889_v8  ;;  %v9924_v6 = vld [vmem:[%s10646_s15 + $0xb0c] ss:$108 sps:$4 sm:$0xff]   ;;  %v9928_v8 = vld [vmem:[%s10646_s15 + $0xb08] ss:$108 sps:$4 sm:$0xff]  }
  0x9a   : > { %8579 = vmatprep.subr.bf16.mxu0 %v9904_v9  ;;  %v9929_v9 = vld [vmem:[%s10646_s15 + $0x450] ss:$108 sps:$4 sm:$0xff]  }
  0x9d   : > { %8580 = vmatpush3.bf16.msra.mxu0 %v9905_v12  ;;  %v9934_v12 = vld [vmem:[%s10646_s15 + $0xbe0] ss:$108 sps:$4 sm:$0xff]  }
  0x9e   : > { %8581 = vmatprep.subr.bf16.mxu0 %v9920_v13  ;;  %v9935_v13 = vld [vmem:[%s10646_s15 + $0x528] ss:$108 sps:$4 sm:$0xff]  }
  0x9f   : > { %4979 = vmatmul.mubr.bf16.gmra.mrb[60].mxu1 %v9848_v10  ;;  %5076 = vmatmul.mubr.bf16.gmra.mrb[60].mxu0 %v9849_v11  ;;  %v9930_v10 = vld [vmem:[%s10646_s15 + $0xbe4] ss:$108 sps:$4 sm:$0xff]   ;;  %v9932_v11 = vld [vmem:[%s10646_s15 + $0x52c] ss:$108 sps:$4 sm:$0xff]  }
  0xa0   : > { %4986 = vmatprep.mubr.bf16.mxu1 %v9850_v14  ;;  %5083 = vmatprep.mubr.bf16.mxu0 %v9852_v15  ;;  %v9940_v14 = vld [vmem:[%s10646_s15 + $0xcbc] ss:$108 sps:$4 sm:$0xff]   ;;  %v9942_v15 = vld [vmem:[%s10646_s15 + $0x604] ss:$108 sps:$4 sm:$0xff]  }
  0xa1   : > { %8582 = vmatpush3.bf16.msra.mxu0 %v9921_v16  ;;  %v9944_v16 = vld [vmem:[%s10646_s15 + $0xcb8] ss:$108 sps:$4 sm:$0xff]  }
  0xa2   : > { %8583 = vmatprep.subr.bf16.mxu0 %v9936_v19 }
  0xa5   : > { %8584 = vmatpush3.bf16.msra.mxu0 %v9937_v20 }
  0xa6   : > { %8793 = vmatprep.subr.bf16.mxu0 %v9952_v26  ;;  %v9946_v26 = vld [vmem:[%s10646_s15 + $0x6dc] ss:$108 sps:$4 sm:$0xff]  }
  0xa7   : > { %4987 = vmatmul.mubr.bf16.gmra.mrb[64].mxu1 %v9854_v17  ;;  %5084 = vmatmul.mubr.bf16.gmra.mrb[64].mxu0 %v9855_v18  ;;  %v9945_v17 = vld [vmem:[%s10646_s15 + $0x600] ss:$108 sps:$4 sm:$0xff]  }
  0xa8   : > { %4994 = vmatprep.mubr.bf16.mxu1 %v9860_v21  ;;  %5091 = vmatprep.mubr.bf16.mxu0 %v9862_v22 }
  0xaf   : > { %4995 = vmatmul.mubr.bf16.gmra.mrb[68].mxu1 %v9864_v23  ;;  %5092 = vmatmul.mubr.bf16.gmra.mrb[68].mxu0 %v9865_v24 }
  0xb0   : > { %5002 = vmatprep.mubr.bf16.mxu1 %v9866_v25  ;;  %5099 = vmatprep.mubr.bf16.mxu0 %v9868_v27  ;;  %v9950_v27 = vld [vmem:[%s10646_s15 + $0x24] ss:$108 sps:$4 sm:$0xff]  }
  0xb7   : > { %5003 = vmatmul.mubr.bf16.gmra.mrb[72].mxu1 %v9870_v28  ;;  %5100 = vmatmul.mubr.bf16.gmra.mrb[72].mxu0 %v9871_v29 }
  0xb8   : > { %5010 = vmatprep.mubr.bf16.mxu1 %v9876_v30  ;;  %5107 = vmatprep.mubr.bf16.mxu0 %v9878_v31 }
  0xbf   : > { %5011 = vmatmul.mubr.bf16.gmra.mrb[76].mxu1 %v9880_v32  ;;  %5108 = vmatmul.mubr.bf16.gmra.mrb[76].mxu0 %v9881_v33  ;;  %v9948_v32 = vld [vmem:[%s10646_s15 + $0x20] ss:$108 sps:$4 sm:$0xff]   ;;  %v9951_v33 = vld [vmem:[%s10646_s15 + $0x6d8] ss:$108 sps:$4 sm:$0xff]  }
  0xc0   : > { %5115 = vmatprep.mubr.bf16.mxu0 %v9882_v34  ;;  %5212 = vmatprep.mubr.bf16.mxu1 %v9886_v35 }
  0xc7   : > { %5116 = vmatmul.mubr.bf16.gmra.mrb[80].mxu0 %v9887_v37  ;;  %5213 = vmatmul.mubr.bf16.vlgmr.msra.gmra.mrb[80].mxu1 %v9884_v36 }
  0xc8   : > { %8682 = vmatpush3.bf16.msra.mxu1 %v9891_v38  ;;  %5123 = vmatprep.mubr.bf16.mxu0 %v9892_v39 }
  0xc9   : > { %5220 = vmatprep.mubr.bf16.mxu1 %v9894_v40  ;;  %8683 = vmatprep.subr.bf16.mxu1 %v9906_v41 }
  0xcc   : > { %8684 = vmatpush3.bf16.msra.mxu1 %v9907_v42  ;;  %v9953_v42 = vld [vmem:[%s13039_s1 + $0x300] sm:$0xff]  }
  0xcd   : > { %8685 = vmatprep.subr.bf16.mxu1 %v9922_v43  ;;  %v9956_v43 = vld [vmem:[%s10646_s15 + $0x7b4] ss:$108 sps:$4 sm:$0xff]  }
  0xcf   : > { %5124 = vmatmul.mubr.bf16.gmra.mrb[84].mxu0 %v9896_v44  ;;  %5221 = vmatmul.mubr.bf16.gmra.mrb[84].mxu1 %v9897_v45 }
  0xd0   : > { %5131 = vmatprep.mubr.bf16.mxu0 %v9898_v46  ;;  %5228 = vmatprep.mubr.bf16.mxu1 %v9900_v47  ;;  %v9958_v46 = vld [vmem:[%s10646_s15 + $0xfc] ss:$108 sps:$4 sm:$0xff]  }
  0xd1   : > { %8686 = vmatpush3.bf16.msra.mxu1 %v9923_v48  ;;  %v9968_v47 = vld [vmem:[%s13039_s1 + $0x348] sm:$0xff]  }
  0xd2   : > { %8687 = vmatprep.subr.bf16.mxu1 %v9938_v49 }
  0xd5   : > { %8688 = vmatpush3.bf16.msra.mxu1 %v9939_v52  ;;  %v9960_v52 = vld [vmem:[%s10646_s15 + $0x7b0] ss:$108 sps:$4 sm:$0xff]  }
  0xd6   : > { %8689 = vmatprep.subr.bf16.mxu1 %v9954_v53  ;;  %v9961_v53 = vld [vmem:[%s10646_s15 + $0xf8] ss:$108 sps:$4 sm:$0xff]  }
  0xd7   : > { %5132 = vmatmul.mubr.bf16.gmra.mrb[88].mxu0 %v9902_v50  ;;  %5229 = vmatmul.mubr.bf16.gmra.mrb[88].mxu1 %v9903_v51  ;;  %v9969_v50 = vld [vmem:[%s13039_s1 + $0x308] sm:$0xff]   ;;  %v9984_v51 = vld [vmem:[%s13039_s1 + $0x350] sm:$0xff]  }
  0xd8   : > { %5139 = vmatprep.mubr.bf16.mxu0 %v9908_v54  ;;  %5236 = vmatprep.mubr.bf16.mxu1 %v9910_v55 }
  0xd9   : > { %8690 = vmatpush3.bf16.msra.mxu1 %v9955_v56 }
  0xda   : > { %8691 = vmatprep.subr.bf16.mxu1 %v9970_v57 }
  0xdd   : > { %8692 = vmatpush3.bf16.msra.mxu1 %v9971_v60 }
  0xde   : > { %8693 = vmatprep.subr.bf16.mxu1 %v9986_v63  ;;  %v9964_v63 = vld [vmem:[%s10646_s15 + $0x1d4] ss:$108 sps:$4 sm:$0xff]  }
  0xdf   : > { %5140 = vmatmul.mubr.bf16.gmra.mrb[92].mxu0 %v9912_v58  ;;  %5237 = vmatmul.mubr.bf16.gmra.mrb[92].mxu1 %v9913_v59 }
  0xe0   : > { %5147 = vmatprep.mubr.bf16.mxu0 %v9914_v61  ;;  %5244 = vmatprep.mubr.bf16.mxu1 %v9916_v62  ;;  %v9962_v62 = vld [vmem:[%s10646_s15 + $0x88c] ss:$108 sps:$4 sm:$0xff]  }
  0xe1   : > { %8694 = vmatpush3.bf16.msra.mxu1 %v9987_v0 }
  0xe2   : > { %8695 = vmatprep.subr.bf16.mxu1 %v10002_v1 }
  0xe5   : > { %8696 = vmatpush3.bf16.msra.mxu1 %v10003_v2  ;;  %v9985_v2 = vld [vmem:[%s13039_s1 + $0x310] sm:$0xff]  }
  0xe6   : > { %8905 = vmatprep.subr.bf16.mxu1 %v10018_v3 }
  0xe7   : > { %5148 = vmatmul.mubr.bf16.gmra.mrb[96].mxu0 %v9918_v4  ;;  %5245 = vmatmul.mubr.bf16.gmra.mrb[96].mxu1 %v9919_v5  ;;  %v10000_v5 = vld [vmem:[%s13039_s1 + $0x358] sm:$0xff]  }
  0xe8   : > { %5155 = vmatprep.mubr.bf16.mxu0 %v9924_v6  ;;  %5252 = vmatprep.mubr.bf16.mxu1 %v9926_v7  ;;  %v10001_v6 = vld [vmem:[%s13039_s1 + $0x318] sm:$0xff]   ;;  %v10016_v7 = vld [vmem:[%s13039_s1 + $0x360] sm:$0xff]  }
  0xef   : > { %5156 = vmatmul.mubr.bf16.gmra.mrb[100].mxu0 %v9928_v8  ;;  %5253 = vmatmul.mubr.bf16.gmra.mrb[100].mxu1 %v9929_v9  ;;  %v9966_v8 = vld [vmem:[%s10646_s15 + $0x888] ss:$108 sps:$4 sm:$0xff]   ;;  %v9967_v9 = vld [vmem:[%s10646_s15 + $0x1d0] ss:$108 sps:$4 sm:$0xff]  }
  0xf0   : > { %5163 = vmatprep.mubr.bf16.mxu0 %v9930_v10  ;;  %5260 = vmatprep.mubr.bf16.mxu1 %v9932_v11 }
  0xf7   : > { %5164 = vmatmul.mubr.bf16.gmra.mrb[104].mxu0 %v9934_v12  ;;  %5261 = vmatmul.mubr.bf16.gmra.mrb[104].mxu1 %v9935_v13 }
  0xf8   : > { %5171 = vmatprep.mubr.bf16.mxu0 %v9940_v14  ;;  %5268 = vmatprep.mubr.bf16.mxu1 %v9942_v15 }
  0xfa   : > { %v8137_v18 = vpop.f32.mrb[0].mxu0  ;;  %v8209_v19 = vpop.f32.mrb[0].mxu1 }
  0xfb   : > { %v8138_v20 = vpop.f32.mrb[1].mxu0  ;;  %v8210_v21 = vpop.f32.mrb[1].mxu1 }
  0xfc   : > { %v11027_v22 = vadd.f32 %v8138_v20, %v8137_v18  ;;  %v8140_v23 = vpop.f32.mrb[2].mxu0  ;;  %v11029_v24 = vadd.f32 %v8210_v21, %v8209_v19  ;;  %v8212_v25 = vpop.f32.mrb[2].mxu1  ;;  %v9972_v18 = vld [vmem:[%s10646_s15 + $0x964] ss:$108 sps:$4 sm:$0xff]   ;;  %v9974_v19 = vld [vmem:[%s10646_s15 + $0x2ac] ss:$108 sps:$4 sm:$0xff]  }
  0xfd   : > { %v8141_v28 = vpop.f32.mrb[3].mxu0  ;;  %v8213_v29 = vpop.f32.mrb[3].mxu1 }
  0xfe   : > { %v11033_v30 = vadd.f32 %v8141_v28, %v8140_v23  ;;  %v11035_v31 = vadd.f32 %v8213_v29, %v8212_v25  ;;  %v10017_v23 = vld [vmem:[%s13039_s1 + $0x320] sm:$0xff]   ;;  %v10032_v25 = vld [vmem:[%s13039_s1 + $0x368] sm:$0xff]   ;;  %v10048_v29 = vld [vmem:[%s13039_s1 + $0x370] sm:$0xff]  }
  0xff   : > { %5172 = vmatmul.mubr.bf16.gmra.mrb[108].mxu0 %v9944_v16  ;;  %5269 = vmatmul.mubr.bf16.gmra.mrb[108].mxu1 %v9945_v17  ;;  %v10033_v28 = vld [vmem:[%s13039_s1 + $0x328] sm:$0xff]  }
 0x100   : > { %5276 = vmatprep.mubr.bf16.mxu1 %v9946_v26  ;;  %5373 = vmatprep.mubr.bf16.mxu0 %v9950_v27 }
 0x102   : > { %v8143_v34 = vpop.f32.mrb[4].mxu0  ;;  %v8215_v35 = vpop.f32.mrb[4].mxu1 }
 0x103   : > { %v8144_v36 = vpop.f32.mrb[5].mxu0  ;;  %v8216_v37 = vpop.f32.mrb[5].mxu1 }
 0x104   : > { %v11039_v38 = vadd.f32 %v8144_v36, %v8143_v34  ;;  %v8146_v39 = vpop.f32.mrb[6].mxu0  ;;  %v11041_v40 = vadd.f32 %v8216_v37, %v8215_v35  ;;  %v8218_v41 = vpop.f32.mrb[6].mxu1 }
 0x105   : > { %v8147_v44 = vpop.f32.mrb[7].mxu0  ;;  %v8219_v45 = vpop.f32.mrb[7].mxu1 }
 0x106   : > { %v11051_v48 = vadd.f32 %v8147_v44, %v8146_v39  ;;  %v11053_v49 = vadd.f32 %v8219_v45, %v8218_v41  ;;  %v9978_v44 = vld [vmem:[%s10646_s15 + $0xa3c] ss:$108 sps:$4 sm:$0xff]   ;;  %v9980_v45 = vld [vmem:[%s10646_s15 + $0x384] ss:$108 sps:$4 sm:$0xff]  }
 0x107   : > { %5277 = vmatmul.mubr.bf16.gmra.mrb[112].mxu1 %v9951_v33  ;;  %5374 = vmatmul.mubr.bf16.vlgmr.msra.gmra.mrb[112].mxu0 %v9948_v32  ;;  %v9976_v32 = vld [vmem:[%s10646_s15 + $0x960] ss:$108 sps:$4 sm:$0xff]   ;;  %v9977_v33 = vld [vmem:[%s10646_s15 + $0x2a8] ss:$108 sps:$4 sm:$0xff]  }
 0x108   : > { %8794 = vmatpush3.bf16.msra.mxu0 %v9953_v42  ;;  %5284 = vmatprep.mubr.bf16.mxu1 %v9956_v43 }
 0x109   : > { %5381 = vmatprep.mubr.bf16.mxu0 %v9958_v46  ;;  %8795 = vmatprep.subr.bf16.mxu0 %v9968_v47 }
 0x10a   : > { %v8149_v54 = vpop.f32.mrb[8].mxu0  ;;  %v8221_v55 = vpop.f32.mrb[8].mxu1 }
 0x10b   : > { %v8150_v56 = vpop.f32.mrb[9].mxu0  ;;  %v8222_v57 = vpop.f32.mrb[9].mxu1 }
 0x10c   : > { %v11063_v58 = vadd.f32 %v8150_v56, %v8149_v54  ;;  %v8152_v59 = vpop.f32.mrb[10].mxu0  ;;  %v11065_v60 = vadd.f32 %v8222_v57, %v8221_v55  ;;  %v8224_v61 = vpop.f32.mrb[10].mxu1  ;;  %8796 = vmatpush3.bf16.msra.mxu0 %v9969_v50  ;;  %v10049_v50 = vld [vmem:[%s13039_s1 + $0x330] sm:$0xff]   ;;  %v10064_v54 = vld [vmem:[%s13039_s1 + $0x378] sm:$0xff]  }
 0x10d   : > { %v8153_v0 = vpop.f32.mrb[11].mxu0  ;;  %v8225_v1 = vpop.f32.mrb[11].mxu1  ;;  %8797 = vmatprep.subr.bf16.mxu0 %v9984_v51  ;;  %v10065_v55 = vld [vmem:[%s13039_s1 + $0x338] sm:$0xff]  }
 0x10e   : > { %v11072_v3 = vadd.f32 %v8153_v0, %v8152_v59  ;;  %v11074_v4 = vadd.f32 %v8225_v1, %v8224_v61  ;;  %v9982_v57 = vld [vmem:[%s10646_s15 + $0xa38] ss:$108 sps:$4 sm:$0xff]   ;;  %v9983_v59 = vld [vmem:[%s10646_s15 + $0x380] ss:$108 sps:$4 sm:$0xff]  }
 0x10f   : > { %5285 = vmatmul.mubr.bf16.gmra.mrb[116].mxu1 %v9960_v52  ;;  %5382 = vmatmul.mubr.bf16.gmra.mrb[116].mxu0 %v9961_v53 }
 0x110   : > { %5292 = vmatprep.mubr.bf16.mxu1 %v9962_v62  ;;  %5389 = vmatprep.mubr.bf16.mxu0 %v9964_v63 }
 0x111   : > { %8798 = vmatpush3.bf16.msra.mxu0 %v9985_v2 }
 0x112   : > { %v8155_v10 = vpop.f32.mrb[12].mxu0  ;;  %v8227_v11 = vpop.f32.mrb[12].mxu1  ;;  %8799 = vmatprep.subr.bf16.mxu0 %v10000_v5 }
 0x113   : > { %v8156_v12 = vpop.f32.mrb[13].mxu0  ;;  %v8228_v13 = vpop.f32.mrb[13].mxu1 }
 0x114   : > { %v11087_v14 = vadd.f32 %v8156_v12, %v8155_v10  ;;  %v8158_v15 = vpop.f32.mrb[14].mxu0  ;;  %v11089_v16 = vadd.f32 %v8228_v13, %v8227_v11  ;;  %v8230_v17 = vpop.f32.mrb[14].mxu1 }
 0x115   : > { %v8159_v20 = vpop.f32.mrb[15].mxu0  ;;  %v8231_v21 = vpop.f32.mrb[15].mxu1  ;;  %8800 = vmatpush3.bf16.msra.mxu0 %v10001_v6  ;;  %v9988_v6 = vld [vmem:[%s10646_s15 + $0xb14] ss:$108 sps:$4 sm:$0xff]  }
 0x116   : > { %v11099_v26 = vadd.f32 %v8159_v20, %v8158_v15  ;;  %v11101_v27 = vadd.f32 %v8231_v21, %v8230_v17  ;;  %8801 = vmatprep.subr.bf16.mxu0 %v10016_v7  ;;  %v9990_v7 = vld [vmem:[%s10646_s15 + $0x45c] ss:$108 sps:$4 sm:$0xff]   ;;  %v9993_v17 = vld [vmem:[%s10646_s15 + $0x458] ss:$108 sps:$4 sm:$0xff]  }
 0x117   : > { %5293 = vmatmul.mubr.bf16.gmra.mrb[120].mxu1 %v9966_v8  ;;  %5390 = vmatmul.mubr.bf16.gmra.mrb[120].mxu0 %v9967_v9  ;;  %v9992_v15 = vld [vmem:[%s10646_s15 + $0xb10] ss:$108 sps:$4 sm:$0xff]  }
 0x118   : > { %5300 = vmatprep.mubr.bf16.mxu1 %v9972_v18  ;;  %5397 = vmatprep.mubr.bf16.mxu0 %v9974_v19 }
 0x119   : > { %8802 = vmatpush3.bf16.msra.mxu0 %v10017_v23 }
 0x11a   : > { %v8161_v34 = vpop.f32.mrb[16].mxu0  ;;  %v8249_v35 = vpop.f32.mrb[16].mxu1  ;;  %8803 = vmatprep.subr.bf16.mxu0 %v10032_v25 }
 0x11b   : > { %v8162_v36 = vpop.f32.mrb[17].mxu0  ;;  %v8250_v37 = vpop.f32.mrb[17].mxu1 }
 0x11c   : > { %v11111_v39 = vadd.f32 %v8162_v36, %v8161_v34  ;;  %v8251_v41 = vadd.f32 %v8250_v37, %v8249_v35  ;;  %v8164_v42 = vpop.f32.mrb[18].mxu0  ;;  %v8252_v43 = vpop.f32.mrb[18].mxu1 }
 0x11d   : > { %v8165_v46 = vpop.f32.mrb[19].mxu0  ;;  %v8253_v47 = vpop.f32.mrb[19].mxu1  ;;  %8804 = vmatpush3.bf16.msra.mxu0 %v10033_v28 }
 0x11e   : > { %v11119_v51 = vadd.f32 %v8251_v41, %v11027_v22  ;;  %v11121_v52 = vadd.f32 %v8165_v46, %v8164_v42  ;;  %v8254_v53 = vadd.f32 %v8253_v47, %v8252_v43  ;;  %8805 = vmatprep.subr.bf16.mxu0 %v10048_v29  ;;  %v10080_v22 = vld [vmem:[%s13039_s1 + $0x440] sm:$0xff]   ;;  %v9994_v29 = vld [vmem:[%s10646_s15 + $0xbec] ss:$108 sps:$4 sm:$0xff]   ;;  %v9998_v41 = vld [vmem:[%s10646_s15 + $0xbe8] ss:$108 sps:$4 sm:$0xff]  }
 0x11f   : > { %5301 = vmatmul.mubr.bf16.gmra.mrb[124].mxu1 %v9976_v32  ;;  %5398 = vmatmul.mubr.bf16.gmra.mrb[124].mxu0 %v9977_v33  ;;  %v9996_v32 = vld [vmem:[%s10646_s15 + $0x534] ss:$108 sps:$4 sm:$0xff]   ;;  %v9999_v42 = vld [vmem:[%s10646_s15 + $0x530] ss:$108 sps:$4 sm:$0xff]  }
 0x120   : > { %v11130_v56 = vadd.f32 %v8254_v53, %v11033_v30  ;;  %5308 = vmatprep.mubr.bf16.mxu1 %v9978_v44  ;;  %5405 = vmatprep.mubr.bf16.mxu0 %v9980_v45 }
 0x121   : > { %8806 = vmatpush3.bf16.msra.mxu0 %v10049_v50 }
 0x122   : > { %v8167_v61 = vpop.f32.mrb[20].mxu0  ;;  %v8255_v62 = vpop.f32.mrb[20].mxu1  ;;  %8807 = vmatprep.subr.bf16.mxu0 %v10064_v54  ;;  %v10004_v54 = vld [vmem:[%s10646_s15 + $0xcc4] ss:$108 sps:$4 sm:$0xff]  }
 0x123   : > { %v8168_v63 = vpop.f32.mrb[21].mxu0  ;;  %v8256_v0 = vpop.f32.mrb[21].mxu1 }
 0x124   : > { %v11137_v1 = vadd.f32 %v8168_v63, %v8167_v61  ;;  %v8257_v30 = vadd.f32 %v8256_v0, %v8255_v62  ;;  %v8170_v2 = vpop.f32.mrb[22].mxu0  ;;  %v8258_v5 = vpop.f32.mrb[22].mxu1  ;;  %v10008_v63 = vld [vmem:[%s10646_s15 + $0xcc0] ss:$108 sps:$4 sm:$0xff]   ;;  %v10009_v0 = vld [vmem:[%s10646_s15 + $0x608] ss:$108 sps:$4 sm:$0xff]  }
 0x125   : > { %v8171_v8 = vpop.f32.mrb[23].mxu0  ;;  %v8259_v9 = vpop.f32.mrb[23].mxu1  ;;  %8808 = vmatpush3.bf16.msra.mxu0 %v10065_v55  ;;  %v10006_v55 = vld [vmem:[%s10646_s15 + $0x60c] ss:$108 sps:$4 sm:$0xff]  }
 0x126   : > { %v11142_v10 = vadd.f32 %v8257_v30, %v11039_v38  ;;  %v11144_v11 = vadd.f32 %v8171_v8, %v8170_v2  ;;  %v8260_v12 = vadd.f32 %v8259_v9, %v8258_v5  ;;  %9017 = vmatprep.subr.bf16.mxu0 %v10080_v22 }
 0x127   : > { %5309 = vmatmul.mubr.bf16.gmra.mrb[128].mxu1 %v9982_v57  ;;  %5406 = vmatmul.mubr.bf16.gmra.mrb[128].mxu0 %v9983_v59 }
 0x128   : > { %v11147_v13 = vadd.f32 %v8260_v12, %v11051_v48  ;;  %5316 = vmatprep.mubr.bf16.mxu1 %v9988_v6  ;;  %5413 = vmatprep.mubr.bf16.mxu0 %v9990_v7  ;;  %v10010_v12 = vld [vmem:[%s10646_s15 + $0x6e4] ss:$108 sps:$4 sm:$0xff]  }
 0x12a   : > { %v8173_v18 = vpop.f32.mrb[24].mxu0  ;;  %v8261_v19 = vpop.f32.mrb[24].mxu1 }
 0x12b   : > { %v8174_v20 = vpop.f32.mrb[25].mxu0  ;;  %v8262_v38 = vpop.f32.mrb[25].mxu1 }
 0x12c   : > { %v11151_v21 = vadd.f32 %v8174_v20, %v8173_v18  ;;  %v8263_v23 = vadd.f32 %v8262_v38, %v8261_v19  ;;  %v8176_v25 = vpop.f32.mrb[26].mxu0  ;;  %v8264_v28 = vpop.f32.mrb[26].mxu1 }
 0x12d   : > { %v8177_v33 = vpop.f32.mrb[27].mxu0  ;;  %v8265_v48 = vpop.f32.mrb[27].mxu1 }
 0x12e   : > { %v11156_v34 = vadd.f32 %v8263_v23, %v11063_v58  ;;  %v11158_v35 = vadd.f32 %v8177_v33, %v8176_v25  ;;  %v8266_v36 = vadd.f32 %v8265_v48, %v8264_v28  ;;  %v10012_v23 = vld [vmem:[%s10646_s15 + $0x28] ss:$108 sps:$4 sm:$0xff]   ;;  %v10015_v25 = vld [vmem:[%s10646_s15 + $0x6e0] ss:$108 sps:$4 sm:$0xff]  }
 0x12f   : > { %5317 = vmatmul.mubr.bf16.gmra.mrb[132].mxu1 %v9992_v15  ;;  %5414 = vmatmul.mubr.bf16.gmra.mrb[132].mxu0 %v9993_v17  ;;  %v10014_v15 = vld [vmem:[%s10646_s15 + $0x2c] ss:$108 sps:$4 sm:$0xff]  }
 0x130   : > { %v11161_v37 = vadd.f32 %v8266_v36, %v11072_v3  ;;  %5324 = vmatprep.mubr.bf16.mxu1 %v9994_v29  ;;  %5421 = vmatprep.mubr.bf16.mxu0 %v9996_v32 }
 0x132   : > { %v8179_v43 = vpop.f32.mrb[28].mxu0  ;;  %v8267_v44 = vpop.f32.mrb[28].mxu1 }
 0x133   : > { %v8180_v45 = vpop.f32.mrb[29].mxu0  ;;  %v8268_v46 = vpop.f32.mrb[29].mxu1 }
 0x134   : > { %v11165_v58 = vadd.f32 %v8180_v45, %v8179_v43  ;;  %v8269_v47 = vadd.f32 %v8268_v46, %v8267_v44  ;;  %v8182_v50 = vpop.f32.mrb[30].mxu0  ;;  %v8270_v53 = vpop.f32.mrb[30].mxu1  ;;  %v10022_v45 = vld [vmem:[%s10646_s15 + $0x104] ss:$108 sps:$4 sm:$0xff]   ;;  %v10034_v46 = vld [vmem:[%s13039_s1 + $0x3c8] sm:$0xff]  }
 0x135   : > { %v8183_v22 = vpop.f32.mrb[31].mxu0  ;;  %v8271_v3 = vpop.f32.mrb[31].mxu1 }
 0x136   : > { %v11170_v57 = vadd.f32 %v8269_v47, %v11087_v14  ;;  %v11172_v59 = vadd.f32 %v8183_v22, %v8182_v50  ;;  %v8272_v61 = vadd.f32 %v8271_v3, %v8270_v53  ;;  %v10024_v22 = vld [vmem:[%s10646_s15 + $0x7b8] ss:$108 sps:$4 sm:$0xff]   ;;  %v10025_v3 = vld [vmem:[%s10646_s15 + $0x100] ss:$108 sps:$4 sm:$0xff]  }
 0x137   : > { %5325 = vmatmul.mubr.bf16.gmra.mrb[136].mxu1 %v9998_v41  ;;  %5422 = vmatmul.mubr.bf16.gmra.mrb[136].mxu0 %v9999_v42  ;;  %v10019_v42 = vld [vmem:[%s13039_s1 + $0x380] sm:$0xff]  }
 0x138   : > { %v11175_v62 = vadd.f32 %v8272_v61, %v11099_v26  ;;  %5332 = vmatprep.mubr.bf16.mxu1 %v10004_v54  ;;  %5429 = vmatprep.mubr.bf16.mxu0 %v10006_v55  ;;  %v10035_v55 = vld [vmem:[%s13039_s1 + $0x388] sm:$0xff]  }
 0x13a   : > { %v8185_v30 = vpop.f32.mrb[32].mxu0  ;;  %v8273_v2 = vpop.f32.mrb[32].mxu1 }
 0x13b   : > { %v8186_v5 = vpop.f32.mrb[33].mxu0  ;;  %v8274_v6 = vpop.f32.mrb[33].mxu1 }
 0x13c   : > { %v11179_v14 = vadd.f32 %v8186_v5, %v8185_v30  ;;  %v8275_v7 = vadd.f32 %v8274_v6, %v8273_v2  ;;  %v8188_v8 = vpop.f32.mrb[34].mxu0  ;;  %v8276_v9 = vpop.f32.mrb[34].mxu1 }
 0x13d   : > { %v8189_v17 = vpop.f32.mrb[35].mxu0  ;;  %v8277_v26 = vpop.f32.mrb[35].mxu1 }
 0x13e   : > { %v11184_v18 = vadd.f32 %v8275_v7, %v11111_v39  ;;  %v11186_v19 = vadd.f32 %v8189_v17, %v8188_v8  ;;  %v8278_v20 = vadd.f32 %v8277_v26, %v8276_v9  ;;  %v10026_v7 = vld [vmem:[%s10646_s15 + $0x894] ss:$108 sps:$4 sm:$0xff]   ;;  %v10028_v8 = vld [vmem:[%s10646_s15 + $0x1dc] ss:$108 sps:$4 sm:$0xff]  }
 0x13f   : > { %5333 = vmatmul.mubr.bf16.gmra.mrb[140].mxu1 %v10008_v63  ;;  %5430 = vmatmul.mubr.bf16.gmra.mrb[140].mxu0 %v10009_v0 }
 0x140   : > { %v11189_v38 = vadd.f32 %v8278_v20, %v11121_v52  ;;  %5437 = vmatprep.mubr.bf16.mxu0 %v10010_v12  ;;  %5534 = vmatprep.mubr.bf16.mxu1 %v10014_v15  ;;  %v10020_v52 = vld [vmem:[%s10646_s15 + $0x7bc] ss:$108 sps:$4 sm:$0xff]   ;;  %v10051_v15 = vld [vmem:[%s13039_s1 + $0x390] sm:$0xff]  }
 0x142   : > { %v8191_v28 = vpop.f32.mrb[36].mxu0  ;;  %v8279_v29 = vpop.f32.mrb[36].mxu1 }
 0x143   : > { %v8192_v32 = vpop.f32.mrb[37].mxu0  ;;  %v8280_v33 = vpop.f32.mrb[37].mxu1 }
 0x144   : > { %v11193_v39 = vadd.f32 %v8192_v32, %v8191_v28  ;;  %v8281_v48 = vadd.f32 %v8280_v33, %v8279_v29  ;;  %v8194_v36 = vpop.f32.mrb[38].mxu0  ;;  %v8282_v41 = vpop.f32.mrb[38].mxu1  ;;  %v10030_v29 = vld [vmem:[%s10646_s15 + $0x890] ss:$108 sps:$4 sm:$0xff]   ;;  %v10031_v32 = vld [vmem:[%s10646_s15 + $0x1d8] ss:$108 sps:$4 sm:$0xff]  }
 0x145   : > { %v8195_v43 = vpop.f32.mrb[39].mxu0  ;;  %v8283_v44 = vpop.f32.mrb[39].mxu1 }
 0x146   : > { %v11204_v47 = vadd.f32 %v8281_v48, %v11137_v1  ;;  %v11206_v50 = vadd.f32 %v8195_v43, %v8194_v36  ;;  %v8284_v53 = vadd.f32 %v8283_v44, %v8282_v41  ;;  %v10050_v1 = vld [vmem:[%s13039_s1 + $0x3d0] sm:$0xff]   ;;  %v10036_v44 = vld [vmem:[%s10646_s15 + $0x96c] ss:$108 sps:$4 sm:$0xff]  }
 0x147   : > { %5438 = vmatmul.mubr.bf16.gmra.mrb[144].mxu0 %v10015_v25  ;;  %5535 = vmatmul.mubr.bf16.vlgmr.msra.gmra.mrb[144].mxu1 %v10012_v23  ;;  %v10066_v23 = vld [vmem:[%s13039_s1 + $0x3d8] sm:$0xff]  }
 0x148   : > { %v11209_v54 = vadd.f32 %v8284_v53, %v11144_v11  ;;  %8906 = vmatpush3.bf16.msra.mxu1 %v10019_v42  ;;  %5445 = vmatprep.mubr.bf16.mxu0 %v10020_v52  ;;  %v10067_v25 = vld [vmem:[%s13039_s1 + $0x398] sm:$0xff]  }
 0x149   : > { %5542 = vmatprep.mubr.bf16.mxu1 %v10022_v45  ;;  %8907 = vmatprep.subr.bf16.mxu1 %v10034_v46  ;;  %v10038_v45 = vld [vmem:[%s10646_s15 + $0x2b4] ss:$108 sps:$4 sm:$0xff]  }
 0x14a   : > { %v8197_v61 = vpop.f32.mrb[40].mxu0  ;;  %v8285_v63 = vpop.f32.mrb[40].mxu1 }
 0x14b   : > { %v8198_v11 = vpop.f32.mrb[41].mxu0  ;;  %v8286_v0 = vpop.f32.mrb[41].mxu1 }
 0x14c   : > { %v11219_v30 = vadd.f32 %v8198_v11, %v8197_v61  ;;  %v8287_v2 = vadd.f32 %v8286_v0, %v8285_v63  ;;  %v8200_v5 = vpop.f32.mrb[42].mxu0  ;;  %v8288_v6 = vpop.f32.mrb[42].mxu1  ;;  %8908 = vmatpush3.bf16.msra.mxu1 %v10035_v55  ;;  %v10083_v55 = vld [vmem:[%s13039_s1 + $0x3a0] sm:$0xff]   ;;  %v10099_v11 = vld [vmem:[%s13039_s1 + $0x3a8] sm:$0xff]  }
 0x14d   : > { %v8201_v9 = vpop.f32.mrb[43].mxu0  ;;  %v8289_v12 = vpop.f32.mrb[43].mxu1  ;;  %8909 = vmatprep.subr.bf16.mxu1 %v10050_v1  ;;  %v10098_v1 = vld [vmem:[%s13039_s1 + $0x3e8] sm:$0xff]  }
 0x14e   : > { %v11227_v17 = vadd.f32 %v8287_v2, %v11151_v21  ;;  %v11229_v26 = vadd.f32 %v8201_v9, %v8200_v5  ;;  %v8290_v20 = vadd.f32 %v8289_v12, %v8288_v6  ;;  %v10082_v21 = vld [vmem:[%s13039_s1 + $0x3e0] sm:$0xff]   ;;  %v10040_v0 = vld [vmem:[%s10646_s15 + $0x968] ss:$108 sps:$4 sm:$0xff]   ;;  %v10041_v2 = vld [vmem:[%s10646_s15 + $0x2b0] ss:$108 sps:$4 sm:$0xff]  }
 0x14f   : > { %5446 = vmatmul.mubr.bf16.gmra.mrb[148].mxu0 %v10024_v22  ;;  %5543 = vmatmul.mubr.bf16.gmra.mrb[148].mxu1 %v10025_v3 }
 0x150   : > { %v11238_v28 = vadd.f32 %v8290_v20, %v11158_v35  ;;  %5453 = vmatprep.mubr.bf16.mxu0 %v10026_v7  ;;  %5550 = vmatprep.mubr.bf16.mxu1 %v10028_v8  ;;  %v10042_v20 = vld [vmem:[%s10646_s15 + $0xa44] ss:$108 sps:$4 sm:$0xff]  }
 0x151   : > { %8910 = vmatpush3.bf16.msra.mxu1 %v10051_v15 }
 0x152   : > { %v8203_v33 = vpop.f32.mrb[44].mxu0  ;;  %v8291_v48 = vpop.f32.mrb[44].mxu1  ;;  %8911 = vmatprep.subr.bf16.mxu1 %v10066_v23  ;;  %v10044_v23 = vld [vmem:[%s10646_s15 + $0x38c] ss:$108 sps:$4 sm:$0xff]  }
 0x153   : > { %v8204_v36 = vpop.f32.mrb[45].mxu0  ;;  %v8292_v41 = vpop.f32.mrb[45].mxu1 }
 0x154   : > { %v11245_v42 = vadd.f32 %v8204_v36, %v8203_v33  ;;  %v8293_v35 = vadd.f32 %v8292_v41, %v8291_v48  ;;  %v8206_v52 = vpop.f32.mrb[46].mxu0  ;;  %v8294_v43 = vpop.f32.mrb[46].mxu1  ;;  %v10130_v41 = vld [vmem:[%s13039_s1 + $0x3f8] sm:$0xff]  }
 0x155   : > { %v8207_v46 = vpop.f32.mrb[47].mxu0  ;;  %v8295_v53 = vpop.f32.mrb[47].mxu1  ;;  %8912 = vmatpush3.bf16.msra.mxu1 %v10067_v25 }
 0x156   : > { %v11256_v22 = vadd.f32 %v8293_v35, %v11165_v58  ;;  %v11258_v3 = vadd.f32 %v8207_v46, %v8206_v52  ;;  %v8296_v61 = vadd.f32 %v8295_v53, %v8294_v43  ;;  %8913 = vmatprep.subr.bf16.mxu1 %v10082_v21  ;;  %v10114_v58 = vld [vmem:[%s13039_s1 + $0x3f0] sm:$0xff]   ;;  %v10131_v35 = vld [vmem:[%s13039_s1 + $0x3b8] sm:$0xff]   ;;  %v10046_v43 = vld [vmem:[%s10646_s15 + $0xa40] ss:$108 sps:$4 sm:$0xff]  }
 0x157   : > { %5454 = vmatmul.mubr.bf16.gmra.mrb[152].mxu0 %v10030_v29  ;;  %5551 = vmatmul.mubr.bf16.gmra.mrb[152].mxu1 %v10031_v32  ;;  %v10115_v29 = vld [vmem:[%s13039_s1 + $0x3b0] sm:$0xff]  }
 0x158   : > { %v11261_v63 = vadd.f32 %v8296_v61, %v11172_v59  ;;  %5461 = vmatprep.mubr.bf16.mxu0 %v10036_v44  ;;  %5558 = vmatprep.mubr.bf16.mxu1 %v10038_v45  ;;  %v10047_v44 = vld [vmem:[%s10646_s15 + $0x388] ss:$108 sps:$4 sm:$0xff]  }
 0x159   : > { %8914 = vmatpush3.bf16.msra.mxu1 %v10083_v55 }
 0x15a   : > { %v8297_v5 = vpop.f32.mrb[48].mxu1  ;;  %v8361_v6 = vpop.f32.mrb[48].mxu0  ;;  %8915 = vmatprep.subr.bf16.mxu1 %v10098_v1 }
 0x15b   : > { %v8298_v59 = vpop.f32.mrb[49].mxu1  ;;  %v8362_v7 = vpop.f32.mrb[49].mxu0 }
 0x15c   : > { %v8299_v8 = vadd.f32 %v8298_v59, %v8297_v5  ;;  %v8363_v9 = vadd.f32 %v8362_v7, %v8361_v6  ;;  %v8300_v12 = vpop.f32.mrb[50].mxu1  ;;  %v8364_v15 = vpop.f32.mrb[50].mxu0 }
 0x15d   : > { %v8301_v25 = vpop.f32.mrb[51].mxu1  ;;  %v8365_v21 = vpop.f32.mrb[51].mxu0  ;;  %8916 = vmatpush3.bf16.msra.mxu1 %v10099_v11  ;;  %v10052_v11 = vld [vmem:[%s10646_s15 + $0xb1c] ss:$108 sps:$4 sm:$0xff]  }
 0x15e   : > { %v11277_v32 = vadd.f32 %v8299_v8, %v11179_v14  ;;  %v11280_v33 = vadd.f32 %v8363_v9, %v11119_v51  ;;  %v8302_v48 = vadd.f32 %v8301_v25, %v8300_v12  ;;  %v8366_v36 = vadd.f32 %v8365_v21, %v8364_v15  ;;  %8917 = vmatprep.subr.bf16.mxu1 %v10114_v58  ;;  %v10146_v51 = vld [vmem:[%s13039_s1 + $0x4c0] sm:$0xff]  }
 0x15f   : > { %5462 = vmatmul.mubr.bf16.gmra.mrb[156].mxu0 %v10040_v0  ;;  %5559 = vmatmul.mubr.bf16.gmra.mrb[156].mxu1 %v10041_v2  ;;  %v10054_v58 = vld [vmem:[%s10646_s15 + $0x464] ss:$108 sps:$4 sm:$0xff]   ;;  %v10057_v12 = vld [vmem:[%s10646_s15 + $0x460] ss:$108 sps:$4 sm:$0xff]  }
 0x160   : > { %v11289_v52 = vadd.f32 %v8302_v48, %v11186_v19  ;;  %v11292_v14 = vadd.f32 %v8366_v36, %v11130_v56  ;;  %5469 = vmatprep.mubr.bf16.mxu0 %v10042_v20  ;;  %5566 = vmatprep.mubr.bf16.mxu1 %v10044_v23  ;;  %v10058_v36 = vld [vmem:[%s10646_s15 + $0xbf4] ss:$108 sps:$4 sm:$0xff]  }
 0x161   : > { %8918 = vmatpush3.bf16.msra.mxu1 %v10115_v29 }
 0x162   : > { %v8303_v45 = vpop.f32.mrb[52].mxu1  ;;  %v8367_v46 = vpop.f32.mrb[52].mxu0  ;;  %8919 = vmatprep.subr.bf16.mxu1 %v10130_v41 }
 0x163   : > { %v8304_v53 = vpop.f32.mrb[53].mxu1  ;;  %v8368_v19 = vpop.f32.mrb[53].mxu0 }
 0x164   : > { %v8305_v55 = vadd.f32 %v8304_v53, %v8303_v45  ;;  %v8369_v1 = vadd.f32 %v8368_v19, %v8367_v46  ;;  %v8306_v56 = vpop.f32.mrb[54].mxu1  ;;  %v8370_v61 = vpop.f32.mrb[54].mxu0  ;;  %v10062_v53 = vld [vmem:[%s10646_s15 + $0xbf0] ss:$108 sps:$4 sm:$0xff]  }
 0x165   : > { %v8307_v0 = vpop.f32.mrb[55].mxu1  ;;  %v8371_v2 = vpop.f32.mrb[55].mxu0  ;;  %8920 = vmatpush3.bf16.msra.mxu1 %v10131_v35 }
 0x166   : > { %v11302_v5 = vadd.f32 %v8305_v55, %v11193_v39  ;;  %v11305_v6 = vadd.f32 %v8369_v1, %v11142_v10  ;;  %v8308_v59 = vadd.f32 %v8307_v0, %v8306_v56  ;;  %v8372_v7 = vadd.f32 %v8371_v2, %v8370_v61  ;;  %9129 = vmatprep.subr.bf16.mxu1 %v10146_v51  ;;  %v10056_v39 = vld [vmem:[%s10646_s15 + $0xb18] ss:$108 sps:$4 sm:$0xff]  }
 0x167   : > { %5470 = vmatmul.mubr.bf16.gmra.mrb[160].mxu0 %v10046_v43  ;;  %5567 = vmatmul.mubr.bf16.gmra.mrb[160].mxu1 %v10047_v44  ;;  %v10068_v0 = vld [vmem:[%s10646_s15 + $0xccc] ss:$108 sps:$4 sm:$0xff]  }
 0x168   : > { %v11308_v8 = vadd.f32 %v8308_v59, %v11206_v50  ;;  %v11311_v9 = vadd.f32 %v8372_v7, %v11147_v13  ;;  %5477 = vmatprep.mubr.bf16.mxu0 %v10052_v11  ;;  %5574 = vmatprep.mubr.bf16.mxu1 %v10054_v58  ;;  %v10060_v50 = vld [vmem:[%s10646_s15 + $0x53c] ss:$108 sps:$4 sm:$0xff]  }
 0x16a   : > { %v8309_v15 = vpop.f32.mrb[56].mxu1  ;;  %v8373_v10 = vpop.f32.mrb[56].mxu0 }
 0x16b   : > { %v8310_v20 = vpop.f32.mrb[57].mxu1  ;;  %v8374_v23 = vpop.f32.mrb[57].mxu0 }
 0x16c   : > { %v8311_v25 = vadd.f32 %v8310_v20, %v8309_v15  ;;  %v8375_v21 = vadd.f32 %v8374_v23, %v8373_v10  ;;  %v8312_v29 = vpop.f32.mrb[58].mxu1  ;;  %v8376_v48 = vpop.f32.mrb[58].mxu0  ;;  %v10072_v20 = vld [vmem:[%s10646_s15 + $0xcc8] ss:$108 sps:$4 sm:$0xff]  }
 0x16d   : > { %v8313_v41 = vpop.f32.mrb[59].mxu1  ;;  %v8377_v35 = vpop.f32.mrb[59].mxu0 }
 0x16e   : > { %v11318_v13 = vadd.f32 %v8311_v25, %v11219_v30  ;;  %v11321_v51 = vadd.f32 %v8375_v21, %v11156_v34  ;;  %v8314_v43 = vadd.f32 %v8313_v41, %v8312_v29  ;;  %v8378_v44 = vadd.f32 %v8377_v35, %v8376_v48  ;;  %v10063_v30 = vld [vmem:[%s10646_s15 + $0x538] ss:$108 sps:$4 sm:$0xff]  }
 0x16f   : > { %5478 = vmatmul.mubr.bf16.gmra.mrb[164].mxu0 %v10056_v39  ;;  %5575 = vmatmul.mubr.bf16.gmra.mrb[164].mxu1 %v10057_v12  ;;  %v10074_v41 = vld [vmem:[%s10646_s15 + $0x6ec] ss:$108 sps:$4 sm:$0xff]  }
 0x170   : > { %v11324_v45 = vadd.f32 %v8314_v43, %v11229_v26  ;;  %v11327_v46 = vadd.f32 %v8378_v44, %v11161_v37  ;;  %5485 = vmatprep.mubr.bf16.mxu0 %v10058_v36  ;;  %5582 = vmatprep.mubr.bf16.mxu1 %v10060_v50  ;;  %v10070_v26 = vld [vmem:[%s10646_s15 + $0x614] ss:$108 sps:$4 sm:$0xff]  }
 0x172   : > { %v8315_v19 = vpop.f32.mrb[60].mxu1  ;;  %v8379_v55 = vpop.f32.mrb[60].mxu0 }
 0x173   : > { %v8316_v34 = vpop.f32.mrb[61].mxu1  ;;  %v8380_v1 = vpop.f32.mrb[61].mxu0 }
 0x174   : > { %v8317_v56 = vadd.f32 %v8316_v34, %v8315_v19  ;;  %v8381_v61 = vadd.f32 %v8380_v1, %v8379_v55  ;;  %v8318_v11 = vpop.f32.mrb[62].mxu1  ;;  %v8382_v58 = vpop.f32.mrb[62].mxu0  ;;  %v10076_v34 = vld [vmem:[%s10646_s15 + $0x30] ss:$108 sps:$4 sm:$0xff]  }
 0x175   : > { %v8319_v2 = vpop.f32.mrb[63].mxu1  ;;  %v8383_v59 = vpop.f32.mrb[63].mxu0 }
 0x176   : > { %v11334_v37 = vadd.f32 %v8317_v56, %v11245_v42  ;;  %v11337_v7 = vadd.f32 %v8381_v61, %v11170_v57  ;;  %v8320_v39 = vadd.f32 %v8319_v2, %v8318_v11  ;;  %v8384_v12 = vadd.f32 %v8383_v59, %v8382_v58  ;;  %v10073_v42 = vld [vmem:[%s10646_s15 + $0x610] ss:$108 sps:$4 sm:$0xff]  }
 0x177   : > { %5486 = vmatmul.mubr.bf16.gmra.mrb[168].mxu0 %v10062_v53  ;;  %5583 = vmatmul.mubr.bf16.gmra.mrb[168].mxu1 %v10063_v30  ;;  %v10084_v2 = vld [vmem:[%s10646_s15 + $0x7c4] ss:$108 sps:$4 sm:$0xff]  }
 0x178   : > { %v11340_v15 = vadd.f32 %v8320_v39, %v11258_v3  ;;  %v11343_v10 = vadd.f32 %v8384_v12, %v11175_v62  ;;  %5493 = vmatprep.mubr.bf16.mxu0 %v10068_v0  ;;  %5590 = vmatprep.mubr.bf16.mxu1 %v10070_v26  ;;  %v10078_v3 = vld [vmem:[%s10646_s15 + $0x34] ss:$108 sps:$4 sm:$0xff]   ;;  %v10086_v39 = vld [vmem:[%s10646_s15 + $0x10c] ss:$108 sps:$4 sm:$0xff]  }
 0x179   : > { %v10096_v12 = vld [vmem:[%s13039_s1 + $0x448] sm:$0xff]  }
 0x17a   : > { %v8321_v23 = vpop.f32.mrb[64].mxu1  ;;  %v8385_v25 = vpop.f32.mrb[64].mxu0 }
 0x17b   : > { %v8322_v57 = vpop.f32.mrb[65].mxu1  ;;  %v8386_v21 = vpop.f32.mrb[65].mxu0 }
 0x17c   : > { %v8323_v29 = vadd.f32 %v8322_v57, %v8321_v23  ;;  %v8387_v48 = vadd.f32 %v8386_v21, %v8385_v25  ;;  %v8324_v36 = vpop.f32.mrb[66].mxu1  ;;  %v8388_v50 = vpop.f32.mrb[66].mxu0 }
 0x17d   : > { %v8325_v35 = vpop.f32.mrb[67].mxu1  ;;  %v8389_v43 = vpop.f32.mrb[67].mxu0 }
 0x17e   : > { %v11350_v62 = vadd.f32 %v8323_v29, %v11029_v24  ;;  %v11353_v44 = vadd.f32 %v8387_v48, %v11184_v18  ;;  %v8326_v53 = vadd.f32 %v8325_v35, %v8324_v36  ;;  %v8390_v30 = vadd.f32 %v8389_v43, %v8388_v50  ;;  %v10079_v24 = vld [vmem:[%s10646_s15 + $0x6e8] ss:$108 sps:$4 sm:$0xff]   ;;  %v10088_v29 = vld [vmem:[%s10646_s15 + $0x7c0] ss:$108 sps:$4 sm:$0xff]  }
 0x17f   : > { %5494 = vmatmul.mubr.bf16.gmra.mrb[172].mxu0 %v10072_v20  ;;  %5591 = vmatmul.mubr.bf16.gmra.mrb[172].mxu1 %v10073_v42  ;;  %v10089_v48 = vld [vmem:[%s10646_s15 + $0x108] ss:$108 sps:$4 sm:$0xff]  }
 0x180   : > { %v11356_v19 = vadd.f32 %v8326_v53, %v11035_v31  ;;  %v11359_v55 = vadd.f32 %v8390_v30, %v11189_v38  ;;  %5598 = vmatprep.mubr.bf16.mxu1 %v10074_v41  ;;  %5695 = vmatprep.mubr.bf16.mxu0 %v10078_v3  ;;  %v10081_v31 = vld [vmem:[%s13039_s1 + $0x400] sm:$0xff]   ;;  %v10090_v53 = vld [vmem:[%s10646_s15 + $0x89c] ss:$108 sps:$4 sm:$0xff]  }
 0x181   : > { %v10092_v30 = vld [vmem:[%s10646_s15 + $0x1e4] ss:$108 sps:$4 sm:$0xff]  }
 0x182   : > { %v8327_v1 = vpop.f32.mrb[68].mxu1  ;;  %v8391_v56 = vpop.f32.mrb[68].mxu0 }
 0x183   : > { %v8328_v18 = vpop.f32.mrb[69].mxu1  ;;  %v8392_v61 = vpop.f32.mrb[69].mxu0 }
 0x184   : > { %v8329_v11 = vadd.f32 %v8328_v18, %v8327_v1  ;;  %v8393_v58 = vadd.f32 %v8392_v61, %v8391_v56  ;;  %v8330_v0 = vpop.f32.mrb[70].mxu1  ;;  %v8394_v26 = vpop.f32.mrb[70].mxu0  ;;  %v10113_v1 = vld [vmem:[%s13039_s1 + $0x410] sm:$0xff]  }
 0x185   : > { %v8331_v38 = vpop.f32.mrb[71].mxu1  ;;  %v8395_v59 = vpop.f32.mrb[71].mxu0 }
 0x186   : > { %v11372_v20 = vadd.f32 %v8329_v11, %v11041_v40  ;;  %v11375_v42 = vadd.f32 %v8393_v58, %v11204_v47  ;;  %v8332_v23 = vadd.f32 %v8331_v38, %v8330_v0  ;;  %v8396_v25 = vadd.f32 %v8395_v59, %v8394_v26  ;;  %v10097_v40 = vld [vmem:[%s13039_s1 + $0x408] sm:$0xff]   ;;  %v10112_v47 = vld [vmem:[%s13039_s1 + $0x450] sm:$0xff]   ;;  %v10128_v58 = vld [vmem:[%s13039_s1 + $0x458] sm:$0xff]  }
 0x187   : > { %5599 = vmatmul.mubr.bf16.gmra.mrb[176].mxu1 %v10079_v24  ;;  %5696 = vmatmul.mubr.bf16.vlgmr.msra.gmra.mrb[176].mxu0 %v10076_v34  ;;  %v10129_v0 = vld [vmem:[%s13039_s1 + $0x418] sm:$0xff]  }
 0x188   : > { %v11378_v57 = vadd.f32 %v8332_v23, %v11053_v49  ;;  %v11381_v21 = vadd.f32 %v8396_v25, %v11209_v54  ;;  %9018 = vmatpush3.bf16.msra.mxu0 %v10081_v31  ;;  %5606 = vmatprep.mubr.bf16.mxu1 %v10084_v2  ;;  %v10094_v31 = vld [vmem:[%s10646_s15 + $0x898] ss:$108 sps:$4 sm:$0xff]   ;;  %v10095_v2 = vld [vmem:[%s10646_s15 + $0x1e0] ss:$108 sps:$4 sm:$0xff]  }
 0x189   : > { %5703 = vmatprep.mubr.bf16.mxu0 %v10086_v39  ;;  %9019 = vmatprep.subr.bf16.mxu0 %v10096_v12 }
 0x18a   : > { %v8333_v49 = vpop.f32.mrb[72].mxu1  ;;  %v8397_v36 = vpop.f32.mrb[72].mxu0 }
 0x18b   : > { %v8334_v54 = vpop.f32.mrb[73].mxu1  ;;  %v8398_v50 = vpop.f32.mrb[73].mxu0 }
 0x18c   : > { %v8335_v41 = vadd.f32 %v8334_v54, %v8333_v49  ;;  %v8399_v3 = vadd.f32 %v8398_v50, %v8397_v36  ;;  %v8336_v35 = vpop.f32.mrb[74].mxu1  ;;  %v8400_v43 = vpop.f32.mrb[74].mxu0  ;;  %9020 = vmatpush3.bf16.msra.mxu0 %v10097_v40  ;;  %v10100_v40 = vld [vmem:[%s10646_s15 + $0x974] ss:$108 sps:$4 sm:$0xff]   ;;  %v10160_v36 = vld [vmem:[%s13039_s1 + $0x468] sm:$0xff]  }
 0x18d   : > { %v8337_v34 = vpop.f32.mrb[75].mxu1  ;;  %v8401_v24 = vpop.f32.mrb[75].mxu0  ;;  %9021 = vmatprep.subr.bf16.mxu0 %v10112_v47  ;;  %v10102_v47 = vld [vmem:[%s10646_s15 + $0x2bc] ss:$108 sps:$4 sm:$0xff]   ;;  %v10145_v49 = vld [vmem:[%s13039_s1 + $0x420] sm:$0xff]  }
 0x18e   : > { %v11397_v56 = vadd.f32 %v8335_v41, %v11065_v60  ;;  %v11400_v18 = vadd.f32 %v8399_v3, %v11227_v17  ;;  %v8338_v61 = vadd.f32 %v8337_v34, %v8336_v35  ;;  %v8402_v11 = vadd.f32 %v8401_v24, %v8400_v43  ;;  %v10144_v17 = vld [vmem:[%s13039_s1 + $0x460] sm:$0xff]  }
 0x18f   : > { %5607 = vmatmul.mubr.bf16.gmra.mrb[180].mxu1 %v10088_v29  ;;  %5704 = vmatmul.mubr.bf16.gmra.mrb[180].mxu0 %v10089_v48 }
 0x190   : > { %v11409_v26 = vadd.f32 %v8338_v61, %v11074_v4  ;;  %v11412_v60 = vadd.f32 %v8402_v11, %v11238_v28  ;;  %5614 = vmatprep.mubr.bf16.mxu1 %v10090_v53  ;;  %5711 = vmatprep.mubr.bf16.mxu0 %v10092_v30  ;;  %v10104_v53 = vld [vmem:[%s10646_s15 + $0x970] ss:$108 sps:$4 sm:$0xff]   ;;  %v10105_v30 = vld [vmem:[%s10646_s15 + $0x2b8] ss:$108 sps:$4 sm:$0xff]  }
 0x191   : > { %9022 = vmatpush3.bf16.msra.mxu0 %v10113_v1 }
 0x192   : > { %v8339_v38 = vpop.f32.mrb[76].mxu1  ;;  %v8403_v59 = vpop.f32.mrb[76].mxu0  ;;  %9023 = vmatprep.subr.bf16.mxu0 %v10128_v58 }
 0x193   : > { %v8340_v39 = vpop.f32.mrb[77].mxu1  ;;  %v8404_v4 = vpop.f32.mrb[77].mxu0 }
 0x194   : > { %v8341_v12 = vadd.f32 %v8340_v39, %v8339_v38  ;;  %v8405_v23 = vadd.f32 %v8404_v4, %v8403_v59  ;;  %v8342_v28 = vpop.f32.mrb[78].mxu1  ;;  %v8406_v25 = vpop.f32.mrb[78].mxu0  ;;  %v10177_v38 = vld [vmem:[%s13039_s1 + $0x430] sm:$0xff]  }
 0x195   : > { %v8343_v29 = vpop.f32.mrb[79].mxu1  ;;  %v8407_v48 = vpop.f32.mrb[79].mxu0  ;;  %9024 = vmatpush3.bf16.msra.mxu0 %v10129_v0  ;;  %v10106_v0 = vld [vmem:[%s10646_s15 + $0xa4c] ss:$108 sps:$4 sm:$0xff]  }
 0x196   : > { %v11428_v54 = vadd.f32 %v8341_v12, %v11089_v16  ;;  %v11431_v50 = vadd.f32 %v8405_v23, %v11256_v22  ;;  %v8344_v41 = vadd.f32 %v8343_v29, %v8342_v28  ;;  %v8408_v3 = vadd.f32 %v8407_v48, %v8406_v25  ;;  %9025 = vmatprep.subr.bf16.mxu0 %v10144_v17  ;;  %v10161_v16 = vld [vmem:[%s13039_s1 + $0x428] sm:$0xff]   ;;  %v10176_v22 = vld [vmem:[%s13039_s1 + $0x470] sm:$0xff]   ;;  %v10192_v23 = vld [vmem:[%s13039_s1 + $0x478] sm:$0xff]  }
 0x197   : > { %5615 = vmatmul.mubr.bf16.gmra.mrb[184].mxu1 %v10094_v31  ;;  %5712 = vmatmul.mubr.bf16.gmra.mrb[184].mxu0 %v10095_v2  ;;  %v10108_v17 = vld [vmem:[%s10646_s15 + $0x394] ss:$108 sps:$4 sm:$0xff]   ;;  %v10193_v28 = vld [vmem:[%s13039_s1 + $0x438] sm:$0xff]  }
 0x198   : > { %v11434_v35 = vadd.f32 %v8344_v41, %v11101_v27  ;;  %v11437_v43 = vadd.f32 %v8408_v3, %v11261_v63  ;;  %5622 = vmatprep.mubr.bf16.mxu1 %v10100_v40  ;;  %5719 = vmatprep.mubr.bf16.mxu0 %v10102_v47  ;;  %v10110_v40 = vld [vmem:[%s10646_s15 + $0xa48] ss:$108 sps:$4 sm:$0xff]   ;;  %v10111_v47 = vld [vmem:[%s10646_s15 + $0x390] ss:$108 sps:$4 sm:$0xff]  }
 0x199   : > { %9026 = vmatpush3.bf16.msra.mxu0 %v10145_v49 }
 0x19a   : > { %v8409_v27 = vpop.f32.mrb[80].mxu0  ;;  %v8473_v34 = vpop.f32.mrb[80].mxu1  ;;  %9027 = vmatprep.subr.bf16.mxu0 %v10160_v36 }
 0x19b   : > { %v8410_v63 = vpop.f32.mrb[81].mxu0  ;;  %v8474_v24 = vpop.f32.mrb[81].mxu1 }
 0x19c   : > { %v8411_v1 = vadd.f32 %v8410_v63, %v8409_v27  ;;  %v8475_v61 = vadd.f32 %v8474_v24, %v8473_v34  ;;  %v8412_v11 = vpop.f32.mrb[82].mxu0  ;;  %v8476_v58 = vpop.f32.mrb[82].mxu1 }
 0x19d   : > { %v8413_v31 = vpop.f32.mrb[83].mxu0  ;;  %v8477_v2 = vpop.f32.mrb[83].mxu1  ;;  %9028 = vmatpush3.bf16.msra.mxu0 %v10161_v16  ;;  %v10116_v16 = vld [vmem:[%s10646_s15 + $0xb24] ss:$108 sps:$4 sm:$0xff]  }
 0x19e   : > { %v11453_v59 = vadd.f32 %v8411_v1, %v11277_v32  ;;  %v11456_v39 = vadd.f32 %v8475_v61, %v11280_v33  ;;  %v8414_v4 = vadd.f32 %v8413_v31, %v8412_v11  ;;  %v8478_v12 = vadd.f32 %v8477_v2, %v8476_v58  ;;  %9029 = vmatprep.subr.bf16.mxu0 %v10176_v22  ;;  %v10208_v33 = vld [vmem:[%s13039_s1 + $0x540] sm:$0xff]   ;;  %v10118_v22 = vld [vmem:[%s10646_s15 + $0x46c] ss:$108 sps:$4 sm:$0xff]   ;;  %v10121_v11 = vld [vmem:[%s10646_s15 + $0x468] ss:$108 sps:$4 sm:$0xff]  }
 0x19f   : > { %5623 = vmatmul.mubr.bf16.gmra.mrb[188].mxu1 %v10104_v53  ;;  %5720 = vmatmul.mubr.bf16.gmra.mrb[188].mxu0 %v10105_v30 }
 0x1a0   : > { %v11465_v25 = vadd.f32 %v8414_v4, %v11289_v52  ;;  %v11468_v32 = vadd.f32 %v8478_v12, %v11292_v14  ;;  %5630 = vmatprep.mubr.bf16.mxu1 %v10106_v0  ;;  %5727 = vmatprep.mubr.bf16.mxu0 %v10108_v17  ;;  %v10122_v12 = vld [vmem:[%s10646_s15 + $0xbfc] ss:$108 sps:$4 sm:$0xff]  }
 0x1a1   : > { %9030 = vmatpush3.bf16.msra.mxu0 %v10177_v38 }
 0x1a2   : > { %v8415_v29 = vpop.f32.mrb[84].mxu0  ;;  %v8479_v48 = vpop.f32.mrb[84].mxu1  ;;  %9031 = vmatprep.subr.bf16.mxu0 %v10192_v23 }
 0x1a3   : > { %v8416_v49 = vpop.f32.mrb[85].mxu0  ;;  %v8480_v52 = vpop.f32.mrb[85].mxu1 }
 0x1a4   : > { %v8417_v36 = vadd.f32 %v8416_v49, %v8415_v29  ;;  %v8481_v41 = vadd.f32 %v8480_v52, %v8479_v48  ;;  %v8418_v14 = vpop.f32.mrb[86].mxu0  ;;  %v8482_v3 = vpop.f32.mrb[86].mxu1  ;;  %v10126_v49 = vld [vmem:[%s10646_s15 + $0xbf8] ss:$108 sps:$4 sm:$0xff]  }
 0x1a5   : > { %v8419_v53 = vpop.f32.mrb[87].mxu0  ;;  %v8483_v30 = vpop.f32.mrb[87].mxu1  ;;  %9032 = vmatpush3.bf16.msra.mxu0 %v10193_v28 }
 0x1a6   : > { %v11478_v27 = vadd.f32 %v8417_v36, %v11302_v5  ;;  %v11481_v34 = vadd.f32 %v8481_v41, %v11305_v6  ;;  %v8420_v63 = vadd.f32 %v8419_v53, %v8418_v14  ;;  %v8484_v24 = vadd.f32 %v8483_v30, %v8482_v3  ;;  %9241 = vmatprep.subr.bf16.mxu0 %v10208_v33  ;;  %v10120_v5 = vld [vmem:[%s10646_s15 + $0xb20] ss:$108 sps:$4 sm:$0xff]  }
 0x1a7   : > { %5631 = vmatmul.mubr.bf16.gmra.mrb[192].mxu1 %v10110_v40  ;;  %5728 = vmatmul.mubr.bf16.gmra.mrb[192].mxu0 %v10111_v47  ;;  %v10132_v53 = vld [vmem:[%s10646_s15 + $0xcd4] ss:$108 sps:$4 sm:$0xff]  }
 0x1a8   : > { %v11484_v1 = vadd.f32 %v8420_v63, %v11308_v8  ;;  %v11487_v61 = vadd.f32 %v8484_v24, %v11311_v9  ;;  %5638 = vmatprep.mubr.bf16.mxu1 %v10116_v16  ;;  %5735 = vmatprep.mubr.bf16.mxu0 %v10118_v22  ;;  %v10124_v8 = vld [vmem:[%s10646_s15 + $0x544] ss:$108 sps:$4 sm:$0xff]  }
 0x1aa   : > { %v8421_v58 = vpop.f32.mrb[88].mxu0  ;;  %v8485_v6 = vpop.f32.mrb[88].mxu1 }
 0x1ab   : > { %v8422_v0 = vpop.f32.mrb[89].mxu0  ;;  %v8486_v17 = vpop.f32.mrb[89].mxu1 }
 0x1ac   : > { %v8423_v31 = vadd.f32 %v8422_v0, %v8421_v58  ;;  %v8487_v2 = vadd.f32 %v8486_v17, %v8485_v6  ;;  %v8424_v38 = vpop.f32.mrb[90].mxu0  ;;  %v8488_v4 = vpop.f32.mrb[90].mxu1  ;;  %v10136_v0 = vld [vmem:[%s10646_s15 + $0xcd0] ss:$108 sps:$4 sm:$0xff]  }
 0x1ad   : > { %v8425_v23 = vpop.f32.mrb[91].mxu0  ;;  %v8489_v28 = vpop.f32.mrb[91].mxu1 }
 0x1ae   : > { %v11494_v9 = vadd.f32 %v8423_v31, %v11318_v13  ;;  %v11497_v33 = vadd.f32 %v8487_v2, %v11321_v51  ;;  %v8426_v40 = vadd.f32 %v8425_v23, %v8424_v38  ;;  %v8490_v47 = vadd.f32 %v8489_v28, %v8488_v4  ;;  %v10127_v13 = vld [vmem:[%s10646_s15 + $0x540] ss:$108 sps:$4 sm:$0xff]  }
 0x1af   : > { %5639 = vmatmul.mubr.bf16.gmra.mrb[196].mxu1 %v10120_v5  ;;  %5736 = vmatmul.mubr.bf16.gmra.mrb[196].mxu0 %v10121_v11  ;;  %v10138_v23 = vld [vmem:[%s10646_s15 + $0x6f4] ss:$108 sps:$4 sm:$0xff]  }
 0x1b0   : > { %v11500_v29 = vadd.f32 %v8426_v40, %v11324_v45  ;;  %v11503_v48 = vadd.f32 %v8490_v47, %v11327_v46  ;;  %5646 = vmatprep.mubr.bf16.mxu1 %v10122_v12  ;;  %5743 = vmatprep.mubr.bf16.mxu0 %v10124_v8  ;;  %v10134_v45 = vld [vmem:[%s10646_s15 + $0x61c] ss:$108 sps:$4 sm:$0xff]  }
 0x1b2   : > { %v8427_v52 = vpop.f32.mrb[92].mxu0  ;;  %v8491_v36 = vpop.f32.mrb[92].mxu1 }
 0x1b3   : > { %v8428_v51 = vpop.f32.mrb[93].mxu0  ;;  %v8492_v41 = vpop.f32.mrb[93].mxu1 }
 0x1b4   : > { %v8429_v14 = vadd.f32 %v8428_v51, %v8427_v52  ;;  %v8493_v3 = vadd.f32 %v8492_v41, %v8491_v36  ;;  %v8430_v16 = vpop.f32.mrb[94].mxu0  ;;  %v8494_v22 = vpop.f32.mrb[94].mxu1  ;;  %v10140_v51 = vld [vmem:[%s10646_s15 + $0x38] ss:$108 sps:$4 sm:$0xff]  }
 0x1b5   : > { %v8431_v30 = vpop.f32.mrb[95].mxu0  ;;  %v8495_v63 = vpop.f32.mrb[95].mxu1 }
 0x1b6   : > { %v11510_v46 = vadd.f32 %v8429_v14, %v11334_v37  ;;  %v11513_v24 = vadd.f32 %v8493_v3, %v11337_v7  ;;  %v8432_v5 = vadd.f32 %v8431_v30, %v8430_v16  ;;  %v8496_v11 = vadd.f32 %v8495_v63, %v8494_v22  ;;  %v10137_v37 = vld [vmem:[%s10646_s15 + $0x618] ss:$108 sps:$4 sm:$0xff]  }
 0x1b7   : > { %5647 = vmatmul.mubr.bf16.gmra.mrb[200].mxu1 %v10126_v49  ;;  %5744 = vmatmul.mubr.bf16.gmra.mrb[200].mxu0 %v10127_v13  ;;  %v10148_v30 = vld [vmem:[%s10646_s15 + $0x7cc] ss:$108 sps:$4 sm:$0xff]  }
 0x1b8   : > { %v11516_v58 = vadd.f32 %v8432_v5, %v11340_v15  ;;  %v11519_v6 = vadd.f32 %v8496_v11, %v11343_v10  ;;  %5654 = vmatprep.mubr.bf16.mxu1 %v10132_v53  ;;  %5751 = vmatprep.mubr.bf16.mxu0 %v10134_v45  ;;  %v10142_v15 = vld [vmem:[%s10646_s15 + $0x3c] ss:$108 sps:$4 sm:$0xff]   ;;  %v10150_v5 = vld [vmem:[%s10646_s15 + $0x114] ss:$108 sps:$4 sm:$0xff]  }
 0x1b9   : > { %v10162_v11 = vld [vmem:[%s13039_s1 + $0x4c8] sm:$0xff]  }
 0x1ba   : > { %v8433_v17 = vpop.f32.mrb[96].mxu0  ;;  %v8497_v31 = vpop.f32.mrb[96].mxu1 }
 0x1bb   : > { %v8434_v7 = vpop.f32.mrb[97].mxu0  ;;  %v8498_v2 = vpop.f32.mrb[97].mxu1 }
 0x1bc   : > { %v8435_v38 = vadd.f32 %v8434_v7, %v8433_v17  ;;  %v8499_v4 = vadd.f32 %v8498_v2, %v8497_v31  ;;  %v8436_v12 = vpop.f32.mrb[98].mxu0  ;;  %v8500_v8 = vpop.f32.mrb[98].mxu1  ;;  %v10163_v7 = vld [vmem:[%s13039_s1 + $0x488] sm:$0xff]   ;;  %v10178_v2 = vld [vmem:[%s13039_s1 + $0x4d0] sm:$0xff]  }
 0x1bd   : > { %v8437_v28 = vpop.f32.mrb[99].mxu0  ;;  %v8501_v40 = vpop.f32.mrb[99].mxu1 }
 0x1be   : > { %v11526_v10 = vadd.f32 %v8435_v38, %v11350_v62  ;;  %v11529_v47 = vadd.f32 %v8499_v4, %v11353_v44  ;;  %v8438_v49 = vadd.f32 %v8437_v28, %v8436_v12  ;;  %v8502_v13 = vadd.f32 %v8501_v40, %v8500_v8  ;;  %v10143_v62 = vld [vmem:[%s10646_s15 + $0x6f0] ss:$108 sps:$4 sm:$0xff]  }
 0x1bf   : > { %5655 = vmatmul.mubr.bf16.gmra.mrb[204].mxu1 %v10136_v0  ;;  %5752 = vmatmul.mubr.bf16.gmra.mrb[204].mxu0 %v10137_v37  ;;  %v10153_v4 = vld [vmem:[%s10646_s15 + $0x110] ss:$108 sps:$4 sm:$0xff]  }
 0x1c0   : > { %v11532_v52 = vadd.f32 %v8438_v49, %v11356_v19  ;;  %v11535_v36 = vadd.f32 %v8502_v13, %v11359_v55  ;;  %5759 = vmatprep.mubr.bf16.mxu0 %v10138_v23  ;;  %5856 = vmatprep.mubr.bf16.mxu1 %v10142_v15  ;;  %v10147_v19 = vld [vmem:[%s13039_s1 + $0x480] sm:$0xff]  }
 0x1c1   : > { %v10154_v13 = vld [vmem:[%s10646_s15 + $0x8a4] ss:$108 sps:$4 sm:$0xff]  }
 0x1c2   : > { %v8439_v41 = vpop.f32.mrb[100].mxu0  ;;  %v8503_v14 = vpop.f32.mrb[100].mxu1 }
 0x1c3   : > { %v8440_v44 = vpop.f32.mrb[101].mxu0  ;;  %v8504_v3 = vpop.f32.mrb[101].mxu1 }
 0x1c4   : > { %v8441_v16 = vadd.f32 %v8440_v44, %v8439_v41  ;;  %v8505_v22 = vadd.f32 %v8504_v3, %v8503_v14  ;;  %v8442_v53 = vpop.f32.mrb[102].mxu0  ;;  %v8506_v45 = vpop.f32.mrb[102].mxu1  ;;  %v10179_v41 = vld [vmem:[%s13039_s1 + $0x490] sm:$0xff]  }
 0x1c5   : > { %v8443_v55 = vpop.f32.mrb[103].mxu0  ;;  %v8507_v63 = vpop.f32.mrb[103].mxu1 }
 0x1c6   : > { %v11548_v0 = vadd.f32 %v8441_v16, %v11372_v20  ;;  %v11551_v37 = vadd.f32 %v8505_v22, %v11375_v42  ;;  %v8444_v17 = vadd.f32 %v8443_v55, %v8442_v53  ;;  %v8508_v31 = vadd.f32 %v8507_v63, %v8506_v45  ;;  %v10152_v42 = vld [vmem:[%s10646_s15 + $0x7c8] ss:$108 sps:$4 sm:$0xff]   ;;  %v10194_v22 = vld [vmem:[%s13039_s1 + $0x4d8] sm:$0xff]  }
 0x1c7   : > { %5760 = vmatmul.mubr.bf16.gmra.mrb[208].mxu0 %v10143_v62  ;;  %5857 = vmatmul.mubr.bf16.vlgmr.msra.gmra.mrb[208].mxu1 %v10140_v51  ;;  %v10156_v51 = vld [vmem:[%s10646_s15 + $0x1ec] ss:$108 sps:$4 sm:$0xff]  }
 0x1c8   : > { %v11560_v38 = vadd.f32 %v8444_v17, %v11378_v57  ;;  %v11563_v20 = vadd.f32 %v8508_v31, %v11381_v21  ;;  %9130 = vmatpush3.bf16.msra.mxu1 %v10147_v19  ;;  %5767 = vmatprep.mubr.bf16.mxu0 %v10148_v30  ;;  %v10195_v53 = vld [vmem:[%s13039_s1 + $0x498] sm:$0xff]   ;;  %v10158_v19 = vld [vmem:[%s10646_s15 + $0x8a0] ss:$108 sps:$4 sm:$0xff]   ;;  %v10159_v30 = vld [vmem:[%s10646_s15 + $0x1e8] ss:$108 sps:$4 sm:$0xff]  }
 0x1c9   : > { %5864 = vmatprep.mubr.bf16.mxu1 %v10150_v5  ;;  %9131 = vmatprep.subr.bf16.mxu1 %v10162_v11 }
 0x1ca   : > { %v8445_v12 = vpop.f32.mrb[104].mxu0  ;;  %v8509_v8 = vpop.f32.mrb[104].mxu1 }
 0x1cb   : > { %v8446_v23 = vpop.f32.mrb[105].mxu0  ;;  %v8510_v15 = vpop.f32.mrb[105].mxu1 }
 0x1cc   : > { %v8447_v28 = vadd.f32 %v8446_v23, %v8445_v12  ;;  %v8511_v40 = vadd.f32 %v8510_v15, %v8509_v8  ;;  %v8448_v49 = vpop.f32.mrb[106].mxu0  ;;  %v8512_v57 = vpop.f32.mrb[106].mxu1  ;;  %9132 = vmatpush3.bf16.msra.mxu1 %v10163_v7  ;;  %v10164_v7 = vld [vmem:[%s10646_s15 + $0x97c] ss:$108 sps:$4 sm:$0xff]   ;;  %v10211_v12 = vld [vmem:[%s13039_s1 + $0x4a0] sm:$0xff]  }
 0x1cd   : > { %v8449_v21 = vpop.f32.mrb[107].mxu0  ;;  %v8513_v62 = vpop.f32.mrb[107].mxu1  ;;  %9133 = vmatprep.subr.bf16.mxu1 %v10178_v2  ;;  %v10166_v2 = vld [vmem:[%s10646_s15 + $0x2c4] ss:$108 sps:$4 sm:$0xff]  }
 0x1ce   : > { %v11573_v14 = vadd.f32 %v8447_v28, %v11397_v56  ;;  %v11576_v44 = vadd.f32 %v8511_v40, %v11400_v18  ;;  %v8450_v3 = vadd.f32 %v8449_v21, %v8448_v49  ;;  %v8514_v16 = vadd.f32 %v8513_v62, %v8512_v57  ;;  %v10210_v18 = vld [vmem:[%s13039_s1 + $0x4e0] sm:$0xff]   ;;  %v10226_v40 = vld [vmem:[%s13039_s1 + $0x4e8] sm:$0xff]  }
 0x1cf   : > { %5768 = vmatmul.mubr.bf16.gmra.mrb[212].mxu0 %v10152_v42  ;;  %5865 = vmatmul.mubr.bf16.gmra.mrb[212].mxu1 %v10153_v4  ;;  %v10169_v62 = vld [vmem:[%s10646_s15 + $0x2c0] ss:$108 sps:$4 sm:$0xff]  }
 0x1d0   : > { %v11585_v45 = vadd.f32 %v8450_v3, %v11409_v26  ;;  %v11588_v56 = vadd.f32 %v8514_v16, %v11412_v60  ;;  %5775 = vmatprep.mubr.bf16.mxu0 %v10154_v13  ;;  %5872 = vmatprep.mubr.bf16.mxu1 %v10156_v51 }
 0x1d1   : > { %9134 = vmatpush3.bf16.msra.mxu1 %v10179_v41 }
 0x1d2   : > { %v8451_v55 = vpop.f32.mrb[108].mxu0  ;;  %v8515_v63 = vpop.f32.mrb[108].mxu1  ;;  %9135 = vmatprep.subr.bf16.mxu1 %v10194_v22 }
 0x1d3   : > { %v8452_v5 = vpop.f32.mrb[109].mxu0  ;;  %v8516_v26 = vpop.f32.mrb[109].mxu1 }
 0x1d4   : > { %v8453_v11 = vadd.f32 %v8452_v5, %v8451_v55  ;;  %v8517_v17 = vadd.f32 %v8516_v26, %v8515_v63  ;;  %v8454_v60 = vpop.f32.mrb[110].mxu0  ;;  %v8518_v31 = vpop.f32.mrb[110].mxu1  ;;  %v10243_v55 = vld [vmem:[%s13039_s1 + $0x4b0] sm:$0xff]  }
 0x1d5   : > { %v8455_v42 = vpop.f32.mrb[111].mxu0  ;;  %v8519_v4 = vpop.f32.mrb[111].mxu1  ;;  %9136 = vmatpush3.bf16.msra.mxu1 %v10195_v53  ;;  %v10170_v53 = vld [vmem:[%s10646_s15 + $0xa54] ss:$108 sps:$4 sm:$0xff]  }
 0x1d6   : > { %v11601_v8 = vadd.f32 %v8453_v11, %v11428_v54  ;;  %v11604_v23 = vadd.f32 %v8517_v17, %v11431_v50  ;;  %v8456_v15 = vadd.f32 %v8455_v42, %v8454_v60  ;;  %v8520_v28 = vadd.f32 %v8519_v4, %v8518_v31  ;;  %9137 = vmatprep.subr.bf16.mxu1 %v10210_v18  ;;  %v10227_v50 = vld [vmem:[%s13039_s1 + $0x4a8] sm:$0xff]   ;;  %v10258_v17 = vld [vmem:[%s13039_s1 + $0x4f8] sm:$0xff]  }
 0x1d7   : > { %5776 = vmatmul.mubr.bf16.gmra.mrb[216].mxu0 %v10158_v19  ;;  %5873 = vmatmul.mubr.bf16.gmra.mrb[216].mxu1 %v10159_v30  ;;  %v10172_v18 = vld [vmem:[%s10646_s15 + $0x39c] ss:$108 sps:$4 sm:$0xff]   ;;  %v10175_v4 = vld [vmem:[%s10646_s15 + $0x398] ss:$108 sps:$4 sm:$0xff]  }
 0x1d8   : > { %v11610_v49 = vadd.f32 %v8456_v15, %v11434_v35  ;;  %v11613_v54 = vadd.f32 %v8520_v28, %v11437_v43  ;;  %5783 = vmatprep.mubr.bf16.mxu0 %v10164_v7  ;;  %5880 = vmatprep.mubr.bf16.mxu1 %v10166_v2  ;;  %v10242_v35 = vld [vmem:[%s13039_s1 + $0x4f0] sm:$0xff]   ;;  %v10168_v43 = vld [vmem:[%s10646_s15 + $0x978] ss:$108 sps:$4 sm:$0xff]  }
 0x1d9   : > { %9138 = vmatpush3.bf16.msra.mxu1 %v10211_v12 }
 0x1da   : > { %v8521_v57 = vpop.f32.mrb[112].mxu1  ;;  %v8585_v13 = vpop.f32.mrb[112].mxu0  ;;  %9139 = vmatprep.subr.bf16.mxu1 %v10226_v40 }
 0x1db   : > { %v8522_v51 = vpop.f32.mrb[113].mxu1  ;;  %v8586_v21 = vpop.f32.mrb[113].mxu0 }
 0x1dc   : > { %v8523_v41 = vadd.f32 %v8522_v51, %v8521_v57  ;;  %v8587_v3 = vadd.f32 %v8586_v21, %v8585_v13  ;;  %v8524_v16 = vpop.f32.mrb[114].mxu1  ;;  %v8588_v22 = vpop.f32.mrb[114].mxu0  ;;  %v10182_v57 = vld [vmem:[%s10646_s15 + $0x474] ss:$108 sps:$4 sm:$0xff]  }
 0x1dd   : > { %v8525_v19 = vpop.f32.mrb[115].mxu1  ;;  %v8589_v30 = vpop.f32.mrb[115].mxu0  ;;  %9140 = vmatpush3.bf16.msra.mxu1 %v10227_v50  ;;  %v10180_v50 = vld [vmem:[%s10646_s15 + $0xb2c] ss:$108 sps:$4 sm:$0xff]  }
 0x1de   : > { %v11629_v63 = vadd.f32 %v8523_v41, %v11453_v59  ;;  %v11632_v5 = vadd.f32 %v8587_v3, %v11456_v39  ;;  %v8526_v26 = vadd.f32 %v8525_v19, %v8524_v16  ;;  %v8590_v11 = vadd.f32 %v8589_v30, %v8588_v22  ;;  %9141 = vmatprep.subr.bf16.mxu1 %v10242_v35  ;;  %v10259_v39 = vld [vmem:[%s13039_s1 + $0x4b8] sm:$0xff]  }
 0x1df   : > { %5784 = vmatmul.mubr.bf16.gmra.mrb[220].mxu0 %v10168_v43  ;;  %5881 = vmatmul.mubr.bf16.gmra.mrb[220].mxu1 %v10169_v62 }
 0x1e0   : > { %v11638_v60 = vadd.f32 %v8526_v26, %v11465_v25  ;;  %v11641_v59 = vadd.f32 %v8590_v11, %v11468_v32  ;;  %5791 = vmatprep.mubr.bf16.mxu0 %v10170_v53  ;;  %5888 = vmatprep.mubr.bf16.mxu1 %v10172_v18  ;;  %v10274_v25 = vld [vmem:[%s13039_s1 + $0x5c0] sm:$0xff]   ;;  %v10174_v32 = vld [vmem:[%s10646_s15 + $0xa50] ss:$108 sps:$4 sm:$0xff]   ;;  %v10184_v53 = vld [vmem:[%s10646_s15 + $0xb28] ss:$108 sps:$4 sm:$0xff]  }
 0x1e1   : > { %9142 = vmatpush3.bf16.msra.mxu1 %v10243_v55  ;;  %v10185_v18 = vld [vmem:[%s10646_s15 + $0x470] ss:$108 sps:$4 sm:$0xff]  }
 0x1e2   : > { %v8527_v31 = vpop.f32.mrb[116].mxu1  ;;  %v8591_v7 = vpop.f32.mrb[116].mxu0  ;;  %9143 = vmatprep.subr.bf16.mxu1 %v10258_v17  ;;  %v10186_v11 = vld [vmem:[%s10646_s15 + $0xc04] ss:$108 sps:$4 sm:$0xff]   ;;  %v10188_v17 = vld [vmem:[%s10646_s15 + $0x54c] ss:$108 sps:$4 sm:$0xff]  }
 0x1e3   : > { %v8528_v2 = vpop.f32.mrb[117].mxu1  ;;  %v8592_v42 = vpop.f32.mrb[117].mxu0 }
 0x1e4   : > { %v8529_v12 = vadd.f32 %v8528_v2, %v8527_v31  ;;  %v8593_v15 = vadd.f32 %v8592_v42, %v8591_v7  ;;  %v8530_v28 = vpop.f32.mrb[118].mxu1  ;;  %v8594_v40 = vpop.f32.mrb[118].mxu0 }
 0x1e5   : > { %v8531_v13 = vpop.f32.mrb[119].mxu1  ;;  %v8595_v35 = vpop.f32.mrb[119].mxu0  ;;  %9144 = vmatpush3.bf16.msra.mxu1 %v10259_v39 }
 0x1e6   : > { %v11654_v51 = vadd.f32 %v8529_v12, %v11478_v27  ;;  %v11657_v21 = vadd.f32 %v8593_v15, %v11481_v34  ;;  %v8532_v43 = vadd.f32 %v8531_v13, %v8530_v28  ;;  %v8596_v62 = vadd.f32 %v8595_v35, %v8594_v40  ;;  %9353 = vmatprep.subr.bf16.mxu1 %v10274_v25  ;;  %v10191_v15 = vld [vmem:[%s10646_s15 + $0x548] ss:$108 sps:$4 sm:$0xff]   ;;  %v10198_v35 = vld [vmem:[%s10646_s15 + $0x624] ss:$108 sps:$4 sm:$0xff]  }
 0x1e7   : > { %5792 = vmatmul.mubr.bf16.gmra.mrb[224].mxu0 %v10174_v32  ;;  %5889 = vmatmul.mubr.bf16.gmra.mrb[224].mxu1 %v10175_v4  ;;  %v10196_v13 = vld [vmem:[%s10646_s15 + $0xcdc] ss:$108 sps:$4 sm:$0xff]  }
 0x1e8   : > { %v11660_v41 = vadd.f32 %v8532_v43, %v11484_v1  ;;  %v11663_v3 = vadd.f32 %v8596_v62, %v11487_v61  ;;  %5799 = vmatprep.mubr.bf16.mxu0 %v10180_v50  ;;  %5896 = vmatprep.mubr.bf16.mxu1 %v10182_v57 }
 0x1ea   : > { %v8533_v27 = vpop.f32.mrb[120].mxu1  ;;  %v8597_v16 = vpop.f32.mrb[120].mxu0 }
 0x1eb   : > { %v8534_v22 = vpop.f32.mrb[121].mxu1  ;;  %v8598_v34 = vpop.f32.mrb[121].mxu0 }
 0x1ec   : > { %v8535_v19 = vadd.f32 %v8534_v22, %v8533_v27  ;;  %v8599_v30 = vadd.f32 %v8598_v34, %v8597_v16  ;;  %v8536_v55 = vpop.f32.mrb[122].mxu1  ;;  %v8600_v26 = vpop.f32.mrb[122].mxu0 }
 0x1ed   : > { %v8537_v39 = vpop.f32.mrb[123].mxu1  ;;  %v8601_v1 = vpop.f32.mrb[123].mxu0 }
 0x1ee   : > { %v11670_v61 = vadd.f32 %v8535_v19, %v11494_v9  ;;  %v11673_v31 = vadd.f32 %v8599_v30, %v11497_v33  ;;  %v8538_v7 = vadd.f32 %v8537_v39, %v8536_v55  ;;  %v8602_v25 = vadd.f32 %v8601_v1, %v8600_v26  ;;  %v10190_v33 = vld [vmem:[%s10646_s15 + $0xc00] ss:$108 sps:$4 sm:$0xff]   ;;  %v10202_v39 = vld [vmem:[%s10646_s15 + $0x6fc] ss:$108 sps:$4 sm:$0xff]   ;;  %v10206_v1 = vld [vmem:[%s10646_s15 + $0x44] ss:$108 sps:$4 sm:$0xff]  }
 0x1ef   : > { %5800 = vmatmul.mubr.bf16.gmra.mrb[228].mxu0 %v10184_v53  ;;  %5897 = vmatmul.mubr.bf16.gmra.mrb[228].mxu1 %v10185_v18  ;;  %v10201_v30 = vld [vmem:[%s10646_s15 + $0x620] ss:$108 sps:$4 sm:$0xff]  }
 0x1f0   : > { %v11676_v2 = vadd.f32 %v8538_v7, %v11500_v29  ;;  %v11679_v42 = vadd.f32 %v8602_v25, %v11503_v48  ;;  %5807 = vmatprep.mubr.bf16.mxu0 %v10186_v11  ;;  %5904 = vmatprep.mubr.bf16.mxu1 %v10188_v17 }
 0x1f2   : > { %v8539_v32 = vpop.f32.mrb[124].mxu1  ;;  %v8603_v9 = vpop.f32.mrb[124].mxu0 }
 0x1f3   : > { %v8540_v4 = vpop.f32.mrb[125].mxu1  ;;  %v8604_v12 = vpop.f32.mrb[125].mxu0 }
 0x1f4   : > { %v8541_v28 = vadd.f32 %v8540_v4, %v8539_v32  ;;  %v8605_v40 = vadd.f32 %v8604_v12, %v8603_v9  ;;  %v8542_v50 = vpop.f32.mrb[126].mxu1  ;;  %v8606_v57 = vpop.f32.mrb[126].mxu0 }
 0x1f5   : > { %v8543_v43 = vpop.f32.mrb[127].mxu1  ;;  %v8607_v29 = vpop.f32.mrb[127].mxu0 }
 0x1f6   : > { %v11686_v48 = vadd.f32 %v8541_v28, %v11510_v46  ;;  %v11689_v62 = vadd.f32 %v8605_v40, %v11513_v24  ;;  %v8544_v27 = vadd.f32 %v8543_v43, %v8542_v50  ;;  %v8608_v16 = vadd.f32 %v8607_v29, %v8606_v57  ;;  %v10200_v24 = vld [vmem:[%s10646_s15 + $0xcd8] ss:$108 sps:$4 sm:$0xff]   ;;  %v10212_v43 = vld [vmem:[%s10646_s15 + $0x7d4] ss:$108 sps:$4 sm:$0xff]  }
 0x1f7   : > { %5808 = vmatmul.mubr.bf16.gmra.mrb[232].mxu0 %v10190_v33  ;;  %5905 = vmatmul.mubr.bf16.gmra.mrb[232].mxu1 %v10191_v15  ;;  %v10207_v40 = vld [vmem:[%s10646_s15 + $0x6f8] ss:$108 sps:$4 sm:$0xff]  }
 0x1f8   : > { %v11692_v22 = vadd.f32 %v8544_v27, %v11516_v58  ;;  %v11695_v34 = vadd.f32 %v8608_v16, %v11519_v6  ;;  %5815 = vmatprep.mubr.bf16.mxu0 %v10196_v13  ;;  %5912 = vmatprep.mubr.bf16.mxu1 %v10198_v35  ;;  %v10214_v27 = vld [vmem:[%s10646_s15 + $0x11c] ss:$108 sps:$4 sm:$0xff]  }
 0x1f9   : > { %v10224_v16 = vld [vmem:[%s13039_s1 + $0x548] sm:$0xff]  }
 0x1fa   : > { %v8545_v53 = vpop.f32.mrb[128].mxu1  ;;  %v8609_v46 = vpop.f32.mrb[128].mxu0 }
 0x1fb   : > { %v8546_v18 = vpop.f32.mrb[129].mxu1  ;;  %v8610_v19 = vpop.f32.mrb[129].mxu0 }
 0x1fc   : > { %v8547_v55 = vadd.f32 %v8546_v18, %v8545_v53  ;;  %v8611_v26 = vadd.f32 %v8610_v19, %v8609_v46  ;;  %v8548_v11 = vpop.f32.mrb[130].mxu1  ;;  %v8612_v17 = vpop.f32.mrb[130].mxu0 }
 0x1fd   : > { %v8549_v7 = vpop.f32.mrb[131].mxu1  ;;  %v8613_v58 = vpop.f32.mrb[131].mxu0 }
 0x1fe   : > { %v11702_v6 = vadd.f32 %v8547_v55, %v11526_v10  ;;  %v11705_v25 = vadd.f32 %v8611_v26, %v11529_v47  ;;  %v8550_v32 = vadd.f32 %v8549_v7, %v8548_v11  ;;  %v8614_v9 = vadd.f32 %v8613_v58, %v8612_v17  ;;  %v10204_v47 = vld [vmem:[%s10646_s15 + $0x40] ss:$108 sps:$4 sm:$0xff]   ;;  %v10217_v17 = vld [vmem:[%s10646_s15 + $0x118] ss:$108 sps:$4 sm:$0xff]  }
 0x1ff   : > { %5816 = vmatmul.mubr.bf16.gmra.mrb[236].mxu0 %v10200_v24  ;;  %5913 = vmatmul.mubr.bf16.gmra.mrb[236].mxu1 %v10201_v30 }
 0x200   : > { %v11708_v4 = vadd.f32 %v8550_v32, %v11532_v52  ;;  %v11711_v12 = vadd.f32 %v8614_v9, %v11535_v36  ;;  %5920 = vmatprep.mubr.bf16.mxu1 %v10202_v39  ;;  %6017 = vmatprep.mubr.bf16.mxu0 %v10206_v1  ;;  %v10209_v52 = vld [vmem:[%s13039_s1 + $0x500] sm:$0xff]   ;;  %v10218_v32 = vld [vmem:[%s10646_s15 + $0x8ac] ss:$108 sps:$4 sm:$0xff]  }
 0x201   : > { %v10220_v9 = vld [vmem:[%s10646_s15 + $0x1f4] ss:$108 sps:$4 sm:$0xff]  }
 0x202   : > { %v8551_v33 = vpop.f32.mrb[132].mxu1  ;;  %v8615_v10 = vpop.f32.mrb[132].mxu0 }
 0x203   : > { %v8552_v15 = vpop.f32.mrb[133].mxu1  ;;  %v8616_v28 = vpop.f32.mrb[133].mxu0 }
 0x204   : > { %v8553_v50 = vadd.f32 %v8552_v15, %v8551_v33  ;;  %v8617_v57 = vadd.f32 %v8616_v28, %v8615_v10  ;;  %v8554_v13 = vpop.f32.mrb[134].mxu1  ;;  %v8618_v35 = vpop.f32.mrb[134].mxu0  ;;  %v10241_v15 = vld [vmem:[%s13039_s1 + $0x510] sm:$0xff]  }
 0x205   : > { %v8555_v36 = vpop.f32.mrb[135].mxu1  ;;  %v8619_v29 = vpop.f32.mrb[135].mxu0 }
 0x206   : > { %v11724_v53 = vadd.f32 %v8553_v50, %v11548_v0  ;;  %v11727_v46 = vadd.f32 %v8617_v57, %v11551_v37  ;;  %v8556_v18 = vadd.f32 %v8555_v36, %v8554_v13  ;;  %v8620_v19 = vadd.f32 %v8619_v29, %v8618_v35  ;;  %v10225_v0 = vld [vmem:[%s13039_s1 + $0x508] sm:$0xff]   ;;  %v10240_v37 = vld [vmem:[%s13039_s1 + $0x550] sm:$0xff]   ;;  %v10256_v57 = vld [vmem:[%s13039_s1 + $0x558] sm:$0xff]  }
 0x207   : > { %5921 = vmatmul.mubr.bf16.gmra.mrb[240].mxu1 %v10207_v40  ;;  %6018 = vmatmul.mubr.bf16.vlgmr.msra.gmra.mrb[240].mxu0 %v10204_v47  ;;  %v10223_v29 = vld [vmem:[%s10646_s15 + $0x1f0] ss:$108 sps:$4 sm:$0xff]  }
 0x208   : > { %v11730_v24 = vadd.f32 %v8556_v18, %v11560_v38  ;;  %v11733_v30 = vadd.f32 %v8620_v19, %v11563_v20  ;;  %9242 = vmatpush3.bf16.msra.mxu0 %v10209_v52  ;;  %5928 = vmatprep.mubr.bf16.mxu1 %v10212_v43  ;;  %v10216_v20 = vld [vmem:[%s10646_s15 + $0x7d0] ss:$108 sps:$4 sm:$0xff]  }
 0x209   : > { %6025 = vmatprep.mubr.bf16.mxu0 %v10214_v27  ;;  %9243 = vmatprep.subr.bf16.mxu0 %v10224_v16 }
 0x20a   : > { %v8557_v55 = vpop.f32.mrb[136].mxu1  ;;  %v8621_v38 = vpop.f32.mrb[136].mxu0 }
 0x20b   : > { %v8558_v26 = vpop.f32.mrb[137].mxu1  ;;  %v8622_v11 = vpop.f32.mrb[137].mxu0 }
 0x20c   : > { %v8559_v39 = vadd.f32 %v8558_v26, %v8557_v55  ;;  %v8623_v1 = vadd.f32 %v8622_v11, %v8621_v38  ;;  %v8560_v7 = vpop.f32.mrb[138].mxu1  ;;  %v8624_v58 = vpop.f32.mrb[138].mxu0  ;;  %9244 = vmatpush3.bf16.msra.mxu0 %v10225_v0  ;;  %v10228_v0 = vld [vmem:[%s10646_s15 + $0x984] ss:$108 sps:$4 sm:$0xff]  }
 0x20d   : > { %v8561_v33 = vpop.f32.mrb[139].mxu1  ;;  %v8625_v10 = vpop.f32.mrb[139].mxu0  ;;  %9245 = vmatprep.subr.bf16.mxu0 %v10240_v37  ;;  %v10230_v37 = vld [vmem:[%s10646_s15 + $0x2cc] ss:$108 sps:$4 sm:$0xff]   ;;  %v10273_v26 = vld [vmem:[%s13039_s1 + $0x520] sm:$0xff]  }
 0x20e   : > { %v11749_v28 = vadd.f32 %v8559_v39, %v11573_v14  ;;  %v11752_v47 = vadd.f32 %v8623_v1, %v11576_v44  ;;  %v8562_v40 = vadd.f32 %v8561_v33, %v8560_v7  ;;  %v8626_v50 = vadd.f32 %v8625_v10, %v8624_v58  ;;  %v10257_v14 = vld [vmem:[%s13039_s1 + $0x518] sm:$0xff]   ;;  %v10288_v1 = vld [vmem:[%s13039_s1 + $0x568] sm:$0xff]  }
 0x20f   : > { %5929 = vmatmul.mubr.bf16.gmra.mrb[244].mxu1 %v10216_v20  ;;  %6026 = vmatmul.mubr.bf16.gmra.mrb[244].mxu0 %v10217_v17  ;;  %v10233_v10 = vld [vmem:[%s10646_s15 + $0x2c8] ss:$108 sps:$4 sm:$0xff]  }
 0x210   : > { %v11758_v13 = vadd.f32 %v8562_v40, %v11585_v45  ;;  %v11761_v35 = vadd.f32 %v8626_v50, %v11588_v56  ;;  %5936 = vmatprep.mubr.bf16.mxu1 %v10218_v32  ;;  %6033 = vmatprep.mubr.bf16.mxu0 %v10220_v9  ;;  %v10272_v45 = vld [vmem:[%s13039_s1 + $0x560] sm:$0xff]   ;;  %v10222_v56 = vld [vmem:[%s10646_s15 + $0x8a8] ss:$108 sps:$4 sm:$0xff]  }
 0x211   : > { %9246 = vmatpush3.bf16.msra.mxu0 %v10241_v15 }
 0x212   : > { %v8563_v44 = vpop.f32.mrb[140].mxu1  ;;  %v8627_v52 = vpop.f32.mrb[140].mxu0  ;;  %9247 = vmatprep.subr.bf16.mxu0 %v10256_v57 }
 0x213   : > { %v8564_v43 = vpop.f32.mrb[141].mxu1  ;;  %v8628_v36 = vpop.f32.mrb[141].mxu0 }
 0x214   : > { %v8565_v27 = vadd.f32 %v8564_v43, %v8563_v44  ;;  %v8629_v16 = vadd.f32 %v8628_v36, %v8627_v52  ;;  %v8566_v18 = vpop.f32.mrb[142].mxu1  ;;  %v8630_v19 = vpop.f32.mrb[142].mxu0  ;;  %v10239_v44 = vld [vmem:[%s10646_s15 + $0x3a4] ss:$108 sps:$4 sm:$0xff]  }
 0x215   : > { %v8567_v55 = vpop.f32.mrb[143].mxu1  ;;  %v8631_v38 = vpop.f32.mrb[143].mxu0  ;;  %9248 = vmatpush3.bf16.msra.mxu0 %v10257_v14  ;;  %v10236_v14 = vld [vmem:[%s10646_s15 + $0xa5c] ss:$108 sps:$4 sm:$0xff]   ;;  %v10305_v43 = vld [vmem:[%s13039_s1 + $0x530] sm:$0xff]  }
 0x216   : > { %v11777_v11 = vadd.f32 %v8565_v27, %v11601_v8  ;;  %v11780_v20 = vadd.f32 %v8629_v16, %v11604_v23  ;;  %v8568_v17 = vadd.f32 %v8567_v55, %v8566_v18  ;;  %v8632_v39 = vadd.f32 %v8631_v38, %v8630_v19  ;;  %9249 = vmatprep.subr.bf16.mxu0 %v10272_v45  ;;  %v10289_v23 = vld [vmem:[%s13039_s1 + $0x528] sm:$0xff]   ;;  %v10320_v16 = vld [vmem:[%s13039_s1 + $0x578] sm:$0xff]  }
 0x217   : > { %5937 = vmatmul.mubr.bf16.gmra.mrb[248].mxu1 %v10222_v56  ;;  %6034 = vmatmul.mubr.bf16.gmra.mrb[248].mxu0 %v10223_v29  ;;  %v10234_v38 = vld [vmem:[%s10646_s15 + $0xa58] ss:$108 sps:$4 sm:$0xff]  }
 0x218   : > { %v11786_v7 = vadd.f32 %v8568_v17, %v11610_v49  ;;  %v11789_v8 = vadd.f32 %v8632_v39, %v11613_v54  ;;  %5944 = vmatprep.mubr.bf16.mxu1 %v10228_v0  ;;  %6041 = vmatprep.mubr.bf16.mxu0 %v10230_v37  ;;  %v10304_v49 = vld [vmem:[%s13039_s1 + $0x570] sm:$0xff]   ;;  %v10232_v54 = vld [vmem:[%s10646_s15 + $0x980] ss:$108 sps:$4 sm:$0xff]  }
 0x219   : > { %9250 = vmatpush3.bf16.msra.mxu0 %v10273_v26  ;;  %v10336_v37 = vld [vmem:[%s13039_s1 + $0x640] sm:$0xff]  }
 0x21a   : > { %v8633_v58 = vpop.f32.mrb[144].mxu0  ;;  %v8697_v32 = vpop.f32.mrb[144].mxu1  ;;  %9251 = vmatprep.subr.bf16.mxu0 %v10288_v1  ;;  %v10237_v26 = vld [vmem:[%s10646_s15 + $0x3a0] ss:$108 sps:$4 sm:$0xff]  }
 0x21b   : > { %v8634_v9 = vpop.f32.mrb[145].mxu0  ;;  %v8698_v33 = vpop.f32.mrb[145].mxu1 }
 0x21c   : > { %v8635_v15 = vadd.f32 %v8634_v9, %v8633_v58  ;;  %v8699_v40 = vadd.f32 %v8698_v33, %v8697_v32  ;;  %v8636_v50 = vpop.f32.mrb[146].mxu0  ;;  %v8700_v57 = vpop.f32.mrb[146].mxu1  ;;  %v10249_v58 = vld [vmem:[%s10646_s15 + $0x47c] ss:$108 sps:$4 sm:$0xff]  }
 0x21d   : > { %v8637_v52 = vpop.f32.mrb[147].mxu0  ;;  %v8701_v45 = vpop.f32.mrb[147].mxu1  ;;  %9252 = vmatpush3.bf16.msra.mxu0 %v10289_v23  ;;  %v10246_v23 = vld [vmem:[%s10646_s15 + $0xb34] ss:$108 sps:$4 sm:$0xff]  }
 0x21e   : > { %v8638_v36 = vadd.f32 %v8637_v52, %v8636_v50  ;;  %v8702_v56 = vadd.f32 %v8701_v45, %v8700_v57  ;;  %v11805_v29 = vadd.f32 %v8635_v15, %v11629_v63  ;;  %v11808_v27 = vadd.f32 %v8699_v40, %v11632_v5  ;;  %9253 = vmatprep.subr.bf16.mxu0 %v10304_v49  ;;  %v10321_v5 = vld [vmem:[%s13039_s1 + $0x538] sm:$0xff]  }
 0x21f   : > { %5945 = vmatmul.mubr.bf16.gmra.mrb[252].mxu1 %v10232_v54  ;;  %6042 = vmatmul.mubr.bf16.gmra.mrb[252].mxu0 %v10233_v10 }
 0x220   : > { %5952 = vmatprep.mubr.bf16.mxu1 %v10236_v14  ;;  %6049 = vmatprep.mubr.bf16.mxu0 %v10239_v44  ;;  %v11814_v18 = vadd.f32 %v8638_v36, %v11638_v60  ;;  %v11817_v63 = vadd.f32 %v8702_v56, %v11641_v59  ;;  %v10244_v44 = vld [vmem:[%s10646_s15 + $0xb30] ss:$108 sps:$4 sm:$0xff]   ;;  %v10252_v56 = vld [vmem:[%s10646_s15 + $0xc0c] ss:$108 sps:$4 sm:$0xff]  }
 0x221   : > { %9254 = vmatpush3.bf16.msra.mxu0 %v10305_v43 }
 0x222   : > { %v8639_v19 = vpop.f32.mrb[148].mxu0  ;;  %v8703_v0 = vpop.f32.mrb[148].mxu1  ;;  %9255 = vmatprep.subr.bf16.mxu0 %v10320_v16  ;;  %v10255_v16 = vld [vmem:[%s10646_s15 + $0x554] ss:$108 sps:$4 sm:$0xff]  }
 0x223   : > { %v8640_v55 = vpop.f32.mrb[149].mxu0  ;;  %v8704_v60 = vpop.f32.mrb[149].mxu1 }
 0x224   : > { %v8641_v17 = vadd.f32 %v8640_v55, %v8639_v19  ;;  %v8705_v59 = vadd.f32 %v8704_v60, %v8703_v0  ;;  %v8642_v39 = vpop.f32.mrb[150].mxu0  ;;  %v8706_v1 = vpop.f32.mrb[150].mxu1 }
 0x225   : > { %v8643_v32 = vpop.f32.mrb[151].mxu0  ;;  %v8707_v49 = vpop.f32.mrb[151].mxu1  ;;  %9256 = vmatpush3.bf16.msra.mxu0 %v10321_v5 }
 0x226   : > { %v8644_v9 = vadd.f32 %v8643_v32, %v8642_v39  ;;  %v8708_v33 = vadd.f32 %v8707_v49, %v8706_v1  ;;  %v11830_v54 = vadd.f32 %v8641_v17, %v11654_v51  ;;  %v11833_v10 = vadd.f32 %v8705_v59, %v11657_v21  ;;  %9465 = vmatprep.subr.bf16.mxu0 %v10336_v37  ;;  %v10247_v21 = vld [vmem:[%s10646_s15 + $0x478] ss:$108 sps:$4 sm:$0xff]   ;;  %v10250_v59 = vld [vmem:[%s10646_s15 + $0xc08] ss:$108 sps:$4 sm:$0xff]   ;;  %v10253_v39 = vld [vmem:[%s10646_s15 + $0x550] ss:$108 sps:$4 sm:$0xff]  }
 0x227   : > { %5953 = vmatmul.mubr.bf16.gmra.mrb[0].mxu1 %v10234_v38  ;;  %6050 = vmatmul.mubr.bf16.gmra.mrb[0].mxu0 %v10237_v26  ;;  %v10262_v32 = vld [vmem:[%s10646_s15 + $0xce4] ss:$108 sps:$4 sm:$0xff]   ;;  %v10265_v49 = vld [vmem:[%s10646_s15 + $0x62c] ss:$108 sps:$4 sm:$0xff]  }
 0x228   : > { %5960 = vmatprep.mubr.bf16.mxu1 %v10246_v23  ;;  %6057 = vmatprep.mubr.bf16.mxu0 %v10249_v58  ;;  %v11836_v15 = vadd.f32 %v8644_v9, %v11660_v41  ;;  %v11839_v40 = vadd.f32 %v8708_v33, %v11663_v3 }
 0x22a   : > { %v8645_v50 = vpop.f32.mrb[152].mxu0  ;;  %v8709_v57 = vpop.f32.mrb[152].mxu1 }
 0x22b   : > { %v8646_v51 = vpop.f32.mrb[153].mxu0  ;;  %v8710_v14 = vpop.f32.mrb[153].mxu1 }
 0x22c   : > { %v8647_v52 = vadd.f32 %v8646_v51, %v8645_v50  ;;  %v8711_v45 = vadd.f32 %v8710_v14, %v8709_v57  ;;  %v8648_v43 = vpop.f32.mrb[154].mxu0  ;;  %v8712_v36 = vpop.f32.mrb[154].mxu1 }
 0x22d   : > { %v8649_v5 = vpop.f32.mrb[155].mxu0  ;;  %v8713_v19 = vpop.f32.mrb[155].mxu1 }
 0x22e   : > { %v8650_v41 = vadd.f32 %v8649_v5, %v8648_v43  ;;  %v8714_v0 = vadd.f32 %v8713_v19, %v8712_v36  ;;  %v11846_v3 = vadd.f32 %v8647_v52, %v11670_v61  ;;  %v11849_v37 = vadd.f32 %v8711_v45, %v11673_v31  ;;  %v10260_v45 = vld [vmem:[%s10646_s15 + $0xce0] ss:$108 sps:$4 sm:$0xff]   ;;  %v10263_v43 = vld [vmem:[%s10646_s15 + $0x628] ss:$108 sps:$4 sm:$0xff]   ;;  %v10268_v5 = vld [vmem:[%s10646_s15 + $0x704] ss:$108 sps:$4 sm:$0xff]  }
 0x22f   : > { %5961 = vmatmul.mubr.bf16.gmra.mrb[4].mxu1 %v10244_v44  ;;  %6058 = vmatmul.mubr.bf16.gmra.mrb[4].mxu0 %v10247_v21  ;;  %v10271_v19 = vld [vmem:[%s10646_s15 + $0x4c] ss:$108 sps:$4 sm:$0xff]  }
 0x230   : > { %5968 = vmatprep.mubr.bf16.mxu1 %v10252_v56  ;;  %6065 = vmatprep.mubr.bf16.mxu0 %v10255_v16  ;;  %v11852_v55 = vadd.f32 %v8650_v41, %v11676_v2  ;;  %v11855_v60 = vadd.f32 %v8714_v0, %v11679_v42 }
 0x232   : > { %v8651_v38 = vpop.f32.mrb[156].mxu0  ;;  %v8715_v26 = vpop.f32.mrb[156].mxu1 }
 0x233   : > { %v8652_v17 = vpop.f32.mrb[157].mxu0  ;;  %v8716_v61 = vpop.f32.mrb[157].mxu1 }
 0x234   : > { %v8653_v31 = vadd.f32 %v8652_v17, %v8651_v38  ;;  %v8717_v1 = vadd.f32 %v8716_v61, %v8715_v26  ;;  %v8654_v23 = vpop.f32.mrb[158].mxu0  ;;  %v8718_v58 = vpop.f32.mrb[158].mxu1 }
 0x235   : > { %v8655_v9 = vpop.f32.mrb[159].mxu0  ;;  %v8719_v33 = vpop.f32.mrb[159].mxu1 }
 0x236   : > { %v8656_v2 = vadd.f32 %v8655_v9, %v8654_v23  ;;  %v8720_v50 = vadd.f32 %v8719_v33, %v8718_v58  ;;  %v11862_v42 = vadd.f32 %v8653_v31, %v11686_v48  ;;  %v11865_v57 = vadd.f32 %v8717_v1, %v11689_v62  ;;  %v10266_v1 = vld [vmem:[%s10646_s15 + $0x700] ss:$108 sps:$4 sm:$0xff]   ;;  %v10269_v23 = vld [vmem:[%s10646_s15 + $0x48] ss:$108 sps:$4 sm:$0xff]  }
 0x237   : > { %5969 = vmatmul.mubr.bf16.gmra.mrb[8].mxu1 %v10250_v59  ;;  %6066 = vmatmul.mubr.bf16.gmra.mrb[8].mxu0 %v10253_v39  ;;  %v10275_v9 = vld [vmem:[%s13039_s1 + $0x580] sm:$0xff]  }
 0x238   : > { %5976 = vmatprep.mubr.bf16.mxu1 %v10262_v32  ;;  %6073 = vmatprep.mubr.bf16.mxu0 %v10265_v49  ;;  %v11868_v51 = vadd.f32 %v8656_v2, %v11692_v22  ;;  %v11871_v14 = vadd.f32 %v8720_v50, %v11695_v34  ;;  %v10281_v50 = vld [vmem:[%s10646_s15 + $0x124] ss:$108 sps:$4 sm:$0xff]  }
 0x23a   : > { %v8657_v44 = vpop.f32.mrb[160].mxu0  ;;  %v8721_v21 = vpop.f32.mrb[160].mxu1 }
 0x23b   : > { %v8658_v52 = vpop.f32.mrb[161].mxu0  ;;  %v8722_v48 = vpop.f32.mrb[161].mxu1 }
 0x23c   : > { %v8659_v62 = vadd.f32 %v8658_v52, %v8657_v44  ;;  %v8723_v36 = vadd.f32 %v8722_v48, %v8721_v21  ;;  %v8660_v56 = vpop.f32.mrb[162].mxu0  ;;  %v8724_v16 = vpop.f32.mrb[162].mxu1 }
 0x23d   : > { %v8661_v41 = vpop.f32.mrb[163].mxu0  ;;  %v8725_v0 = vpop.f32.mrb[163].mxu1 }
 0x23e   : > { %v8662_v22 = vadd.f32 %v8661_v41, %v8660_v56  ;;  %v8726_v38 = vadd.f32 %v8725_v0, %v8724_v16  ;;  %v11878_v34 = vadd.f32 %v8659_v62, %v11702_v6  ;;  %v11881_v26 = vadd.f32 %v8723_v36, %v11705_v25 }
 0x23f   : > { %5977 = vmatmul.mubr.bf16.gmra.mrb[12].mxu1 %v10260_v45  ;;  %6074 = vmatmul.mubr.bf16.gmra.mrb[12].mxu0 %v10263_v43  ;;  %v10291_v45 = vld [vmem:[%s13039_s1 + $0x588] sm:$0xff]  }
 0x240   : > { %6081 = vmatprep.mubr.bf16.mxu0 %v10268_v5  ;;  %6178 = vmatprep.mubr.bf16.mxu1 %v10271_v19  ;;  %v11884_v17 = vadd.f32 %v8662_v22, %v11708_v4  ;;  %v11887_v61 = vadd.f32 %v8726_v38, %v11711_v12  ;;  %v10278_v4 = vld [vmem:[%s10646_s15 + $0x7dc] ss:$108 sps:$4 sm:$0xff]   ;;  %v10276_v5 = vld [vmem:[%s10646_s15 + $0x7d8] ss:$108 sps:$4 sm:$0xff]   ;;  %v10279_v19 = vld [vmem:[%s10646_s15 + $0x120] ss:$108 sps:$4 sm:$0xff]  }
 0x241   : > { %v10290_v12 = vld [vmem:[%s13039_s1 + $0x5c8] sm:$0xff]   ;;  %v10284_v38 = vld [vmem:[%s10646_s15 + $0x8b4] ss:$108 sps:$4 sm:$0xff]  }
 0x242   : > { %v8663_v59 = vpop.f32.mrb[164].mxu0  ;;  %v8727_v39 = vpop.f32.mrb[164].mxu1 }
 0x243   : > { %v8664_v31 = vpop.f32.mrb[165].mxu0  ;;  %v8728_v6 = vpop.f32.mrb[165].mxu1 }
 0x244   : > { %v8665_v25 = vadd.f32 %v8664_v31, %v8663_v59  ;;  %v8729_v58 = vadd.f32 %v8728_v6, %v8727_v39  ;;  %v8666_v32 = vpop.f32.mrb[166].mxu0  ;;  %v8730_v49 = vpop.f32.mrb[166].mxu1  ;;  %v10287_v59 = vld [vmem:[%s10646_s15 + $0x1fc] ss:$108 sps:$4 sm:$0xff]   ;;  %v10307_v31 = vld [vmem:[%s13039_s1 + $0x590] sm:$0xff]  }
 0x245   : > { %v8667_v33 = vpop.f32.mrb[167].mxu0  ;;  %v8731_v2 = vpop.f32.mrb[167].mxu1 }
 0x246   : > { %v8668_v44 = vadd.f32 %v8667_v33, %v8666_v32  ;;  %v8732_v21 = vadd.f32 %v8731_v2, %v8730_v49  ;;  %v11900_v52 = vadd.f32 %v8665_v25, %v11724_v53  ;;  %v11903_v48 = vadd.f32 %v8729_v58, %v11727_v46  ;;  %v10306_v46 = vld [vmem:[%s13039_s1 + $0x5d0] sm:$0xff]  }
 0x247   : > { %6082 = vmatmul.mubr.bf16.gmra.mrb[16].mxu0 %v10266_v1  ;;  %6179 = vmatmul.mubr.bf16.vlgmr.msra.gmra.mrb[16].mxu1 %v10269_v23  ;;  %v10322_v23 = vld [vmem:[%s13039_s1 + $0x5d8] sm:$0xff]  }
 0x248   : > { %9354 = vmatpush3.bf16.msra.mxu1 %v10275_v9  ;;  %6089 = vmatprep.mubr.bf16.mxu0 %v10278_v4  ;;  %v11909_v43 = vadd.f32 %v8668_v44, %v11730_v24  ;;  %v11912_v53 = vadd.f32 %v8732_v21, %v11733_v30  ;;  %v10338_v4 = vld [vmem:[%s13039_s1 + $0x5e0] sm:$0xff]   ;;  %v10282_v2 = vld [vmem:[%s10646_s15 + $0x8b0] ss:$108 sps:$4 sm:$0xff]  }
 0x249   : > { %6186 = vmatprep.mubr.bf16.mxu1 %v10281_v50  ;;  %9355 = vmatprep.subr.bf16.mxu1 %v10290_v12  ;;  %v10285_v50 = vld [vmem:[%s10646_s15 + $0x1f8] ss:$108 sps:$4 sm:$0xff]  }
 0x24a   : > { %v8669_v62 = vpop.f32.mrb[168].mxu0  ;;  %v8733_v36 = vpop.f32.mrb[168].mxu1 }
 0x24b   : > { %v8670_v56 = vpop.f32.mrb[169].mxu0  ;;  %v8734_v16 = vpop.f32.mrb[169].mxu1 }
 0x24c   : > { %v8671_v41 = vadd.f32 %v8670_v56, %v8669_v62  ;;  %v8735_v0 = vadd.f32 %v8734_v16, %v8733_v36  ;;  %v8672_v24 = vpop.f32.mrb[170].mxu0  ;;  %v8736_v22 = vpop.f32.mrb[170].mxu1  ;;  %9356 = vmatpush3.bf16.msra.mxu1 %v10291_v45  ;;  %v10294_v45 = vld [vmem:[%s10646_s15 + $0x98c] ss:$108 sps:$4 sm:$0xff]   ;;  %v10339_v56 = vld [vmem:[%s13039_s1 + $0x5a0] sm:$0xff]  }
 0x24d   : > { %v8673_v30 = vpop.f32.mrb[171].mxu0  ;;  %v8737_v39 = vpop.f32.mrb[171].mxu1  ;;  %9357 = vmatprep.subr.bf16.mxu1 %v10306_v46  ;;  %v10297_v46 = vld [vmem:[%s10646_s15 + $0x2d4] ss:$108 sps:$4 sm:$0xff]  }
 0x24e   : > { %v8674_v6 = vadd.f32 %v8673_v30, %v8672_v24  ;;  %v8738_v1 = vadd.f32 %v8737_v39, %v8736_v22  ;;  %v11928_v25 = vadd.f32 %v8671_v41, %v11749_v28  ;;  %v11931_v58 = vadd.f32 %v8735_v0, %v11752_v47  ;;  %v10323_v28 = vld [vmem:[%s13039_s1 + $0x598] sm:$0xff]   ;;  %v10354_v0 = vld [vmem:[%s13039_s1 + $0x5e8] sm:$0xff]  }
 0x24f   : > { %6090 = vmatmul.mubr.bf16.gmra.mrb[20].mxu0 %v10276_v5  ;;  %6187 = vmatmul.mubr.bf16.gmra.mrb[20].mxu1 %v10279_v19  ;;  %v10292_v39 = vld [vmem:[%s10646_s15 + $0x988] ss:$108 sps:$4 sm:$0xff]  }
 0x250   : > { %6097 = vmatprep.mubr.bf16.mxu0 %v10284_v38  ;;  %6194 = vmatprep.mubr.bf16.mxu1 %v10287_v59  ;;  %v11934_v32 = vadd.f32 %v8674_v6, %v11758_v13  ;;  %v11937_v49 = vadd.f32 %v8738_v1, %v11761_v35  ;;  %v10370_v59 = vld [vmem:[%s13039_s1 + $0x5f0] sm:$0xff]  }
 0x251   : > { %9358 = vmatpush3.bf16.msra.mxu1 %v10307_v31  ;;  %v10295_v31 = vld [vmem:[%s10646_s15 + $0x2d0] ss:$108 sps:$4 sm:$0xff]  }
 0x252   : > { %v8675_v47 = vpop.f32.mrb[172].mxu0  ;;  %v8739_v9 = vpop.f32.mrb[172].mxu1  ;;  %9359 = vmatprep.subr.bf16.mxu1 %v10322_v23 }
 0x253   : > { %v8676_v33 = vpop.f32.mrb[173].mxu0  ;;  %v8740_v13 = vpop.f32.mrb[173].mxu1 }
 0x254   : > { %v8677_v12 = vadd.f32 %v8676_v33, %v8675_v47  ;;  %v8741_v35 = vadd.f32 %v8740_v13, %v8739_v9  ;;  %v8678_v44 = vpop.f32.mrb[174].mxu0  ;;  %v8742_v21 = vpop.f32.mrb[174].mxu1  ;;  %v10303_v47 = vld [vmem:[%s10646_s15 + $0x3ac] ss:$108 sps:$4 sm:$0xff]   ;;  %v10371_v33 = vld [vmem:[%s13039_s1 + $0x5b0] sm:$0xff]  }
 0x255   : > { %v8679_v62 = vpop.f32.mrb[175].mxu0  ;;  %v8743_v36 = vpop.f32.mrb[175].mxu1  ;;  %9360 = vmatpush3.bf16.msra.mxu1 %v10323_v28  ;;  %v10300_v28 = vld [vmem:[%s10646_s15 + $0xa64] ss:$108 sps:$4 sm:$0xff]  }
 0x256   : > { %v8680_v16 = vadd.f32 %v8679_v62, %v8678_v44  ;;  %v8744_v5 = vadd.f32 %v8743_v36, %v8742_v21  ;;  %9361 = vmatprep.subr.bf16.mxu1 %v10338_v4  ;;  %v11953_v19 = vadd.f32 %v8677_v12, %v11777_v11  ;;  %v11956_v41 = vadd.f32 %v8741_v35, %v11780_v20  ;;  %v10355_v20 = vld [vmem:[%s13039_s1 + $0x5a8] sm:$0xff]   ;;  %v10386_v35 = vld [vmem:[%s13039_s1 + $0x5f8] sm:$0xff]  }
 0x257   : > { %6098 = vmatmul.mubr.bf16.gmra.mrb[24].mxu0 %v10282_v2  ;;  %6195 = vmatmul.mubr.bf16.gmra.mrb[24].mxu1 %v10285_v50  ;;  %v10298_v62 = vld [vmem:[%s10646_s15 + $0xa60] ss:$108 sps:$4 sm:$0xff]   ;;  %v10301_v36 = vld [vmem:[%s10646_s15 + $0x3a8] ss:$108 sps:$4 sm:$0xff]  }
 0x258   : > { %6105 = vmatprep.mubr.bf16.mxu0 %v10294_v45  ;;  %6202 = vmatprep.mubr.bf16.mxu1 %v10297_v46  ;;  %v11962_v24 = vadd.f32 %v8680_v16, %v11786_v7  ;;  %v11965_v11 = vadd.f32 %v8744_v5, %v11789_v8 }
 0x259   : > { %9362 = vmatpush3.bf16.msra.mxu1 %v10339_v56 }
 0x25a   : > { %v8745_v22 = vpop.f32.mrb[176].mxu1  ;;  %v8809_v38 = vpop.f32.mrb[176].mxu0  ;;  %9363 = vmatprep.subr.bf16.mxu1 %v10354_v0 }
 0x25b   : > { %v8746_v30 = vpop.f32.mrb[177].mxu1  ;;  %v8810_v7 = vpop.f32.mrb[177].mxu0 }
 0x25c   : > { %v8747_v6 = vadd.f32 %v8746_v30, %v8745_v22  ;;  %v8811_v8 = vadd.f32 %v8810_v7, %v8809_v38  ;;  %v8748_v1 = vpop.f32.mrb[178].mxu1  ;;  %v8812_v23 = vpop.f32.mrb[178].mxu0  ;;  %v10313_v22 = vld [vmem:[%s10646_s15 + $0x484] ss:$108 sps:$4 sm:$0xff]  }
 0x25d   : > { %v8749_v9 = vpop.f32.mrb[179].mxu1  ;;  %v8813_v4 = vpop.f32.mrb[179].mxu0  ;;  %9364 = vmatpush3.bf16.msra.mxu1 %v10355_v20  ;;  %v10310_v20 = vld [vmem:[%s10646_s15 + $0xb3c] ss:$108 sps:$4 sm:$0xff]  }
 0x25e   : > { %v11981_v13 = vadd.f32 %v8747_v6, %v11805_v29  ;;  %v11984_v2 = vadd.f32 %v8811_v8, %v11808_v27  ;;  %v8750_v50 = vadd.f32 %v8749_v9, %v8748_v1  ;;  %v8814_v12 = vadd.f32 %v8813_v4, %v8812_v23  ;;  %9365 = vmatprep.subr.bf16.mxu1 %v10370_v59  ;;  %v10387_v27 = vld [vmem:[%s13039_s1 + $0x5b8] sm:$0xff]  }
 0x25f   : > { %6106 = vmatmul.mubr.bf16.gmra.mrb[28].mxu0 %v10292_v39  ;;  %6203 = vmatmul.mubr.bf16.gmra.mrb[28].mxu1 %v10295_v31 }
 0x260   : > { %v11990_v44 = vadd.f32 %v8750_v50, %v11814_v18  ;;  %v11993_v29 = vadd.f32 %v8814_v12, %v11817_v63  ;;  %6113 = vmatprep.mubr.bf16.mxu0 %v10300_v28  ;;  %6210 = vmatprep.mubr.bf16.mxu1 %v10303_v47  ;;  %v12001_v18 = vld [vmem:[%s13039_s1 + $0x680] sm:$0xff]  }
 0x261   : > { %9366 = vmatpush3.bf16.msra.mxu1 %v10371_v33  ;;  %v10308_v28 = vld [vmem:[%s10646_s15 + $0xb38] ss:$108 sps:$4 sm:$0xff]   ;;  %v10311_v47 = vld [vmem:[%s10646_s15 + $0x480] ss:$108 sps:$4 sm:$0xff]  }
 0x262   : > { %v8751_v21 = vpop.f32.mrb[180].mxu1  ;;  %v8815_v45 = vpop.f32.mrb[180].mxu0  ;;  %9367 = vmatprep.subr.bf16.mxu1 %v10386_v35  ;;  %v10316_v12 = vld [vmem:[%s10646_s15 + $0xc14] ss:$108 sps:$4 sm:$0xff]   ;;  %v10319_v35 = vld [vmem:[%s10646_s15 + $0x55c] ss:$108 sps:$4 sm:$0xff]  }
 0x263   : > { %v8752_v46 = vpop.f32.mrb[181].mxu1  ;;  %v8816_v63 = vpop.f32.mrb[181].mxu0 }
 0x264   : > { %v8753_v56 = vadd.f32 %v8752_v46, %v8751_v21  ;;  %v8817_v16 = vadd.f32 %v8816_v63, %v8815_v45  ;;  %v8754_v5 = vpop.f32.mrb[182].mxu1  ;;  %v8818_v0 = vpop.f32.mrb[182].mxu0 }
 0x265   : > { %v8755_v38 = vpop.f32.mrb[183].mxu1  ;;  %v8819_v59 = vpop.f32.mrb[183].mxu0  ;;  %9368 = vmatpush3.bf16.msra.mxu1 %v10387_v27 }
 0x266   : > { %v12008_v30 = vadd.f32 %v8753_v56, %v11830_v54  ;;  %v12011_v7 = vadd.f32 %v8817_v16, %v11833_v10  ;;  %v8756_v39 = vadd.f32 %v8755_v38, %v8754_v5  ;;  %v8820_v31 = vadd.f32 %v8819_v59, %v8818_v0  ;;  %9601 = vmatprep.subr.bf16.mxu1 %v12001_v18  ;;  %v10317_v5 = vld [vmem:[%s10646_s15 + $0x558] ss:$108 sps:$4 sm:$0xff]  }
 0x267   : > { %6114 = vmatmul.mubr.bf16.gmra.mrb[32].mxu0 %v10298_v62  ;;  %6211 = vmatmul.mubr.bf16.gmra.mrb[32].mxu1 %v10301_v36  ;;  %v10326_v59 = vld [vmem:[%s10646_s15 + $0xcec] ss:$108 sps:$4 sm:$0xff]  }
 0x268   : > { %v12015_v6 = vadd.f32 %v8756_v39, %v11836_v15  ;;  %v12018_v8 = vadd.f32 %v8820_v31, %v11839_v40  ;;  %6121 = vmatprep.mubr.bf16.mxu0 %v10310_v20  ;;  %6218 = vmatprep.mubr.bf16.mxu1 %v10313_v22  ;;  %v10329_v39 = vld [vmem:[%s10646_s15 + $0x634] ss:$108 sps:$4 sm:$0xff]  }
 0x26a   : > { %v8757_v54 = vpop.f32.mrb[184].mxu1  ;;  %v8821_v1 = vpop.f32.mrb[184].mxu0 }
 0x26b   : > { %v8758_v10 = vpop.f32.mrb[185].mxu1  ;;  %v8822_v23 = vpop.f32.mrb[185].mxu0 }
 0x26c   : > { %v8759_v9 = vadd.f32 %v8758_v10, %v8757_v54  ;;  %v8823_v4 = vadd.f32 %v8822_v23, %v8821_v1  ;;  %v8760_v33 = vpop.f32.mrb[186].mxu1  ;;  %v8824_v50 = vpop.f32.mrb[186].mxu0 }
 0x26d   : > { %v8761_v27 = vpop.f32.mrb[187].mxu1  ;;  %v8825_v15 = vpop.f32.mrb[187].mxu0 }
 0x26e   : > { %v12025_v40 = vadd.f32 %v8759_v9, %v11846_v3  ;;  %v12028_v21 = vadd.f32 %v8823_v4, %v11849_v37  ;;  %v8762_v45 = vadd.f32 %v8761_v27, %v8760_v33  ;;  %v8826_v46 = vadd.f32 %v8825_v15, %v8824_v50  ;;  %v10314_v37 = vld [vmem:[%s10646_s15 + $0xc10] ss:$108 sps:$4 sm:$0xff]   ;;  %v10332_v15 = vld [vmem:[%s10646_s15 + $0x70c] ss:$108 sps:$4 sm:$0xff]  }
 0x26f   : > { %6122 = vmatmul.mubr.bf16.gmra.mrb[36].mxu0 %v10308_v28  ;;  %6219 = vmatmul.mubr.bf16.gmra.mrb[36].mxu1 %v10311_v47  ;;  %v10327_v33 = vld [vmem:[%s10646_s15 + $0x630] ss:$108 sps:$4 sm:$0xff]  }
 0x270   : > { %v12031_v63 = vadd.f32 %v8762_v45, %v11852_v55  ;;  %v12034_v62 = vadd.f32 %v8826_v46, %v11855_v60  ;;  %6129 = vmatprep.mubr.bf16.mxu0 %v10316_v12  ;;  %6226 = vmatprep.mubr.bf16.mxu1 %v10319_v35  ;;  %v10335_v45 = vld [vmem:[%s10646_s15 + $0x54] ss:$108 sps:$4 sm:$0xff]  }
 0x272   : > { %v8763_v36 = vpop.f32.mrb[188].mxu1  ;;  %v8827_v3 = vpop.f32.mrb[188].mxu0 }
 0x273   : > { %v8764_v56 = vpop.f32.mrb[189].mxu1  ;;  %v8828_v16 = vpop.f32.mrb[189].mxu0 }
 0x274   : > { %v8765_v0 = vadd.f32 %v8764_v56, %v8763_v36  ;;  %v8829_v20 = vadd.f32 %v8828_v16, %v8827_v3  ;;  %v8766_v22 = vpop.f32.mrb[190].mxu1  ;;  %v8830_v38 = vpop.f32.mrb[190].mxu0 }
 0x275   : > { %v8767_v31 = vpop.f32.mrb[191].mxu1  ;;  %v8831_v55 = vpop.f32.mrb[191].mxu0 }
 0x276   : > { %v12041_v60 = vadd.f32 %v8765_v0, %v11862_v42  ;;  %v12044_v54 = vadd.f32 %v8829_v20, %v11865_v57  ;;  %v8768_v1 = vadd.f32 %v8767_v31, %v8766_v22  ;;  %v8832_v10 = vadd.f32 %v8831_v55, %v8830_v38  ;;  %v10324_v57 = vld [vmem:[%s10646_s15 + $0xce8] ss:$108 sps:$4 sm:$0xff]   ;;  %v10333_v22 = vld [vmem:[%s10646_s15 + $0x50] ss:$108 sps:$4 sm:$0xff]  }
 0x277   : > { %6130 = vmatmul.mubr.bf16.gmra.mrb[40].mxu0 %v10314_v37  ;;  %6227 = vmatmul.mubr.bf16.gmra.mrb[40].mxu1 %v10317_v5  ;;  %v10342_v55 = vld [vmem:[%s10646_s15 + $0x7e4] ss:$108 sps:$4 sm:$0xff]  }
 0x278   : > { %v12047_v23 = vadd.f32 %v8768_v1, %v11868_v51  ;;  %v12050_v28 = vadd.f32 %v8832_v10, %v11871_v14  ;;  %6137 = vmatprep.mubr.bf16.mxu0 %v10326_v59  ;;  %6234 = vmatprep.mubr.bf16.mxu1 %v10329_v39  ;;  %v10345_v10 = vld [vmem:[%s10646_s15 + $0x12c] ss:$108 sps:$4 sm:$0xff]  }
 0x27a   : > { %v8769_v47 = vpop.f32.mrb[192].mxu1  ;;  %v8833_v42 = vpop.f32.mrb[192].mxu0 }
 0x27b   : > { %v8770_v9 = vpop.f32.mrb[193].mxu1  ;;  %v8834_v4 = vpop.f32.mrb[193].mxu0 }
 0x27c   : > { %v8771_v50 = vadd.f32 %v8770_v9, %v8769_v47  ;;  %v8835_v12 = vadd.f32 %v8834_v4, %v8833_v42  ;;  %v8772_v35 = vpop.f32.mrb[194].mxu1  ;;  %v8836_v27 = vpop.f32.mrb[194].mxu0  ;;  %v10352_v47 = vld [vmem:[%s13039_s1 + $0x648] sm:$0xff]  }
 0x27d   : > { %v8773_v46 = vpop.f32.mrb[195].mxu1  ;;  %v8837_v51 = vpop.f32.mrb[195].mxu0 }
 0x27e   : > { %v12057_v14 = vadd.f32 %v8771_v50, %v11878_v34  ;;  %v12060_v36 = vadd.f32 %v8835_v12, %v11881_v26  ;;  %v8774_v3 = vadd.f32 %v8773_v46, %v8772_v35  ;;  %v8838_v56 = vadd.f32 %v8837_v51, %v8836_v27  ;;  %v10330_v26 = vld [vmem:[%s10646_s15 + $0x708] ss:$108 sps:$4 sm:$0xff]  }
 0x27f   : > { %6138 = vmatmul.mubr.bf16.gmra.mrb[44].mxu0 %v10324_v57  ;;  %6235 = vmatmul.mubr.bf16.gmra.mrb[44].mxu1 %v10327_v33 }
 0x280   : > { %v12063_v16 = vadd.f32 %v8774_v3, %v11884_v17  ;;  %v12066_v37 = vadd.f32 %v8838_v56, %v11887_v61  ;;  %6242 = vmatprep.mubr.bf16.mxu1 %v10332_v15  ;;  %6339 = vmatprep.mubr.bf16.mxu0 %v10335_v45  ;;  %v10337_v17 = vld [vmem:[%s13039_s1 + $0x600] sm:$0xff]   ;;  %v10343_v15 = vld [vmem:[%s10646_s15 + $0x128] ss:$108 sps:$4 sm:$0xff]  }
 0x281   : > { %v10348_v56 = vld [vmem:[%s10646_s15 + $0x8bc] ss:$108 sps:$4 sm:$0xff]  }
 0x282   : > { %v8775_v5 = vpop.f32.mrb[196].mxu1  ;;  %v8839_v34 = vpop.f32.mrb[196].mxu0 }
 0x283   : > { %v8776_v0 = vpop.f32.mrb[197].mxu1  ;;  %v8840_v20 = vpop.f32.mrb[197].mxu0 }
 0x284   : > { %v8777_v38 = vadd.f32 %v8776_v0, %v8775_v5  ;;  %v8841_v59 = vadd.f32 %v8840_v20, %v8839_v34  ;;  %v8778_v39 = vpop.f32.mrb[198].mxu1  ;;  %v8842_v31 = vpop.f32.mrb[198].mxu0  ;;  %v10351_v5 = vld [vmem:[%s10646_s15 + $0x204] ss:$108 sps:$4 sm:$0xff]  }
 0x285   : > { %v8779_v61 = vpop.f32.mrb[199].mxu1  ;;  %v8843_v1 = vpop.f32.mrb[199].mxu0  ;;  %v10369_v20 = vld [vmem:[%s13039_s1 + $0x610] sm:$0xff]  }
 0x286   : > { %v12079_v42 = vadd.f32 %v8777_v38, %v11900_v52  ;;  %v12082_v9 = vadd.f32 %v8841_v59, %v11903_v48  ;;  %v8780_v4 = vadd.f32 %v8779_v61, %v8778_v39  ;;  %v8844_v57 = vadd.f32 %v8843_v1, %v8842_v31  ;;  %v10353_v52 = vld [vmem:[%s13039_s1 + $0x608] sm:$0xff]   ;;  %v10368_v48 = vld [vmem:[%s13039_s1 + $0x650] sm:$0xff]   ;;  %v10384_v39 = vld [vmem:[%s13039_s1 + $0x658] sm:$0xff]  }
 0x287   : > { %6243 = vmatmul.mubr.bf16.gmra.mrb[48].mxu1 %v10330_v26  ;;  %6340 = vmatmul.mubr.bf16.vlgmr.msra.gmra.mrb[48].mxu0 %v10333_v22 }
 0x288   : > { %v12085_v33 = vadd.f32 %v8780_v4, %v11909_v43  ;;  %v12088_v50 = vadd.f32 %v8844_v57, %v11912_v53  ;;  %9466 = vmatpush3.bf16.msra.mxu0 %v10337_v17  ;;  %6250 = vmatprep.mubr.bf16.mxu1 %v10342_v55  ;;  %v10340_v53 = vld [vmem:[%s10646_s15 + $0x7e0] ss:$108 sps:$4 sm:$0xff]  }
 0x289   : > { %6347 = vmatprep.mubr.bf16.mxu0 %v10345_v10  ;;  %9467 = vmatprep.subr.bf16.mxu0 %v10352_v47  ;;  %v10349_v10 = vld [vmem:[%s10646_s15 + $0x200] ss:$108 sps:$4 sm:$0xff]  }
 0x28a   : > { %v8781_v12 = vpop.f32.mrb[200].mxu1  ;;  %v8845_v43 = vpop.f32.mrb[200].mxu0 }
 0x28b   : > { %v8782_v35 = vpop.f32.mrb[201].mxu1  ;;  %v8846_v27 = vpop.f32.mrb[201].mxu0 }
 0x28c   : > { %v8783_v45 = vadd.f32 %v8782_v35, %v8781_v12  ;;  %v8847_v46 = vadd.f32 %v8846_v27, %v8845_v43  ;;  %v8784_v51 = vpop.f32.mrb[202].mxu1  ;;  %v8848_v3 = vpop.f32.mrb[202].mxu0  ;;  %9468 = vmatpush3.bf16.msra.mxu0 %v10353_v52  ;;  %v10361_v12 = vld [vmem:[%s10646_s15 + $0x2dc] ss:$108 sps:$4 sm:$0xff]   ;;  %v10401_v27 = vld [vmem:[%s13039_s1 + $0x620] sm:$0xff]  }
 0x28d   : > { %v8785_v34 = vpop.f32.mrb[203].mxu1  ;;  %v8849_v0 = vpop.f32.mrb[203].mxu0  ;;  %9469 = vmatprep.subr.bf16.mxu0 %v10368_v48  ;;  %v10358_v48 = vld [vmem:[%s10646_s15 + $0x994] ss:$108 sps:$4 sm:$0xff]  }
 0x28e   : > { %v12104_v26 = vadd.f32 %v8783_v45, %v11928_v25  ;;  %v12107_v22 = vadd.f32 %v8847_v46, %v11931_v58  ;;  %v8786_v38 = vadd.f32 %v8785_v34, %v8784_v51  ;;  %v8850_v59 = vadd.f32 %v8849_v0, %v8848_v3  ;;  %v10385_v25 = vld [vmem:[%s13039_s1 + $0x618] sm:$0xff]   ;;  %v10415_v51 = vld [vmem:[%s13039_s1 + $0x668] sm:$0xff]  }
 0x28f   : > { %6251 = vmatmul.mubr.bf16.gmra.mrb[52].mxu1 %v10340_v53  ;;  %6348 = vmatmul.mubr.bf16.gmra.mrb[52].mxu0 %v10343_v15 }
 0x290   : > { %v12113_v31 = vadd.f32 %v8786_v38, %v11934_v32  ;;  %v12116_v17 = vadd.f32 %v8850_v59, %v11937_v49  ;;  %6258 = vmatprep.mubr.bf16.mxu1 %v10348_v56  ;;  %6355 = vmatprep.mubr.bf16.mxu0 %v10351_v5  ;;  %v10400_v32 = vld [vmem:[%s13039_s1 + $0x660] sm:$0xff]  }
 0x291   : > { %9470 = vmatpush3.bf16.msra.mxu0 %v10369_v20  ;;  %v10346_v49 = vld [vmem:[%s10646_s15 + $0x8b8] ss:$108 sps:$4 sm:$0xff]  }
 0x292   : > { %v8787_v58 = vpop.f32.mrb[204].mxu1  ;;  %v8851_v55 = vpop.f32.mrb[204].mxu0  ;;  %9471 = vmatprep.subr.bf16.mxu0 %v10384_v39  ;;  %v10359_v20 = vld [vmem:[%s10646_s15 + $0x2d8] ss:$108 sps:$4 sm:$0xff]  }
 0x293   : > { %v8788_v61 = vpop.f32.mrb[205].mxu1  ;;  %v8852_v1 = vpop.f32.mrb[205].mxu0 }
 0x294   : > { %v8789_v47 = vadd.f32 %v8788_v61, %v8787_v58  ;;  %v8853_v4 = vadd.f32 %v8852_v1, %v8851_v55  ;;  %v8790_v57 = vpop.f32.mrb[206].mxu1  ;;  %v8854_v52 = vpop.f32.mrb[206].mxu0  ;;  %v10364_v58 = vld [vmem:[%s10646_s15 + $0xa6c] ss:$108 sps:$4 sm:$0xff]   ;;  %v10367_v55 = vld [vmem:[%s10646_s15 + $0x3b4] ss:$108 sps:$4 sm:$0xff]  }
 0x295   : > { %v8791_v43 = vpop.f32.mrb[207].mxu1  ;;  %v8855_v35 = vpop.f32.mrb[207].mxu0  ;;  %9472 = vmatpush3.bf16.msra.mxu0 %v10385_v25  ;;  %v10431_v1 = vld [vmem:[%s13039_s1 + $0x630] sm:$0xff]  }
 0x296   : > { %v12132_v53 = vadd.f32 %v8789_v47, %v11953_v19  ;;  %v12135_v15 = vadd.f32 %v8853_v4, %v11956_v41  ;;  %v8792_v45 = vadd.f32 %v8791_v43, %v8790_v57  ;;  %v8856_v46 = vadd.f32 %v8855_v35, %v8854_v52  ;;  %9473 = vmatprep.subr.bf16.mxu0 %v10400_v32  ;;  %v10416_v41 = vld [vmem:[%s13039_s1 + $0x628] sm:$0xff]   ;;  %v10445_v57 = vld [vmem:[%s13039_s1 + $0x678] sm:$0xff]  }
 0x297   : > { %6259 = vmatmul.mubr.bf16.gmra.mrb[56].mxu1 %v10346_v49  ;;  %6356 = vmatmul.mubr.bf16.gmra.mrb[56].mxu0 %v10349_v10 }
 0x298   : > { %v12141_v3 = vadd.f32 %v8792_v45, %v11962_v24  ;;  %v12144_v19 = vadd.f32 %v8856_v46, %v11965_v11  ;;  %6266 = vmatprep.mubr.bf16.mxu1 %v10358_v48  ;;  %6363 = vmatprep.mubr.bf16.mxu0 %v10361_v12  ;;  %v10430_v24 = vld [vmem:[%s13039_s1 + $0x670] sm:$0xff]  }
 0x299   : > { %9474 = vmatpush3.bf16.msra.mxu0 %v10401_v27  ;;  %v10356_v11 = vld [vmem:[%s10646_s15 + $0x990] ss:$108 sps:$4 sm:$0xff]   ;;  %v10362_v27 = vld [vmem:[%s10646_s15 + $0xa68] ss:$108 sps:$4 sm:$0xff]  }
 0x29a   : > { %v8857_v56 = vpop.f32.mrb[208].mxu0  ;;  %v8921_v5 = vpop.f32.mrb[208].mxu1  ;;  %9475 = vmatprep.subr.bf16.mxu0 %v10415_v51 }
 0x29b   : > { %v8858_v34 = vpop.f32.mrb[209].mxu0  ;;  %v8922_v0 = vpop.f32.mrb[209].mxu1 }
 0x29c   : > { %v8859_v38 = vadd.f32 %v8858_v34, %v8857_v56  ;;  %v8923_v59 = vadd.f32 %v8922_v0, %v8921_v5  ;;  %v8860_v39 = vpop.f32.mrb[210].mxu0  ;;  %v8924_v25 = vpop.f32.mrb[210].mxu1  ;;  %v10377_v56 = vld [vmem:[%s10646_s15 + $0x48c] ss:$108 sps:$4 sm:$0xff]  }
 0x29d   : > { %v8861_v32 = vpop.f32.mrb[211].mxu0  ;;  %v8925_v61 = vpop.f32.mrb[211].mxu1  ;;  %9476 = vmatpush3.bf16.msra.mxu0 %v10416_v41  ;;  %v10374_v41 = vld [vmem:[%s10646_s15 + $0xb44] ss:$108 sps:$4 sm:$0xff]  }
 0x29e   : > { %v12160_v49 = vadd.f32 %v8859_v38, %v11981_v13  ;;  %v12163_v10 = vadd.f32 %v8923_v59, %v11984_v2  ;;  %v8862_v47 = vadd.f32 %v8861_v32, %v8860_v39  ;;  %v8926_v4 = vadd.f32 %v8925_v61, %v8924_v25  ;;  %9477 = vmatprep.subr.bf16.mxu0 %v10430_v24  ;;  %v10446_v2 = vld [vmem:[%s13039_s1 + $0x638] sm:$0xff]  }
 0x29f   : > { %6267 = vmatmul.mubr.bf16.gmra.mrb[60].mxu1 %v10356_v11  ;;  %6364 = vmatmul.mubr.bf16.gmra.mrb[60].mxu0 %v10359_v20 }
 0x2a0   : > { %v12169_v52 = vadd.f32 %v8862_v47, %v11990_v44  ;;  %v12172_v13 = vadd.f32 %v8926_v4, %v11993_v29  ;;  %6274 = vmatprep.mubr.bf16.mxu1 %v10364_v58  ;;  %6371 = vmatprep.mubr.bf16.mxu0 %v10367_v55  ;;  %v10365_v44 = vld [vmem:[%s10646_s15 + $0x3b0] ss:$108 sps:$4 sm:$0xff]   ;;  %v10375_v55 = vld [vmem:[%s10646_s15 + $0x488] ss:$108 sps:$4 sm:$0xff]  }
 0x2a1   : > { %9478 = vmatpush3.bf16.msra.mxu0 %v10431_v1  ;;  %v10380_v4 = vld [vmem:[%s10646_s15 + $0xc1c] ss:$108 sps:$4 sm:$0xff]  }
 0x2a2   : > { %v8863_v48 = vpop.f32.mrb[212].mxu0  ;;  %v8927_v12 = vpop.f32.mrb[212].mxu1  ;;  %9479 = vmatprep.subr.bf16.mxu0 %v10445_v57  ;;  %v10383_v57 = vld [vmem:[%s10646_s15 + $0x564] ss:$108 sps:$4 sm:$0xff]  }
 0x2a3   : > { %v8864_v43 = vpop.f32.mrb[213].mxu0  ;;  %v8928_v35 = vpop.f32.mrb[213].mxu1 }
 0x2a4   : > { %v8865_v45 = vadd.f32 %v8864_v43, %v8863_v48  ;;  %v8929_v46 = vadd.f32 %v8928_v35, %v8927_v12  ;;  %v8866_v29 = vpop.f32.mrb[214].mxu0  ;;  %v8930_v51 = vpop.f32.mrb[214].mxu1 }
 0x2a5   : > { %v8867_v5 = vpop.f32.mrb[215].mxu0  ;;  %v8931_v24 = vpop.f32.mrb[215].mxu1  ;;  %9480 = vmatpush3.bf16.msra.mxu0 %v10446_v2 }
 0x2a6   : > { %v12182_v34 = vadd.f32 %v8865_v45, %v12008_v30  ;;  %v12185_v0 = vadd.f32 %v8929_v46, %v12011_v7  ;;  %v8868_v11 = vadd.f32 %v8867_v5, %v8866_v29  ;;  %v8932_v20 = vadd.f32 %v8931_v24, %v8930_v51  ;;  %v10372_v7 = vld [vmem:[%s10646_s15 + $0xb40] ss:$108 sps:$4 sm:$0xff]  }
 0x2a7   : > { %6275 = vmatmul.mubr.bf16.gmra.mrb[64].mxu1 %v10362_v27  ;;  %6372 = vmatmul.mubr.bf16.gmra.mrb[64].mxu0 %v10365_v44  ;;  %v10381_v29 = vld [vmem:[%s10646_s15 + $0x560] ss:$108 sps:$4 sm:$0xff]  }
 0x2a8   : > { %v12188_v38 = vadd.f32 %v8868_v11, %v12015_v6  ;;  %v12191_v59 = vadd.f32 %v8932_v20, %v12018_v8  ;;  %6282 = vmatprep.mubr.bf16.mxu1 %v10374_v41  ;;  %6379 = vmatprep.mubr.bf16.mxu0 %v10377_v56  ;;  %v10390_v24 = vld [vmem:[%s10646_s15 + $0xcf4] ss:$108 sps:$4 sm:$0xff]   ;;  %v10393_v11 = vld [vmem:[%s10646_s15 + $0x63c] ss:$108 sps:$4 sm:$0xff]  }
 0x2aa   : > { %v8869_v39 = vpop.f32.mrb[216].mxu0  ;;  %v8933_v30 = vpop.f32.mrb[216].mxu1 }
 0x2ab   : > { %v8870_v25 = vpop.f32.mrb[217].mxu0  ;;  %v8934_v58 = vpop.f32.mrb[217].mxu1 }
 0x2ac   : > { %v8871_v32 = vadd.f32 %v8870_v25, %v8869_v39  ;;  %v8935_v61 = vadd.f32 %v8934_v58, %v8933_v30  ;;  %v8872_v1 = vpop.f32.mrb[218].mxu0  ;;  %v8936_v47 = vpop.f32.mrb[218].mxu1 }
 0x2ad   : > { %v8873_v2 = vpop.f32.mrb[219].mxu0  ;;  %v8937_v6 = vpop.f32.mrb[219].mxu1 }
 0x2ae   : > { %v12198_v8 = vadd.f32 %v8871_v32, %v12025_v40  ;;  %v12201_v48 = vadd.f32 %v8935_v61, %v12028_v21  ;;  %v8874_v12 = vadd.f32 %v8873_v2, %v8872_v1  ;;  %v8938_v43 = vadd.f32 %v8937_v6, %v8936_v47  ;;  %v10378_v21 = vld [vmem:[%s10646_s15 + $0xc18] ss:$108 sps:$4 sm:$0xff]   ;;  %v10396_v6 = vld [vmem:[%s10646_s15 + $0x714] ss:$108 sps:$4 sm:$0xff]  }
 0x2af   : > { %6283 = vmatmul.mubr.bf16.gmra.mrb[68].mxu1 %v10372_v7  ;;  %6380 = vmatmul.mubr.bf16.gmra.mrb[68].mxu0 %v10375_v55  ;;  %v10391_v1 = vld [vmem:[%s10646_s15 + $0x638] ss:$108 sps:$4 sm:$0xff]  }
 0x2b0   : > { %v12204_v35 = vadd.f32 %v8874_v12, %v12031_v63  ;;  %v12207_v27 = vadd.f32 %v8938_v43, %v12034_v62  ;;  %6290 = vmatprep.mubr.bf16.mxu1 %v10380_v4  ;;  %6387 = vmatprep.mubr.bf16.mxu0 %v10383_v57  ;;  %v10399_v12 = vld [vmem:[%s10646_s15 + $0x5c] ss:$108 sps:$4 sm:$0xff]  }
 0x2b2   : > { %v8875_v44 = vpop.f32.mrb[220].mxu0  ;;  %v8939_v40 = vpop.f32.mrb[220].mxu1 }
 0x2b3   : > { %v8876_v45 = vpop.f32.mrb[221].mxu0  ;;  %v8940_v46 = vpop.f32.mrb[221].mxu1 }
 0x2b4   : > { %v8877_v51 = vadd.f32 %v8876_v45, %v8875_v44  ;;  %v8941_v41 = vadd.f32 %v8940_v46, %v8939_v40  ;;  %v8878_v56 = vpop.f32.mrb[222].mxu0  ;;  %v8942_v5 = vpop.f32.mrb[222].mxu1 }
 0x2b5   : > { %v8879_v20 = vpop.f32.mrb[223].mxu0  ;;  %v8943_v63 = vpop.f32.mrb[223].mxu1 }
 0x2b6   : > { %v12214_v62 = vadd.f32 %v8877_v51, %v12041_v60  ;;  %v12217_v39 = vadd.f32 %v8941_v41, %v12044_v54  ;;  %v8880_v30 = vadd.f32 %v8879_v20, %v8878_v56  ;;  %v8944_v25 = vadd.f32 %v8943_v63, %v8942_v5  ;;  %v10388_v54 = vld [vmem:[%s10646_s15 + $0xcf0] ss:$108 sps:$4 sm:$0xff]   ;;  %v10397_v56 = vld [vmem:[%s10646_s15 + $0x58] ss:$108 sps:$4 sm:$0xff]  }
 0x2b7   : > { %6291 = vmatmul.mubr.bf16.gmra.mrb[72].mxu1 %v10378_v21  ;;  %6388 = vmatmul.mubr.bf16.gmra.mrb[72].mxu0 %v10381_v29  ;;  %v10405_v63 = vld [vmem:[%s10646_s15 + $0x7ec] ss:$108 sps:$4 sm:$0xff]  }
 0x2b8   : > { %v12220_v58 = vadd.f32 %v8880_v30, %v12047_v23  ;;  %v12223_v7 = vadd.f32 %v8944_v25, %v12050_v28  ;;  %6298 = vmatprep.mubr.bf16.mxu1 %v10390_v24  ;;  %6395 = vmatprep.mubr.bf16.mxu0 %v10393_v11  ;;  %v10408_v25 = vld [vmem:[%s10646_s15 + $0x134] ss:$108 sps:$4 sm:$0xff]  }
 0x2ba   : > { %v8881_v55 = vpop.f32.mrb[224].mxu0  ;;  %v8945_v60 = vpop.f32.mrb[224].mxu1 }
 0x2bb   : > { %v8882_v32 = vpop.f32.mrb[225].mxu0  ;;  %v8946_v61 = vpop.f32.mrb[225].mxu1 }
 0x2bc   : > { %v8883_v47 = vadd.f32 %v8882_v32, %v8881_v55  ;;  %v8947_v4 = vadd.f32 %v8946_v61, %v8945_v60  ;;  %v8884_v57 = vpop.f32.mrb[226].mxu0  ;;  %v8948_v2 = vpop.f32.mrb[226].mxu1 }
 0x2bd   : > { %v8885_v43 = vpop.f32.mrb[227].mxu0  ;;  %v8949_v23 = vpop.f32.mrb[227].mxu1 }
 0x2be   : > { %v12230_v28 = vadd.f32 %v8883_v47, %v12057_v14  ;;  %v12233_v44 = vadd.f32 %v8947_v4, %v12060_v36  ;;  %v8886_v40 = vadd.f32 %v8885_v43, %v8884_v57  ;;  %v8950_v45 = vadd.f32 %v8949_v23, %v8948_v2  ;;  %v10394_v36 = vld [vmem:[%s10646_s15 + $0x710] ss:$108 sps:$4 sm:$0xff]  }
 0x2bf   : > { %6299 = vmatmul.mubr.bf16.gmra.mrb[76].mxu1 %v10388_v54  ;;  %6396 = vmatmul.mubr.bf16.gmra.mrb[76].mxu0 %v10391_v1  ;;  %v10406_v2 = vld [vmem:[%s10646_s15 + $0x130] ss:$108 sps:$4 sm:$0xff]  }
 0x2c0   : > { %v12236_v46 = vadd.f32 %v8886_v40, %v12063_v16  ;;  %v12239_v21 = vadd.f32 %v8950_v45, %v12066_v37  ;;  %6403 = vmatprep.mubr.bf16.mxu0 %v10396_v6  ;;  %6500 = vmatprep.mubr.bf16.mxu1 %v10399_v12  ;;  %v10417_v37 = vld [vmem:[%s13039_s1 + $0x688] sm:$0xff]   ;;  %v10411_v23 = vld [vmem:[%s10646_s15 + $0x8c4] ss:$108 sps:$4 sm:$0xff]  }
 0x2c2   : > { %v8887_v29 = vpop.f32.mrb[228].mxu0  ;;  %v8951_v14 = vpop.f32.mrb[228].mxu1 }
 0x2c3   : > { %v8888_v51 = vpop.f32.mrb[229].mxu0  ;;  %v8952_v41 = vpop.f32.mrb[229].mxu1 }
 0x2c4   : > { %v8889_v5 = vadd.f32 %v8888_v51, %v8887_v29  ;;  %v8953_v24 = vadd.f32 %v8952_v41, %v8951_v14  ;;  %v8890_v11 = vpop.f32.mrb[230].mxu0  ;;  %v8954_v20 = vpop.f32.mrb[230].mxu1 }
 0x2c5   : > { %v8891_v30 = vpop.f32.mrb[231].mxu0  ;;  %v8955_v16 = vpop.f32.mrb[231].mxu1 }
 0x2c6   : > { %v12249_v55 = vadd.f32 %v8889_v5, %v12079_v42  ;;  %v12252_v60 = vadd.f32 %v8953_v24, %v12082_v9  ;;  %v8892_v32 = vadd.f32 %v8891_v30, %v8890_v11  ;;  %v8956_v61 = vadd.f32 %v8955_v16, %v8954_v20  ;;  %v10432_v42 = vld [vmem:[%s13039_s1 + $0x690] sm:$0xff]   ;;  %v10460_v24 = vld [vmem:[%s13039_s1 + $0x6a0] sm:$0xff]  }
 0x2c7   : > { %6404 = vmatmul.mubr.bf16.gmra.mrb[80].mxu0 %v10394_v36  ;;  %6501 = vmatmul.mubr.bf16.vlgmr.msra.gmra.mrb[80].mxu1 %v10397_v56  ;;  %v10447_v36 = vld [vmem:[%s13039_s1 + $0x698] sm:$0xff]  }
 0x2c8   : > { %v12255_v54 = vadd.f32 %v8892_v32, %v12085_v33  ;;  %v12258_v1 = vadd.f32 %v8956_v61, %v12088_v50  ;;  %9602 = vmatpush3.bf16.msra.mxu1 %v12001_v18  ;;  %6411 = vmatprep.mubr.bf16.mxu0 %v10405_v63  ;;  %v10403_v33 = vld [vmem:[%s10646_s15 + $0x7e8] ss:$108 sps:$4 sm:$0xff]   ;;  %v10414_v18 = vld [vmem:[%s10646_s15 + $0x20c] ss:$108 sps:$4 sm:$0xff]   ;;  %v10423_v32 = vld [vmem:[%s10646_s15 + $0x2e4] ss:$108 sps:$4 sm:$0xff]  }
 0x2c9   : > { %6508 = vmatprep.mubr.bf16.mxu1 %v10408_v25  ;;  %9603 = vmatprep.subr.bf16.mxu1 %v10417_v37  ;;  %v10409_v63 = vld [vmem:[%s10646_s15 + $0x8c0] ss:$108 sps:$4 sm:$0xff]  }
 0x2ca   : > { %v8893_v9 = vpop.f32.mrb[232].mxu0  ;;  %v8957_v47 = vpop.f32.mrb[232].mxu1 }
 0x2cb   : > { %v8894_v4 = vpop.f32.mrb[233].mxu0  ;;  %v8958_v57 = vpop.f32.mrb[233].mxu1 }
 0x2cc   : > { %v8895_v6 = vadd.f32 %v8894_v4, %v8893_v9  ;;  %v8959_v50 = vadd.f32 %v8958_v57, %v8957_v47  ;;  %v8896_v12 = vpop.f32.mrb[234].mxu0  ;;  %v8960_v43 = vpop.f32.mrb[234].mxu1  ;;  %9604 = vmatpush3.bf16.msra.mxu1 %v10417_v37  ;;  %v10420_v37 = vld [vmem:[%s10646_s15 + $0x99c] ss:$108 sps:$4 sm:$0xff]  }
 0x2cd   : > { %v8897_v40 = vpop.f32.mrb[235].mxu0  ;;  %v8961_v45 = vpop.f32.mrb[235].mxu1  ;;  %9605 = vmatprep.subr.bf16.mxu1 %v10432_v42 }
 0x2ce   : > { %v12269_v29 = vadd.f32 %v8895_v6, %v12104_v26  ;;  %v12272_v14 = vadd.f32 %v8959_v50, %v12107_v22  ;;  %v8898_v51 = vadd.f32 %v8897_v40, %v8896_v12  ;;  %v8962_v41 = vadd.f32 %v8961_v45, %v8960_v43  ;;  %v10486_v50 = vld [vmem:[%s13039_s1 + $0x6b0] sm:$0xff]  }
 0x2cf   : > { %6412 = vmatmul.mubr.bf16.gmra.mrb[84].mxu0 %v10403_v33  ;;  %6509 = vmatmul.mubr.bf16.gmra.mrb[84].mxu1 %v10406_v2  ;;  %v10473_v33 = vld [vmem:[%s13039_s1 + $0x6a8] sm:$0xff]  }
 0x2d0   : > { %v12278_v56 = vadd.f32 %v8898_v51, %v12113_v31  ;;  %v12281_v5 = vadd.f32 %v8962_v41, %v12116_v17  ;;  %6419 = vmatprep.mubr.bf16.mxu0 %v10411_v23  ;;  %6516 = vmatprep.mubr.bf16.mxu1 %v10414_v18  ;;  %v10412_v31 = vld [vmem:[%s10646_s15 + $0x208] ss:$108 sps:$4 sm:$0xff]   ;;  %v10418_v23 = vld [vmem:[%s10646_s15 + $0x998] ss:$108 sps:$4 sm:$0xff]  }
 0x2d1   : > { %9606 = vmatpush3.bf16.msra.mxu1 %v10432_v42  ;;  %v10426_v51 = vld [vmem:[%s10646_s15 + $0xa74] ss:$108 sps:$4 sm:$0xff]   ;;  %v10429_v41 = vld [vmem:[%s10646_s15 + $0x3bc] ss:$108 sps:$4 sm:$0xff]  }
 0x2d2   : > { %v8899_v26 = vpop.f32.mrb[236].mxu0  ;;  %v8963_v22 = vpop.f32.mrb[236].mxu1  ;;  %9607 = vmatprep.subr.bf16.mxu1 %v10447_v36 }
 0x2d3   : > { %v8900_v11 = vpop.f32.mrb[237].mxu0  ;;  %v8964_v20 = vpop.f32.mrb[237].mxu1 }
 0x2d4   : > { %v8901_v30 = vadd.f32 %v8900_v11, %v8899_v26  ;;  %v8965_v16 = vadd.f32 %v8964_v20, %v8963_v22  ;;  %v8902_v17 = vpop.f32.mrb[238].mxu0  ;;  %v8966_v25 = vpop.f32.mrb[238].mxu1 }
 0x2d5   : > { %v8903_v61 = vpop.f32.mrb[239].mxu0  ;;  %v8967_v9 = vpop.f32.mrb[239].mxu1  ;;  %9608 = vmatpush3.bf16.msra.mxu1 %v10447_v36 }
 0x2d6   : > { %v12291_v42 = vadd.f32 %v8901_v30, %v12132_v53  ;;  %v12294_v47 = vadd.f32 %v8965_v16, %v12135_v15  ;;  %v8904_v4 = vadd.f32 %v8903_v61, %v8902_v17  ;;  %v8968_v57 = vadd.f32 %v8967_v9, %v8966_v25  ;;  %9609 = vmatprep.subr.bf16.mxu1 %v10460_v24  ;;  %v10424_v25 = vld [vmem:[%s10646_s15 + $0xa70] ss:$108 sps:$4 sm:$0xff]  }
 0x2d7   : > { %6420 = vmatmul.mubr.bf16.gmra.mrb[88].mxu0 %v10409_v63  ;;  %6517 = vmatmul.mubr.bf16.gmra.mrb[88].mxu1 %v10412_v31  ;;  %v10499_v63 = vld [vmem:[%s13039_s1 + $0x6b8] sm:$0xff]  }
 0x2d8   : > { %v12300_v2 = vadd.f32 %v8904_v4, %v12141_v3  ;;  %v12303_v53 = vadd.f32 %v8968_v57, %v12144_v19  ;;  %6427 = vmatprep.mubr.bf16.mxu0 %v10420_v37  ;;  %6524 = vmatprep.mubr.bf16.mxu1 %v10423_v32  ;;  %v10421_v3 = vld [vmem:[%s10646_s15 + $0x2e0] ss:$108 sps:$4 sm:$0xff]   ;;  %v10427_v37 = vld [vmem:[%s10646_s15 + $0x3b8] ss:$108 sps:$4 sm:$0xff]  }
 0x2d9   : > { %9610 = vmatpush3.bf16.msra.mxu1 %v10460_v24  ;;  %v10435_v4 = vld [vmem:[%s10646_s15 + $0xb4c] ss:$108 sps:$4 sm:$0xff]   ;;  %v10438_v57 = vld [vmem:[%s10646_s15 + $0x494] ss:$108 sps:$4 sm:$0xff]  }
 0x2da   : > { %v8969_v15 = vpop.f32.mrb[240].mxu1  ;;  %v9033_v6 = vpop.f32.mrb[240].mxu0  ;;  %9611 = vmatprep.subr.bf16.mxu1 %v10473_v33 }
 0x2db   : > { %v8970_v12 = vpop.f32.mrb[241].mxu1  ;;  %v9034_v43 = vpop.f32.mrb[241].mxu0 }
 0x2dc   : > { %v8971_v18 = vadd.f32 %v8970_v12, %v8969_v15  ;;  %v9035_v40 = vadd.f32 %v9034_v43, %v9033_v6  ;;  %v8972_v19 = vpop.f32.mrb[242].mxu1  ;;  %v9036_v45 = vpop.f32.mrb[242].mxu0 }
 0x2dd   : > { %v8973_v36 = vpop.f32.mrb[243].mxu1  ;;  %v9037_v26 = vpop.f32.mrb[243].mxu0  ;;  %9612 = vmatpush3.bf16.msra.mxu1 %v10473_v33 }
 0x2de   : > { %v12313_v22 = vadd.f32 %v8971_v18, %v12160_v49  ;;  %v12316_v24 = vadd.f32 %v9035_v40, %v12163_v10  ;;  %v8974_v11 = vadd.f32 %v8973_v36, %v8972_v19  ;;  %v9038_v20 = vadd.f32 %v9037_v26, %v9036_v45  ;;  %9613 = vmatprep.subr.bf16.mxu1 %v10486_v50  ;;  %v10436_v19 = vld [vmem:[%s10646_s15 + $0x490] ss:$108 sps:$4 sm:$0xff]  }
 0x2df   : > { %6428 = vmatmul.mubr.bf16.gmra.mrb[92].mxu0 %v10418_v23  ;;  %6525 = vmatmul.mubr.bf16.gmra.mrb[92].mxu1 %v10421_v3  ;;  %v10441_v26 = vld [vmem:[%s10646_s15 + $0xc24] ss:$108 sps:$4 sm:$0xff]  }
 0x2e0   : > { %v12322_v31 = vadd.f32 %v8974_v11, %v12169_v52  ;;  %v12325_v49 = vadd.f32 %v9038_v20, %v12172_v13  ;;  %6435 = vmatprep.mubr.bf16.mxu0 %v10426_v51  ;;  %6532 = vmatprep.mubr.bf16.mxu1 %v10429_v41  ;;  %v10444_v11 = vld [vmem:[%s10646_s15 + $0x56c] ss:$108 sps:$4 sm:$0xff]  }
 0x2e1   : > { %9614 = vmatpush3.bf16.msra.mxu1 %v10486_v50 }
 0x2e2   : > { %v8975_v10 = vpop.f32.mrb[244].mxu1  ;;  %v9039_v30 = vpop.f32.mrb[244].mxu0  ;;  %9615 = vmatprep.subr.bf16.mxu1 %v10499_v63 }
 0x2e3   : > { %v8976_v16 = vpop.f32.mrb[245].mxu1  ;;  %v9040_v17 = vpop.f32.mrb[245].mxu0 }
 0x2e4   : > { %v8977_v32 = vadd.f32 %v8976_v16, %v8975_v10  ;;  %v9041_v61 = vadd.f32 %v9040_v17, %v9039_v30  ;;  %v8978_v9 = vpop.f32.mrb[246].mxu1  ;;  %v9042_v52 = vpop.f32.mrb[246].mxu0 }
 0x2e5   : > { %v8979_v33 = vpop.f32.mrb[247].mxu1  ;;  %v9043_v13 = vpop.f32.mrb[247].mxu0  ;;  %9616 = vmatpush3.bf16.msra.mxu1 %v10499_v63 }
 0x2e6   : > { %v12332_v15 = vadd.f32 %v8977_v32, %v12182_v34  ;;  %v12335_v6 = vadd.f32 %v9041_v61, %v12185_v0  ;;  %v8980_v50 = vadd.f32 %v8979_v33, %v8978_v9  ;;  %v9044_v12 = vadd.f32 %v9043_v13, %v9042_v52  ;;  %v10433_v0 = vld [vmem:[%s10646_s15 + $0xb48] ss:$108 sps:$4 sm:$0xff]   ;;  %v10453_v13 = vld [vmem:[%s10646_s15 + $0x644] ss:$108 sps:$4 sm:$0xff]  }
 0x2e7   : > { %6436 = vmatmul.mubr.bf16.gmra.mrb[96].mxu0 %v10424_v25  ;;  %6533 = vmatmul.mubr.bf16.gmra.mrb[96].mxu1 %v10427_v37  ;;  %v10442_v61 = vld [vmem:[%s10646_s15 + $0x568] ss:$108 sps:$4 sm:$0xff]  }
 0x2e8   : > { %v12338_v43 = vadd.f32 %v8980_v50, %v12188_v38  ;;  %v12341_v23 = vadd.f32 %v9044_v12, %v12191_v59  ;;  %6443 = vmatprep.mubr.bf16.mxu0 %v10435_v4  ;;  %6540 = vmatprep.mubr.bf16.mxu1 %v10438_v57  ;;  %v10450_v33 = vld [vmem:[%s10646_s15 + $0xcfc] ss:$108 sps:$4 sm:$0xff]  }
 0x2ea   : > { %v8981_v3 = vpop.f32.mrb[248].mxu1  ;;  %v9045_v34 = vpop.f32.mrb[248].mxu0 }
 0x2eb   : > { %v8982_v18 = vpop.f32.mrb[249].mxu1  ;;  %v9046_v40 = vpop.f32.mrb[249].mxu0 }
 0x2ec   : > { %v8983_v45 = vadd.f32 %v8982_v18, %v8981_v3  ;;  %v9047_v51 = vadd.f32 %v9046_v40, %v9045_v34  ;;  %v8984_v41 = vpop.f32.mrb[250].mxu1  ;;  %v9048_v36 = vpop.f32.mrb[250].mxu0 }
 0x2ed   : > { %v8985_v20 = vpop.f32.mrb[251].mxu1  ;;  %v9049_v38 = vpop.f32.mrb[251].mxu0 }
 0x2ee   : > { %v12348_v59 = vadd.f32 %v8983_v45, %v12198_v8  ;;  %v12351_v63 = vadd.f32 %v9047_v51, %v12201_v48  ;;  %v8986_v10 = vadd.f32 %v8985_v20, %v8984_v41  ;;  %v9050_v30 = vadd.f32 %v9049_v38, %v9048_v36  ;;  %v10439_v48 = vld [vmem:[%s10646_s15 + $0xc20] ss:$108 sps:$4 sm:$0xff]   ;;  %v10456_v20 = vld [vmem:[%s10646_s15 + $0x71c] ss:$108 sps:$4 sm:$0xff]   ;;  %v10459_v38 = vld [vmem:[%s10646_s15 + $0x64] ss:$108 sps:$4 sm:$0xff]  }
 0x2ef   : > { %6444 = vmatmul.mubr.bf16.gmra.mrb[100].mxu0 %v10433_v0  ;;  %6541 = vmatmul.mubr.bf16.gmra.mrb[100].mxu1 %v10436_v19  ;;  %v10451_v51 = vld [vmem:[%s10646_s15 + $0x640] ss:$108 sps:$4 sm:$0xff]  }
 0x2f0   : > { %v12354_v16 = vadd.f32 %v8986_v10, %v12204_v35  ;;  %v12357_v17 = vadd.f32 %v9050_v30, %v12207_v27  ;;  %6451 = vmatprep.mubr.bf16.mxu0 %v10441_v26  ;;  %6548 = vmatprep.mubr.bf16.mxu1 %v10444_v11 }
 0x2f2   : > { %v8987_v25 = vpop.f32.mrb[252].mxu1  ;;  %v9051_v8 = vpop.f32.mrb[252].mxu0 }
 0x2f3   : > { %v8988_v37 = vpop.f32.mrb[253].mxu1  ;;  %v9052_v32 = vpop.f32.mrb[253].mxu0 }
 0x2f4   : > { %v8989_v9 = vadd.f32 %v8988_v37, %v8987_v25  ;;  %v9053_v52 = vadd.f32 %v9052_v32, %v9051_v8  ;;  %v8990_v4 = vpop.f32.mrb[254].mxu1  ;;  %v9054_v57 = vpop.f32.mrb[254].mxu0 }
 0x2f5   : > { %v8991_v50 = vpop.f32.mrb[255].mxu1  ;;  %v9055_v35 = vpop.f32.mrb[255].mxu0 }
 0x2f6   : > { %v12364_v27 = vadd.f32 %v8989_v9, %v12214_v62  ;;  %v12367_v12 = vadd.f32 %v9053_v52, %v12217_v39  ;;  %v8992_v3 = vadd.f32 %v8991_v50, %v8990_v4  ;;  %v9056_v34 = vadd.f32 %v9055_v35, %v9054_v57  ;;  %v10448_v39 = vld [vmem:[%s10646_s15 + $0xcf8] ss:$108 sps:$4 sm:$0xff]   ;;  %v10457_v52 = vld [vmem:[%s10646_s15 + $0x60] ss:$108 sps:$4 sm:$0xff]   ;;  %v10466_v35 = vld [vmem:[%s10646_s15 + $0x13c] ss:$108 sps:$4 sm:$0xff]  }
 0x2f7   : > { %6452 = vmatmul.mubr.bf16.gmra.mrb[104].mxu0 %v10439_v48  ;;  %6549 = vmatmul.mubr.bf16.gmra.mrb[104].mxu1 %v10442_v61  ;;  %v10463_v50 = vld [vmem:[%s10646_s15 + $0x7f4] ss:$108 sps:$4 sm:$0xff]  }
 0x2f8   : > { %v12370_v18 = vadd.f32 %v8992_v3, %v12220_v58  ;;  %v12373_v40 = vadd.f32 %v9056_v34, %v12223_v7  ;;  %6459 = vmatprep.mubr.bf16.mxu0 %v10450_v33  ;;  %6556 = vmatprep.mubr.bf16.mxu1 %v10453_v13 }
 0x2fa   : > { %v8993_v0 = vpop.f32.mrb[0].mxu1  ;;  %v9057_v62 = vpop.f32.mrb[0].mxu0 }
 0x2fb   : > { %v8994_v19 = vpop.f32.mrb[1].mxu1  ;;  %v9058_v45 = vpop.f32.mrb[1].mxu0 }
 0x2fc   : > { %v8995_v41 = vadd.f32 %v8994_v19, %v8993_v0  ;;  %v9059_v36 = vadd.f32 %v9058_v45, %v9057_v62  ;;  %v8996_v26 = vpop.f32.mrb[2].mxu1  ;;  %v9060_v11 = vpop.f32.mrb[2].mxu0 }
 0x2fd   : > { %v8997_v10 = vpop.f32.mrb[3].mxu1  ;;  %v9061_v58 = vpop.f32.mrb[3].mxu0 }
 0x2fe   : > { %v12380_v7 = vadd.f32 %v8995_v41, %v12230_v28  ;;  %v12383_v30 = vadd.f32 %v9059_v36, %v12233_v44  ;;  %v8998_v25 = vadd.f32 %v8997_v10, %v8996_v26  ;;  %v9062_v8 = vadd.f32 %v9061_v58, %v9060_v11  ;;  %v10454_v44 = vld [vmem:[%s10646_s15 + $0x718] ss:$108 sps:$4 sm:$0xff]   ;;  %v10472_v58 = vld [vmem:[%s10646_s15 + $0x214] ss:$108 sps:$4 sm:$0xff]  }
 0x2ff   : > { %6460 = vmatmul.mubr.bf16.gmra.mrb[108].mxu0 %v10448_v39  ;;  %6557 = vmatmul.mubr.bf16.gmra.mrb[108].mxu1 %v10451_v51  ;;  %v10464_v36 = vld [vmem:[%s10646_s15 + $0x138] ss:$108 sps:$4 sm:$0xff]  }
 0x300   : > { %v12386_v37 = vadd.f32 %v8998_v25, %v12236_v46  ;;  %v12389_v32 = vadd.f32 %v9062_v8, %v12239_v21  ;;  %6564 = vmatprep.mubr.bf16.mxu1 %v10456_v20  ;;  %6661 = vmatprep.mubr.bf16.mxu0 %v10459_v38  ;;  %v10469_v10 = vld [vmem:[%s10646_s15 + $0x8cc] ss:$108 sps:$4 sm:$0xff]  }
 0x302   : > { %v8999_v48 = vpop.f32.mrb[4].mxu1  ;;  %v9063_v28 = vpop.f32.mrb[4].mxu0 }
 0x303   : > { %v9000_v61 = vpop.f32.mrb[5].mxu1  ;;  %v9064_v9 = vpop.f32.mrb[5].mxu0 }
 0x304   : > { %v9001_v4 = vadd.f32 %v9000_v61, %v8999_v48  ;;  %v9065_v57 = vadd.f32 %v9064_v9, %v9063_v28  ;;  %v9002_v33 = vpop.f32.mrb[6].mxu1  ;;  %v9066_v13 = vpop.f32.mrb[6].mxu0 }
 0x305   : > { %v9003_v3 = vpop.f32.mrb[7].mxu1  ;;  %v9067_v46 = vpop.f32.mrb[7].mxu0 }
 0x306   : > { %v12396_v21 = vadd.f32 %v9001_v4, %v12249_v55  ;;  %v12399_v34 = vadd.f32 %v9065_v57, %v12252_v60  ;;  %v9004_v0 = vadd.f32 %v9003_v3, %v9002_v33  ;;  %v9068_v62 = vadd.f32 %v9067_v46, %v9066_v13  ;;  %v10461_v60 = vld [vmem:[%s10646_s15 + $0x7f0] ss:$108 sps:$4 sm:$0xff]   ;;  %v10479_v46 = vld [vmem:[%s10646_s15 + $0x2ec] ss:$108 sps:$4 sm:$0xff]  }
 0x307   : > { %6565 = vmatmul.mubr.bf16.gmra.mrb[112].mxu1 %v10454_v44  ;;  %6662 = vmatmul.mubr.bf16.vlgmr.msra.gmra.mrb[112].mxu0 %v10457_v52  ;;  %v10470_v57 = vld [vmem:[%s10646_s15 + $0x210] ss:$108 sps:$4 sm:$0xff]  }
 0x308   : > { %v12402_v19 = vadd.f32 %v9004_v0, %v12255_v54  ;;  %v12405_v45 = vadd.f32 %v9068_v62, %v12258_v1  ;;  %6572 = vmatprep.mubr.bf16.mxu1 %v10463_v50  ;;  %6669 = vmatprep.mubr.bf16.mxu0 %v10466_v35  ;;  %v10476_v3 = vld [vmem:[%s10646_s15 + $0x9a4] ss:$108 sps:$4 sm:$0xff]  }
 0x30a   : > { %v9005_v39 = vpop.f32.mrb[8].mxu1  ;;  %v9069_v55 = vpop.f32.mrb[8].mxu0 }
 0x30b   : > { %v9006_v51 = vpop.f32.mrb[9].mxu1  ;;  %v9070_v41 = vpop.f32.mrb[9].mxu0 }
 0x30c   : > { %v9007_v26 = vadd.f32 %v9006_v51, %v9005_v39  ;;  %v9071_v11 = vadd.f32 %v9070_v41, %v9069_v55  ;;  %v9008_v20 = vpop.f32.mrb[10].mxu1  ;;  %v9072_v38 = vpop.f32.mrb[10].mxu0 }
 0x30d   : > { %v9009_v25 = vpop.f32.mrb[11].mxu1  ;;  %v9073_v54 = vpop.f32.mrb[11].mxu0 }
 0x30e   : > { %v12412_v1 = vadd.f32 %v9007_v26, %v12269_v29  ;;  %v12415_v8 = vadd.f32 %v9071_v11, %v12272_v14  ;;  %v9010_v48 = vadd.f32 %v9009_v25, %v9008_v20  ;;  %v9074_v28 = vadd.f32 %v9073_v54, %v9072_v38  ;;  %v10467_v14 = vld [vmem:[%s10646_s15 + $0x8c8] ss:$108 sps:$4 sm:$0xff]   ;;  %v10485_v54 = vld [vmem:[%s10646_s15 + $0x3c4] ss:$108 sps:$4 sm:$0xff]  }
 0x30f   : > { %6573 = vmatmul.mubr.bf16.gmra.mrb[116].mxu1 %v10461_v60  ;;  %6670 = vmatmul.mubr.bf16.gmra.mrb[116].mxu0 %v10464_v36  ;;  %v10477_v11 = vld [vmem:[%s10646_s15 + $0x2e8] ss:$108 sps:$4 sm:$0xff]  }
 0x310   : > { %v12418_v61 = vadd.f32 %v9010_v48, %v12278_v56  ;;  %v12421_v9 = vadd.f32 %v9074_v28, %v12281_v5  ;;  %6580 = vmatprep.mubr.bf16.mxu1 %v10469_v10  ;;  %6677 = vmatprep.mubr.bf16.mxu0 %v10472_v58  ;;  %v10482_v25 = vld [vmem:[%s10646_s15 + $0xa7c] ss:$108 sps:$4 sm:$0xff]  }
 0x312   : > { %v9011_v44 = vpop.f32.mrb[12].mxu1  ;;  %v9075_v29 = vpop.f32.mrb[12].mxu0 }
 0x313   : > { %v9012_v52 = vpop.f32.mrb[13].mxu1  ;;  %v9076_v4 = vpop.f32.mrb[13].mxu0 }
 0x314   : > { %v9013_v33 = vadd.f32 %v9012_v52, %v9011_v44  ;;  %v9077_v13 = vadd.f32 %v9076_v4, %v9075_v29  ;;  %v9014_v50 = vpop.f32.mrb[14].mxu1  ;;  %v9078_v35 = vpop.f32.mrb[14].mxu0 }
 0x315   : > { %v9015_v0 = vpop.f32.mrb[15].mxu1  ;;  %v9079_v56 = vpop.f32.mrb[15].mxu0 }
 0x316   : > { %v12428_v5 = vadd.f32 %v9013_v33, %v12291_v42  ;;  %v12431_v62 = vadd.f32 %v9077_v13, %v12294_v47  ;;  %v9016_v39 = vadd.f32 %v9015_v0, %v9014_v50  ;;  %v9080_v55 = vadd.f32 %v9079_v56, %v9078_v35  ;;  %v10474_v47 = vld [vmem:[%s10646_s15 + $0x9a0] ss:$108 sps:$4 sm:$0xff]   ;;  %v10492_v56 = vld [vmem:[%s10646_s15 + $0x49c] ss:$108 sps:$4 sm:$0xff]  }
 0x317   : > { %6581 = vmatmul.mubr.bf16.gmra.mrb[120].mxu1 %v10467_v14  ;;  %6678 = vmatmul.mubr.bf16.gmra.mrb[120].mxu0 %v10470_v57  ;;  %v10483_v13 = vld [vmem:[%s10646_s15 + $0x3c0] ss:$108 sps:$4 sm:$0xff]  }
 0x318   : > { %v12434_v51 = vadd.f32 %v9016_v39, %v12300_v2  ;;  %v12437_v41 = vadd.f32 %v9080_v55, %v12303_v53  ;;  %6588 = vmatprep.mubr.bf16.mxu1 %v10476_v3  ;;  %6685 = vmatprep.mubr.bf16.mxu0 %v10479_v46  ;;  %v10489_v0 = vld [vmem:[%s10646_s15 + $0xb54] ss:$108 sps:$4 sm:$0xff]  }
 0x31a   : > { %v9081_v60 = vpop.f32.mrb[16].mxu0  ;;  %v9145_v42 = vpop.f32.mrb[16].mxu1 }
 0x31b   : > { %v9082_v36 = vpop.f32.mrb[17].mxu0  ;;  %v9146_v26 = vpop.f32.mrb[17].mxu1 }
 0x31c   : > { %v9083_v20 = vadd.f32 %v9082_v36, %v9081_v60  ;;  %v9147_v38 = vadd.f32 %v9146_v26, %v9145_v42  ;;  %v9084_v10 = vpop.f32.mrb[18].mxu0  ;;  %v9148_v58 = vpop.f32.mrb[18].mxu1 }
 0x31d   : > { %v9085_v48 = vpop.f32.mrb[19].mxu0  ;;  %v9149_v2 = vpop.f32.mrb[19].mxu1 }
 0x31e   : > { %v12444_v53 = vadd.f32 %v9083_v20, %v12313_v22  ;;  %v12447_v28 = vadd.f32 %v9147_v38, %v12316_v24  ;;  %v9086_v44 = vadd.f32 %v9085_v48, %v9084_v10  ;;  %v9150_v29 = vadd.f32 %v9149_v2, %v9148_v58  ;;  %v10480_v24 = vld [vmem:[%s10646_s15 + $0xa78] ss:$108 sps:$4 sm:$0xff]   ;;  %v10498_v2 = vld [vmem:[%s10646_s15 + $0x574] ss:$108 sps:$4 sm:$0xff]  }
 0x31f   : > { %6589 = vmatmul.mubr.bf16.gmra.mrb[124].mxu1 %v10474_v47  ;;  %6686 = vmatmul.mubr.bf16.gmra.mrb[124].mxu0 %v10477_v11  ;;  %v10490_v38 = vld [vmem:[%s10646_s15 + $0x498] ss:$108 sps:$4 sm:$0xff]  }
 0x320   : > { %v12450_v52 = vadd.f32 %v9086_v44, %v12322_v31  ;;  %v12453_v4 = vadd.f32 %v9150_v29, %v12325_v49  ;;  %6596 = vmatprep.mubr.bf16.mxu1 %v10482_v25  ;;  %6693 = vmatprep.mubr.bf16.mxu0 %v10485_v54  ;;  %v10495_v48 = vld [vmem:[%s10646_s15 + $0xc2c] ss:$108 sps:$4 sm:$0xff]  }
 0x322   : > { %v9087_v14 = vpop.f32.mrb[20].mxu0  ;;  %v9151_v22 = vpop.f32.mrb[20].mxu1 }
 0x323   : > { %v9088_v57 = vpop.f32.mrb[21].mxu0  ;;  %v9152_v33 = vpop.f32.mrb[21].mxu1 }
 0x324   : > { %v9089_v50 = vadd.f32 %v9088_v57, %v9087_v14  ;;  %v9153_v35 = vadd.f32 %v9152_v33, %v9151_v22  ;;  %v9090_v3 = vpop.f32.mrb[22].mxu0  ;;  %v9154_v46 = vpop.f32.mrb[22].mxu1 }
 0x325   : > { %v9091_v39 = vpop.f32.mrb[23].mxu0  ;;  %v9155_v31 = vpop.f32.mrb[23].mxu1 }
 0x326   : > { %v12460_v49 = vadd.f32 %v9089_v50, %v12332_v15  ;;  %v12463_v55 = vadd.f32 %v9153_v35, %v12335_v6  ;;  %v9092_v60 = vadd.f32 %v9091_v39, %v9090_v3  ;;  %v9156_v42 = vadd.f32 %v9155_v31, %v9154_v46  ;;  %v10487_v6 = vld [vmem:[%s10646_s15 + $0xb50] ss:$108 sps:$4 sm:$0xff]   ;;  %v10505_v31 = vld [vmem:[%s10646_s15 + $0x64c] ss:$108 sps:$4 sm:$0xff]  }
 0x327   : > { %6597 = vmatmul.mubr.bf16.gmra.mrb[128].mxu1 %v10480_v24  ;;  %6694 = vmatmul.mubr.bf16.gmra.mrb[128].mxu0 %v10483_v13  ;;  %v10496_v35 = vld [vmem:[%s10646_s15 + $0x570] ss:$108 sps:$4 sm:$0xff]  }
 0x328   : > { %v12466_v36 = vadd.f32 %v9092_v60, %v12338_v43  ;;  %v12469_v26 = vadd.f32 %v9156_v42, %v12341_v23  ;;  %6604 = vmatprep.mubr.bf16.mxu1 %v10489_v0  ;;  %6701 = vmatprep.mubr.bf16.mxu0 %v10492_v56  ;;  %v10502_v39 = vld [vmem:[%s10646_s15 + $0xd04] ss:$108 sps:$4 sm:$0xff]  }
 0x32a   : > { %v9093_v47 = vpop.f32.mrb[24].mxu0  ;;  %v9157_v15 = vpop.f32.mrb[24].mxu1 }
 0x32b   : > { %v9094_v11 = vpop.f32.mrb[25].mxu0  ;;  %v9158_v20 = vpop.f32.mrb[25].mxu1 }
 0x32c   : > { %v9095_v10 = vadd.f32 %v9094_v11, %v9093_v47  ;;  %v9159_v58 = vadd.f32 %v9158_v20, %v9157_v15  ;;  %v9096_v25 = vpop.f32.mrb[26].mxu0  ;;  %v9160_v54 = vpop.f32.mrb[26].mxu1 }
 0x32d   : > { %v9097_v44 = vpop.f32.mrb[27].mxu0  ;;  %v9161_v43 = vpop.f32.mrb[27].mxu1 }
 0x32e   : > { %v12476_v23 = vadd.f32 %v9095_v10, %v12348_v59  ;;  %v12479_v29 = vadd.f32 %v9159_v58, %v12351_v63  ;;  %v9098_v14 = vadd.f32 %v9097_v44, %v9096_v25  ;;  %v9162_v22 = vadd.f32 %v9161_v43, %v9160_v54  ;;  %v10493_v63 = vld [vmem:[%s10646_s15 + $0xc28] ss:$108 sps:$4 sm:$0xff]   ;;  %v10508_v44 = vld [vmem:[%s10646_s15 + $0x724] ss:$108 sps:$4 sm:$0xff]  }
 0x32f   : > { %6605 = vmatmul.mubr.bf16.gmra.mrb[132].mxu1 %v10487_v6  ;;  %6702 = vmatmul.mubr.bf16.gmra.mrb[132].mxu0 %v10490_v38  ;;  %v10503_v58 = vld [vmem:[%s10646_s15 + $0x648] ss:$108 sps:$4 sm:$0xff]  }
 0x330   : > { %v12482_v57 = vadd.f32 %v9098_v14, %v12354_v16  ;;  %v12485_v33 = vadd.f32 %v9162_v22, %v12357_v17  ;;  %6612 = vmatprep.mubr.bf16.mxu1 %v10495_v48  ;;  %6709 = vmatprep.mubr.bf16.mxu0 %v10498_v2  ;;  %v10509_v43 = vld [vmem:[%s10646_s15 + $0x68] ss:$108 sps:$4 sm:$0xff]  }
 0x332   : > { %v9099_v24 = vpop.f32.mrb[28].mxu0  ;;  %v9163_v59 = vpop.f32.mrb[28].mxu1 }
 0x333   : > { %v9100_v13 = vpop.f32.mrb[29].mxu0  ;;  %v9164_v50 = vpop.f32.mrb[29].mxu1 }
 0x334   : > { %v9101_v3 = vadd.f32 %v9100_v13, %v9099_v24  ;;  %v9165_v46 = vadd.f32 %v9164_v50, %v9163_v59  ;;  %v9102_v0 = vpop.f32.mrb[30].mxu0  ;;  %v9166_v56 = vpop.f32.mrb[30].mxu1 }
 0x335   : > { %v9103_v60 = vpop.f32.mrb[31].mxu0  ;;  %v9167_v16 = vpop.f32.mrb[31].mxu1 }
 0x336   : > { %v12492_v17 = vadd.f32 %v9101_v3, %v12364_v27  ;;  %v12495_v42 = vadd.f32 %v9165_v46, %v12367_v12  ;;  %v9104_v47 = vadd.f32 %v9103_v60, %v9102_v0  ;;  %v9168_v15 = vadd.f32 %v9167_v16, %v9166_v56  ;;  %v10500_v12 = vld [vmem:[%s10646_s15 + $0xd00] ss:$108 sps:$4 sm:$0xff]   ;;  %v10513_v60 = vld [vmem:[%s10646_s15 + $0x7fc] ss:$108 sps:$4 sm:$0xff]   ;;  %v10514_v16 = vld [vmem:[%s10646_s15 + $0x218] ss:$108 sps:$4 sm:$0xff]  }
 0x337   : > { %6613 = vmatmul.mubr.bf16.gmra.mrb[136].mxu1 %v10493_v63  ;;  %6710 = vmatmul.mubr.bf16.gmra.mrb[136].mxu0 %v10496_v35  ;;  %v10510_v46 = vld [vmem:[%s10646_s15 + $0x140] ss:$108 sps:$4 sm:$0xff]  }
 0x338   : > { %v12498_v11 = vadd.f32 %v9104_v47, %v12370_v18  ;;  %v12501_v20 = vadd.f32 %v9168_v15, %v12373_v40  ;;  %6620 = vmatprep.mubr.bf16.mxu1 %v10502_v39  ;;  %6717 = vmatprep.mubr.bf16.mxu0 %v10505_v31 }
 0x33a   : > { %v9105_v6 = vpop.f32.mrb[32].mxu0  ;;  %v9169_v27 = vpop.f32.mrb[32].mxu1 }
 0x33b   : > { %v9106_v38 = vpop.f32.mrb[33].mxu0  ;;  %v9170_v10 = vpop.f32.mrb[33].mxu1 }
 0x33c   : > { %v9107_v25 = vadd.f32 %v9106_v38, %v9105_v6  ;;  %v9171_v54 = vadd.f32 %v9170_v10, %v9169_v27  ;;  %v9108_v48 = vpop.f32.mrb[34].mxu0  ;;  %v9172_v2 = vpop.f32.mrb[34].mxu1 }
 0x33d   : > { %v9109_v14 = vpop.f32.mrb[35].mxu0  ;;  %v9173_v18 = vpop.f32.mrb[35].mxu1 }
 0x33e   : > { %v12508_v40 = vadd.f32 %v9107_v25, %v12380_v7  ;;  %v12511_v22 = vadd.f32 %v9171_v54, %v12383_v30  ;;  %v9110_v24 = vadd.f32 %v9109_v14, %v9108_v48  ;;  %v9174_v59 = vadd.f32 %v9173_v18, %v9172_v2  ;;  %v10506_v30 = vld [vmem:[%s10646_s15 + $0x720] ss:$108 sps:$4 sm:$0xff]   ;;  %v10515_v54 = vld [vmem:[%s10646_s15 + $0x2f0] ss:$108 sps:$4 sm:$0xff]   ;;  %v10519_v18 = vld [vmem:[%s10646_s15 + $0x3c8] ss:$108 sps:$4 sm:$0xff]  }
 0x33f   : > { %6621 = vmatmul.mubr.bf16.gmra.mrb[140].mxu1 %v10500_v12  ;;  %6718 = vmatmul.mubr.bf16.gmra.mrb[140].mxu0 %v10503_v58  ;;  %v10518_v14 = vld [vmem:[%s10646_s15 + $0x8d4] ss:$108 sps:$4 sm:$0xff]  }
 0x340   : > { %v12514_v13 = vadd.f32 %v9110_v24, %v12386_v37  ;;  %v12517_v50 = vadd.f32 %v9174_v59, %v12389_v32  ;;  %6725 = vmatprep.mubr.bf16.mxu0 %v10508_v44  ;;  %9617 = vmatprep.mubr.bf16.mxu1 %v10509_v43 }
 0x342   : > { %v9111_v63 = vpop.f32.mrb[36].mxu0  ;;  %v9175_v7 = vpop.f32.mrb[36].mxu1 }
 0x343   : > { %v9112_v35 = vpop.f32.mrb[37].mxu0  ;;  %v9176_v3 = vpop.f32.mrb[37].mxu1 }
 0x344   : > { %v9113_v0 = vadd.f32 %v9112_v35, %v9111_v63  ;;  %v9177_v56 = vadd.f32 %v9176_v3, %v9175_v7  ;;  %v9114_v39 = vpop.f32.mrb[38].mxu0  ;;  %v9178_v31 = vpop.f32.mrb[38].mxu1 }
 0x345   : > { %v9115_v47 = vpop.f32.mrb[39].mxu0  ;;  %v9179_v37 = vpop.f32.mrb[39].mxu1 }
 0x346   : > { %v12524_v32 = vadd.f32 %v9113_v0, %v12396_v21  ;;  %v12527_v15 = vadd.f32 %v9177_v56, %v12399_v34  ;;  %v9116_v6 = vadd.f32 %v9115_v47, %v9114_v39  ;;  %v9180_v27 = vadd.f32 %v9179_v37, %v9178_v31  ;;  %v10511_v34 = vld [vmem:[%s10646_s15 + $0x7f8] ss:$108 sps:$4 sm:$0xff]   ;;  %v10520_v56 = vld [vmem:[%s10646_s15 + $0x4a0] ss:$108 sps:$4 sm:$0xff]  }
 0x347   : > { %6726 = vmatmul.mubr.bf16.gmra.mrb[144].mxu0 %v10506_v30  ;;  %9618 = vmatmul.mubr.bf16.vlgmr.msra.gmra.mrb[144].mxu1 %v10510_v46  ;;  %v10523_v47 = vld [vmem:[%s10646_s15 + $0x9ac] ss:$108 sps:$4 sm:$0xff]  }
 0x348   : > { %v12530_v38 = vadd.f32 %v9116_v6, %v12402_v19  ;;  %v12533_v10 = vadd.f32 %v9180_v27, %v12405_v45  ;;  %6733 = vmatprep.mubr.bf16.mxu0 %v10513_v60  ;;  %9621 = vmatprep.mubr.bf16.mxu1 %v10514_v16  ;;  %v10524_v37 = vld [vmem:[%s10646_s15 + $0x578] ss:$108 sps:$4 sm:$0xff]  }
 0x34a   : > { %v9117_v12 = vpop.f32.mrb[40].mxu0  ;;  %v9181_v21 = vpop.f32.mrb[40].mxu1 }
 0x34b   : > { %v9118_v58 = vpop.f32.mrb[41].mxu0  ;;  %v9182_v25 = vpop.f32.mrb[41].mxu1 }
 0x34c   : > { %v9119_v48 = vadd.f32 %v9118_v58, %v9117_v12  ;;  %v9183_v2 = vadd.f32 %v9182_v25, %v9181_v21  ;;  %v9120_v44 = vpop.f32.mrb[42].mxu0  ;;  %v9184_v43 = vpop.f32.mrb[42].mxu1 }
 0x34d   : > { %v9121_v24 = vpop.f32.mrb[43].mxu0  ;;  %v9185_v19 = vpop.f32.mrb[43].mxu1 }
 0x34e   : > { %v12540_v45 = vadd.f32 %v9119_v48, %v12412_v1  ;;  %v12543_v59 = vadd.f32 %v9183_v2, %v12415_v8  ;;  %v9122_v63 = vadd.f32 %v9121_v24, %v9120_v44  ;;  %v9186_v7 = vadd.f32 %v9185_v19, %v9184_v43  ;;  %v10516_v8 = vld [vmem:[%s10646_s15 + $0x8d0] ss:$108 sps:$4 sm:$0xff]   ;;  %v10529_v19 = vld [vmem:[%s10646_s15 + $0x728] ss:$108 sps:$4 sm:$0xff]  }
 0x34f   : > { %6734 = vmatmul.mubr.bf16.gmra.mrb[148].mxu0 %v10511_v34  ;;  %9622 = vmatmul.mubr.bf16.gmra.mrb[148].mxu1 %v10515_v54  ;;  %v10525_v2 = vld [vmem:[%s10646_s15 + $0x650] ss:$108 sps:$4 sm:$0xff]  }
 0x350   : > { %v12546_v35 = vadd.f32 %v9122_v63, %v12418_v61  ;;  %v12549_v3 = vadd.f32 %v9186_v7, %v12421_v9  ;;  %6741 = vmatprep.mubr.bf16.mxu0 %v10518_v14  ;;  %9625 = vmatprep.mubr.bf16.mxu1 %v10519_v18  ;;  %v10528_v24 = vld [vmem:[%s10646_s15 + $0xa84] ss:$108 sps:$4 sm:$0xff]  }
 0x352   : > { %v9123_v30 = vpop.f32.mrb[44].mxu0  ;;  %v9187_v1 = vpop.f32.mrb[44].mxu1 }
 0x353   : > { %v9124_v46 = vpop.f32.mrb[45].mxu0  ;;  %v9188_v0 = vpop.f32.mrb[45].mxu1 }
 0x354   : > { %v9125_v39 = vadd.f32 %v9124_v46, %v9123_v30  ;;  %v9189_v31 = vadd.f32 %v9188_v0, %v9187_v1  ;;  %v9126_v60 = vpop.f32.mrb[46].mxu0  ;;  %v9190_v16 = vpop.f32.mrb[46].mxu1 }
 0x355   : > { %v9127_v6 = vpop.f32.mrb[47].mxu0  ;;  %v9191_v61 = vpop.f32.mrb[47].mxu1 }
 0x356   : > { %v12556_v9 = vadd.f32 %v9125_v39, %v12428_v5  ;;  %v12559_v27 = vadd.f32 %v9189_v31, %v12431_v62  ;;  %v9128_v12 = vadd.f32 %v9127_v6, %v9126_v60  ;;  %v9192_v21 = vadd.f32 %v9191_v61, %v9190_v16  ;;  %v10521_v62 = vld [vmem:[%s10646_s15 + $0x9a8] ss:$108 sps:$4 sm:$0xff]   ;;  %v10530_v31 = vld [vmem:[%s10646_s15 + $0x800] ss:$108 sps:$4 sm:$0xff]   ;;  %v10534_v61 = vld [vmem:[%s10646_s15 + $0x8d8] ss:$108 sps:$4 sm:$0xff]  }
 0x357   : > { %6742 = vmatmul.mubr.bf16.gmra.mrb[152].mxu0 %v10516_v8  ;;  %9626 = vmatmul.mubr.bf16.gmra.mrb[152].mxu1 %v10520_v56  ;;  %v10533_v6 = vld [vmem:[%s10646_s15 + $0xb5c] ss:$108 sps:$4 sm:$0xff]  }
 0x358   : > { %v12562_v58 = vadd.f32 %v9128_v12, %v12434_v51  ;;  %v12565_v25 = vadd.f32 %v9192_v21, %v12437_v41  ;;  %6749 = vmatprep.mubr.bf16.mxu0 %v10523_v47  ;;  %9629 = vmatprep.mubr.bf16.mxu1 %v10524_v37 }
 0x35a   : > { %v9193_v34 = vpop.f32.mrb[48].mxu1  ;;  %v9257_v5 = vpop.f32.mrb[48].mxu0 }
 0x35b   : > { %v9194_v54 = vpop.f32.mrb[49].mxu1  ;;  %v9258_v48 = vpop.f32.mrb[49].mxu0 }
 0x35c   : > { %v9195_v44 = vadd.f32 %v9194_v54, %v9193_v34  ;;  %v9259_v43 = vadd.f32 %v9258_v48, %v9257_v5  ;;  %v9196_v14 = vpop.f32.mrb[50].mxu1  ;;  %v9260_v18 = vpop.f32.mrb[50].mxu0 }
 0x35d   : > { %v9197_v63 = vpop.f32.mrb[51].mxu1  ;;  %v9261_v51 = vpop.f32.mrb[51].mxu0 }
 0x35e   : > { %v12572_v41 = vadd.f32 %v9195_v44, %v12444_v53  ;;  %v12575_v7 = vadd.f32 %v9259_v43, %v12447_v28  ;;  %v9198_v30 = vadd.f32 %v9197_v63, %v9196_v14  ;;  %v9262_v1 = vadd.f32 %v9261_v51, %v9260_v18  ;;  %v10526_v28 = vld [vmem:[%s10646_s15 + $0xa80] ss:$108 sps:$4 sm:$0xff]   ;;  %v10535_v43 = vld [vmem:[%s10646_s15 + $0x9b0] ss:$108 sps:$4 sm:$0xff]   ;;  %v10539_v51 = vld [vmem:[%s10646_s15 + $0xa88] ss:$108 sps:$4 sm:$0xff]  }
 0x35f   : > { %6750 = vmatmul.mubr.bf16.gmra.mrb[156].mxu0 %v10521_v62  ;;  %9630 = vmatmul.mubr.bf16.gmra.mrb[156].mxu1 %v10525_v2  ;;  %v10538_v63 = vld [vmem:[%s10646_s15 + $0xc34] ss:$108 sps:$4 sm:$0xff]  }
 0x360   : > { %v12578_v46 = vadd.f32 %v9198_v30, %v12450_v52  ;;  %v12581_v0 = vadd.f32 %v9262_v1, %v12453_v4  ;;  %6757 = vmatprep.mubr.bf16.mxu0 %v10528_v24  ;;  %9633 = vmatprep.mubr.bf16.mxu1 %v10529_v19 }
 0x362   : > { %v9199_v8 = vpop.f32.mrb[52].mxu1  ;;  %v9263_v53 = vpop.f32.mrb[52].mxu0 }
 0x363   : > { %v9200_v56 = vpop.f32.mrb[53].mxu1  ;;  %v9264_v39 = vpop.f32.mrb[53].mxu0 }
 0x364   : > { %v9201_v60 = vadd.f32 %v9200_v56, %v9199_v8  ;;  %v9265_v16 = vadd.f32 %v9264_v39, %v9263_v53  ;;  %v9202_v47 = vpop.f32.mrb[54].mxu1  ;;  %v9266_v37 = vpop.f32.mrb[54].mxu0 }
 0x365   : > { %v9203_v12 = vpop.f32.mrb[55].mxu1  ;;  %v9267_v52 = vpop.f32.mrb[55].mxu0 }
 0x366   : > { %v12588_v4 = vadd.f32 %v9201_v60, %v12460_v49  ;;  %v12591_v21 = vadd.f32 %v9265_v16, %v12463_v55  ;;  %v9204_v34 = vadd.f32 %v9203_v12, %v9202_v47  ;;  %v9268_v5 = vadd.f32 %v9267_v52, %v9266_v37  ;;  %v10531_v55 = vld [vmem:[%s10646_s15 + $0xb58] ss:$108 sps:$4 sm:$0xff]   ;;  %v10540_v16 = vld [vmem:[%s10646_s15 + $0xb60] ss:$108 sps:$4 sm:$0xff]  }
 0x367   : > { %6758 = vmatmul.mubr.bf16.gmra.mrb[160].mxu0 %v10526_v28  ;;  %9634 = vmatmul.mubr.bf16.gmra.mrb[160].mxu1 %v10530_v31  ;;  %v10543_v12 = vld [vmem:[%s10646_s15 + $0xd0c] ss:$108 sps:$4 sm:$0xff]  }
 0x368   : > { %v12594_v54 = vadd.f32 %v9204_v34, %v12466_v36  ;;  %v12597_v48 = vadd.f32 %v9268_v5, %v12469_v26  ;;  %6765 = vmatprep.mubr.bf16.mxu0 %v10533_v6  ;;  %9637 = vmatprep.mubr.bf16.mxu1 %v10534_v61  ;;  %v10544_v52 = vld [vmem:[%s10646_s15 + $0xc38] ss:$108 sps:$4 sm:$0xff]  }
 0x36a   : > { %v9205_v62 = vpop.f32.mrb[56].mxu1  ;;  %v9269_v49 = vpop.f32.mrb[56].mxu0 }
 0x36b   : > { %v9206_v2 = vpop.f32.mrb[57].mxu1  ;;  %v9270_v44 = vpop.f32.mrb[57].mxu0 }
 0x36c   : > { %v9207_v14 = vadd.f32 %v9206_v2, %v9205_v62  ;;  %v9271_v18 = vadd.f32 %v9270_v44, %v9269_v49  ;;  %v9208_v24 = vpop.f32.mrb[58].mxu1  ;;  %v9272_v19 = vpop.f32.mrb[58].mxu0 }
 0x36d   : > { %v9209_v30 = vpop.f32.mrb[59].mxu1  ;;  %v9273_v36 = vpop.f32.mrb[59].mxu0 }
 0x36e   : > { %v12604_v26 = vadd.f32 %v9207_v14, %v12476_v23  ;;  %v12607_v1 = vadd.f32 %v9271_v18, %v12479_v29  ;;  %v9210_v8 = vadd.f32 %v9209_v30, %v9208_v24  ;;  %v9274_v53 = vadd.f32 %v9273_v36, %v9272_v19  ;;  %v10536_v29 = vld [vmem:[%s10646_s15 + $0xc30] ss:$108 sps:$4 sm:$0xff]   ;;  %v10541_v18 = vld [vmem:[%s10646_s15 + $0xd08] ss:$108 sps:$4 sm:$0xff]  }
 0x36f   : > { %6766 = vmatmul.mubr.bf16.gmra.mrb[164].mxu0 %v10531_v55  ;;  %9638 = vmatmul.mubr.bf16.gmra.mrb[164].mxu1 %v10535_v43  ;;  %v10545_v24 = vld [vmem:[%s10646_s15 + $0xd10] ss:$108 sps:$4 sm:$0xff]   ;;  %s7388_s15 = sshll.u32 %s13048_s21, 2 }
 0x370   : > { %v12610_v56 = vadd.f32 %v9210_v8, %v12482_v57  ;;  %v12613_v39 = vadd.f32 %v9274_v53, %v12485_v33  ;;  %6773 = vmatprep.mubr.bf16.mxu0 %v10538_v63  ;;  %9641 = vmatprep.mubr.bf16.mxu1 %v10539_v51  ;;  %s12877_s11 = scalar_lea.vmem %s13041_s3, %s7388_s15 }
 0x372   : > { %v9211_v28 = vpop.f32.mrb[60].mxu1  ;;  %v9275_v23 = vpop.f32.mrb[60].mxu0 }
 0x373   : > { %v9212_v31 = vpop.f32.mrb[61].mxu1  ;;  %v9276_v60 = vpop.f32.mrb[61].mxu0 }
 0x374   : > { %v9213_v47 = vadd.f32 %v9212_v31, %v9211_v28  ;;  %v9277_v37 = vadd.f32 %v9276_v60, %v9275_v23  ;;  %v9214_v6 = vpop.f32.mrb[62].mxu1  ;;  %v9278_v61 = vpop.f32.mrb[62].mxu0 }
 0x375   : > { %v9215_v34 = vpop.f32.mrb[63].mxu1  ;;  %v9279_v57 = vpop.f32.mrb[63].mxu0 }
 0x376   : > { %v12620_v33 = vadd.f32 %v9213_v47, %v12492_v17  ;;  %v12623_v5 = vadd.f32 %v9277_v37, %v12495_v42  ;;  %v9216_v62 = vadd.f32 %v9215_v34, %v9214_v6  ;;  %v9280_v49 = vadd.f32 %v9279_v57, %v9278_v61 }
 0x377   : > { %6774 = vmatmul.mubr.bf16.gmra.mrb[168].mxu0 %v10536_v29  ;;  %9642 = vmatmul.mubr.bf16.gmra.mrb[168].mxu1 %v10540_v16 }
 0x378   : > { %v12626_v2 = vadd.f32 %v9216_v62, %v12498_v11  ;;  %v12629_v44 = vadd.f32 %v9280_v49, %v12501_v20  ;;  %6781 = vmatprep.mubr.bf16.mxu0 %v10543_v12  ;;  %9645 = vmatprep.mubr.bf16.mxu1 %v10544_v52 }
 0x37a   : > { %v9217_v55 = vpop.f32.mrb[64].mxu1  ;;  %v9281_v43 = vpop.f32.mrb[64].mxu0 }
 0x37b   : > { %v9218_v14 = vpop.f32.mrb[65].mxu1  ;;  %v9282_v17 = vpop.f32.mrb[65].mxu0 }
 0x37c   : > { %v9219_v42 = vadd.f32 %v9218_v14, %v9217_v55  ;;  %v9283_v19 = vadd.f32 %v9282_v17, %v9281_v43  ;;  %v9220_v63 = vpop.f32.mrb[66].mxu1  ;;  %v9284_v51 = vpop.f32.mrb[66].mxu0 }
 0x37d   : > { %v9221_v30 = vpop.f32.mrb[67].mxu1  ;;  %v9285_v36 = vpop.f32.mrb[67].mxu0 }
 0x37e   : > { %v12634_v11 = vadd.f32 %v9219_v42, %v12508_v40  ;;  %v12637_v20 = vadd.f32 %v9283_v19, %v12511_v22  ;;  %v9222_v8 = vadd.f32 %v9221_v30, %v9220_v63  ;;  %v9286_v53 = vadd.f32 %v9285_v36, %v9284_v51 }
 0x37f   : > { %6782 = vmatmul.mubr.bf16.gmra.mrb[172].mxu0 %v10541_v18  ;;  %9646 = vmatmul.mubr.bf16.gmra.mrb[172].mxu1 %v10545_v24 }
 0x380   : > { %v12640_v28 = vadd.f32 %v9222_v8, %v12514_v13  ;;  %v12643_v23 = vadd.f32 %v9286_v53, %v12517_v50 }
 0x382   : > { %v9223_v31 = vpop.f32.mrb[68].mxu1  ;;  %v9287_v60 = vpop.f32.mrb[68].mxu0 }
 0x383   : > { %v9224_v29 = vpop.f32.mrb[69].mxu1  ;;  %v9288_v16 = vpop.f32.mrb[69].mxu0 }
 0x384   : > { %v9225_v47 = vadd.f32 %v9224_v29, %v9223_v31  ;;  %v9289_v40 = vadd.f32 %v9288_v16, %v9287_v60  ;;  %v9226_v37 = vpop.f32.mrb[70].mxu1  ;;  %v9290_v6 = vpop.f32.mrb[70].mxu0 }
 0x385   : > { %v9227_v22 = vpop.f32.mrb[71].mxu1  ;;  %v9291_v61 = vpop.f32.mrb[71].mxu0 }
 0x386   : > { %v12646_v12 = vadd.f32 %v9225_v47, %v12524_v32  ;;  %v12649_v52 = vadd.f32 %v9289_v40, %v12527_v15  ;;  %v9228_v13 = vadd.f32 %v9227_v22, %v9226_v37  ;;  %v9292_v34 = vadd.f32 %v9291_v61, %v9290_v6 }
 0x388   : > { %v12652_v50 = vadd.f32 %v9228_v13, %v12530_v38  ;;  %v12655_v57 = vadd.f32 %v9292_v34, %v12533_v10 }
 0x38a   : > { %v9229_v62 = vpop.f32.mrb[72].mxu1  ;;  %v9293_v49 = vpop.f32.mrb[72].mxu0 }
 0x38b   : > { %v9230_v55 = vpop.f32.mrb[73].mxu1  ;;  %v9294_v43 = vpop.f32.mrb[73].mxu0 }
 0x38c   : > { %v9231_v14 = vadd.f32 %v9230_v55, %v9229_v62  ;;  %v9295_v17 = vadd.f32 %v9294_v43, %v9293_v49  ;;  %v9232_v18 = vpop.f32.mrb[74].mxu1  ;;  %v9296_v32 = vpop.f32.mrb[74].mxu0 }
 0x38d   : > { %v9233_v24 = vpop.f32.mrb[75].mxu1  ;;  %v9297_v42 = vpop.f32.mrb[75].mxu0 }
 0x38e   : > { %v12658_v15 = vadd.f32 %v9231_v14, %v12540_v45  ;;  %v12661_v19 = vadd.f32 %v9295_v17, %v12543_v59  ;;  %v9234_v38 = vadd.f32 %v9233_v24, %v9232_v18  ;;  %v9298_v63 = vadd.f32 %v9297_v42, %v9296_v32 }
 0x390   : > { %v12664_v10 = vadd.f32 %v9234_v38, %v12546_v35  ;;  %v12667_v51 = vadd.f32 %v9298_v63, %v12549_v3 }
 0x392   : > { %v9235_v30 = vpop.f32.mrb[76].mxu1  ;;  %v9299_v36 = vpop.f32.mrb[76].mxu0 }
 0x393   : > { %v9236_v8 = vpop.f32.mrb[77].mxu1  ;;  %v9300_v53 = vpop.f32.mrb[77].mxu0 }
 0x394   : > { %v9237_v31 = vadd.f32 %v9236_v8, %v9235_v30  ;;  %v9301_v60 = vadd.f32 %v9300_v53, %v9299_v36  ;;  %v9238_v29 = vpop.f32.mrb[78].mxu1  ;;  %v9302_v45 = vpop.f32.mrb[78].mxu0 }
 0x395   : > { %v9239_v16 = vpop.f32.mrb[79].mxu1  ;;  %v9303_v47 = vpop.f32.mrb[79].mxu0 }
 0x396   : > { %v12670_v59 = vadd.f32 %v9237_v31, %v12556_v9  ;;  %v12673_v40 = vadd.f32 %v9301_v60, %v12559_v27  ;;  %v9240_v35 = vadd.f32 %v9239_v16, %v9238_v29  ;;  %v9304_v37 = vadd.f32 %v9303_v47, %v9302_v45 }
 0x398   : > { %v12676_v3 = vadd.f32 %v9240_v35, %v12562_v58  ;;  %v12679_v6 = vadd.f32 %v9304_v37, %v12565_v25 }
 0x39a   : > { %v9305_v22 = vpop.f32.mrb[80].mxu0  ;;  %v9369_v61 = vpop.f32.mrb[80].mxu1 }
 0x39b   : > { %v9306_v13 = vpop.f32.mrb[81].mxu0  ;;  %v9370_v34 = vpop.f32.mrb[81].mxu1 }
 0x39c   : > { %v9307_v62 = vadd.f32 %v9306_v13, %v9305_v22  ;;  %v9371_v49 = vadd.f32 %v9370_v34, %v9369_v61  ;;  %v9308_v55 = vpop.f32.mrb[82].mxu0  ;;  %v9372_v9 = vpop.f32.mrb[82].mxu1 }
 0x39d   : > { %v9309_v43 = vpop.f32.mrb[83].mxu0  ;;  %v9373_v14 = vpop.f32.mrb[83].mxu1 }
 0x39e   : > { %v12682_v27 = vadd.f32 %v9307_v62, %v12572_v41  ;;  %v12685_v17 = vadd.f32 %v9371_v49, %v12575_v7  ;;  %v9310_v58 = vadd.f32 %v9309_v43, %v9308_v55  ;;  %v9374_v18 = vadd.f32 %v9373_v14, %v9372_v9 }
 0x3a0   : > { %v12688_v25 = vadd.f32 %v9310_v58, %v12578_v46  ;;  %v12691_v32 = vadd.f32 %v9374_v18, %v12581_v0 }
 0x3a2   : > { %v9311_v24 = vpop.f32.mrb[84].mxu0  ;;  %v9375_v42 = vpop.f32.mrb[84].mxu1 }
 0x3a3   : > { %v9312_v38 = vpop.f32.mrb[85].mxu0  ;;  %v9376_v63 = vpop.f32.mrb[85].mxu1 }
 0x3a4   : > { %v9313_v30 = vadd.f32 %v9312_v38, %v9311_v24  ;;  %v9377_v36 = vadd.f32 %v9376_v63, %v9375_v42  ;;  %v9314_v8 = vpop.f32.mrb[86].mxu0  ;;  %v9378_v41 = vpop.f32.mrb[86].mxu1 }
 0x3a5   : > { %v9315_v53 = vpop.f32.mrb[87].mxu0  ;;  %v9379_v31 = vpop.f32.mrb[87].mxu1 }
 0x3a6   : > { %v12694_v7 = vadd.f32 %v9313_v30, %v12588_v4  ;;  %v12697_v60 = vadd.f32 %v9377_v36, %v12591_v21  ;;  %v9316_v46 = vadd.f32 %v9315_v53, %v9314_v8  ;;  %v9380_v29 = vadd.f32 %v9379_v31, %v9378_v41 }
 0x3a8   : > { %v12700_v0 = vadd.f32 %v9316_v46, %v12594_v54  ;;  %v12703_v45 = vadd.f32 %v9380_v29, %v12597_v48 }
 0x3aa   : > { %v9317_v16 = vpop.f32.mrb[88].mxu0  ;;  %v9381_v47 = vpop.f32.mrb[88].mxu1 }
 0x3ab   : > { %v9318_v35 = vpop.f32.mrb[89].mxu0  ;;  %v9382_v37 = vpop.f32.mrb[89].mxu1 }
 0x3ac   : > { %v9319_v22 = vadd.f32 %v9318_v35, %v9317_v16  ;;  %v9383_v61 = vadd.f32 %v9382_v37, %v9381_v47  ;;  %v9320_v13 = vpop.f32.mrb[90].mxu0  ;;  %v9384_v4 = vpop.f32.mrb[90].mxu1 }
 0x3ad   : > { %v9321_v34 = vpop.f32.mrb[91].mxu0  ;;  %v9385_v62 = vpop.f32.mrb[91].mxu1 }
 0x3ae   : > { %v12706_v21 = vadd.f32 %v9319_v22, %v12604_v26  ;;  %v12709_v49 = vadd.f32 %v9383_v61, %v12607_v1  ;;  %v9322_v54 = vadd.f32 %v9321_v34, %v9320_v13  ;;  %v9386_v55 = vadd.f32 %v9385_v62, %v9384_v4 }
 0x3b0   : > { %v12712_v48 = vadd.f32 %v9322_v54, %v12610_v56  ;;  %v12715_v9 = vadd.f32 %v9386_v55, %v12613_v39 }
 0x3b2   : > { %v9323_v43 = vpop.f32.mrb[92].mxu0  ;;  %v9387_v14 = vpop.f32.mrb[92].mxu1 }
 0x3b3   : > { %v9324_v58 = vpop.f32.mrb[93].mxu0  ;;  %v9388_v18 = vpop.f32.mrb[93].mxu1 }
 0x3b4   : > { %v9325_v24 = vadd.f32 %v9324_v58, %v9323_v43  ;;  %v9389_v42 = vadd.f32 %v9388_v18, %v9387_v14  ;;  %v9326_v38 = vpop.f32.mrb[94].mxu0  ;;  %v9390_v26 = vpop.f32.mrb[94].mxu1 }
 0x3b5   : > { %v9327_v63 = vpop.f32.mrb[95].mxu0  ;;  %v9391_v30 = vpop.f32.mrb[95].mxu1 }
 0x3b6   : > { %v12718_v1 = vadd.f32 %v9325_v24, %v12620_v33  ;;  %v12721_v36 = vadd.f32 %v9389_v42, %v12623_v5  ;;  %v9328_v56 = vadd.f32 %v9327_v63, %v9326_v38  ;;  %v9392_v8 = vadd.f32 %v9391_v30, %v9390_v26 }
 0x3b8   : > { %v12724_v39 = vadd.f32 %v9328_v56, %v12626_v2  ;;  %v12727_v41 = vadd.f32 %v9392_v8, %v12629_v44 }
 0x3ba   : > { %v9329_v53 = vpop.f32.mrb[96].mxu0  ;;  %v9393_v31 = vpop.f32.mrb[96].mxu1 }
 0x3bb   : > { %v9330_v46 = vpop.f32.mrb[97].mxu0  ;;  %v9394_v29 = vpop.f32.mrb[97].mxu1 }
 0x3bc   : > { %v9331_v16 = vadd.f32 %v9330_v46, %v9329_v53  ;;  %v9395_v47 = vadd.f32 %v9394_v29, %v9393_v31  ;;  %v9332_v35 = vpop.f32.mrb[98].mxu0  ;;  %v9396_v33 = vpop.f32.mrb[98].mxu1 }
 0x3bd   : > { %v9333_v37 = vpop.f32.mrb[99].mxu0  ;;  %v9397_v22 = vpop.f32.mrb[99].mxu1 }
 0x3be   : > { %v12730_v5 = vadd.f32 %v9331_v16, %v12634_v11  ;;  %v12733_v61 = vadd.f32 %v9395_v47, %v12637_v20  ;;  %v9334_v2 = vadd.f32 %v9333_v37, %v9332_v35  ;;  %v9398_v13 = vadd.f32 %v9397_v22, %v9396_v33 }
 0x3c0   : > { %v12736_v44 = vadd.f32 %v9334_v2, %v12640_v28  ;;  %v12739_v4 = vadd.f32 %v9398_v13, %v12643_v23 }
 0x3c2   : > { %v9335_v34 = vpop.f32.mrb[100].mxu0  ;;  %v9399_v62 = vpop.f32.mrb[100].mxu1 }
 0x3c3   : > { %v9336_v54 = vpop.f32.mrb[101].mxu0  ;;  %v9400_v55 = vpop.f32.mrb[101].mxu1 }
 0x3c4   : > { %v9337_v43 = vadd.f32 %v9336_v54, %v9335_v34  ;;  %v9401_v14 = vadd.f32 %v9400_v55, %v9399_v62  ;;  %v9338_v58 = vpop.f32.mrb[102].mxu0  ;;  %v9402_v11 = vpop.f32.mrb[102].mxu1 }
 0x3c5   : > { %v9339_v18 = vpop.f32.mrb[103].mxu0  ;;  %v9403_v24 = vpop.f32.mrb[103].mxu1 }
 0x3c6   : > { %v12742_v20 = vadd.f32 %v9337_v43, %v12646_v12  ;;  %v12745_v42 = vadd.f32 %v9401_v14, %v12649_v52  ;;  %v9340_v28 = vadd.f32 %v9339_v18, %v9338_v58  ;;  %v9404_v38 = vadd.f32 %v9403_v24, %v9402_v11 }
 0x3c8   : > { %v12748_v23 = vadd.f32 %v9340_v28, %v12652_v50  ;;  %v12751_v26 = vadd.f32 %v9404_v38, %v12655_v57 }
 0x3ca   : > { %v9341_v63 = vpop.f32.mrb[104].mxu0  ;;  %v9405_v30 = vpop.f32.mrb[104].mxu1 }
 0x3cb   : > { %v9342_v56 = vpop.f32.mrb[105].mxu0  ;;  %v9406_v8 = vpop.f32.mrb[105].mxu1 }
 0x3cc   : > { %v9343_v53 = vadd.f32 %v9342_v56, %v9341_v63  ;;  %v9407_v31 = vadd.f32 %v9406_v8, %v9405_v30  ;;  %v9344_v46 = vpop.f32.mrb[106].mxu0  ;;  %v9408_v12 = vpop.f32.mrb[106].mxu1 }
 0x3cd   : > { %v9345_v29 = vpop.f32.mrb[107].mxu0  ;;  %v9409_v16 = vpop.f32.mrb[107].mxu1 }
 0x3ce   : > { %v12754_v52 = vadd.f32 %v9343_v53, %v12658_v15  ;;  %v12757_v47 = vadd.f32 %v9407_v31, %v12661_v19  ;;  %v9346_v50 = vadd.f32 %v9345_v29, %v9344_v46  ;;  %v9410_v35 = vadd.f32 %v9409_v16, %v9408_v12 }
 0x3d0   : > { %v12760_v57 = vadd.f32 %v9346_v50, %v12664_v10  ;;  %v12763_v33 = vadd.f32 %v9410_v35, %v12667_v51 }
 0x3d2   : > { %v9347_v37 = vpop.f32.mrb[108].mxu0  ;;  %v9411_v22 = vpop.f32.mrb[108].mxu1 }
 0x3d3   : > { %v9348_v2 = vpop.f32.mrb[109].mxu0  ;;  %v9412_v13 = vpop.f32.mrb[109].mxu1 }
 0x3d4   : > { %v9349_v34 = vadd.f32 %v9348_v2, %v9347_v37  ;;  %v9413_v62 = vadd.f32 %v9412_v13, %v9411_v22  ;;  %v9350_v54 = vpop.f32.mrb[110].mxu0  ;;  %v9414_v15 = vpop.f32.mrb[110].mxu1 }
 0x3d5   : > { %v9351_v55 = vpop.f32.mrb[111].mxu0  ;;  %v9415_v43 = vpop.f32.mrb[111].mxu1 }
 0x3d6   : > { %v12766_v19 = vadd.f32 %v9349_v34, %v12670_v59  ;;  %v12769_v14 = vadd.f32 %v9413_v62, %v12673_v40  ;;  %v9352_v10 = vadd.f32 %v9351_v55, %v9350_v54  ;;  %v9416_v58 = vadd.f32 %v9415_v43, %v9414_v15 }
 0x3d8   : > { %v12772_v51 = vadd.f32 %v9352_v10, %v12676_v3  ;;  %v12775_v11 = vadd.f32 %v9416_v58, %v12679_v6 }
 0x3da   : > { %v9417_v18 = vpop.f32.mrb[112].mxu1  ;;  %v9481_v24 = vpop.f32.mrb[112].mxu0 }
 0x3db   : > { %v9418_v28 = vpop.f32.mrb[113].mxu1  ;;  %v9482_v38 = vpop.f32.mrb[113].mxu0 }
 0x3dc   : > { %v9419_v63 = vadd.f32 %v9418_v28, %v9417_v18  ;;  %v9483_v30 = vadd.f32 %v9482_v38, %v9481_v24  ;;  %v9420_v56 = vpop.f32.mrb[114].mxu1  ;;  %v9484_v59 = vpop.f32.mrb[114].mxu0 }
 0x3dd   : > { %v9421_v8 = vpop.f32.mrb[115].mxu1  ;;  %v9485_v53 = vpop.f32.mrb[115].mxu0 }
 0x3de   : > { %v12778_v40 = vadd.f32 %v9419_v63, %v12682_v27  ;;  %v9422_v31 = vadd.f32 %v9421_v8, %v9420_v56  ;;  %v9486_v46 = vadd.f32 %v9485_v53, %v9484_v59  ;;  %v12781_v3 = vadd.f32 %v9483_v30, %v12685_v17 }
 0x3e0   : > { %v12784_v6 = vadd.f32 %v9422_v31, %v12688_v25  ;;  %v12787_v12 = vadd.f32 %v9486_v46, %v12691_v32 }
 0x3e2   : > { %v9423_v29 = vpop.f32.mrb[116].mxu1  ;;  %v9487_v16 = vpop.f32.mrb[116].mxu0 }
 0x3e3   : > { %v9424_v50 = vpop.f32.mrb[117].mxu1  ;;  %v9488_v35 = vpop.f32.mrb[117].mxu0 }
 0x3e4   : > { %v9425_v37 = vadd.f32 %v9424_v50, %v9423_v29  ;;  %v9489_v22 = vadd.f32 %v9488_v35, %v9487_v16  ;;  %v9426_v2 = vpop.f32.mrb[118].mxu1  ;;  %v9490_v27 = vpop.f32.mrb[118].mxu0 }
 0x3e5   : > { %v9427_v13 = vpop.f32.mrb[119].mxu1  ;;  %v9491_v34 = vpop.f32.mrb[119].mxu0 }
 0x3e6   : > { %v12790_v62 = vadd.f32 %v9425_v37, %v12694_v7  ;;  %v9428_v17 = vadd.f32 %v9427_v13, %v9426_v2  ;;  %v9492_v54 = vadd.f32 %v9491_v34, %v9490_v27  ;;  %v12793_v25 = vadd.f32 %v9489_v22, %v12697_v60 }
 0x3e8   : > { %v12796_v32 = vadd.f32 %v9428_v17, %v12700_v0  ;;  %v12799_v15 = vadd.f32 %v9492_v54, %v12703_v45 }
 0x3ea   : > { %v9429_v55 = vpop.f32.mrb[120].mxu1  ;;  %v9493_v43 = vpop.f32.mrb[120].mxu0 }
 0x3eb   : > { %v9430_v10 = vpop.f32.mrb[121].mxu1  ;;  %v9494_v58 = vpop.f32.mrb[121].mxu0 }
 0x3ec   : > { %v9431_v18 = vadd.f32 %v9430_v10, %v9429_v55  ;;  %v9495_v24 = vadd.f32 %v9494_v58, %v9493_v43  ;;  %v9432_v28 = vpop.f32.mrb[122].mxu1  ;;  %v9496_v7 = vpop.f32.mrb[122].mxu0 }
 0x3ed   : > { %v9433_v38 = vpop.f32.mrb[123].mxu1  ;;  %v9497_v63 = vpop.f32.mrb[123].mxu0 }
 0x3ee   : > { %v12802_v30 = vadd.f32 %v9431_v18, %v12706_v21  ;;  %v9434_v60 = vadd.f32 %v9433_v38, %v9432_v28  ;;  %v9498_v56 = vadd.f32 %v9497_v63, %v9496_v7  ;;  %v12805_v0 = vadd.f32 %v9495_v24, %v12709_v49 }
 0x3f0   : > { %v12808_v45 = vadd.f32 %v9434_v60, %v12712_v48  ;;  %v12811_v59 = vadd.f32 %v9498_v56, %v12715_v9 }
 0x3f2   : > { %v9435_v8 = vpop.f32.mrb[124].mxu1  ;;  %v9499_v53 = vpop.f32.mrb[124].mxu0 }
 0x3f3   : > { %v9436_v31 = vpop.f32.mrb[125].mxu1  ;;  %v9500_v46 = vpop.f32.mrb[125].mxu0 }
 0x3f4   : > { %v9437_v29 = vadd.f32 %v9436_v31, %v9435_v8  ;;  %v9501_v16 = vadd.f32 %v9500_v46, %v9499_v53  ;;  %v9438_v50 = vpop.f32.mrb[126].mxu1  ;;  %v9502_v21 = vpop.f32.mrb[126].mxu0 }
 0x3f5   : > { %v9439_v35 = vpop.f32.mrb[127].mxu1  ;;  %v9503_v37 = vpop.f32.mrb[127].mxu0 }
 0x3f6   : > { %v12814_v22 = vadd.f32 %v9437_v29, %v12718_v1  ;;  %v9440_v49 = vadd.f32 %v9439_v35, %v9438_v50  ;;  %v9504_v2 = vadd.f32 %v9503_v37, %v9502_v21  ;;  %v12817_v48 = vadd.f32 %v9501_v16, %v12721_v36 }
 0x3f8   : > { %v12820_v9 = vadd.f32 %v9440_v49, %v12724_v39  ;;  %v12823_v27 = vadd.f32 %v9504_v2, %v12727_v41 }
 0x3fa   : > { %v9441_v13 = vpop.f32.mrb[128].mxu1  ;;  %v9505_v34 = vpop.f32.mrb[128].mxu0 }
 0x3fb   : > { %v9442_v17 = vpop.f32.mrb[129].mxu1  ;;  %v9506_v54 = vpop.f32.mrb[129].mxu0 }
 0x3fc   : > { %v9443_v55 = vadd.f32 %v9442_v17, %v9441_v13  ;;  %v9507_v43 = vadd.f32 %v9506_v54, %v9505_v34  ;;  %v9444_v10 = vpop.f32.mrb[130].mxu1  ;;  %v9508_v1 = vpop.f32.mrb[130].mxu0 }
 0x3fd   : > { %v9445_v58 = vpop.f32.mrb[131].mxu1  ;;  %v9509_v18 = vpop.f32.mrb[131].mxu0 }
 0x3fe   : > { %v12826_v24 = vadd.f32 %v9443_v55, %v12730_v5  ;;  %v9446_v36 = vadd.f32 %v9445_v58, %v9444_v10  ;;  %v9510_v28 = vadd.f32 %v9509_v18, %v9508_v1  ;;  %v12829_v39 = vadd.f32 %v9507_v43, %v12733_v61 }
 0x400   : > { %v12832_v41 = vadd.f32 %v9446_v36, %v12736_v44  ;;  %v12835_v7 = vadd.f32 %v9510_v28, %v12739_v4 }
 0x402   : > { %v9447_v38 = vpop.f32.mrb[132].mxu1  ;;  %v9511_v63 = vpop.f32.mrb[132].mxu0 }
 0x403   : > { %v9448_v60 = vpop.f32.mrb[133].mxu1  ;;  %v9512_v56 = vpop.f32.mrb[133].mxu0 }
 0x404   : > { %v9449_v8 = vadd.f32 %v9448_v60, %v9447_v38  ;;  %v9513_v53 = vadd.f32 %v9512_v56, %v9511_v63  ;;  %v9450_v31 = vpop.f32.mrb[134].mxu1  ;;  %v9514_v5 = vpop.f32.mrb[134].mxu0 }
 0x405   : > { %v9451_v46 = vpop.f32.mrb[135].mxu1  ;;  %v9515_v29 = vpop.f32.mrb[135].mxu0 }
 0x406   : > { %v12838_v16 = vadd.f32 %v9449_v8, %v12742_v20  ;;  %v9452_v61 = vadd.f32 %v9451_v46, %v9450_v31  ;;  %v9516_v50 = vadd.f32 %v9515_v29, %v9514_v5  ;;  %v12841_v44 = vadd.f32 %v9513_v53, %v12745_v42 }
 0x408   : > { %v12844_v4 = vadd.f32 %v9452_v61, %v12748_v23  ;;  %v12847_v21 = vadd.f32 %v9516_v50, %v12751_v26  ;;  %v8106_v61 = vld [vmem:[%s12877_s11 + $0x8] sm:$0xff]  }
 0x40a   : > { %v9453_v35 = vpop.f32.mrb[136].mxu1  ;;  %v9517_v37 = vpop.f32.mrb[136].mxu0 }
 0x40b   : > { %v9454_v49 = vpop.f32.mrb[137].mxu1  ;;  %v9518_v2 = vpop.f32.mrb[137].mxu0 }
 0x40c   : > { %v9455_v13 = vadd.f32 %v9454_v49, %v9453_v35  ;;  %v9519_v34 = vadd.f32 %v9518_v2, %v9517_v37  ;;  %v9456_v17 = vpop.f32.mrb[138].mxu1  ;;  %v9520_v20 = vpop.f32.mrb[138].mxu0 }
 0x40d   : > { %v9457_v54 = vpop.f32.mrb[139].mxu1  ;;  %v9521_v55 = vpop.f32.mrb[139].mxu0 }
 0x40e   : > { %v12850_v43 = vadd.f32 %v9455_v13, %v12754_v52  ;;  %v9458_v42 = vadd.f32 %v9457_v54, %v9456_v17  ;;  %v9522_v10 = vadd.f32 %v9521_v55, %v9520_v20  ;;  %v12853_v23 = vadd.f32 %v9519_v34, %v12757_v47  ;;  %v8043_v13 = vld [vmem:[%s12877_s11] sm:$0xff]  }
 0x410   : > { %v12856_v26 = vadd.f32 %v9458_v42, %v12760_v57  ;;  %v12859_v1 = vadd.f32 %v9522_v10, %v12763_v33 }
 0x412   : > { %v9459_v58 = vpop.f32.mrb[140].mxu1  ;;  %v9523_v18 = vpop.f32.mrb[140].mxu0 }
 0x413   : > { %v9460_v36 = vpop.f32.mrb[141].mxu1  ;;  %v9524_v28 = vpop.f32.mrb[141].mxu0 }
 0x414   : > { %v9461_v38 = vadd.f32 %v9460_v36, %v9459_v58  ;;  %v9525_v63 = vadd.f32 %v9524_v28, %v9523_v18  ;;  %v9462_v52 = vpop.f32.mrb[142].mxu1  ;;  %v9526_v60 = vpop.f32.mrb[142].mxu0  ;;  %v8044_v36 = vunpack.c.l.bf16 %v8043_v13 }
 0x415   : > { %v9463_v56 = vpop.f32.mrb[143].mxu1  ;;  %v9527_v8 = vpop.f32.mrb[143].mxu0 }
 0x416   : > { %v12862_v47 = vadd.f32 %v9461_v38, %v12766_v19  ;;  %v9464_v53 = vadd.f32 %v9463_v56, %v9462_v52  ;;  %v9528_v31 = vadd.f32 %v9527_v8, %v9526_v60  ;;  %v12866_v57 = vadd.f32 %v9525_v63, %v12769_v14  ;;  %v12882_v14 = vld [vmem:[%s13040_s2] ss:$0 sm:$0xff] }
 0x417   : > { %v8049_v52 = vunpack.c.h.bf16 %v8106_v61  ;;  %v8045_v60 = vunpack.c.h.bf16 %v8043_v13  ;;  %v8107_v13 = vld [vmem:[%s12877_s11 + $0x10] sm:$0xff]  }
 0x418   : > { %v12869_v33 = vadd.f32 %v9464_v53, %v12772_v51  ;;  %v12872_v5 = vadd.f32 %v9528_v31, %v12775_v11 }
 0x41a   : > { %v9529_v19 = vpop.f32.mrb[144].mxu0  ;;  %v9619_v46 = vpop.f32.mrb[144].mxu1 }
 0x41b   : > { %v6833_v51 = vadd.f32 %v9619_v46, %v12793_v25  ;;  %v9530_v29 = vpop.f32.mrb[145].mxu0  ;;  %v6824_v11 = vpop.f32.mrb[145].mxu1 }
 0x41c   : > { %v9531_v50 = vadd.f32 %v9530_v29, %v9529_v19  ;;  %v6825_v35 = vadd.f32 %v6824_v11, %v12781_v3  ;;  %v9532_v37 = vpop.f32.mrb[146].mxu0  ;;  %v9620_v49 = vpop.f32.mrb[146].mxu1  ;;  %v8048_v3 = vunpack.c.l.bf16 %v8106_v61  ;;  %v8108_v11 = vld [vmem:[%s12877_s11 + $0x18] sm:$0xff]  }
 0x41d   : > { %v7059_v2 = vadd.f32 %v12882_v14, %v6833_v51  ;;  %v6836_v34 = vadd.f32 %v9620_v49, %v12799_v15  ;;  %v9533_v17 = vpop.f32.mrb[147].mxu0  ;;  %v6827_v20 = vpop.f32.mrb[147].mxu1 }
 0x41e   : > { %v7057_v54 = vadd.f32 %v12882_v14, %v6825_v35  ;;  %v9534_v55 = vadd.f32 %v9533_v17, %v9532_v37  ;;  %v6828_v25 = vadd.f32 %v6827_v20, %v12787_v12  ;;  %v12893_v42 = vadd.f32 %v9531_v50, %v12778_v40 }
 0x41f   : > { %v7091_v10 = vmul.f32 0.01, %v7059_v2  ;;  %v7060_v58 = vadd.f32 %v12882_v14, %v6836_v34 }
 0x420   : > { %v7089_v18 = vmul.f32 0.01, %v7057_v54  ;;  %v7058_v28 = vadd.f32 %v12882_v14, %v6828_v25  ;;  %v12899_v15 = vadd.f32 %v9534_v55, %v12784_v6 }
 0x421   : > { %v7123_v38 = vmax.f32 %v7059_v2, %v7091_v10  ;;  %v7092_v63 = vmul.f32 0.01, %v7060_v58  ;;  %v8056_v10 = vunpack.c.l.bf16 %v8108_v11 }
 0x422   : > { %v7121_v40 = vmax.f32 %v7057_v54, %v7089_v18  ;;  %v7090_v12 = vmul.f32 0.01, %v7058_v28  ;;  %v9535_v56 = vpop.f32.mrb[148].mxu0  ;;  %v9623_v8 = vpop.f32.mrb[148].mxu1 }
 0x423   : > { %v7219_v53 = vadd.f32 %v8048_v3, %v7123_v38  ;;  %v7124_v31 = vmax.f32 %v7060_v58, %v7092_v63  ;;  %v6849_v6 = vadd.f32 %v9623_v8, %v12817_v48  ;;  %v9536_v19 = vpop.f32.mrb[149].mxu0  ;;  %v6840_v46 = vpop.f32.mrb[149].mxu1 }
 0x424   : > { %v7217_v51 = vadd.f32 %v8044_v36, %v7121_v40  ;;  %v7122_v29 = vmax.f32 %v7058_v28, %v7090_v12  ;;  %v9537_v61 = vadd.f32 %v9536_v19, %v9535_v56  ;;  %v6841_v50 = vadd.f32 %v6840_v46, %v12805_v0  ;;  %v9538_v35 = vpop.f32.mrb[150].mxu0  ;;  %v9624_v37 = vpop.f32.mrb[150].mxu1  ;;  %v8110_v46 = vld [vmem:[%s12877_s11 + $0x28] sm:$0xff]  }
 0x425   : > { %7251 = vst [vmem:[%s12904_s22 + $0x10] sm:$0xff] %v7219_v53  ;;  %v7220_v49 = vadd.f32 %v8049_v52, %v7124_v31  ;;  %v7063_v2 = vadd.f32 %v12882_v14, %v6849_v6  ;;  %v6852_v48 = vadd.f32 %v9624_v37, %v12823_v27  ;;  %v9539_v34 = vpop.f32.mrb[151].mxu0  ;;  %v6843_v17 = vpop.f32.mrb[151].mxu1  ;;  %v8052_v27 = vunpack.c.l.bf16 %v8107_v13  ;;  %v8109_v37 = vld [vmem:[%s12877_s11 + $0x20] sm:$0xff]  }
 0x426   : > { %7249 = vst [vmem:[%s12904_s22] sm:$0xff] %v7217_v51  ;;  %v7218_v20 = vadd.f32 %v8045_v60, %v7122_v29  ;;  %v7061_v54 = vadd.f32 %v12882_v14, %v6841_v50  ;;  %v9540_v55 = vadd.f32 %v9539_v34, %v9538_v35  ;;  %v6844_v25 = vadd.f32 %v6843_v17, %v12811_v59 }
 0x427   : > { %7252 = vst [vmem:[%s12904_s22 + $0x18] sm:$0xff] %v7220_v49  ;;  %v7095_v0 = vmul.f32 0.01, %v7063_v2  ;;  %v7064_v3 = vadd.f32 %v12882_v14, %v6852_v48  ;;  %v12919_v58 = vadd.f32 %v9537_v61, %v12790_v62  ;;  %v8057_v59 = vunpack.c.h.bf16 %v8108_v11 }
 0x428   : > { %7250 = vst [vmem:[%s12904_s22 + $0x8] sm:$0xff] %v7218_v20  ;;  %v7093_v18 = vmul.f32 0.01, %v7061_v54  ;;  %v7062_v36 = vadd.f32 %v12882_v14, %v6844_v25  ;;  %v12924_v28 = vadd.f32 %v9540_v55, %v12796_v32  ;;  %v8053_v12 = vunpack.c.h.bf16 %v8107_v13 }
 0x429   : > { %v7127_v38 = vmax.f32 %v7063_v2, %v7095_v0  ;;  %v7096_v63 = vmul.f32 0.01, %v7064_v3  ;;  %v8064_v20 = vunpack.c.l.bf16 %v8110_v46 }
 0x42a   : > { %v7125_v52 = vmax.f32 %v7061_v54, %v7093_v18  ;;  %v7094_v40 = vmul.f32 0.01, %v7062_v36  ;;  %v9541_v60 = vpop.f32.mrb[152].mxu0  ;;  %v9627_v56 = vpop.f32.mrb[152].mxu1 }
 0x42b   : > { %v7223_v62 = vadd.f32 %v8056_v10, %v7127_v38  ;;  %v7128_v8 = vmax.f32 %v7064_v3, %v7096_v63  ;;  %v6865_v53 = vadd.f32 %v9627_v56, %v12841_v44  ;;  %v9542_v31 = vpop.f32.mrb[153].mxu0  ;;  %v6856_v6 = vpop.f32.mrb[153].mxu1  ;;  %v8061_v38 = vunpack.c.h.bf16 %v8109_v37 }
 0x42c   : > { %v7221_v32 = vadd.f32 %v8052_v27, %v7125_v52  ;;  %v7126_v19 = vmax.f32 %v7062_v36, %v7094_v40  ;;  %v9543_v51 = vadd.f32 %v9542_v31, %v9541_v60  ;;  %v6857_v29 = vadd.f32 %v6856_v6, %v12829_v39  ;;  %v9544_v11 = vpop.f32.mrb[154].mxu0  ;;  %v9628_v61 = vpop.f32.mrb[154].mxu1 }
 0x42d   : > { %7255 = vst [vmem:[%s12904_s22 + $0x30] sm:$0xff] %v7223_v62  ;;  %v7224_v50 = vadd.f32 %v8057_v59, %v7128_v8  ;;  %v7067_v35 = vadd.f32 %v12882_v14, %v6865_v53  ;;  %v6868_v44 = vadd.f32 %v9628_v61, %v12847_v21  ;;  %v9545_v49 = vpop.f32.mrb[155].mxu0  ;;  %v6859_v2 = vpop.f32.mrb[155].mxu1  ;;  %v8060_v21 = vunpack.c.l.bf16 %v8109_v37  ;;  %v8112_v62 = vld [vmem:[%s12877_s11 + $0x38] sm:$0xff]  }
 0x42e   : > { %7253 = vst [vmem:[%s12904_s22 + $0x20] sm:$0xff] %v7221_v32  ;;  %v7222_v13 = vadd.f32 %v8053_v12, %v7126_v19  ;;  %v7065_v48 = vadd.f32 %v12882_v14, %v6857_v29  ;;  %v9546_v34 = vadd.f32 %v9545_v49, %v9544_v11  ;;  %v6860_v17 = vadd.f32 %v6859_v2, %v12835_v7 }
 0x42f   : > { %7256 = vst [vmem:[%s12904_s22 + $0x38] sm:$0xff] %v7224_v50  ;;  %v7099_v39 = vmul.f32 0.01, %v7067_v35  ;;  %v7068_v54 = vadd.f32 %v12882_v14, %v6868_v44  ;;  %v12939_v55 = vadd.f32 %v9543_v51, %v12802_v30  ;;  %v8065_v7 = vunpack.c.h.bf16 %v8110_v46  ;;  %v8111_v46 = vld [vmem:[%s12877_s11 + $0x30] sm:$0xff]  }
 0x430   : > { %7254 = vst [vmem:[%s12904_s22 + $0x28] sm:$0xff] %v7222_v13  ;;  %v7097_v25 = vmul.f32 0.01, %v7065_v48  ;;  %v7066_v0 = vadd.f32 %v12882_v14, %v6860_v17  ;;  %v12944_v10 = vadd.f32 %v9546_v34, %v12808_v45  ;;  %v8072_v37 = vunpack.c.l.bf16 %v8112_v62 }
 0x431   : > { %v7131_v3 = vmax.f32 %v7067_v35, %v7099_v39  ;;  %v7100_v18 = vmul.f32 0.01, %v7068_v54  ;;  %v8068_v13 = vunpack.c.l.bf16 %v8111_v46  ;;  %v8073_v39 = vunpack.c.h.bf16 %v8112_v62 }
 0x432   : > { %v7129_v27 = vmax.f32 %v7065_v48, %v7097_v25  ;;  %v7098_v36 = vmul.f32 0.01, %v7066_v0  ;;  %v9547_v63 = vpop.f32.mrb[156].mxu0  ;;  %v9631_v59 = vpop.f32.mrb[156].mxu1 }
 0x433   : > { %v7227_v30 = vadd.f32 %v8064_v20, %v7131_v3  ;;  %v7132_v52 = vmax.f32 %v7068_v54, %v7100_v18  ;;  %v6881_v40 = vadd.f32 %v9631_v59, %v12866_v57  ;;  %v9548_v12 = vpop.f32.mrb[157].mxu0  ;;  %v6872_v60 = vpop.f32.mrb[157].mxu1  ;;  %v8069_v54 = vunpack.c.h.bf16 %v8111_v46 }
 0x434   : > { %v7225_v45 = vadd.f32 %v8060_v21, %v7129_v27  ;;  %v7130_v56 = vmax.f32 %v7066_v0, %v7098_v36  ;;  %v9549_v8 = vadd.f32 %v9548_v12, %v9547_v63  ;;  %v6873_v53 = vadd.f32 %v6872_v60, %v12853_v23  ;;  %v9550_v31 = vpop.f32.mrb[158].mxu0  ;;  %v9632_v6 = vpop.f32.mrb[158].mxu1  ;;  %v8114_v36 = vld [vmem:[%s12877_s11 + $0x48] sm:$0xff]   ;;  %v8113_v12 = vld [vmem:[%s12877_s11 + $0x40] sm:$0xff]  }
 0x435   : > { %7259 = vst [vmem:[%s12904_s22 + $0x50] sm:$0xff] %v7227_v30  ;;  %v7228_v32 = vadd.f32 %v8065_v7, %v7132_v52  ;;  %v7071_v19 = vadd.f32 %v12882_v14, %v6881_v40  ;;  %v6884_v57 = vadd.f32 %v9632_v6, %v12872_v5  ;;  %v9551_v51 = vpop.f32.mrb[159].mxu0  ;;  %v6875_v29 = vpop.f32.mrb[159].mxu1 }
 0x436   : > { %7257 = vst [vmem:[%s12904_s22 + $0x40] sm:$0xff] %v7225_v45  ;;  %v7226_v11 = vadd.f32 %v8061_v38, %v7130_v56  ;;  %v7069_v61 = vadd.f32 %v12882_v14, %v6873_v53  ;;  %v9552_v50 = vadd.f32 %v9551_v51, %v9550_v31  ;;  %v6876_v35 = vadd.f32 %v6875_v29, %v12859_v1 }
 0x437   : > { %7260 = vst [vmem:[%s12904_s22 + $0x58] sm:$0xff] %v7228_v32  ;;  %v7103_v23 = vmul.f32 0.01, %v7071_v19  ;;  %v7072_v44 = vadd.f32 %v12882_v14, %v6884_v57  ;;  %v6752_v49 = vadd.f32 %v9549_v8, %v12814_v22  ;;  %v8080_v31 = vunpack.c.l.bf16 %v8114_v36 }
 0x438   : > { %7258 = vst [vmem:[%s12904_s22 + $0x48] sm:$0xff] %v7226_v11  ;;  %v7101_v2 = vmul.f32 0.01, %v7069_v61  ;;  %v7070_v5 = vadd.f32 %v12882_v14, %v6876_v35  ;;  %v12962_v48 = vadd.f32 %v9552_v50, %v12820_v9  ;;  %v8077_v50 = vunpack.c.h.bf16 %v8113_v12 }
 0x439   : > { %v7135_v34 = vmax.f32 %v7071_v19, %v7103_v23  ;;  %v7104_v17 = vmul.f32 0.01, %v7072_v44 }
 0x43a   : > { %v7133_v1 = vmax.f32 %v7069_v61, %v7101_v2  ;;  %v7102_v20 = vmul.f32 0.01, %v7070_v5  ;;  %v9553_v25 = vpop.f32.mrb[160].mxu0  ;;  %v9635_v21 = vpop.f32.mrb[160].mxu1 }
 0x43b   : > { %v7231_v22 = vadd.f32 %v8072_v37, %v7135_v34  ;;  %v7136_v0 = vmax.f32 %v7072_v44, %v7104_v17  ;;  %v6897_v3 = vadd.f32 %v9635_v21, %v12919_v58  ;;  %v9554_v18 = vpop.f32.mrb[161].mxu0  ;;  %v6888_v7 = vpop.f32.mrb[161].mxu1  ;;  %v8116_v34 = vld [vmem:[%s12877_s11 + $0x58] sm:$0xff]   ;;  %v8115_v21 = vld [vmem:[%s12877_s11 + $0x50] sm:$0xff]  }
 0x43c   : > { %v7229_v9 = vadd.f32 %v8068_v13, %v7133_v1  ;;  %v7134_v27 = vmax.f32 %v7070_v5, %v7102_v20  ;;  %v9555_v38 = vadd.f32 %v9554_v18, %v9553_v25  ;;  %v6889_v63 = vadd.f32 %v6888_v7, %v12893_v42  ;;  %v9556_v59 = vpop.f32.mrb[162].mxu0  ;;  %v9636_v30 = vpop.f32.mrb[162].mxu1 }
 0x43d   : > { %7263 = vst [vmem:[%s12904_s22 + $0x70] sm:$0xff] %v7231_v22  ;;  %v7232_v52 = vadd.f32 %v8073_v39, %v7136_v0  ;;  %v7075_v40 = vadd.f32 %v12882_v14, %v6897_v3  ;;  %v6900_v58 = vadd.f32 %v9636_v30, %v12924_v28  ;;  %v9557_v60 = vpop.f32.mrb[163].mxu0  ;;  %v6891_v45 = vpop.f32.mrb[163].mxu1  ;;  %v8076_v28 = vunpack.c.l.bf16 %v8113_v12 }
 0x43e   : > { %7261 = vst [vmem:[%s12904_s22 + $0x60] sm:$0xff] %v7229_v9  ;;  %v7230_v56 = vadd.f32 %v8069_v54, %v7134_v27  ;;  %v7073_v62 = vadd.f32 %v12882_v14, %v6889_v63  ;;  %v9558_v8 = vadd.f32 %v9557_v60, %v9556_v59  ;;  %v6892_v53 = vadd.f32 %v6891_v45, %v12899_v15 }
 0x43f   : > { %7264 = vst [vmem:[%s12904_s22 + $0x78] sm:$0xff] %v7232_v52  ;;  %v7107_v42 = vmul.f32 0.01, %v7075_v40  ;;  %v7076_v6 = vadd.f32 %v12882_v14, %v6900_v58  ;;  %v12977_v32 = vadd.f32 %v9555_v38, %v12826_v24  ;;  %v8081_v15 = vunpack.c.h.bf16 %v8114_v36 }
 0x440   : > { %7262 = vst [vmem:[%s12904_s22 + $0x68] sm:$0xff] %v7230_v56  ;;  %v7105_v19 = vmul.f32 0.01, %v7073_v62  ;;  %v7074_v46 = vadd.f32 %v12882_v14, %v6892_v53  ;;  %v12982_v57 = vadd.f32 %v9558_v8, %v12832_v41  ;;  %v8088_v27 = vunpack.c.l.bf16 %v8116_v34 }
 0x441   : > { %v7139_v51 = vmax.f32 %v7075_v40, %v7107_v42  ;;  %v7108_v29 = vmul.f32 0.01, %v7076_v6  ;;  %v8084_v59 = vunpack.c.l.bf16 %v8115_v21  ;;  %v8089_v12 = vunpack.c.h.bf16 %v8116_v34 }
 0x442   : > { %v7137_v11 = vmax.f32 %v7073_v62, %v7105_v19  ;;  %v7106_v61 = vmul.f32 0.01, %v7074_v46  ;;  %v9559_v35 = vpop.f32.mrb[164].mxu0  ;;  %v9639_v23 = vpop.f32.mrb[164].mxu1  ;;  %v8085_v60 = vunpack.c.h.bf16 %v8115_v21 }
 0x443   : > { %v7235_v24 = vadd.f32 %v8080_v31, %v7139_v51  ;;  %v7140_v37 = vmax.f32 %v7076_v6, %v7108_v29  ;;  %v6913_v44 = vadd.f32 %v9639_v23, %v6752_v49  ;;  %v9560_v2 = vpop.f32.mrb[165].mxu0  ;;  %v6904_v13 = vpop.f32.mrb[165].mxu1 }
 0x444   : > { %v7233_v5 = vadd.f32 %v8076_v28, %v7137_v11  ;;  %v7138_v41 = vmax.f32 %v7074_v46, %v7106_v61  ;;  %v9561_v17 = vadd.f32 %v9560_v2, %v9559_v35  ;;  %v6905_v39 = vadd.f32 %v6904_v13, %v12939_v55  ;;  %v9562_v1 = vpop.f32.mrb[166].mxu0  ;;  %v9640_v20 = vpop.f32.mrb[166].mxu1  ;;  %v8117_v11 = vld [vmem:[%s12877_s11 + $0x60] sm:$0xff]  }
 0x445   : > { %7267 = vst [vmem:[%s12904_s22 + $0x90] sm:$0xff] %v7235_v24  ;;  %v7236_v54 = vadd.f32 %v8081_v15, %v7140_v37  ;;  %v7079_v25 = vadd.f32 %v12882_v14, %v6913_v44  ;;  %v6916_v49 = vadd.f32 %v9640_v20, %v12962_v48  ;;  %v9563_v22 = vpop.f32.mrb[167].mxu0  ;;  %v6907_v0 = vpop.f32.mrb[167].mxu1  ;;  %v8092_v34 = vunpack.c.l.bf16 %v8117_v11 }
 0x446   : > { %7265 = vst [vmem:[%s12904_s22 + $0x80] sm:$0xff] %v7233_v5  ;;  %v7234_v3 = vadd.f32 %v8077_v50, %v7138_v41  ;;  %v7077_v18 = vadd.f32 %v12882_v14, %v6905_v39  ;;  %v9564_v7 = vadd.f32 %v9563_v22, %v9562_v1  ;;  %v6908_v9 = vadd.f32 %v6907_v0, %v12944_v10 }
 0x447   : > { %7268 = vst [vmem:[%s12904_s22 + $0x98] sm:$0xff] %v7236_v54  ;;  %v7111_v55 = vmul.f32 0.01, %v7079_v25  ;;  %v7080_v36 = vadd.f32 %v12882_v14, %v6916_v49  ;;  %v6768_v38 = vadd.f32 %v9561_v17, %v12838_v16  ;;  %v8093_v21 = vunpack.c.h.bf16 %v8117_v11 }
 0x448   : > { %7266 = vst [vmem:[%s12904_s22 + $0x88] sm:$0xff] %v7234_v3  ;;  %v7109_v63 = vmul.f32 0.01, %v7077_v18  ;;  %v7078_v48 = vadd.f32 %v12882_v14, %v6908_v9  ;;  %v6771_v30 = vadd.f32 %v9564_v7, %v12844_v4  ;;  %v8118_v4 = vld [vmem:[%s12877_s11 + $0x68] sm:$0xff]  }
 0x449   : > { %v7143_v52 = vmax.f32 %v7079_v25, %v7111_v55  ;;  %v7112_v40 = vmul.f32 0.01, %v7080_v36  ;;  %v8096_v2 = vunpack.c.l.bf16 %v8118_v4  ;;  %v8097_v54 = vunpack.c.h.bf16 %v8118_v4 }
 0x44a   : > { %v7141_v58 = vmax.f32 %v7077_v18, %v7109_v63  ;;  %v7110_v10 = vmul.f32 0.01, %v7078_v48  ;;  %v9565_v45 = vpop.f32.mrb[168].mxu0  ;;  %v9643_v56 = vpop.f32.mrb[168].mxu1  ;;  %v8119_v63 = vld [vmem:[%s12877_s11 + $0x70] sm:$0xff]  }
 0x44b   : > { %v7239_v62 = vadd.f32 %v8088_v27, %v7143_v52  ;;  %v7144_v16 = vmax.f32 %v7080_v36, %v7112_v40  ;;  %v6929_v8 = vadd.f32 %v9643_v56, %v6768_v38  ;;  %v9566_v53 = vpop.f32.mrb[169].mxu0  ;;  %v6920_v42 = vpop.f32.mrb[169].mxu1 }
 0x44c   : > { %v7237_v31 = vadd.f32 %v8084_v59, %v7141_v58  ;;  %v7142_v6 = vmax.f32 %v7078_v48, %v7110_v10  ;;  %v9567_v19 = vadd.f32 %v9566_v53, %v9565_v45  ;;  %v6921_v28 = vadd.f32 %v6920_v42, %v12977_v32  ;;  %v9568_v46 = vpop.f32.mrb[170].mxu0  ;;  %v9644_v51 = vpop.f32.mrb[170].mxu1 }
 0x44d   : > { %7271 = vst [vmem:[%s12904_s22 + $0xb0] sm:$0xff] %v7239_v62  ;;  %v7240_v29 = vadd.f32 %v8089_v12, %v7144_v16  ;;  %v7083_v15 = vadd.f32 %v12882_v14, %v6929_v8  ;;  %v6932_v61 = vadd.f32 %v9644_v51, %v6771_v30  ;;  %v9569_v50 = vpop.f32.mrb[171].mxu0  ;;  %v6923_v35 = vpop.f32.mrb[171].mxu1  ;;  %v8100_v45 = vunpack.c.l.bf16 %v8119_v63  ;;  %v8120_v62 = vld [vmem:[%s12877_s11 + $0x78] sm:$0xff]  }
 0x44e   : > { %7269 = vst [vmem:[%s12904_s22 + $0xa0] sm:$0xff] %v7237_v31  ;;  %v7238_v23 = vadd.f32 %v8085_v60, %v7142_v6  ;;  %v7081_v24 = vadd.f32 %v12882_v14, %v6921_v28  ;;  %v9570_v37 = vadd.f32 %v9569_v50, %v9568_v46  ;;  %v6924_v44 = vadd.f32 %v6923_v35, %v12982_v57 }
 0x44f   : > { %7272 = vst [vmem:[%s12904_s22 + $0xb8] sm:$0xff] %v7240_v29  ;;  %v7115_v32 = vmul.f32 0.01, %v7083_v15  ;;  %v7084_v13 = vadd.f32 %v12882_v14, %v6932_v61  ;;  %v6776_v5 = vadd.f32 %v9567_v19, %v12850_v43  ;;  %v8101_v31 = vunpack.c.h.bf16 %v8119_v63 }
 0x450   : > { %7270 = vst [vmem:[%s12904_s22 + $0xa8] sm:$0xff] %v7238_v23  ;;  %v7113_v41 = vmul.f32 0.01, %v7081_v24  ;;  %v7082_v17 = vadd.f32 %v12882_v14, %v6924_v44  ;;  %v6779_v39 = vadd.f32 %v9570_v37, %v12856_v26  ;;  %v8104_v4 = vunpack.c.l.bf16 %v8120_v62 }
 0x451   : > { %v7147_v1 = vmax.f32 %v7083_v15, %v7115_v32  ;;  %v7116_v20 = vmul.f32 0.01, %v7084_v13  ;;  %v8105_v29 = vunpack.c.h.bf16 %v8120_v62 }
 0x452   : > { %v7145_v25 = vmax.f32 %v7081_v24, %v7113_v41  ;;  %v7114_v57 = vmul.f32 0.01, %v7082_v17  ;;  %v9571_v49 = vpop.f32.mrb[172].mxu0  ;;  %v9647_v22 = vpop.f32.mrb[172].mxu1 }
 0x453   : > { %v7243_v0 = vadd.f32 %v8096_v2, %v7147_v1  ;;  %v7148_v43 = vmax.f32 %v7084_v13, %v7116_v20  ;;  %v9572_v3 = vpop.f32.mrb[173].mxu0  ;;  %v6936_v18 = vpop.f32.mrb[173].mxu1 }
 0x454   : > { %v7241_v7 = vadd.f32 %v8092_v34, %v7145_v25  ;;  %v7146_v9 = vmax.f32 %v7082_v17, %v7114_v57  ;;  %v9573_v55 = vadd.f32 %v9572_v3, %v9571_v49  ;;  %v6937_v26 = vadd.f32 %v6936_v18, %v6776_v5  ;;  %v9574_v27 = vpop.f32.mrb[174].mxu0  ;;  %v9648_v36 = vpop.f32.mrb[174].mxu1 }
 0x455   : > { %7275 = vst [vmem:[%s12904_s22 + $0xd0] sm:$0xff] %v7243_v0  ;;  %v7244_v38 = vadd.f32 %v8097_v54, %v7148_v43  ;;  %v9575_v59 = vpop.f32.mrb[175].mxu0  ;;  %v6939_v48 = vpop.f32.mrb[175].mxu1 }
 0x456   : > { %7273 = vst [vmem:[%s12904_s22 + $0xc0] sm:$0xff] %v7241_v7  ;;  %v7242_v30 = vadd.f32 %v8093_v21, %v7146_v9  ;;  %v6784_v52 = vadd.f32 %v9573_v55, %v12862_v47  ;;  %v7085_v40 = vadd.f32 %v12882_v14, %v6937_v26  ;;  %v9576_v12 = vadd.f32 %v9575_v59, %v9574_v27 }
 0x457   : > { %7276 = vst [vmem:[%s12904_s22 + $0xd8] sm:$0xff] %v7244_v38  ;;  %v6940_v58 = vadd.f32 %v6939_v48, %v6779_v39 }
 0x458   : > { %7274 = vst [vmem:[%s12904_s22 + $0xc8] sm:$0xff] %v7242_v30  ;;  %v6945_v10 = vadd.f32 %v9647_v22, %v6784_v52  ;;  %v7117_v60 = vmul.f32 0.01, %v7085_v40  ;;  %v6787_v56 = vadd.f32 %v9576_v12, %v12869_v33 }
 0x459   : > { %v7086_v16 = vadd.f32 %v12882_v14, %v6940_v58 }
 0x45a   : > { %v7087_v8 = vadd.f32 %v12882_v14, %v6945_v10  ;;  %v7149_v53 = vmax.f32 %v7085_v40, %v7117_v60  ;;  %v6948_v47 = vadd.f32 %v9648_v36, %v6787_v56 }
 0x45b   : > { %v7118_v42 = vmul.f32 0.01, %v7086_v16 }
 0x45c   : > { %v7119_v6 = vmul.f32 0.01, %v7087_v8  ;;  %v7245_v19 = vadd.f32 %v8100_v45, %v7149_v53  ;;  %v7088_v28 = vadd.f32 %v12882_v14, %v6948_v47 }
 0x45d   : > { %v7150_v46 = vmax.f32 %v7086_v16, %v7118_v42 }
 0x45e   : > { %v7151_v51 = vmax.f32 %v7087_v8, %v7119_v6  ;;  %7277 = vst [vmem:[%s12904_s22 + $0xe0] sm:$0xff] %v7245_v19  ;;  %v7120_v33 = vmul.f32 0.01, %v7088_v28 }
 0x45f   : > { %v7246_v15 = vadd.f32 %v8101_v31, %v7150_v46 }
 0x460   : > { %v7247_v11 = vadd.f32 %v8104_v4, %v7151_v51  ;;  %v7152_v61 = vmax.f32 %v7088_v28, %v7120_v33 }
 0x461   : > { %7278 = vst [vmem:[%s12904_s22 + $0xe8] sm:$0xff] %v7246_v15 }
 0x462   : > { %7279 = vst [vmem:[%s12904_s22 + $0xf0] sm:$0xff] %v7247_v11  ;;  %v7248_v50 = vadd.f32 %v8105_v29, %v7152_v61 }
 0x464   : > { %7280 = vst [vmem:[%s12904_s22 + $0xf8] sm:$0xff] %v7248_v50 }
 0x465 PF: > { %s14_s17 = sadd.s32 1, %s10568_s17   ;;  %s13043_s15 = smov %s10564_s16 }
 0x466   : > { %p11_p5 = scmp.ge.s32.totalorder %s14_s17, 4   ;;  %s13044_s16 = smov %s13046_s18 }
 0x468   :  { %13 = sbr.rel (!%p11_p5) target bundleno = 2 (0x2), region = 80 }

</bundles_post_ra>
